<compile_context>
chip_gen: v7x
topology: tpu7x:2x2x1
jax: 0.10.0
libtpu: 0.0.40
codegen_flags: <defaults>
</compile_context>

<pallas_src>
import functools

import jax
import jax.numpy as jnp
from jax.experimental import pallas as pl
from jax.experimental.pallas import tpu as pltpu


# ----------------------------------------------------------------------------
# Kernel: one grid step processes `windows_per_block` windows.
#   refs: x [wb,N,C] | wq/wk/wv [nH,C,hd] | bq/bk/bv [nH,1,hd]
#         bias [1,nH,N,N] | wo [nH,hd,C] | bo [1,C] | out [wb,N,C]
# ----------------------------------------------------------------------------
def _window_attention_kernel(x_ref, wq_ref, bq_ref, wk_ref, bk_ref, wv_ref,
                             bv_ref, bias_ref, wo_ref, bo_ref, out_ref,
                             *, num_heads, scale, windows_per_block):
    f32 = jnp.float32
    bf16 = jnp.bfloat16
    bo = bo_ref[...]                                       # [1, C], hoisted once

    for w in range(windows_per_block):                     # static unroll
        x = x_ref[w].astype(bf16)                          # [N, C]
        acc = None
        for h in range(num_heads):                         # static unroll
            q = jnp.dot(x, wq_ref[h], preferred_element_type=f32) + bq_ref[h]
            k = jnp.dot(x, wk_ref[h], preferred_element_type=f32) + bk_ref[h]
            v = jnp.dot(x, wv_ref[h], preferred_element_type=f32) + bv_ref[h]
            # logits = (q*scale) @ k^T  (contract on head_dim, no explicit .T)
            s = jax.lax.dot_general(
                (q * scale).astype(bf16), k.astype(bf16),
                dimension_numbers=(((1,), (1,)), ((), ())),
                preferred_element_type=f32)                # [N, N]
            s = s + bias_ref[0, h]                         # rel-pos bias (+mask)
            # softmax (f32)
            m = jnp.max(s, axis=-1, keepdims=True)
            p = jnp.exp(s - m)
            p = p / jnp.sum(p, axis=-1, keepdims=True)
            # attn @ v, then fold output projection per head:
            #   out = sum_h (o_h @ Wproj[h*hd:(h+1)*hd, :]) + bproj
            o = jnp.dot(p.astype(bf16), v.astype(bf16),
                        preferred_element_type=f32)        # [N, hd]
            contrib = jnp.dot(o.astype(bf16), wo_ref[h],
                              preferred_element_type=f32)  # [N, C]
            acc = contrib if acc is None else acc + contrib
        out_ref[w] = (acc + bo).astype(out_ref.dtype)


# ----------------------------------------------------------------------------
# Relative position bias (same indexing as the PyTorch buffer construction).
# Parameter-only preprocessing: table gather done in plain JAX glue.
# ----------------------------------------------------------------------------
def _relative_position_bias(table, window_size, num_heads):
    W = window_size
    coords = jnp.arange(W)
    ch, cw = jnp.meshgrid(coords, coords, indexing="ij")
    fh = ch.reshape(-1)
    fw = cw.reshape(-1)
    rel_h = fh[:, None] - fh[None, :] + (W - 1)
    rel_w = fw[:, None] - fw[None, :] + (W - 1)
    idx = rel_h * (2 * W - 1) + rel_w                                # [N, N]
    bias = table[idx.reshape(-1)].reshape(W * W, W * W, num_heads)
    return jnp.transpose(bias, (2, 0, 1)).astype(jnp.float32)        # [nH,N,N]


# ----------------------------------------------------------------------------
# Wrapper
# ----------------------------------------------------------------------------
def window_attention(x, params, *, window_size, num_heads, mask=None,
                     windows_per_block=None):
    """x: [B_, N, C] (B_ = batch*num_windows, N = window_size**2, C = dim)."""
    B_, N, C = x.shape
    assert N == window_size * window_size
    assert C % num_heads == 0
    hd = C // num_heads
    scale = float(hd) ** -0.5

    # how many windows per grid step (amortizes per-step pipeline overhead)
    if windows_per_block is None:
        windows_per_block = 1
        for cand in (8, 4, 2):
            if B_ % cand == 0 and B_ // cand >= 2:
                windows_per_block = cand
                break
    if mask is not None:
        windows_per_block = 1     # mask index differs per window inside a block
    assert B_ % windows_per_block == 0
    wb = windows_per_block
    grid = (B_ // wb,)

    # --- reorganize weights per head (plain JAX glue, done once) ------------
    bf16 = jnp.bfloat16
    f32 = jnp.float32
    # params["w_qkv"] is in "x @ W" orientation [C, 3C] (= qkv.weight.T), with
    # output columns ordered [3, num_heads, head_dim] like the PyTorch reshape.
    w3 = params["w_qkv"].reshape(C, 3, num_heads, hd)
    wq = jnp.transpose(w3[:, 0], (1, 0, 2)).astype(bf16)     # [nH, C, hd]
    wk = jnp.transpose(w3[:, 1], (1, 0, 2)).astype(bf16)
    wv = jnp.transpose(w3[:, 2], (1, 0, 2)).astype(bf16)
    b3 = params["b_qkv"].reshape(3, num_heads, 1, hd).astype(f32)
    bq, bk, bv = b3[0], b3[1], b3[2]                         # [nH, 1, hd]
    wo = params["w_proj"].reshape(num_heads, hd, C).astype(bf16)   # [nH, hd, C]
    bo = params["b_proj"].reshape(1, C).astype(f32)

    rel_bias = _relative_position_bias(params["rel_bias_table"], window_size,
                                       num_heads)            # [nH, N, N]
    if mask is None:
        bias_all = rel_bias[None]                            # [1, nH, N, N]
        bias_idx = lambda b: (0, 0, 0, 0)
    else:
        nW = mask.shape[0]
        bias_all = rel_bias[None] + mask[:, None].astype(f32)  # [nW, nH, N, N]
        bias_idx = lambda b: (b % nW, 0, 0, 0)

    def resident(shape):
        # weights: whole array in VMEM, same block every step -> DMA'd once
        return pl.BlockSpec(shape, lambda b, _n=len(shape): (0,) * _n)

    kernel = functools.partial(_window_attention_kernel, num_heads=num_heads,
                               scale=scale, windows_per_block=wb)

    return pl.pallas_call(
        kernel,
        out_shape=jax.ShapeDtypeStruct((B_, N, C), x.dtype),
        grid=grid,
        in_specs=[
            pl.BlockSpec((wb, N, C), lambda b: (b, 0, 0)),   # x tile (streamed)
            resident((num_heads, C, hd)),                    # wq
            resident((num_heads, 1, hd)),                    # bq
            resident((num_heads, C, hd)),                    # wk
            resident((num_heads, 1, hd)),                    # bk
            resident((num_heads, C, hd)),                    # wv
            resident((num_heads, 1, hd)),                    # bv
            pl.BlockSpec((1, num_heads, N, N), bias_idx),    # rel-pos (+mask)
            resident((num_heads, hd, C)),                    # wo
            resident((1, C)),                                # bo
        ],
        out_specs=pl.BlockSpec((wb, N, C), lambda b: (b, 0, 0)),
        compiler_params=pltpu.CompilerParams(
            dimension_semantics=("parallel",),               # megacore on v7x
            vmem_limit_bytes=32 * 1024 * 1024,
        ),
    )(x, wq, bq, wk, bk, wv, bv, bias_all, wo, bo)


# ----------------------------------------------------------------------------
# Pure-JAX reference (mirrors the PyTorch forward, f32 throughout)
# ----------------------------------------------------------------------------
def _reference(x, params, window_size, num_heads, mask=None):
    B_, N, C = x.shape
    hd = C // num_heads
    scale = float(hd) ** -0.5
    qkv = x @ params["w_qkv"] + params["b_qkv"]
    qkv = qkv.reshape(B_, N, 3, num_heads, hd).transpose(2, 0, 3, 1, 4)
    q, k, v = qkv[0] * scale, qkv[1], qkv[2]
    attn = jnp.einsum("bhnd,bhmd->bhnm", q, k)
    attn = attn + _relative_position_bias(params["rel_bias_table"],
                                          window_size, num_heads)[None]
    if mask is not None:
        nW = mask.shape[0]
        attn = attn.reshape(B_ // nW, nW, num_heads, N, N) + mask[None, :, None]
        attn = attn.reshape(B_, num_heads, N, N)
    attn = jax.nn.softmax(attn, axis=-1)
    o = jnp.einsum("bhnm,bhmd->bhnd", attn, v)
    o = o.transpose(0, 2, 1, 3).reshape(B_, N, C)
    return o @ params["w_proj"] + params["b_proj"]


if __name__ == "__main__":
    # small but layout-friendly config: C=128 (lane-aligned), window 8x8 -> N=64
    dim = 128
    window_size = 8
    num_heads = 4
    batch = 2
    num_windows = 4
    B_ = batch * num_windows
    N = window_size * window_size

    key = jax.random.PRNGKey(0)
    kx, kw1, kb1, kw2, kt = jax.random.split(key, 5)
    x = jax.random.normal(kx, (B_, N, dim), dtype=jnp.float32)
    params = {
        # "x @ W" orientation (= torch Linear weight transposed)
        "w_qkv": jax.random.normal(kw1, (dim, 3 * dim), jnp.float32) * 0.02,
        "b_qkv": jax.random.normal(kb1, (3 * dim,), jnp.float32) * 0.02,
        "w_proj": jax.random.normal(kw2, (dim, dim), jnp.float32) * 0.02,
        "b_proj": jnp.zeros((dim,), jnp.float32),
        "rel_bias_table": jax.random.normal(
            kt, ((2 * window_size - 1) ** 2, num_heads), jnp.float32) * 0.02,
    }

    out = window_attention(x, params, window_size=window_size,
                           num_heads=num_heads, mask=None)
    out = jax.block_until_ready(out)
    assert out.shape == (B_, N, dim)

    ref = jax.block_until_ready(
        _reference(x, params, window_size, num_heads, mask=None))
    # kernel uses bf16 MXU operands with f32 accumulation -> loose tolerance
    assert jnp.allclose(out, ref, atol=2e-2, rtol=0.0), float(
        jnp.max(jnp.abs(out - ref)))

    # TODO(synk): attn_drop / proj_drop are identity here (p=0.0 / eval mode).
    print("KERNEL_OK")
</pallas_src>

<mosaic_0001>
module attributes {stable_mosaic.version = 11 : i64} {
  func.func @_window_attention_kernel(%arg0: i32, %arg1: memref<4x64x128xf32, #tpu.memory_space<vmem>>, %arg2: memref<4x128x32xbf16, #tpu.memory_space<vmem>>, %arg3: memref<4x1x32xf32, #tpu.memory_space<vmem>>, %arg4: memref<4x128x32xbf16, #tpu.memory_space<vmem>>, %arg5: memref<4x1x32xf32, #tpu.memory_space<vmem>>, %arg6: memref<4x128x32xbf16, #tpu.memory_space<vmem>>, %arg7: memref<4x1x32xf32, #tpu.memory_space<vmem>>, %arg8: memref<1x4x64x64xf32, #tpu.memory_space<vmem>>, %arg9: memref<4x32x128xbf16, #tpu.memory_space<vmem>>, %arg10: memref<1x128xf32, #tpu.memory_space<vmem>>, %arg11: memref<4x64x128xf32, #tpu.memory_space<vmem>>) attributes {dimension_semantics = [#tpu.dimension_semantics<parallel>], iteration_bounds = array<i64: 2>, scalar_prefetch = 0 : i64, scratch_operands = 0 : i64, tpu.core_type = #tpu.core_type<tc>, window_params = [{transform_indices = @transform_0, window_bounds = array<i64: 4, 64, 128>}, {pipeline_mode = #tpu.pipeline_mode<synchronous>, transform_indices = @transform_1, window_bounds = array<i64: 4, 128, 32>}, {pipeline_mode = #tpu.pipeline_mode<synchronous>, transform_indices = @transform_2, window_bounds = array<i64: 4, 1, 32>}, {pipeline_mode = #tpu.pipeline_mode<synchronous>, transform_indices = @transform_3, window_bounds = array<i64: 4, 128, 32>}, {pipeline_mode = #tpu.pipeline_mode<synchronous>, transform_indices = @transform_4, window_bounds = array<i64: 4, 1, 32>}, {pipeline_mode = #tpu.pipeline_mode<synchronous>, transform_indices = @transform_5, window_bounds = array<i64: 4, 128, 32>}, {pipeline_mode = #tpu.pipeline_mode<synchronous>, transform_indices = @transform_6, window_bounds = array<i64: 4, 1, 32>}, {pipeline_mode = #tpu.pipeline_mode<synchronous>, transform_indices = @transform_7, window_bounds = array<i64: 1, 4, 64, 64>}, {pipeline_mode = #tpu.pipeline_mode<synchronous>, transform_indices = @transform_8, window_bounds = array<i64: 4, 32, 128>}, {pipeline_mode = #tpu.pipeline_mode<synchronous>, transform_indices = @transform_9, window_bounds = array<i64: 1, 128>}, {transform_indices = @transform_10, window_bounds = array<i64: 4, 64, 128>}]} {
    %c0 = arith.constant 0 : index
    %c0_0 = arith.constant 0 : index
    %0 = vector.load %arg10[%c0, %c0_0] : memref<1x128xf32, #tpu.memory_space<vmem>>, vector<1x128xf32>
    %c0_1 = arith.constant 0 : index
    %c0_2 = arith.constant 0 : index
    %c0_3 = arith.constant 0 : index
    %1 = vector.load %arg1[%c0_1, %c0_2, %c0_3] : memref<4x64x128xf32, #tpu.memory_space<vmem>>, vector<1x64x128xf32>
    %2 = vector.shape_cast %1 : vector<1x64x128xf32> to vector<64x128xf32>
    %3 = arith.truncf %2 : vector<64x128xf32> to vector<64x128xbf16>
    %c0_4 = arith.constant 0 : index
    %c0_5 = arith.constant 0 : index
    %c0_6 = arith.constant 0 : index
    %4 = vector.load %arg2[%c0_4, %c0_5, %c0_6] : memref<4x128x32xbf16, #tpu.memory_space<vmem>>, vector<1x128x32xbf16>
    %5 = vector.shape_cast %4 : vector<1x128x32xbf16> to vector<128x32xbf16>
    %cst = arith.constant dense<0.000000e+00> : vector<64x32xf32>
    %6 = tpu.matmul %3, %5, %cst {dimension_numbers = #tpu.dot_dimension_numbers<[1], [0], [0], [1], [0, 0, 1, 1], [], []>} : vector<64x128xbf16>, vector<128x32xbf16>, vector<64x32xf32> -> vector<64x32xf32>
    %c0_7 = arith.constant 0 : index
    %c0_8 = arith.constant 0 : index
    %c0_9 = arith.constant 0 : index
    %7 = vector.load %arg3[%c0_7, %c0_8, %c0_9] : memref<4x1x32xf32, #tpu.memory_space<vmem>>, vector<1x1x32xf32>
    %8 = vector.shape_cast %7 : vector<1x1x32xf32> to vector<1x32xf32>
    %9 = vector.broadcast %8 : vector<1x32xf32> to vector<64x32xf32>
    %10 = arith.addf %6, %9 : vector<64x32xf32>
    %c0_10 = arith.constant 0 : index
    %c0_11 = arith.constant 0 : index
    %c0_12 = arith.constant 0 : index
    %11 = vector.load %arg4[%c0_10, %c0_11, %c0_12] : memref<4x128x32xbf16, #tpu.memory_space<vmem>>, vector<1x128x32xbf16>
    %12 = vector.shape_cast %11 : vector<1x128x32xbf16> to vector<128x32xbf16>
    %cst_13 = arith.constant dense<0.000000e+00> : vector<64x32xf32>
    %13 = tpu.matmul %3, %12, %cst_13 {dimension_numbers = #tpu.dot_dimension_numbers<[1], [0], [0], [1], [0, 0, 1, 1], [], []>} : vector<64x128xbf16>, vector<128x32xbf16>, vector<64x32xf32> -> vector<64x32xf32>
    %c0_14 = arith.constant 0 : index
    %c0_15 = arith.constant 0 : index
    %c0_16 = arith.constant 0 : index
    %14 = vector.load %arg5[%c0_14, %c0_15, %c0_16] : memref<4x1x32xf32, #tpu.memory_space<vmem>>, vector<1x1x32xf32>
    %15 = vector.shape_cast %14 : vector<1x1x32xf32> to vector<1x32xf32>
    %16 = vector.broadcast %15 : vector<1x32xf32> to vector<64x32xf32>
    %17 = arith.addf %13, %16 : vector<64x32xf32>
    %c0_17 = arith.constant 0 : index
    %c0_18 = arith.constant 0 : index
    %c0_19 = arith.constant 0 : index
    %18 = vector.load %arg6[%c0_17, %c0_18, %c0_19] : memref<4x128x32xbf16, #tpu.memory_space<vmem>>, vector<1x128x32xbf16>
    %19 = vector.shape_cast %18 : vector<1x128x32xbf16> to vector<128x32xbf16>
    %cst_20 = arith.constant dense<0.000000e+00> : vector<64x32xf32>
    %20 = tpu.matmul %3, %19, %cst_20 {dimension_numbers = #tpu.dot_dimension_numbers<[1], [0], [0], [1], [0, 0, 1, 1], [], []>} : vector<64x128xbf16>, vector<128x32xbf16>, vector<64x32xf32> -> vector<64x32xf32>
    %c0_21 = arith.constant 0 : index
    %c0_22 = arith.constant 0 : index
    %c0_23 = arith.constant 0 : index
    %21 = vector.load %arg7[%c0_21, %c0_22, %c0_23] : memref<4x1x32xf32, #tpu.memory_space<vmem>>, vector<1x1x32xf32>
    %22 = vector.shape_cast %21 : vector<1x1x32xf32> to vector<1x32xf32>
    %23 = vector.broadcast %22 : vector<1x32xf32> to vector<64x32xf32>
    %24 = arith.addf %20, %23 : vector<64x32xf32>
    %cst_24 = arith.constant 0.176776692 : f32
    %25 = vector.broadcast %cst_24 : f32 to vector<64x32xf32>
    %26 = arith.mulf %10, %25 : vector<64x32xf32>
    %27 = arith.truncf %26 : vector<64x32xf32> to vector<64x32xbf16>
    %28 = arith.truncf %17 : vector<64x32xf32> to vector<64x32xbf16>
    %cst_25 = arith.constant dense<0.000000e+00> : vector<64x64xf32>
    %29 = tpu.matmul %27, %28, %cst_25 {dimension_numbers = #tpu.dot_dimension_numbers<[1], [1], [0], [0], [0, 0, 1, 0], [], []>} : vector<64x32xbf16>, vector<64x32xbf16>, vector<64x64xf32> -> vector<64x64xf32>
    %c0_26 = arith.constant 0 : index
    %c0_27 = arith.constant 0 : index
    %c0_28 = arith.constant 0 : index
    %c0_29 = arith.constant 0 : index
    %30 = vector.load %arg8[%c0_26, %c0_27, %c0_28, %c0_29] : memref<1x4x64x64xf32, #tpu.memory_space<vmem>>, vector<1x1x64x64xf32>
    %31 = vector.shape_cast %30 : vector<1x1x64x64xf32> to vector<64x64xf32>
    %32 = arith.addf %29, %31 : vector<64x64xf32>
    %cst_30 = arith.constant dense<0xFF800000> : vector<64xf32>
    %33 = vector.multi_reduction <maximumf>, %32, %cst_30 [1] : vector<64x64xf32> to vector<64xf32>
    %34 = vector.shape_cast %33 : vector<64xf32> to vector<64x1xf32>
    %35 = vector.broadcast %34 : vector<64x1xf32> to vector<64x64xf32>
    %36 = arith.subf %32, %35 : vector<64x64xf32>
    %37 = math.exp %36 : vector<64x64xf32>
    %cst_31 = arith.constant dense<0.000000e+00> : vector<64xf32>
    %38 = vector.multi_reduction <add>, %37, %cst_31 [1] : vector<64x64xf32> to vector<64xf32>
    %39 = vector.shape_cast %38 : vector<64xf32> to vector<64x1xf32>
    %40 = vector.broadcast %39 : vector<64x1xf32> to vector<64x64xf32>
    %41 = arith.divf %37, %40 : vector<64x64xf32>
    %42 = arith.truncf %41 : vector<64x64xf32> to vector<64x64xbf16>
    %43 = arith.truncf %24 : vector<64x32xf32> to vector<64x32xbf16>
    %cst_32 = arith.constant dense<0.000000e+00> : vector<64x32xf32>
    %44 = tpu.matmul %42, %43, %cst_32 {dimension_numbers = #tpu.dot_dimension_numbers<[1], [0], [0], [1], [0, 0, 1, 1], [], []>} : vector<64x64xbf16>, vector<64x32xbf16>, vector<64x32xf32> -> vector<64x32xf32>
    %45 = arith.truncf %44 : vector<64x32xf32> to vector<64x32xbf16>
    %c0_33 = arith.constant 0 : index
    %c0_34 = arith.constant 0 : index
    %c0_35 = arith.constant 0 : index
    %46 = vector.load %arg9[%c0_33, %c0_34, %c0_35] : memref<4x32x128xbf16, #tpu.memory_space<vmem>>, vector<1x32x128xbf16>
    %47 = vector.shape_cast %46 : vector<1x32x128xbf16> to vector<32x128xbf16>
    %cst_36 = arith.constant dense<0.000000e+00> : vector<64x128xf32>
    %48 = tpu.matmul %45, %47, %cst_36 {dimension_numbers = #tpu.dot_dimension_numbers<[1], [0], [0], [1], [0, 0, 1, 1], [], []>} : vector<64x32xbf16>, vector<32x128xbf16>, vector<64x128xf32> -> vector<64x128xf32>
    %c1 = arith.constant 1 : index
    %c0_37 = arith.constant 0 : index
    %c0_38 = arith.constant 0 : index
    %49 = vector.load %arg2[%c1, %c0_37, %c0_38] : memref<4x128x32xbf16, #tpu.memory_space<vmem>>, vector<1x128x32xbf16>
    %50 = vector.shape_cast %49 : vector<1x128x32xbf16> to vector<128x32xbf16>
    %cst_39 = arith.constant dense<0.000000e+00> : vector<64x32xf32>
    %51 = tpu.matmul %3, %50, %cst_39 {dimension_numbers = #tpu.dot_dimension_numbers<[1], [0], [0], [1], [0, 0, 1, 1], [], []>} : vector<64x128xbf16>, vector<128x32xbf16>, vector<64x32xf32> -> vector<64x32xf32>
    %c1_40 = arith.constant 1 : index
    %c0_41 = arith.constant 0 : index
    %c0_42 = arith.constant 0 : index
    %52 = vector.load %arg3[%c1_40, %c0_41, %c0_42] : memref<4x1x32xf32, #tpu.memory_space<vmem>>, vector<1x1x32xf32>
    %53 = vector.shape_cast %52 : vector<1x1x32xf32> to vector<1x32xf32>
    %54 = vector.broadcast %53 : vector<1x32xf32> to vector<64x32xf32>
    %55 = arith.addf %51, %54 : vector<64x32xf32>
    %c1_43 = arith.constant 1 : index
    %c0_44 = arith.constant 0 : index
    %c0_45 = arith.constant 0 : index
    %56 = vector.load %arg4[%c1_43, %c0_44, %c0_45] : memref<4x128x32xbf16, #tpu.memory_space<vmem>>, vector<1x128x32xbf16>
    %57 = vector.shape_cast %56 : vector<1x128x32xbf16> to vector<128x32xbf16>
    %cst_46 = arith.constant dense<0.000000e+00> : vector<64x32xf32>
    %58 = tpu.matmul %3, %57, %cst_46 {dimension_numbers = #tpu.dot_dimension_numbers<[1], [0], [0], [1], [0, 0, 1, 1], [], []>} : vector<64x128xbf16>, vector<128x32xbf16>, vector<64x32xf32> -> vector<64x32xf32>
    %c1_47 = arith.constant 1 : index
    %c0_48 = arith.constant 0 : index
    %c0_49 = arith.constant 0 : index
    %59 = vector.load %arg5[%c1_47, %c0_48, %c0_49] : memref<4x1x32xf32, #tpu.memory_space<vmem>>, vector<1x1x32xf32>
    %60 = vector.shape_cast %59 : vector<1x1x32xf32> to vector<1x32xf32>
    %61 = vector.broadcast %60 : vector<1x32xf32> to vector<64x32xf32>
    %62 = arith.addf %58, %61 : vector<64x32xf32>
    %c1_50 = arith.constant 1 : index
    %c0_51 = arith.constant 0 : index
    %c0_52 = arith.constant 0 : index
    %63 = vector.load %arg6[%c1_50, %c0_51, %c0_52] : memref<4x128x32xbf16, #tpu.memory_space<vmem>>, vector<1x128x32xbf16>
    %64 = vector.shape_cast %63 : vector<1x128x32xbf16> to vector<128x32xbf16>
    %cst_53 = arith.constant dense<0.000000e+00> : vector<64x32xf32>
    %65 = tpu.matmul %3, %64, %cst_53 {dimension_numbers = #tpu.dot_dimension_numbers<[1], [0], [0], [1], [0, 0, 1, 1], [], []>} : vector<64x128xbf16>, vector<128x32xbf16>, vector<64x32xf32> -> vector<64x32xf32>
    %c1_54 = arith.constant 1 : index
    %c0_55 = arith.constant 0 : index
    %c0_56 = arith.constant 0 : index
    %66 = vector.load %arg7[%c1_54, %c0_55, %c0_56] : memref<4x1x32xf32, #tpu.memory_space<vmem>>, vector<1x1x32xf32>
    %67 = vector.shape_cast %66 : vector<1x1x32xf32> to vector<1x32xf32>
    %68 = vector.broadcast %67 : vector<1x32xf32> to vector<64x32xf32>
    %69 = arith.addf %65, %68 : vector<64x32xf32>
    %cst_57 = arith.constant 0.176776692 : f32
    %70 = vector.broadcast %cst_57 : f32 to vector<64x32xf32>
    %71 = arith.mulf %55, %70 : vector<64x32xf32>
    %72 = arith.truncf %71 : vector<64x32xf32> to vector<64x32xbf16>
    %73 = arith.truncf %62 : vector<64x32xf32> to vector<64x32xbf16>
    %cst_58 = arith.constant dense<0.000000e+00> : vector<64x64xf32>
    %74 = tpu.matmul %72, %73, %cst_58 {dimension_numbers = #tpu.dot_dimension_numbers<[1], [1], [0], [0], [0, 0, 1, 0], [], []>} : vector<64x32xbf16>, vector<64x32xbf16>, vector<64x64xf32> -> vector<64x64xf32>
    %c0_59 = arith.constant 0 : index
    %c1_60 = arith.constant 1 : index
    %c0_61 = arith.constant 0 : index
    %c0_62 = arith.constant 0 : index
    %75 = vector.load %arg8[%c0_59, %c1_60, %c0_61, %c0_62] : memref<1x4x64x64xf32, #tpu.memory_space<vmem>>, vector<1x1x64x64xf32>
    %76 = vector.shape_cast %75 : vector<1x1x64x64xf32> to vector<64x64xf32>
    %77 = arith.addf %74, %76 : vector<64x64xf32>
    %cst_63 = arith.constant dense<0xFF800000> : vector<64xf32>
    %78 = vector.multi_reduction <maximumf>, %77, %cst_63 [1] : vector<64x64xf32> to vector<64xf32>
    %79 = vector.shape_cast %78 : vector<64xf32> to vector<64x1xf32>
    %80 = vector.broadcast %79 : vector<64x1xf32> to vector<64x64xf32>
    %81 = arith.subf %77, %80 : vector<64x64xf32>
    %82 = math.exp %81 : vector<64x64xf32>
    %cst_64 = arith.constant dense<0.000000e+00> : vector<64xf32>
    %83 = vector.multi_reduction <add>, %82, %cst_64 [1] : vector<64x64xf32> to vector<64xf32>
    %84 = vector.shape_cast %83 : vector<64xf32> to vector<64x1xf32>
    %85 = vector.broadcast %84 : vector<64x1xf32> to vector<64x64xf32>
    %86 = arith.divf %82, %85 : vector<64x64xf32>
    %87 = arith.truncf %86 : vector<64x64xf32> to vector<64x64xbf16>
    %88 = arith.truncf %69 : vector<64x32xf32> to vector<64x32xbf16>
    %cst_65 = arith.constant dense<0.000000e+00> : vector<64x32xf32>
    %89 = tpu.matmul %87, %88, %cst_65 {dimension_numbers = #tpu.dot_dimension_numbers<[1], [0], [0], [1], [0, 0, 1, 1], [], []>} : vector<64x64xbf16>, vector<64x32xbf16>, vector<64x32xf32> -> vector<64x32xf32>
    %90 = arith.truncf %89 : vector<64x32xf32> to vector<64x32xbf16>
    %c1_66 = arith.constant 1 : index
    %c0_67 = arith.constant 0 : index
    %c0_68 = arith.constant 0 : index
    %91 = vector.load %arg9[%c1_66, %c0_67, %c0_68] : memref<4x32x128xbf16, #tpu.memory_space<vmem>>, vector<1x32x128xbf16>
    %92 = vector.shape_cast %91 : vector<1x32x128xbf16> to vector<32x128xbf16>
    %cst_69 = arith.constant dense<0.000000e+00> : vector<64x128xf32>
    %93 = tpu.matmul %90, %92, %cst_69 {dimension_numbers = #tpu.dot_dimension_numbers<[1], [0], [0], [1], [0, 0, 1, 1], [], []>} : vector<64x32xbf16>, vector<32x128xbf16>, vector<64x128xf32> -> vector<64x128xf32>
    %94 = arith.addf %48, %93 : vector<64x128xf32>
    %c2 = arith.constant 2 : index
    %c0_70 = arith.constant 0 : index
    %c0_71 = arith.constant 0 : index
    %95 = vector.load %arg2[%c2, %c0_70, %c0_71] : memref<4x128x32xbf16, #tpu.memory_space<vmem>>, vector<1x128x32xbf16>
    %96 = vector.shape_cast %95 : vector<1x128x32xbf16> to vector<128x32xbf16>
    %cst_72 = arith.constant dense<0.000000e+00> : vector<64x32xf32>
    %97 = tpu.matmul %3, %96, %cst_72 {dimension_numbers = #tpu.dot_dimension_numbers<[1], [0], [0], [1], [0, 0, 1, 1], [], []>} : vector<64x128xbf16>, vector<128x32xbf16>, vector<64x32xf32> -> vector<64x32xf32>
    %c2_73 = arith.constant 2 : index
    %c0_74 = arith.constant 0 : index
    %c0_75 = arith.constant 0 : index
    %98 = vector.load %arg3[%c2_73, %c0_74, %c0_75] : memref<4x1x32xf32, #tpu.memory_space<vmem>>, vector<1x1x32xf32>
    %99 = vector.shape_cast %98 : vector<1x1x32xf32> to vector<1x32xf32>
    %100 = vector.broadcast %99 : vector<1x32xf32> to vector<64x32xf32>
    %101 = arith.addf %97, %100 : vector<64x32xf32>
    %c2_76 = arith.constant 2 : index
    %c0_77 = arith.constant 0 : index
    %c0_78 = arith.constant 0 : index
    %102 = vector.load %arg4[%c2_76, %c0_77, %c0_78] : memref<4x128x32xbf16, #tpu.memory_space<vmem>>, vector<1x128x32xbf16>
    %103 = vector.shape_cast %102 : vector<1x128x32xbf16> to vector<128x32xbf16>
    %cst_79 = arith.constant dense<0.000000e+00> : vector<64x32xf32>
    %104 = tpu.matmul %3, %103, %cst_79 {dimension_numbers = #tpu.dot_dimension_numbers<[1], [0], [0], [1], [0, 0, 1, 1], [], []>} : vector<64x128xbf16>, vector<128x32xbf16>, vector<64x32xf32> -> vector<64x32xf32>
    %c2_80 = arith.constant 2 : index
    %c0_81 = arith.constant 0 : index
    %c0_82 = arith.constant 0 : index
    %105 = vector.load %arg5[%c2_80, %c0_81, %c0_82] : memref<4x1x32xf32, #tpu.memory_space<vmem>>, vector<1x1x32xf32>
    %106 = vector.shape_cast %105 : vector<1x1x32xf32> to vector<1x32xf32>
    %107 = vector.broadcast %106 : vector<1x32xf32> to vector<64x32xf32>
    %108 = arith.addf %104, %107 : vector<64x32xf32>
    %c2_83 = arith.constant 2 : index
    %c0_84 = arith.constant 0 : index
    %c0_85 = arith.constant 0 : index
    %109 = vector.load %arg6[%c2_83, %c0_84, %c0_85] : memref<4x128x32xbf16, #tpu.memory_space<vmem>>, vector<1x128x32xbf16>
    %110 = vector.shape_cast %109 : vector<1x128x32xbf16> to vector<128x32xbf16>
    %cst_86 = arith.constant dense<0.000000e+00> : vector<64x32xf32>
    %111 = tpu.matmul %3, %110, %cst_86 {dimension_numbers = #tpu.dot_dimension_numbers<[1], [0], [0], [1], [0, 0, 1, 1], [], []>} : vector<64x128xbf16>, vector<128x32xbf16>, vector<64x32xf32> -> vector<64x32xf32>
    %c2_87 = arith.constant 2 : index
    %c0_88 = arith.constant 0 : index
    %c0_89 = arith.constant 0 : index
    %112 = vector.load %arg7[%c2_87, %c0_88, %c0_89] : memref<4x1x32xf32, #tpu.memory_space<vmem>>, vector<1x1x32xf32>
    %113 = vector.shape_cast %112 : vector<1x1x32xf32> to vector<1x32xf32>
    %114 = vector.broadcast %113 : vector<1x32xf32> to vector<64x32xf32>
    %115 = arith.addf %111, %114 : vector<64x32xf32>
    %cst_90 = arith.constant 0.176776692 : f32
    %116 = vector.broadcast %cst_90 : f32 to vector<64x32xf32>
    %117 = arith.mulf %101, %116 : vector<64x32xf32>
    %118 = arith.truncf %117 : vector<64x32xf32> to vector<64x32xbf16>
    %119 = arith.truncf %108 : vector<64x32xf32> to vector<64x32xbf16>
    %cst_91 = arith.constant dense<0.000000e+00> : vector<64x64xf32>
    %120 = tpu.matmul %118, %119, %cst_91 {dimension_numbers = #tpu.dot_dimension_numbers<[1], [1], [0], [0], [0, 0, 1, 0], [], []>} : vector<64x32xbf16>, vector<64x32xbf16>, vector<64x64xf32> -> vector<64x64xf32>
    %c0_92 = arith.constant 0 : index
    %c2_93 = arith.constant 2 : index
    %c0_94 = arith.constant 0 : index
    %c0_95 = arith.constant 0 : index
    %121 = vector.load %arg8[%c0_92, %c2_93, %c0_94, %c0_95] : memref<1x4x64x64xf32, #tpu.memory_space<vmem>>, vector<1x1x64x64xf32>
    %122 = vector.shape_cast %121 : vector<1x1x64x64xf32> to vector<64x64xf32>
    %123 = arith.addf %120, %122 : vector<64x64xf32>
    %cst_96 = arith.constant dense<0xFF800000> : vector<64xf32>
    %124 = vector.multi_reduction <maximumf>, %123, %cst_96 [1] : vector<64x64xf32> to vector<64xf32>
    %125 = vector.shape_cast %124 : vector<64xf32> to vector<64x1xf32>
    %126 = vector.broadcast %125 : vector<64x1xf32> to vector<64x64xf32>
    %127 = arith.subf %123, %126 : vector<64x64xf32>
    %128 = math.exp %127 : vector<64x64xf32>
    %cst_97 = arith.constant dense<0.000000e+00> : vector<64xf32>
    %129 = vector.multi_reduction <add>, %128, %cst_97 [1] : vector<64x64xf32> to vector<64xf32>
    %130 = vector.shape_cast %129 : vector<64xf32> to vector<64x1xf32>
    %131 = vector.broadcast %130 : vector<64x1xf32> to vector<64x64xf32>
    %132 = arith.divf %128, %131 : vector<64x64xf32>
    %133 = arith.truncf %132 : vector<64x64xf32> to vector<64x64xbf16>
    %134 = arith.truncf %115 : vector<64x32xf32> to vector<64x32xbf16>
    %cst_98 = arith.constant dense<0.000000e+00> : vector<64x32xf32>
    %135 = tpu.matmul %133, %134, %cst_98 {dimension_numbers = #tpu.dot_dimension_numbers<[1], [0], [0], [1], [0, 0, 1, 1], [], []>} : vector<64x64xbf16>, vector<64x32xbf16>, vector<64x32xf32> -> vector<64x32xf32>
    %136 = arith.truncf %135 : vector<64x32xf32> to vector<64x32xbf16>
    %c2_99 = arith.constant 2 : index
    %c0_100 = arith.constant 0 : index
    %c0_101 = arith.constant 0 : index
    %137 = vector.load %arg9[%c2_99, %c0_100, %c0_101] : memref<4x32x128xbf16, #tpu.memory_space<vmem>>, vector<1x32x128xbf16>
    %138 = vector.shape_cast %137 : vector<1x32x128xbf16> to vector<32x128xbf16>
    %cst_102 = arith.constant dense<0.000000e+00> : vector<64x128xf32>
    %139 = tpu.matmul %136, %138, %cst_102 {dimension_numbers = #tpu.dot_dimension_numbers<[1], [0], [0], [1], [0, 0, 1, 1], [], []>} : vector<64x32xbf16>, vector<32x128xbf16>, vector<64x128xf32> -> vector<64x128xf32>
    %140 = arith.addf %94, %139 : vector<64x128xf32>
    %c3 = arith.constant 3 : index
    %c0_103 = arith.constant 0 : index
    %c0_104 = arith.constant 0 : index
    %141 = vector.load %arg2[%c3, %c0_103, %c0_104] : memref<4x128x32xbf16, #tpu.memory_space<vmem>>, vector<1x128x32xbf16>
    %142 = vector.shape_cast %141 : vector<1x128x32xbf16> to vector<128x32xbf16>
    %cst_105 = arith.constant dense<0.000000e+00> : vector<64x32xf32>
    %143 = tpu.matmul %3, %142, %cst_105 {dimension_numbers = #tpu.dot_dimension_numbers<[1], [0], [0], [1], [0, 0, 1, 1], [], []>} : vector<64x128xbf16>, vector<128x32xbf16>, vector<64x32xf32> -> vector<64x32xf32>
    %c3_106 = arith.constant 3 : index
    %c0_107 = arith.constant 0 : index
    %c0_108 = arith.constant 0 : index
    %144 = vector.load %arg3[%c3_106, %c0_107, %c0_108] : memref<4x1x32xf32, #tpu.memory_space<vmem>>, vector<1x1x32xf32>
    %145 = vector.shape_cast %144 : vector<1x1x32xf32> to vector<1x32xf32>
    %146 = vector.broadcast %145 : vector<1x32xf32> to vector<64x32xf32>
    %147 = arith.addf %143, %146 : vector<64x32xf32>
    %c3_109 = arith.constant 3 : index
    %c0_110 = arith.constant 0 : index
    %c0_111 = arith.constant 0 : index
    %148 = vector.load %arg4[%c3_109, %c0_110, %c0_111] : memref<4x128x32xbf16, #tpu.memory_space<vmem>>, vector<1x128x32xbf16>
    %149 = vector.shape_cast %148 : vector<1x128x32xbf16> to vector<128x32xbf16>
    %cst_112 = arith.constant dense<0.000000e+00> : vector<64x32xf32>
    %150 = tpu.matmul %3, %149, %cst_112 {dimension_numbers = #tpu.dot_dimension_numbers<[1], [0], [0], [1], [0, 0, 1, 1], [], []>} : vector<64x128xbf16>, vector<128x32xbf16>, vector<64x32xf32> -> vector<64x32xf32>
    %c3_113 = arith.constant 3 : index
    %c0_114 = arith.constant 0 : index
    %c0_115 = arith.constant 0 : index
    %151 = vector.load %arg5[%c3_113, %c0_114, %c0_115] : memref<4x1x32xf32, #tpu.memory_space<vmem>>, vector<1x1x32xf32>
    %152 = vector.shape_cast %151 : vector<1x1x32xf32> to vector<1x32xf32>
    %153 = vector.broadcast %152 : vector<1x32xf32> to vector<64x32xf32>
    %154 = arith.addf %150, %153 : vector<64x32xf32>
    %c3_116 = arith.constant 3 : index
    %c0_117 = arith.constant 0 : index
    %c0_118 = arith.constant 0 : index
    %155 = vector.load %arg6[%c3_116, %c0_117, %c0_118] : memref<4x128x32xbf16, #tpu.memory_space<vmem>>, vector<1x128x32xbf16>
    %156 = vector.shape_cast %155 : vector<1x128x32xbf16> to vector<128x32xbf16>
    %cst_119 = arith.constant dense<0.000000e+00> : vector<64x32xf32>
    %157 = tpu.matmul %3, %156, %cst_119 {dimension_numbers = #tpu.dot_dimension_numbers<[1], [0], [0], [1], [0, 0, 1, 1], [], []>} : vector<64x128xbf16>, vector<128x32xbf16>, vector<64x32xf32> -> vector<64x32xf32>
    %c3_120 = arith.constant 3 : index
    %c0_121 = arith.constant 0 : index
    %c0_122 = arith.constant 0 : index
    %158 = vector.load %arg7[%c3_120, %c0_121, %c0_122] : memref<4x1x32xf32, #tpu.memory_space<vmem>>, vector<1x1x32xf32>
    %159 = vector.shape_cast %158 : vector<1x1x32xf32> to vector<1x32xf32>
    %160 = vector.broadcast %159 : vector<1x32xf32> to vector<64x32xf32>
    %161 = arith.addf %157, %160 : vector<64x32xf32>
    %cst_123 = arith.constant 0.176776692 : f32
    %162 = vector.broadcast %cst_123 : f32 to vector<64x32xf32>
    %163 = arith.mulf %147, %162 : vector<64x32xf32>
    %164 = arith.truncf %163 : vector<64x32xf32> to vector<64x32xbf16>
    %165 = arith.truncf %154 : vector<64x32xf32> to vector<64x32xbf16>
    %cst_124 = arith.constant dense<0.000000e+00> : vector<64x64xf32>
    %166 = tpu.matmul %164, %165, %cst_124 {dimension_numbers = #tpu.dot_dimension_numbers<[1], [1], [0], [0], [0, 0, 1, 0], [], []>} : vector<64x32xbf16>, vector<64x32xbf16>, vector<64x64xf32> -> vector<64x64xf32>
    %c0_125 = arith.constant 0 : index
    %c3_126 = arith.constant 3 : index
    %c0_127 = arith.constant 0 : index
    %c0_128 = arith.constant 0 : index
    %167 = vector.load %arg8[%c0_125, %c3_126, %c0_127, %c0_128] : memref<1x4x64x64xf32, #tpu.memory_space<vmem>>, vector<1x1x64x64xf32>
    %168 = vector.shape_cast %167 : vector<1x1x64x64xf32> to vector<64x64xf32>
    %169 = arith.addf %166, %168 : vector<64x64xf32>
    %cst_129 = arith.constant dense<0xFF800000> : vector<64xf32>
    %170 = vector.multi_reduction <maximumf>, %169, %cst_129 [1] : vector<64x64xf32> to vector<64xf32>
    %171 = vector.shape_cast %170 : vector<64xf32> to vector<64x1xf32>
    %172 = vector.broadcast %171 : vector<64x1xf32> to vector<64x64xf32>
    %173 = arith.subf %169, %172 : vector<64x64xf32>
    %174 = math.exp %173 : vector<64x64xf32>
    %cst_130 = arith.constant dense<0.000000e+00> : vector<64xf32>
    %175 = vector.multi_reduction <add>, %174, %cst_130 [1] : vector<64x64xf32> to vector<64xf32>
    %176 = vector.shape_cast %175 : vector<64xf32> to vector<64x1xf32>
    %177 = vector.broadcast %176 : vector<64x1xf32> to vector<64x64xf32>
    %178 = arith.divf %174, %177 : vector<64x64xf32>
    %179 = arith.truncf %178 : vector<64x64xf32> to vector<64x64xbf16>
    %180 = arith.truncf %161 : vector<64x32xf32> to vector<64x32xbf16>
    %cst_131 = arith.constant dense<0.000000e+00> : vector<64x32xf32>
    %181 = tpu.matmul %179, %180, %cst_131 {dimension_numbers = #tpu.dot_dimension_numbers<[1], [0], [0], [1], [0, 0, 1, 1], [], []>} : vector<64x64xbf16>, vector<64x32xbf16>, vector<64x32xf32> -> vector<64x32xf32>
    %182 = arith.truncf %181 : vector<64x32xf32> to vector<64x32xbf16>
    %c3_132 = arith.constant 3 : index
    %c0_133 = arith.constant 0 : index
    %c0_134 = arith.constant 0 : index
    %183 = vector.load %arg9[%c3_132, %c0_133, %c0_134] : memref<4x32x128xbf16, #tpu.memory_space<vmem>>, vector<1x32x128xbf16>
    %184 = vector.shape_cast %183 : vector<1x32x128xbf16> to vector<32x128xbf16>
    %cst_135 = arith.constant dense<0.000000e+00> : vector<64x128xf32>
    %185 = tpu.matmul %182, %184, %cst_135 {dimension_numbers = #tpu.dot_dimension_numbers<[1], [0], [0], [1], [0, 0, 1, 1], [], []>} : vector<64x32xbf16>, vector<32x128xbf16>, vector<64x128xf32> -> vector<64x128xf32>
    %186 = arith.addf %140, %185 : vector<64x128xf32>
    %187 = vector.broadcast %0 : vector<1x128xf32> to vector<64x128xf32>
    %188 = arith.addf %186, %187 : vector<64x128xf32>
    %c0_136 = arith.constant 0 : index
    %c0_137 = arith.constant 0 : index
    %c0_138 = arith.constant 0 : index
    %189 = vector.load %arg11[%c0_136, %c0_137, %c0_138] : memref<4x64x128xf32, #tpu.memory_space<vmem>>, vector<1x64x128xf32>
    %190 = vector.shape_cast %189 : vector<1x64x128xf32> to vector<64x128xf32>
    %191 = vector.shape_cast %188 : vector<64x128xf32> to vector<1x64x128xf32>
    tpu.vector_store %arg11[%c0_136, %c0_137, %c0_138], %191 {strides = array<i32>} : memref<4x64x128xf32, #tpu.memory_space<vmem>>, vector<1x64x128xf32>,
    %c1_139 = arith.constant 1 : index
    %c0_140 = arith.constant 0 : index
    %c0_141 = arith.constant 0 : index
    %192 = vector.load %arg1[%c1_139, %c0_140, %c0_141] : memref<4x64x128xf32, #tpu.memory_space<vmem>>, vector<1x64x128xf32>
    %193 = vector.shape_cast %192 : vector<1x64x128xf32> to vector<64x128xf32>
    %194 = arith.truncf %193 : vector<64x128xf32> to vector<64x128xbf16>
    %c0_142 = arith.constant 0 : index
    %c0_143 = arith.constant 0 : index
    %c0_144 = arith.constant 0 : index
    %195 = vector.load %arg2[%c0_142, %c0_143, %c0_144] : memref<4x128x32xbf16, #tpu.memory_space<vmem>>, vector<1x128x32xbf16>
    %196 = vector.shape_cast %195 : vector<1x128x32xbf16> to vector<128x32xbf16>
    %cst_145 = arith.constant dense<0.000000e+00> : vector<64x32xf32>
    %197 = tpu.matmul %194, %196, %cst_145 {dimension_numbers = #tpu.dot_dimension_numbers<[1], [0], [0], [1], [0, 0, 1, 1], [], []>} : vector<64x128xbf16>, vector<128x32xbf16>, vector<64x32xf32> -> vector<64x32xf32>
    %c0_146 = arith.constant 0 : index
    %c0_147 = arith.constant 0 : index
    %c0_148 = arith.constant 0 : index
    %198 = vector.load %arg3[%c0_146, %c0_147, %c0_148] : memref<4x1x32xf32, #tpu.memory_space<vmem>>, vector<1x1x32xf32>
    %199 = vector.shape_cast %198 : vector<1x1x32xf32> to vector<1x32xf32>
    %200 = vector.broadcast %199 : vector<1x32xf32> to vector<64x32xf32>
    %201 = arith.addf %197, %200 : vector<64x32xf32>
    %c0_149 = arith.constant 0 : index
    %c0_150 = arith.constant 0 : index
    %c0_151 = arith.constant 0 : index
    %202 = vector.load %arg4[%c0_149, %c0_150, %c0_151] : memref<4x128x32xbf16, #tpu.memory_space<vmem>>, vector<1x128x32xbf16>
    %203 = vector.shape_cast %202 : vector<1x128x32xbf16> to vector<128x32xbf16>
    %cst_152 = arith.constant dense<0.000000e+00> : vector<64x32xf32>
    %204 = tpu.matmul %194, %203, %cst_152 {dimension_numbers = #tpu.dot_dimension_numbers<[1], [0], [0], [1], [0, 0, 1, 1], [], []>} : vector<64x128xbf16>, vector<128x32xbf16>, vector<64x32xf32> -> vector<64x32xf32>
    %c0_153 = arith.constant 0 : index
    %c0_154 = arith.constant 0 : index
    %c0_155 = arith.constant 0 : index
    %205 = vector.load %arg5[%c0_153, %c0_154, %c0_155] : memref<4x1x32xf32, #tpu.memory_space<vmem>>, vector<1x1x32xf32>
    %206 = vector.shape_cast %205 : vector<1x1x32xf32> to vector<1x32xf32>
    %207 = vector.broadcast %206 : vector<1x32xf32> to vector<64x32xf32>
    %208 = arith.addf %204, %207 : vector<64x32xf32>
    %c0_156 = arith.constant 0 : index
    %c0_157 = arith.constant 0 : index
    %c0_158 = arith.constant 0 : index
    %209 = vector.load %arg6[%c0_156, %c0_157, %c0_158] : memref<4x128x32xbf16, #tpu.memory_space<vmem>>, vector<1x128x32xbf16>
    %210 = vector.shape_cast %209 : vector<1x128x32xbf16> to vector<128x32xbf16>
    %cst_159 = arith.constant dense<0.000000e+00> : vector<64x32xf32>
    %211 = tpu.matmul %194, %210, %cst_159 {dimension_numbers = #tpu.dot_dimension_numbers<[1], [0], [0], [1], [0, 0, 1, 1], [], []>} : vector<64x128xbf16>, vector<128x32xbf16>, vector<64x32xf32> -> vector<64x32xf32>
    %c0_160 = arith.constant 0 : index
    %c0_161 = arith.constant 0 : index
    %c0_162 = arith.constant 0 : index
    %212 = vector.load %arg7[%c0_160, %c0_161, %c0_162] : memref<4x1x32xf32, #tpu.memory_space<vmem>>, vector<1x1x32xf32>
    %213 = vector.shape_cast %212 : vector<1x1x32xf32> to vector<1x32xf32>
    %214 = vector.broadcast %213 : vector<1x32xf32> to vector<64x32xf32>
    %215 = arith.addf %211, %214 : vector<64x32xf32>
    %cst_163 = arith.constant 0.176776692 : f32
    %216 = vector.broadcast %cst_163 : f32 to vector<64x32xf32>
    %217 = arith.mulf %201, %216 : vector<64x32xf32>
    %218 = arith.truncf %217 : vector<64x32xf32> to vector<64x32xbf16>
    %219 = arith.truncf %208 : vector<64x32xf32> to vector<64x32xbf16>
    %cst_164 = arith.constant dense<0.000000e+00> : vector<64x64xf32>
    %220 = tpu.matmul %218, %219, %cst_164 {dimension_numbers = #tpu.dot_dimension_numbers<[1], [1], [0], [0], [0, 0, 1, 0], [], []>} : vector<64x32xbf16>, vector<64x32xbf16>, vector<64x64xf32> -> vector<64x64xf32>
    %c0_165 = arith.constant 0 : index
    %c0_166 = arith.constant 0 : index
    %c0_167 = arith.constant 0 : index
    %c0_168 = arith.constant 0 : index
    %221 = vector.load %arg8[%c0_165, %c0_166, %c0_167, %c0_168] : memref<1x4x64x64xf32, #tpu.memory_space<vmem>>, vector<1x1x64x64xf32>
    %222 = vector.shape_cast %221 : vector<1x1x64x64xf32> to vector<64x64xf32>
    %223 = arith.addf %220, %222 : vector<64x64xf32>
    %cst_169 = arith.constant dense<0xFF800000> : vector<64xf32>
    %224 = vector.multi_reduction <maximumf>, %223, %cst_169 [1] : vector<64x64xf32> to vector<64xf32>
    %225 = vector.shape_cast %224 : vector<64xf32> to vector<64x1xf32>
    %226 = vector.broadcast %225 : vector<64x1xf32> to vector<64x64xf32>
    %227 = arith.subf %223, %226 : vector<64x64xf32>
    %228 = math.exp %227 : vector<64x64xf32>
    %cst_170 = arith.constant dense<0.000000e+00> : vector<64xf32>
    %229 = vector.multi_reduction <add>, %228, %cst_170 [1] : vector<64x64xf32> to vector<64xf32>
    %230 = vector.shape_cast %229 : vector<64xf32> to vector<64x1xf32>
    %231 = vector.broadcast %230 : vector<64x1xf32> to vector<64x64xf32>
    %232 = arith.divf %228, %231 : vector<64x64xf32>
    %233 = arith.truncf %232 : vector<64x64xf32> to vector<64x64xbf16>
    %234 = arith.truncf %215 : vector<64x32xf32> to vector<64x32xbf16>
    %cst_171 = arith.constant dense<0.000000e+00> : vector<64x32xf32>
    %235 = tpu.matmul %233, %234, %cst_171 {dimension_numbers = #tpu.dot_dimension_numbers<[1], [0], [0], [1], [0, 0, 1, 1], [], []>} : vector<64x64xbf16>, vector<64x32xbf16>, vector<64x32xf32> -> vector<64x32xf32>
    %236 = arith.truncf %235 : vector<64x32xf32> to vector<64x32xbf16>
    %c0_172 = arith.constant 0 : index
    %c0_173 = arith.constant 0 : index
    %c0_174 = arith.constant 0 : index
    %237 = vector.load %arg9[%c0_172, %c0_173, %c0_174] : memref<4x32x128xbf16, #tpu.memory_space<vmem>>, vector<1x32x128xbf16>
    %238 = vector.shape_cast %237 : vector<1x32x128xbf16> to vector<32x128xbf16>
    %cst_175 = arith.constant dense<0.000000e+00> : vector<64x128xf32>
    %239 = tpu.matmul %236, %238, %cst_175 {dimension_numbers = #tpu.dot_dimension_numbers<[1], [0], [0], [1], [0, 0, 1, 1], [], []>} : vector<64x32xbf16>, vector<32x128xbf16>, vector<64x128xf32> -> vector<64x128xf32>
    %c1_176 = arith.constant 1 : index
    %c0_177 = arith.constant 0 : index
    %c0_178 = arith.constant 0 : index
    %240 = vector.load %arg2[%c1_176, %c0_177, %c0_178] : memref<4x128x32xbf16, #tpu.memory_space<vmem>>, vector<1x128x32xbf16>
    %241 = vector.shape_cast %240 : vector<1x128x32xbf16> to vector<128x32xbf16>
    %cst_179 = arith.constant dense<0.000000e+00> : vector<64x32xf32>
    %242 = tpu.matmul %194, %241, %cst_179 {dimension_numbers = #tpu.dot_dimension_numbers<[1], [0], [0], [1], [0, 0, 1, 1], [], []>} : vector<64x128xbf16>, vector<128x32xbf16>, vector<64x32xf32> -> vector<64x32xf32>
    %c1_180 = arith.constant 1 : index
    %c0_181 = arith.constant 0 : index
    %c0_182 = arith.constant 0 : index
    %243 = vector.load %arg3[%c1_180, %c0_181, %c0_182] : memref<4x1x32xf32, #tpu.memory_space<vmem>>, vector<1x1x32xf32>
    %244 = vector.shape_cast %243 : vector<1x1x32xf32> to vector<1x32xf32>
    %245 = vector.broadcast %244 : vector<1x32xf32> to vector<64x32xf32>
    %246 = arith.addf %242, %245 : vector<64x32xf32>
    %c1_183 = arith.constant 1 : index
    %c0_184 = arith.constant 0 : index
    %c0_185 = arith.constant 0 : index
    %247 = vector.load %arg4[%c1_183, %c0_184, %c0_185] : memref<4x128x32xbf16, #tpu.memory_space<vmem>>, vector<1x128x32xbf16>
    %248 = vector.shape_cast %247 : vector<1x128x32xbf16> to vector<128x32xbf16>
    %cst_186 = arith.constant dense<0.000000e+00> : vector<64x32xf32>
    %249 = tpu.matmul %194, %248, %cst_186 {dimension_numbers = #tpu.dot_dimension_numbers<[1], [0], [0], [1], [0, 0, 1, 1], [], []>} : vector<64x128xbf16>, vector<128x32xbf16>, vector<64x32xf32> -> vector<64x32xf32>
    %c1_187 = arith.constant 1 : index
    %c0_188 = arith.constant 0 : index
    %c0_189 = arith.constant 0 : index
    %250 = vector.load %arg5[%c1_187, %c0_188, %c0_189] : memref<4x1x32xf32, #tpu.memory_space<vmem>>, vector<1x1x32xf32>
    %251 = vector.shape_cast %250 : vector<1x1x32xf32> to vector<1x32xf32>
    %252 = vector.broadcast %251 : vector<1x32xf32> to vector<64x32xf32>
    %253 = arith.addf %249, %252 : vector<64x32xf32>
    %c1_190 = arith.constant 1 : index
    %c0_191 = arith.constant 0 : index
    %c0_192 = arith.constant 0 : index
    %254 = vector.load %arg6[%c1_190, %c0_191, %c0_192] : memref<4x128x32xbf16, #tpu.memory_space<vmem>>, vector<1x128x32xbf16>
    %255 = vector.shape_cast %254 : vector<1x128x32xbf16> to vector<128x32xbf16>
    %cst_193 = arith.constant dense<0.000000e+00> : vector<64x32xf32>
    %256 = tpu.matmul %194, %255, %cst_193 {dimension_numbers = #tpu.dot_dimension_numbers<[1], [0], [0], [1], [0, 0, 1, 1], [], []>} : vector<64x128xbf16>, vector<128x32xbf16>, vector<64x32xf32> -> vector<64x32xf32>
    %c1_194 = arith.constant 1 : index
    %c0_195 = arith.constant 0 : index
    %c0_196 = arith.constant 0 : index
    %257 = vector.load %arg7[%c1_194, %c0_195, %c0_196] : memref<4x1x32xf32, #tpu.memory_space<vmem>>, vector<1x1x32xf32>
    %258 = vector.shape_cast %257 : vector<1x1x32xf32> to vector<1x32xf32>
    %259 = vector.broadcast %258 : vector<1x32xf32> to vector<64x32xf32>
    %260 = arith.addf %256, %259 : vector<64x32xf32>
    %cst_197 = arith.constant 0.176776692 : f32
    %261 = vector.broadcast %cst_197 : f32 to vector<64x32xf32>
    %262 = arith.mulf %246, %261 : vector<64x32xf32>
    %263 = arith.truncf %262 : vector<64x32xf32> to vector<64x32xbf16>
    %264 = arith.truncf %253 : vector<64x32xf32> to vector<64x32xbf16>
    %cst_198 = arith.constant dense<0.000000e+00> : vector<64x64xf32>
    %265 = tpu.matmul %263, %264, %cst_198 {dimension_numbers = #tpu.dot_dimension_numbers<[1], [1], [0], [0], [0, 0, 1, 0], [], []>} : vector<64x32xbf16>, vector<64x32xbf16>, vector<64x64xf32> -> vector<64x64xf32>
    %c0_199 = arith.constant 0 : index
    %c1_200 = arith.constant 1 : index
    %c0_201 = arith.constant 0 : index
    %c0_202 = arith.constant 0 : index
    %266 = vector.load %arg8[%c0_199, %c1_200, %c0_201, %c0_202] : memref<1x4x64x64xf32, #tpu.memory_space<vmem>>, vector<1x1x64x64xf32>
    %267 = vector.shape_cast %266 : vector<1x1x64x64xf32> to vector<64x64xf32>
    %268 = arith.addf %265, %267 : vector<64x64xf32>
    %cst_203 = arith.constant dense<0xFF800000> : vector<64xf32>
    %269 = vector.multi_reduction <maximumf>, %268, %cst_203 [1] : vector<64x64xf32> to vector<64xf32>
    %270 = vector.shape_cast %269 : vector<64xf32> to vector<64x1xf32>
    %271 = vector.broadcast %270 : vector<64x1xf32> to vector<64x64xf32>
    %272 = arith.subf %268, %271 : vector<64x64xf32>
    %273 = math.exp %272 : vector<64x64xf32>
    %cst_204 = arith.constant dense<0.000000e+00> : vector<64xf32>
    %274 = vector.multi_reduction <add>, %273, %cst_204 [1] : vector<64x64xf32> to vector<64xf32>
    %275 = vector.shape_cast %274 : vector<64xf32> to vector<64x1xf32>
    %276 = vector.broadcast %275 : vector<64x1xf32> to vector<64x64xf32>
    %277 = arith.divf %273, %276 : vector<64x64xf32>
    %278 = arith.truncf %277 : vector<64x64xf32> to vector<64x64xbf16>
    %279 = arith.truncf %260 : vector<64x32xf32> to vector<64x32xbf16>
    %cst_205 = arith.constant dense<0.000000e+00> : vector<64x32xf32>
    %280 = tpu.matmul %278, %279, %cst_205 {dimension_numbers = #tpu.dot_dimension_numbers<[1], [0], [0], [1], [0, 0, 1, 1], [], []>} : vector<64x64xbf16>, vector<64x32xbf16>, vector<64x32xf32> -> vector<64x32xf32>
    %281 = arith.truncf %280 : vector<64x32xf32> to vector<64x32xbf16>
    %c1_206 = arith.constant 1 : index
    %c0_207 = arith.constant 0 : index
    %c0_208 = arith.constant 0 : index
    %282 = vector.load %arg9[%c1_206, %c0_207, %c0_208] : memref<4x32x128xbf16, #tpu.memory_space<vmem>>, vector<1x32x128xbf16>
    %283 = vector.shape_cast %282 : vector<1x32x128xbf16> to vector<32x128xbf16>
    %cst_209 = arith.constant dense<0.000000e+00> : vector<64x128xf32>
    %284 = tpu.matmul %281, %283, %cst_209 {dimension_numbers = #tpu.dot_dimension_numbers<[1], [0], [0], [1], [0, 0, 1, 1], [], []>} : vector<64x32xbf16>, vector<32x128xbf16>, vector<64x128xf32> -> vector<64x128xf32>
    %285 = arith.addf %239, %284 : vector<64x128xf32>
    %c2_210 = arith.constant 2 : index
    %c0_211 = arith.constant 0 : index
    %c0_212 = arith.constant 0 : index
    %286 = vector.load %arg2[%c2_210, %c0_211, %c0_212] : memref<4x128x32xbf16, #tpu.memory_space<vmem>>, vector<1x128x32xbf16>
    %287 = vector.shape_cast %286 : vector<1x128x32xbf16> to vector<128x32xbf16>
    %cst_213 = arith.constant dense<0.000000e+00> : vector<64x32xf32>
    %288 = tpu.matmul %194, %287, %cst_213 {dimension_numbers = #tpu.dot_dimension_numbers<[1], [0], [0], [1], [0, 0, 1, 1], [], []>} : vector<64x128xbf16>, vector<128x32xbf16>, vector<64x32xf32> -> vector<64x32xf32>
    %c2_214 = arith.constant 2 : index
    %c0_215 = arith.constant 0 : index
    %c0_216 = arith.constant 0 : index
    %289 = vector.load %arg3[%c2_214, %c0_215, %c0_216] : memref<4x1x32xf32, #tpu.memory_space<vmem>>, vector<1x1x32xf32>
    %290 = vector.shape_cast %289 : vector<1x1x32xf32> to vector<1x32xf32>
    %291 = vector.broadcast %290 : vector<1x32xf32> to vector<64x32xf32>
    %292 = arith.addf %288, %291 : vector<64x32xf32>
    %c2_217 = arith.constant 2 : index
    %c0_218 = arith.constant 0 : index
    %c0_219 = arith.constant 0 : index
    %293 = vector.load %arg4[%c2_217, %c0_218, %c0_219] : memref<4x128x32xbf16, #tpu.memory_space<vmem>>, vector<1x128x32xbf16>
    %294 = vector.shape_cast %293 : vector<1x128x32xbf16> to vector<128x32xbf16>
    %cst_220 = arith.constant dense<0.000000e+00> : vector<64x32xf32>
    %295 = tpu.matmul %194, %294, %cst_220 {dimension_numbers = #tpu.dot_dimension_numbers<[1], [0], [0], [1], [0, 0, 1, 1], [], []>} : vector<64x128xbf16>, vector<128x32xbf16>, vector<64x32xf32> -> vector<64x32xf32>
    %c2_221 = arith.constant 2 : index
    %c0_222 = arith.constant 0 : index
    %c0_223 = arith.constant 0 : index
    %296 = vector.load %arg5[%c2_221, %c0_222, %c0_223] : memref<4x1x32xf32, #tpu.memory_space<vmem>>, vector<1x1x32xf32>
    %297 = vector.shape_cast %296 : vector<1x1x32xf32> to vector<1x32xf32>
    %298 = vector.broadcast %297 : vector<1x32xf32> to vector<64x32xf32>
    %299 = arith.addf %295, %298 : vector<64x32xf32>
    %c2_224 = arith.constant 2 : index
    %c0_225 = arith.constant 0 : index
    %c0_226 = arith.constant 0 : index
    %300 = vector.load %arg6[%c2_224, %c0_225, %c0_226] : memref<4x128x32xbf16, #tpu.memory_space<vmem>>, vector<1x128x32xbf16>
    %301 = vector.shape_cast %300 : vector<1x128x32xbf16> to vector<128x32xbf16>
    %cst_227 = arith.constant dense<0.000000e+00> : vector<64x32xf32>
    %302 = tpu.matmul %194, %301, %cst_227 {dimension_numbers = #tpu.dot_dimension_numbers<[1], [0], [0], [1], [0, 0, 1, 1], [], []>} : vector<64x128xbf16>, vector<128x32xbf16>, vector<64x32xf32> -> vector<64x32xf32>
    %c2_228 = arith.constant 2 : index
    %c0_229 = arith.constant 0 : index
    %c0_230 = arith.constant 0 : index
    %303 = vector.load %arg7[%c2_228, %c0_229, %c0_230] : memref<4x1x32xf32, #tpu.memory_space<vmem>>, vector<1x1x32xf32>
    %304 = vector.shape_cast %303 : vector<1x1x32xf32> to vector<1x32xf32>
    %305 = vector.broadcast %304 : vector<1x32xf32> to vector<64x32xf32>
    %306 = arith.addf %302, %305 : vector<64x32xf32>
    %cst_231 = arith.constant 0.176776692 : f32
    %307 = vector.broadcast %cst_231 : f32 to vector<64x32xf32>
    %308 = arith.mulf %292, %307 : vector<64x32xf32>
    %309 = arith.truncf %308 : vector<64x32xf32> to vector<64x32xbf16>
    %310 = arith.truncf %299 : vector<64x32xf32> to vector<64x32xbf16>
    %cst_232 = arith.constant dense<0.000000e+00> : vector<64x64xf32>
    %311 = tpu.matmul %309, %310, %cst_232 {dimension_numbers = #tpu.dot_dimension_numbers<[1], [1], [0], [0], [0, 0, 1, 0], [], []>} : vector<64x32xbf16>, vector<64x32xbf16>, vector<64x64xf32> -> vector<64x64xf32>
    %c0_233 = arith.constant 0 : index
    %c2_234 = arith.constant 2 : index
    %c0_235 = arith.constant 0 : index
    %c0_236 = arith.constant 0 : index
    %312 = vector.load %arg8[%c0_233, %c2_234, %c0_235, %c0_236] : memref<1x4x64x64xf32, #tpu.memory_space<vmem>>, vector<1x1x64x64xf32>
    %313 = vector.shape_cast %312 : vector<1x1x64x64xf32> to vector<64x64xf32>
    %314 = arith.addf %311, %313 : vector<64x64xf32>
    %cst_237 = arith.constant dense<0xFF800000> : vector<64xf32>
    %315 = vector.multi_reduction <maximumf>, %314, %cst_237 [1] : vector<64x64xf32> to vector<64xf32>
    %316 = vector.shape_cast %315 : vector<64xf32> to vector<64x1xf32>
    %317 = vector.broadcast %316 : vector<64x1xf32> to vector<64x64xf32>
    %318 = arith.subf %314, %317 : vector<64x64xf32>
    %319 = math.exp %318 : vector<64x64xf32>
    %cst_238 = arith.constant dense<0.000000e+00> : vector<64xf32>
    %320 = vector.multi_reduction <add>, %319, %cst_238 [1] : vector<64x64xf32> to vector<64xf32>
    %321 = vector.shape_cast %320 : vector<64xf32> to vector<64x1xf32>
    %322 = vector.broadcast %321 : vector<64x1xf32> to vector<64x64xf32>
    %323 = arith.divf %319, %322 : vector<64x64xf32>
    %324 = arith.truncf %323 : vector<64x64xf32> to vector<64x64xbf16>
    %325 = arith.truncf %306 : vector<64x32xf32> to vector<64x32xbf16>
    %cst_239 = arith.constant dense<0.000000e+00> : vector<64x32xf32>
    %326 = tpu.matmul %324, %325, %cst_239 {dimension_numbers = #tpu.dot_dimension_numbers<[1], [0], [0], [1], [0, 0, 1, 1], [], []>} : vector<64x64xbf16>, vector<64x32xbf16>, vector<64x32xf32> -> vector<64x32xf32>
    %327 = arith.truncf %326 : vector<64x32xf32> to vector<64x32xbf16>
    %c2_240 = arith.constant 2 : index
    %c0_241 = arith.constant 0 : index
    %c0_242 = arith.constant 0 : index
    %328 = vector.load %arg9[%c2_240, %c0_241, %c0_242] : memref<4x32x128xbf16, #tpu.memory_space<vmem>>, vector<1x32x128xbf16>
    %329 = vector.shape_cast %328 : vector<1x32x128xbf16> to vector<32x128xbf16>
    %cst_243 = arith.constant dense<0.000000e+00> : vector<64x128xf32>
    %330 = tpu.matmul %327, %329, %cst_243 {dimension_numbers = #tpu.dot_dimension_numbers<[1], [0], [0], [1], [0, 0, 1, 1], [], []>} : vector<64x32xbf16>, vector<32x128xbf16>, vector<64x128xf32> -> vector<64x128xf32>
    %331 = arith.addf %285, %330 : vector<64x128xf32>
    %c3_244 = arith.constant 3 : index
    %c0_245 = arith.constant 0 : index
    %c0_246 = arith.constant 0 : index
    %332 = vector.load %arg2[%c3_244, %c0_245, %c0_246] : memref<4x128x32xbf16, #tpu.memory_space<vmem>>, vector<1x128x32xbf16>
    %333 = vector.shape_cast %332 : vector<1x128x32xbf16> to vector<128x32xbf16>
    %cst_247 = arith.constant dense<0.000000e+00> : vector<64x32xf32>
    %334 = tpu.matmul %194, %333, %cst_247 {dimension_numbers = #tpu.dot_dimension_numbers<[1], [0], [0], [1], [0, 0, 1, 1], [], []>} : vector<64x128xbf16>, vector<128x32xbf16>, vector<64x32xf32> -> vector<64x32xf32>
    %c3_248 = arith.constant 3 : index
    %c0_249 = arith.constant 0 : index
    %c0_250 = arith.constant 0 : index
    %335 = vector.load %arg3[%c3_248, %c0_249, %c0_250] : memref<4x1x32xf32, #tpu.memory_space<vmem>>, vector<1x1x32xf32>
    %336 = vector.shape_cast %335 : vector<1x1x32xf32> to vector<1x32xf32>
    %337 = vector.broadcast %336 : vector<1x32xf32> to vector<64x32xf32>
    %338 = arith.addf %334, %337 : vector<64x32xf32>
    %c3_251 = arith.constant 3 : index
    %c0_252 = arith.constant 0 : index
    %c0_253 = arith.constant 0 : index
    %339 = vector.load %arg4[%c3_251, %c0_252, %c0_253] : memref<4x128x32xbf16, #tpu.memory_space<vmem>>, vector<1x128x32xbf16>
    %340 = vector.shape_cast %339 : vector<1x128x32xbf16> to vector<128x32xbf16>
    %cst_254 = arith.constant dense<0.000000e+00> : vector<64x32xf32>
    %341 = tpu.matmul %194, %340, %cst_254 {dimension_numbers = #tpu.dot_dimension_numbers<[1], [0], [0], [1], [0, 0, 1, 1], [], []>} : vector<64x128xbf16>, vector<128x32xbf16>, vector<64x32xf32> -> vector<64x32xf32>
    %c3_255 = arith.constant 3 : index
    %c0_256 = arith.constant 0 : index
    %c0_257 = arith.constant 0 : index
    %342 = vector.load %arg5[%c3_255, %c0_256, %c0_257] : memref<4x1x32xf32, #tpu.memory_space<vmem>>, vector<1x1x32xf32>
    %343 = vector.shape_cast %342 : vector<1x1x32xf32> to vector<1x32xf32>
    %344 = vector.broadcast %343 : vector<1x32xf32> to vector<64x32xf32>
    %345 = arith.addf %341, %344 : vector<64x32xf32>
    %c3_258 = arith.constant 3 : index
    %c0_259 = arith.constant 0 : index
    %c0_260 = arith.constant 0 : index
    %346 = vector.load %arg6[%c3_258, %c0_259, %c0_260] : memref<4x128x32xbf16, #tpu.memory_space<vmem>>, vector<1x128x32xbf16>
    %347 = vector.shape_cast %346 : vector<1x128x32xbf16> to vector<128x32xbf16>
    %cst_261 = arith.constant dense<0.000000e+00> : vector<64x32xf32>
    %348 = tpu.matmul %194, %347, %cst_261 {dimension_numbers = #tpu.dot_dimension_numbers<[1], [0], [0], [1], [0, 0, 1, 1], [], []>} : vector<64x128xbf16>, vector<128x32xbf16>, vector<64x32xf32> -> vector<64x32xf32>
    %c3_262 = arith.constant 3 : index
    %c0_263 = arith.constant 0 : index
    %c0_264 = arith.constant 0 : index
    %349 = vector.load %arg7[%c3_262, %c0_263, %c0_264] : memref<4x1x32xf32, #tpu.memory_space<vmem>>, vector<1x1x32xf32>
    %350 = vector.shape_cast %349 : vector<1x1x32xf32> to vector<1x32xf32>
    %351 = vector.broadcast %350 : vector<1x32xf32> to vector<64x32xf32>
    %352 = arith.addf %348, %351 : vector<64x32xf32>
    %cst_265 = arith.constant 0.176776692 : f32
    %353 = vector.broadcast %cst_265 : f32 to vector<64x32xf32>
    %354 = arith.mulf %338, %353 : vector<64x32xf32>
    %355 = arith.truncf %354 : vector<64x32xf32> to vector<64x32xbf16>
    %356 = arith.truncf %345 : vector<64x32xf32> to vector<64x32xbf16>
    %cst_266 = arith.constant dense<0.000000e+00> : vector<64x64xf32>
    %357 = tpu.matmul %355, %356, %cst_266 {dimension_numbers = #tpu.dot_dimension_numbers<[1], [1], [0], [0], [0, 0, 1, 0], [], []>} : vector<64x32xbf16>, vector<64x32xbf16>, vector<64x64xf32> -> vector<64x64xf32>
    %c0_267 = arith.constant 0 : index
    %c3_268 = arith.constant 3 : index
    %c0_269 = arith.constant 0 : index
    %c0_270 = arith.constant 0 : index
    %358 = vector.load %arg8[%c0_267, %c3_268, %c0_269, %c0_270] : memref<1x4x64x64xf32, #tpu.memory_space<vmem>>, vector<1x1x64x64xf32>
    %359 = vector.shape_cast %358 : vector<1x1x64x64xf32> to vector<64x64xf32>
    %360 = arith.addf %357, %359 : vector<64x64xf32>
    %cst_271 = arith.constant dense<0xFF800000> : vector<64xf32>
    %361 = vector.multi_reduction <maximumf>, %360, %cst_271 [1] : vector<64x64xf32> to vector<64xf32>
    %362 = vector.shape_cast %361 : vector<64xf32> to vector<64x1xf32>
    %363 = vector.broadcast %362 : vector<64x1xf32> to vector<64x64xf32>
    %364 = arith.subf %360, %363 : vector<64x64xf32>
    %365 = math.exp %364 : vector<64x64xf32>
    %cst_272 = arith.constant dense<0.000000e+00> : vector<64xf32>
    %366 = vector.multi_reduction <add>, %365, %cst_272 [1] : vector<64x64xf32> to vector<64xf32>
    %367 = vector.shape_cast %366 : vector<64xf32> to vector<64x1xf32>
    %368 = vector.broadcast %367 : vector<64x1xf32> to vector<64x64xf32>
    %369 = arith.divf %365, %368 : vector<64x64xf32>
    %370 = arith.truncf %369 : vector<64x64xf32> to vector<64x64xbf16>
    %371 = arith.truncf %352 : vector<64x32xf32> to vector<64x32xbf16>
    %cst_273 = arith.constant dense<0.000000e+00> : vector<64x32xf32>
    %372 = tpu.matmul %370, %371, %cst_273 {dimension_numbers = #tpu.dot_dimension_numbers<[1], [0], [0], [1], [0, 0, 1, 1], [], []>} : vector<64x64xbf16>, vector<64x32xbf16>, vector<64x32xf32> -> vector<64x32xf32>
    %373 = arith.truncf %372 : vector<64x32xf32> to vector<64x32xbf16>
    %c3_274 = arith.constant 3 : index
    %c0_275 = arith.constant 0 : index
    %c0_276 = arith.constant 0 : index
    %374 = vector.load %arg9[%c3_274, %c0_275, %c0_276] : memref<4x32x128xbf16, #tpu.memory_space<vmem>>, vector<1x32x128xbf16>
    %375 = vector.shape_cast %374 : vector<1x32x128xbf16> to vector<32x128xbf16>
    %cst_277 = arith.constant dense<0.000000e+00> : vector<64x128xf32>
    %376 = tpu.matmul %373, %375, %cst_277 {dimension_numbers = #tpu.dot_dimension_numbers<[1], [0], [0], [1], [0, 0, 1, 1], [], []>} : vector<64x32xbf16>, vector<32x128xbf16>, vector<64x128xf32> -> vector<64x128xf32>
    %377 = arith.addf %331, %376 : vector<64x128xf32>
    %378 = vector.broadcast %0 : vector<1x128xf32> to vector<64x128xf32>
    %379 = arith.addf %377, %378 : vector<64x128xf32>
    %c1_278 = arith.constant 1 : index
    %c0_279 = arith.constant 0 : index
    %c0_280 = arith.constant 0 : index
    %380 = vector.load %arg11[%c1_278, %c0_279, %c0_280] : memref<4x64x128xf32, #tpu.memory_space<vmem>>, vector<1x64x128xf32>
    %381 = vector.shape_cast %380 : vector<1x64x128xf32> to vector<64x128xf32>
    %382 = vector.shape_cast %379 : vector<64x128xf32> to vector<1x64x128xf32>
    tpu.vector_store %arg11[%c1_278, %c0_279, %c0_280], %382 {strides = array<i32>} : memref<4x64x128xf32, #tpu.memory_space<vmem>>, vector<1x64x128xf32>,
    %c2_281 = arith.constant 2 : index
    %c0_282 = arith.constant 0 : index
    %c0_283 = arith.constant 0 : index
    %383 = vector.load %arg1[%c2_281, %c0_282, %c0_283] : memref<4x64x128xf32, #tpu.memory_space<vmem>>, vector<1x64x128xf32>
    %384 = vector.shape_cast %383 : vector<1x64x128xf32> to vector<64x128xf32>
    %385 = arith.truncf %384 : vector<64x128xf32> to vector<64x128xbf16>
    %c0_284 = arith.constant 0 : index
    %c0_285 = arith.constant 0 : index
    %c0_286 = arith.constant 0 : index
    %386 = vector.load %arg2[%c0_284, %c0_285, %c0_286] : memref<4x128x32xbf16, #tpu.memory_space<vmem>>, vector<1x128x32xbf16>
    %387 = vector.shape_cast %386 : vector<1x128x32xbf16> to vector<128x32xbf16>
    %cst_287 = arith.constant dense<0.000000e+00> : vector<64x32xf32>
    %388 = tpu.matmul %385, %387, %cst_287 {dimension_numbers = #tpu.dot_dimension_numbers<[1], [0], [0], [1], [0, 0, 1, 1], [], []>} : vector<64x128xbf16>, vector<128x32xbf16>, vector<64x32xf32> -> vector<64x32xf32>
    %c0_288 = arith.constant 0 : index
    %c0_289 = arith.constant 0 : index
    %c0_290 = arith.constant 0 : index
    %389 = vector.load %arg3[%c0_288, %c0_289, %c0_290] : memref<4x1x32xf32, #tpu.memory_space<vmem>>, vector<1x1x32xf32>
    %390 = vector.shape_cast %389 : vector<1x1x32xf32> to vector<1x32xf32>
    %391 = vector.broadcast %390 : vector<1x32xf32> to vector<64x32xf32>
    %392 = arith.addf %388, %391 : vector<64x32xf32>
    %c0_291 = arith.constant 0 : index
    %c0_292 = arith.constant 0 : index
    %c0_293 = arith.constant 0 : index
    %393 = vector.load %arg4[%c0_291, %c0_292, %c0_293] : memref<4x128x32xbf16, #tpu.memory_space<vmem>>, vector<1x128x32xbf16>
    %394 = vector.shape_cast %393 : vector<1x128x32xbf16> to vector<128x32xbf16>
    %cst_294 = arith.constant dense<0.000000e+00> : vector<64x32xf32>
    %395 = tpu.matmul %385, %394, %cst_294 {dimension_numbers = #tpu.dot_dimension_numbers<[1], [0], [0], [1], [0, 0, 1, 1], [], []>} : vector<64x128xbf16>, vector<128x32xbf16>, vector<64x32xf32> -> vector<64x32xf32>
    %c0_295 = arith.constant 0 : index
    %c0_296 = arith.constant 0 : index
    %c0_297 = arith.constant 0 : index
    %396 = vector.load %arg5[%c0_295, %c0_296, %c0_297] : memref<4x1x32xf32, #tpu.memory_space<vmem>>, vector<1x1x32xf32>
    %397 = vector.shape_cast %396 : vector<1x1x32xf32> to vector<1x32xf32>
    %398 = vector.broadcast %397 : vector<1x32xf32> to vector<64x32xf32>
    %399 = arith.addf %395, %398 : vector<64x32xf32>
    %c0_298 = arith.constant 0 : index
    %c0_299 = arith.constant 0 : index
    %c0_300 = arith.constant 0 : index
    %400 = vector.load %arg6[%c0_298, %c0_299, %c0_300] : memref<4x128x32xbf16, #tpu.memory_space<vmem>>, vector<1x128x32xbf16>
    %401 = vector.shape_cast %400 : vector<1x128x32xbf16> to vector<128x32xbf16>
    %cst_301 = arith.constant dense<0.000000e+00> : vector<64x32xf32>
    %402 = tpu.matmul %385, %401, %cst_301 {dimension_numbers = #tpu.dot_dimension_numbers<[1], [0], [0], [1], [0, 0, 1, 1], [], []>} : vector<64x128xbf16>, vector<128x32xbf16>, vector<64x32xf32> -> vector<64x32xf32>
    %c0_302 = arith.constant 0 : index
    %c0_303 = arith.constant 0 : index
    %c0_304 = arith.constant 0 : index
    %403 = vector.load %arg7[%c0_302, %c0_303, %c0_304] : memref<4x1x32xf32, #tpu.memory_space<vmem>>, vector<1x1x32xf32>
    %404 = vector.shape_cast %403 : vector<1x1x32xf32> to vector<1x32xf32>
    %405 = vector.broadcast %404 : vector<1x32xf32> to vector<64x32xf32>
    %406 = arith.addf %402, %405 : vector<64x32xf32>
    %cst_305 = arith.constant 0.176776692 : f32
    %407 = vector.broadcast %cst_305 : f32 to vector<64x32xf32>
    %408 = arith.mulf %392, %407 : vector<64x32xf32>
    %409 = arith.truncf %408 : vector<64x32xf32> to vector<64x32xbf16>
    %410 = arith.truncf %399 : vector<64x32xf32> to vector<64x32xbf16>
    %cst_306 = arith.constant dense<0.000000e+00> : vector<64x64xf32>
    %411 = tpu.matmul %409, %410, %cst_306 {dimension_numbers = #tpu.dot_dimension_numbers<[1], [1], [0], [0], [0, 0, 1, 0], [], []>} : vector<64x32xbf16>, vector<64x32xbf16>, vector<64x64xf32> -> vector<64x64xf32>
    %c0_307 = arith.constant 0 : index
    %c0_308 = arith.constant 0 : index
    %c0_309 = arith.constant 0 : index
    %c0_310 = arith.constant 0 : index
    %412 = vector.load %arg8[%c0_307, %c0_308, %c0_309, %c0_310] : memref<1x4x64x64xf32, #tpu.memory_space<vmem>>, vector<1x1x64x64xf32>
    %413 = vector.shape_cast %412 : vector<1x1x64x64xf32> to vector<64x64xf32>
    %414 = arith.addf %411, %413 : vector<64x64xf32>
    %cst_311 = arith.constant dense<0xFF800000> : vector<64xf32>
    %415 = vector.multi_reduction <maximumf>, %414, %cst_311 [1] : vector<64x64xf32> to vector<64xf32>
    %416 = vector.shape_cast %415 : vector<64xf32> to vector<64x1xf32>
    %417 = vector.broadcast %416 : vector<64x1xf32> to vector<64x64xf32>
    %418 = arith.subf %414, %417 : vector<64x64xf32>
    %419 = math.exp %418 : vector<64x64xf32>
    %cst_312 = arith.constant dense<0.000000e+00> : vector<64xf32>
    %420 = vector.multi_reduction <add>, %419, %cst_312 [1] : vector<64x64xf32> to vector<64xf32>
    %421 = vector.shape_cast %420 : vector<64xf32> to vector<64x1xf32>
    %422 = vector.broadcast %421 : vector<64x1xf32> to vector<64x64xf32>
    %423 = arith.divf %419, %422 : vector<64x64xf32>
    %424 = arith.truncf %423 : vector<64x64xf32> to vector<64x64xbf16>
    %425 = arith.truncf %406 : vector<64x32xf32> to vector<64x32xbf16>
    %cst_313 = arith.constant dense<0.000000e+00> : vector<64x32xf32>
    %426 = tpu.matmul %424, %425, %cst_313 {dimension_numbers = #tpu.dot_dimension_numbers<[1], [0], [0], [1], [0, 0, 1, 1], [], []>} : vector<64x64xbf16>, vector<64x32xbf16>, vector<64x32xf32> -> vector<64x32xf32>
    %427 = arith.truncf %426 : vector<64x32xf32> to vector<64x32xbf16>
    %c0_314 = arith.constant 0 : index
    %c0_315 = arith.constant 0 : index
    %c0_316 = arith.constant 0 : index
    %428 = vector.load %arg9[%c0_314, %c0_315, %c0_316] : memref<4x32x128xbf16, #tpu.memory_space<vmem>>, vector<1x32x128xbf16>
    %429 = vector.shape_cast %428 : vector<1x32x128xbf16> to vector<32x128xbf16>
    %cst_317 = arith.constant dense<0.000000e+00> : vector<64x128xf32>
    %430 = tpu.matmul %427, %429, %cst_317 {dimension_numbers = #tpu.dot_dimension_numbers<[1], [0], [0], [1], [0, 0, 1, 1], [], []>} : vector<64x32xbf16>, vector<32x128xbf16>, vector<64x128xf32> -> vector<64x128xf32>
    %c1_318 = arith.constant 1 : index
    %c0_319 = arith.constant 0 : index
    %c0_320 = arith.constant 0 : index
    %431 = vector.load %arg2[%c1_318, %c0_319, %c0_320] : memref<4x128x32xbf16, #tpu.memory_space<vmem>>, vector<1x128x32xbf16>
    %432 = vector.shape_cast %431 : vector<1x128x32xbf16> to vector<128x32xbf16>
    %cst_321 = arith.constant dense<0.000000e+00> : vector<64x32xf32>
    %433 = tpu.matmul %385, %432, %cst_321 {dimension_numbers = #tpu.dot_dimension_numbers<[1], [0], [0], [1], [0, 0, 1, 1], [], []>} : vector<64x128xbf16>, vector<128x32xbf16>, vector<64x32xf32> -> vector<64x32xf32>
    %c1_322 = arith.constant 1 : index
    %c0_323 = arith.constant 0 : index
    %c0_324 = arith.constant 0 : index
    %434 = vector.load %arg3[%c1_322, %c0_323, %c0_324] : memref<4x1x32xf32, #tpu.memory_space<vmem>>, vector<1x1x32xf32>
    %435 = vector.shape_cast %434 : vector<1x1x32xf32> to vector<1x32xf32>
    %436 = vector.broadcast %435 : vector<1x32xf32> to vector<64x32xf32>
    %437 = arith.addf %433, %436 : vector<64x32xf32>
    %c1_325 = arith.constant 1 : index
    %c0_326 = arith.constant 0 : index
    %c0_327 = arith.constant 0 : index
    %438 = vector.load %arg4[%c1_325, %c0_326, %c0_327] : memref<4x128x32xbf16, #tpu.memory_space<vmem>>, vector<1x128x32xbf16>
    %439 = vector.shape_cast %438 : vector<1x128x32xbf16> to vector<128x32xbf16>
    %cst_328 = arith.constant dense<0.000000e+00> : vector<64x32xf32>
    %440 = tpu.matmul %385, %439, %cst_328 {dimension_numbers = #tpu.dot_dimension_numbers<[1], [0], [0], [1], [0, 0, 1, 1], [], []>} : vector<64x128xbf16>, vector<128x32xbf16>, vector<64x32xf32> -> vector<64x32xf32>
    %c1_329 = arith.constant 1 : index
    %c0_330 = arith.constant 0 : index
    %c0_331 = arith.constant 0 : index
    %441 = vector.load %arg5[%c1_329, %c0_330, %c0_331] : memref<4x1x32xf32, #tpu.memory_space<vmem>>, vector<1x1x32xf32>
    %442 = vector.shape_cast %441 : vector<1x1x32xf32> to vector<1x32xf32>
    %443 = vector.broadcast %442 : vector<1x32xf32> to vector<64x32xf32>
    %444 = arith.addf %440, %443 : vector<64x32xf32>
    %c1_332 = arith.constant 1 : index
    %c0_333 = arith.constant 0 : index
    %c0_334 = arith.constant 0 : index
    %445 = vector.load %arg6[%c1_332, %c0_333, %c0_334] : memref<4x128x32xbf16, #tpu.memory_space<vmem>>, vector<1x128x32xbf16>
    %446 = vector.shape_cast %445 : vector<1x128x32xbf16> to vector<128x32xbf16>
    %cst_335 = arith.constant dense<0.000000e+00> : vector<64x32xf32>
    %447 = tpu.matmul %385, %446, %cst_335 {dimension_numbers = #tpu.dot_dimension_numbers<[1], [0], [0], [1], [0, 0, 1, 1], [], []>} : vector<64x128xbf16>, vector<128x32xbf16>, vector<64x32xf32> -> vector<64x32xf32>
    %c1_336 = arith.constant 1 : index
    %c0_337 = arith.constant 0 : index
    %c0_338 = arith.constant 0 : index
    %448 = vector.load %arg7[%c1_336, %c0_337, %c0_338] : memref<4x1x32xf32, #tpu.memory_space<vmem>>, vector<1x1x32xf32>
    %449 = vector.shape_cast %448 : vector<1x1x32xf32> to vector<1x32xf32>
    %450 = vector.broadcast %449 : vector<1x32xf32> to vector<64x32xf32>
    %451 = arith.addf %447, %450 : vector<64x32xf32>
    %cst_339 = arith.constant 0.176776692 : f32
    %452 = vector.broadcast %cst_339 : f32 to vector<64x32xf32>
    %453 = arith.mulf %437, %452 : vector<64x32xf32>
    %454 = arith.truncf %453 : vector<64x32xf32> to vector<64x32xbf16>
    %455 = arith.truncf %444 : vector<64x32xf32> to vector<64x32xbf16>
    %cst_340 = arith.constant dense<0.000000e+00> : vector<64x64xf32>
    %456 = tpu.matmul %454, %455, %cst_340 {dimension_numbers = #tpu.dot_dimension_numbers<[1], [1], [0], [0], [0, 0, 1, 0], [], []>} : vector<64x32xbf16>, vector<64x32xbf16>, vector<64x64xf32> -> vector<64x64xf32>
    %c0_341 = arith.constant 0 : index
    %c1_342 = arith.constant 1 : index
    %c0_343 = arith.constant 0 : index
    %c0_344 = arith.constant 0 : index
    %457 = vector.load %arg8[%c0_341, %c1_342, %c0_343, %c0_344] : memref<1x4x64x64xf32, #tpu.memory_space<vmem>>, vector<1x1x64x64xf32>
    %458 = vector.shape_cast %457 : vector<1x1x64x64xf32> to vector<64x64xf32>
    %459 = arith.addf %456, %458 : vector<64x64xf32>
    %cst_345 = arith.constant dense<0xFF800000> : vector<64xf32>
    %460 = vector.multi_reduction <maximumf>, %459, %cst_345 [1] : vector<64x64xf32> to vector<64xf32>
    %461 = vector.shape_cast %460 : vector<64xf32> to vector<64x1xf32>
    %462 = vector.broadcast %461 : vector<64x1xf32> to vector<64x64xf32>
    %463 = arith.subf %459, %462 : vector<64x64xf32>
    %464 = math.exp %463 : vector<64x64xf32>
    %cst_346 = arith.constant dense<0.000000e+00> : vector<64xf32>
    %465 = vector.multi_reduction <add>, %464, %cst_346 [1] : vector<64x64xf32> to vector<64xf32>
    %466 = vector.shape_cast %465 : vector<64xf32> to vector<64x1xf32>
    %467 = vector.broadcast %466 : vector<64x1xf32> to vector<64x64xf32>
    %468 = arith.divf %464, %467 : vector<64x64xf32>
    %469 = arith.truncf %468 : vector<64x64xf32> to vector<64x64xbf16>
    %470 = arith.truncf %451 : vector<64x32xf32> to vector<64x32xbf16>
    %cst_347 = arith.constant dense<0.000000e+00> : vector<64x32xf32>
    %471 = tpu.matmul %469, %470, %cst_347 {dimension_numbers = #tpu.dot_dimension_numbers<[1], [0], [0], [1], [0, 0, 1, 1], [], []>} : vector<64x64xbf16>, vector<64x32xbf16>, vector<64x32xf32> -> vector<64x32xf32>
    %472 = arith.truncf %471 : vector<64x32xf32> to vector<64x32xbf16>
    %c1_348 = arith.constant 1 : index
    %c0_349 = arith.constant 0 : index
    %c0_350 = arith.constant 0 : index
    %473 = vector.load %arg9[%c1_348, %c0_349, %c0_350] : memref<4x32x128xbf16, #tpu.memory_space<vmem>>, vector<1x32x128xbf16>
    %474 = vector.shape_cast %473 : vector<1x32x128xbf16> to vector<32x128xbf16>
    %cst_351 = arith.constant dense<0.000000e+00> : vector<64x128xf32>
    %475 = tpu.matmul %472, %474, %cst_351 {dimension_numbers = #tpu.dot_dimension_numbers<[1], [0], [0], [1], [0, 0, 1, 1], [], []>} : vector<64x32xbf16>, vector<32x128xbf16>, vector<64x128xf32> -> vector<64x128xf32>
    %476 = arith.addf %430, %475 : vector<64x128xf32>
    %c2_352 = arith.constant 2 : index
    %c0_353 = arith.constant 0 : index
    %c0_354 = arith.constant 0 : index
    %477 = vector.load %arg2[%c2_352, %c0_353, %c0_354] : memref<4x128x32xbf16, #tpu.memory_space<vmem>>, vector<1x128x32xbf16>
    %478 = vector.shape_cast %477 : vector<1x128x32xbf16> to vector<128x32xbf16>
    %cst_355 = arith.constant dense<0.000000e+00> : vector<64x32xf32>
    %479 = tpu.matmul %385, %478, %cst_355 {dimension_numbers = #tpu.dot_dimension_numbers<[1], [0], [0], [1], [0, 0, 1, 1], [], []>} : vector<64x128xbf16>, vector<128x32xbf16>, vector<64x32xf32> -> vector<64x32xf32>
    %c2_356 = arith.constant 2 : index
    %c0_357 = arith.constant 0 : index
    %c0_358 = arith.constant 0 : index
    %480 = vector.load %arg3[%c2_356, %c0_357, %c0_358] : memref<4x1x32xf32, #tpu.memory_space<vmem>>, vector<1x1x32xf32>
    %481 = vector.shape_cast %480 : vector<1x1x32xf32> to vector<1x32xf32>
    %482 = vector.broadcast %481 : vector<1x32xf32> to vector<64x32xf32>
    %483 = arith.addf %479, %482 : vector<64x32xf32>
    %c2_359 = arith.constant 2 : index
    %c0_360 = arith.constant 0 : index
    %c0_361 = arith.constant 0 : index
    %484 = vector.load %arg4[%c2_359, %c0_360, %c0_361] : memref<4x128x32xbf16, #tpu.memory_space<vmem>>, vector<1x128x32xbf16>
    %485 = vector.shape_cast %484 : vector<1x128x32xbf16> to vector<128x32xbf16>
    %cst_362 = arith.constant dense<0.000000e+00> : vector<64x32xf32>
    %486 = tpu.matmul %385, %485, %cst_362 {dimension_numbers = #tpu.dot_dimension_numbers<[1], [0], [0], [1], [0, 0, 1, 1], [], []>} : vector<64x128xbf16>, vector<128x32xbf16>, vector<64x32xf32> -> vector<64x32xf32>
    %c2_363 = arith.constant 2 : index
    %c0_364 = arith.constant 0 : index
    %c0_365 = arith.constant 0 : index
    %487 = vector.load %arg5[%c2_363, %c0_364, %c0_365] : memref<4x1x32xf32, #tpu.memory_space<vmem>>, vector<1x1x32xf32>
    %488 = vector.shape_cast %487 : vector<1x1x32xf32> to vector<1x32xf32>
    %489 = vector.broadcast %488 : vector<1x32xf32> to vector<64x32xf32>
    %490 = arith.addf %486, %489 : vector<64x32xf32>
    %c2_366 = arith.constant 2 : index
    %c0_367 = arith.constant 0 : index
    %c0_368 = arith.constant 0 : index
    %491 = vector.load %arg6[%c2_366, %c0_367, %c0_368] : memref<4x128x32xbf16, #tpu.memory_space<vmem>>, vector<1x128x32xbf16>
    %492 = vector.shape_cast %491 : vector<1x128x32xbf16> to vector<128x32xbf16>
    %cst_369 = arith.constant dense<0.000000e+00> : vector<64x32xf32>
    %493 = tpu.matmul %385, %492, %cst_369 {dimension_numbers = #tpu.dot_dimension_numbers<[1], [0], [0], [1], [0, 0, 1, 1], [], []>} : vector<64x128xbf16>, vector<128x32xbf16>, vector<64x32xf32> -> vector<64x32xf32>
    %c2_370 = arith.constant 2 : index
    %c0_371 = arith.constant 0 : index
    %c0_372 = arith.constant 0 : index
    %494 = vector.load %arg7[%c2_370, %c0_371, %c0_372] : memref<4x1x32xf32, #tpu.memory_space<vmem>>, vector<1x1x32xf32>
    %495 = vector.shape_cast %494 : vector<1x1x32xf32> to vector<1x32xf32>
    %496 = vector.broadcast %495 : vector<1x32xf32> to vector<64x32xf32>
    %497 = arith.addf %493, %496 : vector<64x32xf32>
    %cst_373 = arith.constant 0.176776692 : f32
    %498 = vector.broadcast %cst_373 : f32 to vector<64x32xf32>
    %499 = arith.mulf %483, %498 : vector<64x32xf32>
    %500 = arith.truncf %499 : vector<64x32xf32> to vector<64x32xbf16>
    %501 = arith.truncf %490 : vector<64x32xf32> to vector<64x32xbf16>
    %cst_374 = arith.constant dense<0.000000e+00> : vector<64x64xf32>
    %502 = tpu.matmul %500, %501, %cst_374 {dimension_numbers = #tpu.dot_dimension_numbers<[1], [1], [0], [0], [0, 0, 1, 0], [], []>} : vector<64x32xbf16>, vector<64x32xbf16>, vector<64x64xf32> -> vector<64x64xf32>
    %c0_375 = arith.constant 0 : index
    %c2_376 = arith.constant 2 : index
    %c0_377 = arith.constant 0 : index
    %c0_378 = arith.constant 0 : index
    %503 = vector.load %arg8[%c0_375, %c2_376, %c0_377, %c0_378] : memref<1x4x64x64xf32, #tpu.memory_space<vmem>>, vector<1x1x64x64xf32>
    %504 = vector.shape_cast %503 : vector<1x1x64x64xf32> to vector<64x64xf32>
    %505 = arith.addf %502, %504 : vector<64x64xf32>
    %cst_379 = arith.constant dense<0xFF800000> : vector<64xf32>
    %506 = vector.multi_reduction <maximumf>, %505, %cst_379 [1] : vector<64x64xf32> to vector<64xf32>
    %507 = vector.shape_cast %506 : vector<64xf32> to vector<64x1xf32>
    %508 = vector.broadcast %507 : vector<64x1xf32> to vector<64x64xf32>
    %509 = arith.subf %505, %508 : vector<64x64xf32>
    %510 = math.exp %509 : vector<64x64xf32>
    %cst_380 = arith.constant dense<0.000000e+00> : vector<64xf32>
    %511 = vector.multi_reduction <add>, %510, %cst_380 [1] : vector<64x64xf32> to vector<64xf32>
    %512 = vector.shape_cast %511 : vector<64xf32> to vector<64x1xf32>
    %513 = vector.broadcast %512 : vector<64x1xf32> to vector<64x64xf32>
    %514 = arith.divf %510, %513 : vector<64x64xf32>
    %515 = arith.truncf %514 : vector<64x64xf32> to vector<64x64xbf16>
    %516 = arith.truncf %497 : vector<64x32xf32> to vector<64x32xbf16>
    %cst_381 = arith.constant dense<0.000000e+00> : vector<64x32xf32>
    %517 = tpu.matmul %515, %516, %cst_381 {dimension_numbers = #tpu.dot_dimension_numbers<[1], [0], [0], [1], [0, 0, 1, 1], [], []>} : vector<64x64xbf16>, vector<64x32xbf16>, vector<64x32xf32> -> vector<64x32xf32>
    %518 = arith.truncf %517 : vector<64x32xf32> to vector<64x32xbf16>
    %c2_382 = arith.constant 2 : index
    %c0_383 = arith.constant 0 : index
    %c0_384 = arith.constant 0 : index
    %519 = vector.load %arg9[%c2_382, %c0_383, %c0_384] : memref<4x32x128xbf16, #tpu.memory_space<vmem>>, vector<1x32x128xbf16>
    %520 = vector.shape_cast %519 : vector<1x32x128xbf16> to vector<32x128xbf16>
    %cst_385 = arith.constant dense<0.000000e+00> : vector<64x128xf32>
    %521 = tpu.matmul %518, %520, %cst_385 {dimension_numbers = #tpu.dot_dimension_numbers<[1], [0], [0], [1], [0, 0, 1, 1], [], []>} : vector<64x32xbf16>, vector<32x128xbf16>, vector<64x128xf32> -> vector<64x128xf32>
    %522 = arith.addf %476, %521 : vector<64x128xf32>
    %c3_386 = arith.constant 3 : index
    %c0_387 = arith.constant 0 : index
    %c0_388 = arith.constant 0 : index
    %523 = vector.load %arg2[%c3_386, %c0_387, %c0_388] : memref<4x128x32xbf16, #tpu.memory_space<vmem>>, vector<1x128x32xbf16>
    %524 = vector.shape_cast %523 : vector<1x128x32xbf16> to vector<128x32xbf16>
    %cst_389 = arith.constant dense<0.000000e+00> : vector<64x32xf32>
    %525 = tpu.matmul %385, %524, %cst_389 {dimension_numbers = #tpu.dot_dimension_numbers<[1], [0], [0], [1], [0, 0, 1, 1], [], []>} : vector<64x128xbf16>, vector<128x32xbf16>, vector<64x32xf32> -> vector<64x32xf32>
    %c3_390 = arith.constant 3 : index
    %c0_391 = arith.constant 0 : index
    %c0_392 = arith.constant 0 : index
    %526 = vector.load %arg3[%c3_390, %c0_391, %c0_392] : memref<4x1x32xf32, #tpu.memory_space<vmem>>, vector<1x1x32xf32>
    %527 = vector.shape_cast %526 : vector<1x1x32xf32> to vector<1x32xf32>
    %528 = vector.broadcast %527 : vector<1x32xf32> to vector<64x32xf32>
    %529 = arith.addf %525, %528 : vector<64x32xf32>
    %c3_393 = arith.constant 3 : index
    %c0_394 = arith.constant 0 : index
    %c0_395 = arith.constant 0 : index
    %530 = vector.load %arg4[%c3_393, %c0_394, %c0_395] : memref<4x128x32xbf16, #tpu.memory_space<vmem>>, vector<1x128x32xbf16>
    %531 = vector.shape_cast %530 : vector<1x128x32xbf16> to vector<128x32xbf16>
    %cst_396 = arith.constant dense<0.000000e+00> : vector<64x32xf32>
    %532 = tpu.matmul %385, %531, %cst_396 {dimension_numbers = #tpu.dot_dimension_numbers<[1], [0], [0], [1], [0, 0, 1, 1], [], []>} : vector<64x128xbf16>, vector<128x32xbf16>, vector<64x32xf32> -> vector<64x32xf32>
    %c3_397 = arith.constant 3 : index
    %c0_398 = arith.constant 0 : index
    %c0_399 = arith.constant 0 : index
    %533 = vector.load %arg5[%c3_397, %c0_398, %c0_399] : memref<4x1x32xf32, #tpu.memory_space<vmem>>, vector<1x1x32xf32>
    %534 = vector.shape_cast %533 : vector<1x1x32xf32> to vector<1x32xf32>
    %535 = vector.broadcast %534 : vector<1x32xf32> to vector<64x32xf32>
    %536 = arith.addf %532, %535 : vector<64x32xf32>
    %c3_400 = arith.constant 3 : index
    %c0_401 = arith.constant 0 : index
    %c0_402 = arith.constant 0 : index
    %537 = vector.load %arg6[%c3_400, %c0_401, %c0_402] : memref<4x128x32xbf16, #tpu.memory_space<vmem>>, vector<1x128x32xbf16>
    %538 = vector.shape_cast %537 : vector<1x128x32xbf16> to vector<128x32xbf16>
    %cst_403 = arith.constant dense<0.000000e+00> : vector<64x32xf32>
    %539 = tpu.matmul %385, %538, %cst_403 {dimension_numbers = #tpu.dot_dimension_numbers<[1], [0], [0], [1], [0, 0, 1, 1], [], []>} : vector<64x128xbf16>, vector<128x32xbf16>, vector<64x32xf32> -> vector<64x32xf32>
    %c3_404 = arith.constant 3 : index
    %c0_405 = arith.constant 0 : index
    %c0_406 = arith.constant 0 : index
    %540 = vector.load %arg7[%c3_404, %c0_405, %c0_406] : memref<4x1x32xf32, #tpu.memory_space<vmem>>, vector<1x1x32xf32>
    %541 = vector.shape_cast %540 : vector<1x1x32xf32> to vector<1x32xf32>
    %542 = vector.broadcast %541 : vector<1x32xf32> to vector<64x32xf32>
    %543 = arith.addf %539, %542 : vector<64x32xf32>
    %cst_407 = arith.constant 0.176776692 : f32
    %544 = vector.broadcast %cst_407 : f32 to vector<64x32xf32>
    %545 = arith.mulf %529, %544 : vector<64x32xf32>
    %546 = arith.truncf %545 : vector<64x32xf32> to vector<64x32xbf16>
    %547 = arith.truncf %536 : vector<64x32xf32> to vector<64x32xbf16>
    %cst_408 = arith.constant dense<0.000000e+00> : vector<64x64xf32>
    %548 = tpu.matmul %546, %547, %cst_408 {dimension_numbers = #tpu.dot_dimension_numbers<[1], [1], [0], [0], [0, 0, 1, 0], [], []>} : vector<64x32xbf16>, vector<64x32xbf16>, vector<64x64xf32> -> vector<64x64xf32>
    %c0_409 = arith.constant 0 : index
    %c3_410 = arith.constant 3 : index
    %c0_411 = arith.constant 0 : index
    %c0_412 = arith.constant 0 : index
    %549 = vector.load %arg8[%c0_409, %c3_410, %c0_411, %c0_412] : memref<1x4x64x64xf32, #tpu.memory_space<vmem>>, vector<1x1x64x64xf32>
    %550 = vector.shape_cast %549 : vector<1x1x64x64xf32> to vector<64x64xf32>
    %551 = arith.addf %548, %550 : vector<64x64xf32>
    %cst_413 = arith.constant dense<0xFF800000> : vector<64xf32>
    %552 = vector.multi_reduction <maximumf>, %551, %cst_413 [1] : vector<64x64xf32> to vector<64xf32>
    %553 = vector.shape_cast %552 : vector<64xf32> to vector<64x1xf32>
    %554 = vector.broadcast %553 : vector<64x1xf32> to vector<64x64xf32>
    %555 = arith.subf %551, %554 : vector<64x64xf32>
    %556 = math.exp %555 : vector<64x64xf32>
    %cst_414 = arith.constant dense<0.000000e+00> : vector<64xf32>
    %557 = vector.multi_reduction <add>, %556, %cst_414 [1] : vector<64x64xf32> to vector<64xf32>
    %558 = vector.shape_cast %557 : vector<64xf32> to vector<64x1xf32>
    %559 = vector.broadcast %558 : vector<64x1xf32> to vector<64x64xf32>
    %560 = arith.divf %556, %559 : vector<64x64xf32>
    %561 = arith.truncf %560 : vector<64x64xf32> to vector<64x64xbf16>
    %562 = arith.truncf %543 : vector<64x32xf32> to vector<64x32xbf16>
    %cst_415 = arith.constant dense<0.000000e+00> : vector<64x32xf32>
    %563 = tpu.matmul %561, %562, %cst_415 {dimension_numbers = #tpu.dot_dimension_numbers<[1], [0], [0], [1], [0, 0, 1, 1], [], []>} : vector<64x64xbf16>, vector<64x32xbf16>, vector<64x32xf32> -> vector<64x32xf32>
    %564 = arith.truncf %563 : vector<64x32xf32> to vector<64x32xbf16>
    %c3_416 = arith.constant 3 : index
    %c0_417 = arith.constant 0 : index
    %c0_418 = arith.constant 0 : index
    %565 = vector.load %arg9[%c3_416, %c0_417, %c0_418] : memref<4x32x128xbf16, #tpu.memory_space<vmem>>, vector<1x32x128xbf16>
    %566 = vector.shape_cast %565 : vector<1x32x128xbf16> to vector<32x128xbf16>
    %cst_419 = arith.constant dense<0.000000e+00> : vector<64x128xf32>
    %567 = tpu.matmul %564, %566, %cst_419 {dimension_numbers = #tpu.dot_dimension_numbers<[1], [0], [0], [1], [0, 0, 1, 1], [], []>} : vector<64x32xbf16>, vector<32x128xbf16>, vector<64x128xf32> -> vector<64x128xf32>
    %568 = arith.addf %522, %567 : vector<64x128xf32>
    %569 = vector.broadcast %0 : vector<1x128xf32> to vector<64x128xf32>
    %570 = arith.addf %568, %569 : vector<64x128xf32>
    %c2_420 = arith.constant 2 : index
    %c0_421 = arith.constant 0 : index
    %c0_422 = arith.constant 0 : index
    %571 = vector.load %arg11[%c2_420, %c0_421, %c0_422] : memref<4x64x128xf32, #tpu.memory_space<vmem>>, vector<1x64x128xf32>
    %572 = vector.shape_cast %571 : vector<1x64x128xf32> to vector<64x128xf32>
    %573 = vector.shape_cast %570 : vector<64x128xf32> to vector<1x64x128xf32>
    tpu.vector_store %arg11[%c2_420, %c0_421, %c0_422], %573 {strides = array<i32>} : memref<4x64x128xf32, #tpu.memory_space<vmem>>, vector<1x64x128xf32>,
    %c3_423 = arith.constant 3 : index
    %c0_424 = arith.constant 0 : index
    %c0_425 = arith.constant 0 : index
    %574 = vector.load %arg1[%c3_423, %c0_424, %c0_425] : memref<4x64x128xf32, #tpu.memory_space<vmem>>, vector<1x64x128xf32>
    %575 = vector.shape_cast %574 : vector<1x64x128xf32> to vector<64x128xf32>
    %576 = arith.truncf %575 : vector<64x128xf32> to vector<64x128xbf16>
    %c0_426 = arith.constant 0 : index
    %c0_427 = arith.constant 0 : index
    %c0_428 = arith.constant 0 : index
    %577 = vector.load %arg2[%c0_426, %c0_427, %c0_428] : memref<4x128x32xbf16, #tpu.memory_space<vmem>>, vector<1x128x32xbf16>
    %578 = vector.shape_cast %577 : vector<1x128x32xbf16> to vector<128x32xbf16>
    %cst_429 = arith.constant dense<0.000000e+00> : vector<64x32xf32>
    %579 = tpu.matmul %576, %578, %cst_429 {dimension_numbers = #tpu.dot_dimension_numbers<[1], [0], [0], [1], [0, 0, 1, 1], [], []>} : vector<64x128xbf16>, vector<128x32xbf16>, vector<64x32xf32> -> vector<64x32xf32>
    %c0_430 = arith.constant 0 : index
    %c0_431 = arith.constant 0 : index
    %c0_432 = arith.constant 0 : index
    %580 = vector.load %arg3[%c0_430, %c0_431, %c0_432] : memref<4x1x32xf32, #tpu.memory_space<vmem>>, vector<1x1x32xf32>
    %581 = vector.shape_cast %580 : vector<1x1x32xf32> to vector<1x32xf32>
    %582 = vector.broadcast %581 : vector<1x32xf32> to vector<64x32xf32>
    %583 = arith.addf %579, %582 : vector<64x32xf32>
    %c0_433 = arith.constant 0 : index
    %c0_434 = arith.constant 0 : index
    %c0_435 = arith.constant 0 : index
    %584 = vector.load %arg4[%c0_433, %c0_434, %c0_435] : memref<4x128x32xbf16, #tpu.memory_space<vmem>>, vector<1x128x32xbf16>
    %585 = vector.shape_cast %584 : vector<1x128x32xbf16> to vector<128x32xbf16>
    %cst_436 = arith.constant dense<0.000000e+00> : vector<64x32xf32>
    %586 = tpu.matmul %576, %585, %cst_436 {dimension_numbers = #tpu.dot_dimension_numbers<[1], [0], [0], [1], [0, 0, 1, 1], [], []>} : vector<64x128xbf16>, vector<128x32xbf16>, vector<64x32xf32> -> vector<64x32xf32>
    %c0_437 = arith.constant 0 : index
    %c0_438 = arith.constant 0 : index
    %c0_439 = arith.constant 0 : index
    %587 = vector.load %arg5[%c0_437, %c0_438, %c0_439] : memref<4x1x32xf32, #tpu.memory_space<vmem>>, vector<1x1x32xf32>
    %588 = vector.shape_cast %587 : vector<1x1x32xf32> to vector<1x32xf32>
    %589 = vector.broadcast %588 : vector<1x32xf32> to vector<64x32xf32>
    %590 = arith.addf %586, %589 : vector<64x32xf32>
    %c0_440 = arith.constant 0 : index
    %c0_441 = arith.constant 0 : index
    %c0_442 = arith.constant 0 : index
    %591 = vector.load %arg6[%c0_440, %c0_441, %c0_442] : memref<4x128x32xbf16, #tpu.memory_space<vmem>>, vector<1x128x32xbf16>
    %592 = vector.shape_cast %591 : vector<1x128x32xbf16> to vector<128x32xbf16>
    %cst_443 = arith.constant dense<0.000000e+00> : vector<64x32xf32>
    %593 = tpu.matmul %576, %592, %cst_443 {dimension_numbers = #tpu.dot_dimension_numbers<[1], [0], [0], [1], [0, 0, 1, 1], [], []>} : vector<64x128xbf16>, vector<128x32xbf16>, vector<64x32xf32> -> vector<64x32xf32>
    %c0_444 = arith.constant 0 : index
    %c0_445 = arith.constant 0 : index
    %c0_446 = arith.constant 0 : index
    %594 = vector.load %arg7[%c0_444, %c0_445, %c0_446] : memref<4x1x32xf32, #tpu.memory_space<vmem>>, vector<1x1x32xf32>
    %595 = vector.shape_cast %594 : vector<1x1x32xf32> to vector<1x32xf32>
    %596 = vector.broadcast %595 : vector<1x32xf32> to vector<64x32xf32>
    %597 = arith.addf %593, %596 : vector<64x32xf32>
    %cst_447 = arith.constant 0.176776692 : f32
    %598 = vector.broadcast %cst_447 : f32 to vector<64x32xf32>
    %599 = arith.mulf %583, %598 : vector<64x32xf32>
    %600 = arith.truncf %599 : vector<64x32xf32> to vector<64x32xbf16>
    %601 = arith.truncf %590 : vector<64x32xf32> to vector<64x32xbf16>
    %cst_448 = arith.constant dense<0.000000e+00> : vector<64x64xf32>
    %602 = tpu.matmul %600, %601, %cst_448 {dimension_numbers = #tpu.dot_dimension_numbers<[1], [1], [0], [0], [0, 0, 1, 0], [], []>} : vector<64x32xbf16>, vector<64x32xbf16>, vector<64x64xf32> -> vector<64x64xf32>
    %c0_449 = arith.constant 0 : index
    %c0_450 = arith.constant 0 : index
    %c0_451 = arith.constant 0 : index
    %c0_452 = arith.constant 0 : index
    %603 = vector.load %arg8[%c0_449, %c0_450, %c0_451, %c0_452] : memref<1x4x64x64xf32, #tpu.memory_space<vmem>>, vector<1x1x64x64xf32>
    %604 = vector.shape_cast %603 : vector<1x1x64x64xf32> to vector<64x64xf32>
    %605 = arith.addf %602, %604 : vector<64x64xf32>
    %cst_453 = arith.constant dense<0xFF800000> : vector<64xf32>
    %606 = vector.multi_reduction <maximumf>, %605, %cst_453 [1] : vector<64x64xf32> to vector<64xf32>
    %607 = vector.shape_cast %606 : vector<64xf32> to vector<64x1xf32>
    %608 = vector.broadcast %607 : vector<64x1xf32> to vector<64x64xf32>
    %609 = arith.subf %605, %608 : vector<64x64xf32>
    %610 = math.exp %609 : vector<64x64xf32>
    %cst_454 = arith.constant dense<0.000000e+00> : vector<64xf32>
    %611 = vector.multi_reduction <add>, %610, %cst_454 [1] : vector<64x64xf32> to vector<64xf32>
    %612 = vector.shape_cast %611 : vector<64xf32> to vector<64x1xf32>
    %613 = vector.broadcast %612 : vector<64x1xf32> to vector<64x64xf32>
    %614 = arith.divf %610, %613 : vector<64x64xf32>
    %615 = arith.truncf %614 : vector<64x64xf32> to vector<64x64xbf16>
    %616 = arith.truncf %597 : vector<64x32xf32> to vector<64x32xbf16>
    %cst_455 = arith.constant dense<0.000000e+00> : vector<64x32xf32>
    %617 = tpu.matmul %615, %616, %cst_455 {dimension_numbers = #tpu.dot_dimension_numbers<[1], [0], [0], [1], [0, 0, 1, 1], [], []>} : vector<64x64xbf16>, vector<64x32xbf16>, vector<64x32xf32> -> vector<64x32xf32>
    %618 = arith.truncf %617 : vector<64x32xf32> to vector<64x32xbf16>
    %c0_456 = arith.constant 0 : index
    %c0_457 = arith.constant 0 : index
    %c0_458 = arith.constant 0 : index
    %619 = vector.load %arg9[%c0_456, %c0_457, %c0_458] : memref<4x32x128xbf16, #tpu.memory_space<vmem>>, vector<1x32x128xbf16>
    %620 = vector.shape_cast %619 : vector<1x32x128xbf16> to vector<32x128xbf16>
    %cst_459 = arith.constant dense<0.000000e+00> : vector<64x128xf32>
    %621 = tpu.matmul %618, %620, %cst_459 {dimension_numbers = #tpu.dot_dimension_numbers<[1], [0], [0], [1], [0, 0, 1, 1], [], []>} : vector<64x32xbf16>, vector<32x128xbf16>, vector<64x128xf32> -> vector<64x128xf32>
    %c1_460 = arith.constant 1 : index
    %c0_461 = arith.constant 0 : index
    %c0_462 = arith.constant 0 : index
    %622 = vector.load %arg2[%c1_460, %c0_461, %c0_462] : memref<4x128x32xbf16, #tpu.memory_space<vmem>>, vector<1x128x32xbf16>
    %623 = vector.shape_cast %622 : vector<1x128x32xbf16> to vector<128x32xbf16>
    %cst_463 = arith.constant dense<0.000000e+00> : vector<64x32xf32>
    %624 = tpu.matmul %576, %623, %cst_463 {dimension_numbers = #tpu.dot_dimension_numbers<[1], [0], [0], [1], [0, 0, 1, 1], [], []>} : vector<64x128xbf16>, vector<128x32xbf16>, vector<64x32xf32> -> vector<64x32xf32>
    %c1_464 = arith.constant 1 : index
    %c0_465 = arith.constant 0 : index
    %c0_466 = arith.constant 0 : index
    %625 = vector.load %arg3[%c1_464, %c0_465, %c0_466] : memref<4x1x32xf32, #tpu.memory_space<vmem>>, vector<1x1x32xf32>
    %626 = vector.shape_cast %625 : vector<1x1x32xf32> to vector<1x32xf32>
    %627 = vector.broadcast %626 : vector<1x32xf32> to vector<64x32xf32>
    %628 = arith.addf %624, %627 : vector<64x32xf32>
    %c1_467 = arith.constant 1 : index
    %c0_468 = arith.constant 0 : index
    %c0_469 = arith.constant 0 : index
    %629 = vector.load %arg4[%c1_467, %c0_468, %c0_469] : memref<4x128x32xbf16, #tpu.memory_space<vmem>>, vector<1x128x32xbf16>
    %630 = vector.shape_cast %629 : vector<1x128x32xbf16> to vector<128x32xbf16>
    %cst_470 = arith.constant dense<0.000000e+00> : vector<64x32xf32>
    %631 = tpu.matmul %576, %630, %cst_470 {dimension_numbers = #tpu.dot_dimension_numbers<[1], [0], [0], [1], [0, 0, 1, 1], [], []>} : vector<64x128xbf16>, vector<128x32xbf16>, vector<64x32xf32> -> vector<64x32xf32>
    %c1_471 = arith.constant 1 : index
    %c0_472 = arith.constant 0 : index
    %c0_473 = arith.constant 0 : index
    %632 = vector.load %arg5[%c1_471, %c0_472, %c0_473] : memref<4x1x32xf32, #tpu.memory_space<vmem>>, vector<1x1x32xf32>
    %633 = vector.shape_cast %632 : vector<1x1x32xf32> to vector<1x32xf32>
    %634 = vector.broadcast %633 : vector<1x32xf32> to vector<64x32xf32>
    %635 = arith.addf %631, %634 : vector<64x32xf32>
    %c1_474 = arith.constant 1 : index
    %c0_475 = arith.constant 0 : index
    %c0_476 = arith.constant 0 : index
    %636 = vector.load %arg6[%c1_474, %c0_475, %c0_476] : memref<4x128x32xbf16, #tpu.memory_space<vmem>>, vector<1x128x32xbf16>
    %637 = vector.shape_cast %636 : vector<1x128x32xbf16> to vector<128x32xbf16>
    %cst_477 = arith.constant dense<0.000000e+00> : vector<64x32xf32>
    %638 = tpu.matmul %576, %637, %cst_477 {dimension_numbers = #tpu.dot_dimension_numbers<[1], [0], [0], [1], [0, 0, 1, 1], [], []>} : vector<64x128xbf16>, vector<128x32xbf16>, vector<64x32xf32> -> vector<64x32xf32>
    %c1_478 = arith.constant 1 : index
    %c0_479 = arith.constant 0 : index
    %c0_480 = arith.constant 0 : index
    %639 = vector.load %arg7[%c1_478, %c0_479, %c0_480] : memref<4x1x32xf32, #tpu.memory_space<vmem>>, vector<1x1x32xf32>
    %640 = vector.shape_cast %639 : vector<1x1x32xf32> to vector<1x32xf32>
    %641 = vector.broadcast %640 : vector<1x32xf32> to vector<64x32xf32>
    %642 = arith.addf %638, %641 : vector<64x32xf32>
    %cst_481 = arith.constant 0.176776692 : f32
    %643 = vector.broadcast %cst_481 : f32 to vector<64x32xf32>
    %644 = arith.mulf %628, %643 : vector<64x32xf32>
    %645 = arith.truncf %644 : vector<64x32xf32> to vector<64x32xbf16>
    %646 = arith.truncf %635 : vector<64x32xf32> to vector<64x32xbf16>
    %cst_482 = arith.constant dense<0.000000e+00> : vector<64x64xf32>
    %647 = tpu.matmul %645, %646, %cst_482 {dimension_numbers = #tpu.dot_dimension_numbers<[1], [1], [0], [0], [0, 0, 1, 0], [], []>} : vector<64x32xbf16>, vector<64x32xbf16>, vector<64x64xf32> -> vector<64x64xf32>
    %c0_483 = arith.constant 0 : index
    %c1_484 = arith.constant 1 : index
    %c0_485 = arith.constant 0 : index
    %c0_486 = arith.constant 0 : index
    %648 = vector.load %arg8[%c0_483, %c1_484, %c0_485, %c0_486] : memref<1x4x64x64xf32, #tpu.memory_space<vmem>>, vector<1x1x64x64xf32>
    %649 = vector.shape_cast %648 : vector<1x1x64x64xf32> to vector<64x64xf32>
    %650 = arith.addf %647, %649 : vector<64x64xf32>
    %cst_487 = arith.constant dense<0xFF800000> : vector<64xf32>
    %651 = vector.multi_reduction <maximumf>, %650, %cst_487 [1] : vector<64x64xf32> to vector<64xf32>
    %652 = vector.shape_cast %651 : vector<64xf32> to vector<64x1xf32>
    %653 = vector.broadcast %652 : vector<64x1xf32> to vector<64x64xf32>
    %654 = arith.subf %650, %653 : vector<64x64xf32>
    %655 = math.exp %654 : vector<64x64xf32>
    %cst_488 = arith.constant dense<0.000000e+00> : vector<64xf32>
    %656 = vector.multi_reduction <add>, %655, %cst_488 [1] : vector<64x64xf32> to vector<64xf32>
    %657 = vector.shape_cast %656 : vector<64xf32> to vector<64x1xf32>
    %658 = vector.broadcast %657 : vector<64x1xf32> to vector<64x64xf32>
    %659 = arith.divf %655, %658 : vector<64x64xf32>
    %660 = arith.truncf %659 : vector<64x64xf32> to vector<64x64xbf16>
    %661 = arith.truncf %642 : vector<64x32xf32> to vector<64x32xbf16>
    %cst_489 = arith.constant dense<0.000000e+00> : vector<64x32xf32>
    %662 = tpu.matmul %660, %661, %cst_489 {dimension_numbers = #tpu.dot_dimension_numbers<[1], [0], [0], [1], [0, 0, 1, 1], [], []>} : vector<64x64xbf16>, vector<64x32xbf16>, vector<64x32xf32> -> vector<64x32xf32>
    %663 = arith.truncf %662 : vector<64x32xf32> to vector<64x32xbf16>
    %c1_490 = arith.constant 1 : index
    %c0_491 = arith.constant 0 : index
    %c0_492 = arith.constant 0 : index
    %664 = vector.load %arg9[%c1_490, %c0_491, %c0_492] : memref<4x32x128xbf16, #tpu.memory_space<vmem>>, vector<1x32x128xbf16>
    %665 = vector.shape_cast %664 : vector<1x32x128xbf16> to vector<32x128xbf16>
    %cst_493 = arith.constant dense<0.000000e+00> : vector<64x128xf32>
    %666 = tpu.matmul %663, %665, %cst_493 {dimension_numbers = #tpu.dot_dimension_numbers<[1], [0], [0], [1], [0, 0, 1, 1], [], []>} : vector<64x32xbf16>, vector<32x128xbf16>, vector<64x128xf32> -> vector<64x128xf32>
    %667 = arith.addf %621, %666 : vector<64x128xf32>
    %c2_494 = arith.constant 2 : index
    %c0_495 = arith.constant 0 : index
    %c0_496 = arith.constant 0 : index
    %668 = vector.load %arg2[%c2_494, %c0_495, %c0_496] : memref<4x128x32xbf16, #tpu.memory_space<vmem>>, vector<1x128x32xbf16>
    %669 = vector.shape_cast %668 : vector<1x128x32xbf16> to vector<128x32xbf16>
    %cst_497 = arith.constant dense<0.000000e+00> : vector<64x32xf32>
    %670 = tpu.matmul %576, %669, %cst_497 {dimension_numbers = #tpu.dot_dimension_numbers<[1], [0], [0], [1], [0, 0, 1, 1], [], []>} : vector<64x128xbf16>, vector<128x32xbf16>, vector<64x32xf32> -> vector<64x32xf32>
    %c2_498 = arith.constant 2 : index
    %c0_499 = arith.constant 0 : index
    %c0_500 = arith.constant 0 : index
    %671 = vector.load %arg3[%c2_498, %c0_499, %c0_500] : memref<4x1x32xf32, #tpu.memory_space<vmem>>, vector<1x1x32xf32>
    %672 = vector.shape_cast %671 : vector<1x1x32xf32> to vector<1x32xf32>
    %673 = vector.broadcast %672 : vector<1x32xf32> to vector<64x32xf32>
    %674 = arith.addf %670, %673 : vector<64x32xf32>
    %c2_501 = arith.constant 2 : index
    %c0_502 = arith.constant 0 : index
    %c0_503 = arith.constant 0 : index
    %675 = vector.load %arg4[%c2_501, %c0_502, %c0_503] : memref<4x128x32xbf16, #tpu.memory_space<vmem>>, vector<1x128x32xbf16>
    %676 = vector.shape_cast %675 : vector<1x128x32xbf16> to vector<128x32xbf16>
    %cst_504 = arith.constant dense<0.000000e+00> : vector<64x32xf32>
    %677 = tpu.matmul %576, %676, %cst_504 {dimension_numbers = #tpu.dot_dimension_numbers<[1], [0], [0], [1], [0, 0, 1, 1], [], []>} : vector<64x128xbf16>, vector<128x32xbf16>, vector<64x32xf32> -> vector<64x32xf32>
    %c2_505 = arith.constant 2 : index
    %c0_506 = arith.constant 0 : index
    %c0_507 = arith.constant 0 : index
    %678 = vector.load %arg5[%c2_505, %c0_506, %c0_507] : memref<4x1x32xf32, #tpu.memory_space<vmem>>, vector<1x1x32xf32>
    %679 = vector.shape_cast %678 : vector<1x1x32xf32> to vector<1x32xf32>
    %680 = vector.broadcast %679 : vector<1x32xf32> to vector<64x32xf32>
    %681 = arith.addf %677, %680 : vector<64x32xf32>
    %c2_508 = arith.constant 2 : index
    %c0_509 = arith.constant 0 : index
    %c0_510 = arith.constant 0 : index
    %682 = vector.load %arg6[%c2_508, %c0_509, %c0_510] : memref<4x128x32xbf16, #tpu.memory_space<vmem>>, vector<1x128x32xbf16>
    %683 = vector.shape_cast %682 : vector<1x128x32xbf16> to vector<128x32xbf16>
    %cst_511 = arith.constant dense<0.000000e+00> : vector<64x32xf32>
    %684 = tpu.matmul %576, %683, %cst_511 {dimension_numbers = #tpu.dot_dimension_numbers<[1], [0], [0], [1], [0, 0, 1, 1], [], []>} : vector<64x128xbf16>, vector<128x32xbf16>, vector<64x32xf32> -> vector<64x32xf32>
    %c2_512 = arith.constant 2 : index
    %c0_513 = arith.constant 0 : index
    %c0_514 = arith.constant 0 : index
    %685 = vector.load %arg7[%c2_512, %c0_513, %c0_514] : memref<4x1x32xf32, #tpu.memory_space<vmem>>, vector<1x1x32xf32>
    %686 = vector.shape_cast %685 : vector<1x1x32xf32> to vector<1x32xf32>
    %687 = vector.broadcast %686 : vector<1x32xf32> to vector<64x32xf32>
    %688 = arith.addf %684, %687 : vector<64x32xf32>
    %cst_515 = arith.constant 0.176776692 : f32
    %689 = vector.broadcast %cst_515 : f32 to vector<64x32xf32>
    %690 = arith.mulf %674, %689 : vector<64x32xf32>
    %691 = arith.truncf %690 : vector<64x32xf32> to vector<64x32xbf16>
    %692 = arith.truncf %681 : vector<64x32xf32> to vector<64x32xbf16>
    %cst_516 = arith.constant dense<0.000000e+00> : vector<64x64xf32>
    %693 = tpu.matmul %691, %692, %cst_516 {dimension_numbers = #tpu.dot_dimension_numbers<[1], [1], [0], [0], [0, 0, 1, 0], [], []>} : vector<64x32xbf16>, vector<64x32xbf16>, vector<64x64xf32> -> vector<64x64xf32>
    %c0_517 = arith.constant 0 : index
    %c2_518 = arith.constant 2 : index
    %c0_519 = arith.constant 0 : index
    %c0_520 = arith.constant 0 : index
    %694 = vector.load %arg8[%c0_517, %c2_518, %c0_519, %c0_520] : memref<1x4x64x64xf32, #tpu.memory_space<vmem>>, vector<1x1x64x64xf32>
    %695 = vector.shape_cast %694 : vector<1x1x64x64xf32> to vector<64x64xf32>
    %696 = arith.addf %693, %695 : vector<64x64xf32>
    %cst_521 = arith.constant dense<0xFF800000> : vector<64xf32>
    %697 = vector.multi_reduction <maximumf>, %696, %cst_521 [1] : vector<64x64xf32> to vector<64xf32>
    %698 = vector.shape_cast %697 : vector<64xf32> to vector<64x1xf32>
    %699 = vector.broadcast %698 : vector<64x1xf32> to vector<64x64xf32>
    %700 = arith.subf %696, %699 : vector<64x64xf32>
    %701 = math.exp %700 : vector<64x64xf32>
    %cst_522 = arith.constant dense<0.000000e+00> : vector<64xf32>
    %702 = vector.multi_reduction <add>, %701, %cst_522 [1] : vector<64x64xf32> to vector<64xf32>
    %703 = vector.shape_cast %702 : vector<64xf32> to vector<64x1xf32>
    %704 = vector.broadcast %703 : vector<64x1xf32> to vector<64x64xf32>
    %705 = arith.divf %701, %704 : vector<64x64xf32>
    %706 = arith.truncf %705 : vector<64x64xf32> to vector<64x64xbf16>
    %707 = arith.truncf %688 : vector<64x32xf32> to vector<64x32xbf16>
    %cst_523 = arith.constant dense<0.000000e+00> : vector<64x32xf32>
    %708 = tpu.matmul %706, %707, %cst_523 {dimension_numbers = #tpu.dot_dimension_numbers<[1], [0], [0], [1], [0, 0, 1, 1], [], []>} : vector<64x64xbf16>, vector<64x32xbf16>, vector<64x32xf32> -> vector<64x32xf32>
    %709 = arith.truncf %708 : vector<64x32xf32> to vector<64x32xbf16>
    %c2_524 = arith.constant 2 : index
    %c0_525 = arith.constant 0 : index
    %c0_526 = arith.constant 0 : index
    %710 = vector.load %arg9[%c2_524, %c0_525, %c0_526] : memref<4x32x128xbf16, #tpu.memory_space<vmem>>, vector<1x32x128xbf16>
    %711 = vector.shape_cast %710 : vector<1x32x128xbf16> to vector<32x128xbf16>
    %cst_527 = arith.constant dense<0.000000e+00> : vector<64x128xf32>
    %712 = tpu.matmul %709, %711, %cst_527 {dimension_numbers = #tpu.dot_dimension_numbers<[1], [0], [0], [1], [0, 0, 1, 1], [], []>} : vector<64x32xbf16>, vector<32x128xbf16>, vector<64x128xf32> -> vector<64x128xf32>
    %713 = arith.addf %667, %712 : vector<64x128xf32>
    %c3_528 = arith.constant 3 : index
    %c0_529 = arith.constant 0 : index
    %c0_530 = arith.constant 0 : index
    %714 = vector.load %arg2[%c3_528, %c0_529, %c0_530] : memref<4x128x32xbf16, #tpu.memory_space<vmem>>, vector<1x128x32xbf16>
    %715 = vector.shape_cast %714 : vector<1x128x32xbf16> to vector<128x32xbf16>
    %cst_531 = arith.constant dense<0.000000e+00> : vector<64x32xf32>
    %716 = tpu.matmul %576, %715, %cst_531 {dimension_numbers = #tpu.dot_dimension_numbers<[1], [0], [0], [1], [0, 0, 1, 1], [], []>} : vector<64x128xbf16>, vector<128x32xbf16>, vector<64x32xf32> -> vector<64x32xf32>
    %c3_532 = arith.constant 3 : index
    %c0_533 = arith.constant 0 : index
    %c0_534 = arith.constant 0 : index
    %717 = vector.load %arg3[%c3_532, %c0_533, %c0_534] : memref<4x1x32xf32, #tpu.memory_space<vmem>>, vector<1x1x32xf32>
    %718 = vector.shape_cast %717 : vector<1x1x32xf32> to vector<1x32xf32>
    %719 = vector.broadcast %718 : vector<1x32xf32> to vector<64x32xf32>
    %720 = arith.addf %716, %719 : vector<64x32xf32>
    %c3_535 = arith.constant 3 : index
    %c0_536 = arith.constant 0 : index
    %c0_537 = arith.constant 0 : index
    %721 = vector.load %arg4[%c3_535, %c0_536, %c0_537] : memref<4x128x32xbf16, #tpu.memory_space<vmem>>, vector<1x128x32xbf16>
    %722 = vector.shape_cast %721 : vector<1x128x32xbf16> to vector<128x32xbf16>
    %cst_538 = arith.constant dense<0.000000e+00> : vector<64x32xf32>
    %723 = tpu.matmul %576, %722, %cst_538 {dimension_numbers = #tpu.dot_dimension_numbers<[1], [0], [0], [1], [0, 0, 1, 1], [], []>} : vector<64x128xbf16>, vector<128x32xbf16>, vector<64x32xf32> -> vector<64x32xf32>
    %c3_539 = arith.constant 3 : index
    %c0_540 = arith.constant 0 : index
    %c0_541 = arith.constant 0 : index
    %724 = vector.load %arg5[%c3_539, %c0_540, %c0_541] : memref<4x1x32xf32, #tpu.memory_space<vmem>>, vector<1x1x32xf32>
    %725 = vector.shape_cast %724 : vector<1x1x32xf32> to vector<1x32xf32>
    %726 = vector.broadcast %725 : vector<1x32xf32> to vector<64x32xf32>
    %727 = arith.addf %723, %726 : vector<64x32xf32>
    %c3_542 = arith.constant 3 : index
    %c0_543 = arith.constant 0 : index
    %c0_544 = arith.constant 0 : index
    %728 = vector.load %arg6[%c3_542, %c0_543, %c0_544] : memref<4x128x32xbf16, #tpu.memory_space<vmem>>, vector<1x128x32xbf16>
    %729 = vector.shape_cast %728 : vector<1x128x32xbf16> to vector<128x32xbf16>
    %cst_545 = arith.constant dense<0.000000e+00> : vector<64x32xf32>
    %730 = tpu.matmul %576, %729, %cst_545 {dimension_numbers = #tpu.dot_dimension_numbers<[1], [0], [0], [1], [0, 0, 1, 1], [], []>} : vector<64x128xbf16>, vector<128x32xbf16>, vector<64x32xf32> -> vector<64x32xf32>
    %c3_546 = arith.constant 3 : index
    %c0_547 = arith.constant 0 : index
    %c0_548 = arith.constant 0 : index
    %731 = vector.load %arg7[%c3_546, %c0_547, %c0_548] : memref<4x1x32xf32, #tpu.memory_space<vmem>>, vector<1x1x32xf32>
    %732 = vector.shape_cast %731 : vector<1x1x32xf32> to vector<1x32xf32>
    %733 = vector.broadcast %732 : vector<1x32xf32> to vector<64x32xf32>
    %734 = arith.addf %730, %733 : vector<64x32xf32>
    %cst_549 = arith.constant 0.176776692 : f32
    %735 = vector.broadcast %cst_549 : f32 to vector<64x32xf32>
    %736 = arith.mulf %720, %735 : vector<64x32xf32>
    %737 = arith.truncf %736 : vector<64x32xf32> to vector<64x32xbf16>
    %738 = arith.truncf %727 : vector<64x32xf32> to vector<64x32xbf16>
    %cst_550 = arith.constant dense<0.000000e+00> : vector<64x64xf32>
    %739 = tpu.matmul %737, %738, %cst_550 {dimension_numbers = #tpu.dot_dimension_numbers<[1], [1], [0], [0], [0, 0, 1, 0], [], []>} : vector<64x32xbf16>, vector<64x32xbf16>, vector<64x64xf32> -> vector<64x64xf32>
    %c0_551 = arith.constant 0 : index
    %c3_552 = arith.constant 3 : index
    %c0_553 = arith.constant 0 : index
    %c0_554 = arith.constant 0 : index
    %740 = vector.load %arg8[%c0_551, %c3_552, %c0_553, %c0_554] : memref<1x4x64x64xf32, #tpu.memory_space<vmem>>, vector<1x1x64x64xf32>
    %741 = vector.shape_cast %740 : vector<1x1x64x64xf32> to vector<64x64xf32>
    %742 = arith.addf %739, %741 : vector<64x64xf32>
    %cst_555 = arith.constant dense<0xFF800000> : vector<64xf32>
    %743 = vector.multi_reduction <maximumf>, %742, %cst_555 [1] : vector<64x64xf32> to vector<64xf32>
    %744 = vector.shape_cast %743 : vector<64xf32> to vector<64x1xf32>
    %745 = vector.broadcast %744 : vector<64x1xf32> to vector<64x64xf32>
    %746 = arith.subf %742, %745 : vector<64x64xf32>
    %747 = math.exp %746 : vector<64x64xf32>
    %cst_556 = arith.constant dense<0.000000e+00> : vector<64xf32>
    %748 = vector.multi_reduction <add>, %747, %cst_556 [1] : vector<64x64xf32> to vector<64xf32>
    %749 = vector.shape_cast %748 : vector<64xf32> to vector<64x1xf32>
    %750 = vector.broadcast %749 : vector<64x1xf32> to vector<64x64xf32>
    %751 = arith.divf %747, %750 : vector<64x64xf32>
    %752 = arith.truncf %751 : vector<64x64xf32> to vector<64x64xbf16>
    %753 = arith.truncf %734 : vector<64x32xf32> to vector<64x32xbf16>
    %cst_557 = arith.constant dense<0.000000e+00> : vector<64x32xf32>
    %754 = tpu.matmul %752, %753, %cst_557 {dimension_numbers = #tpu.dot_dimension_numbers<[1], [0], [0], [1], [0, 0, 1, 1], [], []>} : vector<64x64xbf16>, vector<64x32xbf16>, vector<64x32xf32> -> vector<64x32xf32>
    %755 = arith.truncf %754 : vector<64x32xf32> to vector<64x32xbf16>
    %c3_558 = arith.constant 3 : index
    %c0_559 = arith.constant 0 : index
    %c0_560 = arith.constant 0 : index
    %756 = vector.load %arg9[%c3_558, %c0_559, %c0_560] : memref<4x32x128xbf16, #tpu.memory_space<vmem>>, vector<1x32x128xbf16>
    %757 = vector.shape_cast %756 : vector<1x32x128xbf16> to vector<32x128xbf16>
    %cst_561 = arith.constant dense<0.000000e+00> : vector<64x128xf32>
    %758 = tpu.matmul %755, %757, %cst_561 {dimension_numbers = #tpu.dot_dimension_numbers<[1], [0], [0], [1], [0, 0, 1, 1], [], []>} : vector<64x32xbf16>, vector<32x128xbf16>, vector<64x128xf32> -> vector<64x128xf32>
    %759 = arith.addf %713, %758 : vector<64x128xf32>
    %760 = vector.broadcast %0 : vector<1x128xf32> to vector<64x128xf32>
    %761 = arith.addf %759, %760 : vector<64x128xf32>
    %c3_562 = arith.constant 3 : index
    %c0_563 = arith.constant 0 : index
    %c0_564 = arith.constant 0 : index
    %762 = vector.load %arg11[%c3_562, %c0_563, %c0_564] : memref<4x64x128xf32, #tpu.memory_space<vmem>>, vector<1x64x128xf32>
    %763 = vector.shape_cast %762 : vector<1x64x128xf32> to vector<64x128xf32>
    %764 = vector.shape_cast %761 : vector<64x128xf32> to vector<1x64x128xf32>
    tpu.vector_store %arg11[%c3_562, %c0_563, %c0_564], %764 {strides = array<i32>} : memref<4x64x128xf32, #tpu.memory_space<vmem>>, vector<1x64x128xf32>,
    return
  }
  func.func @transform_0(%arg0: i32) -> (i32, i32, i32) {
    %c0_i32 = arith.constant 0 : i32
    %c0_i32_0 = arith.constant 0 : i32
    %c0_i32_1 = arith.constant 0 : i32
    return %arg0, %c0_i32, %c0_i32_0 : i32, i32, i32
  }
  func.func @transform_1(%arg0: i32) -> (i32, i32, i32) {
    %c0_i32 = arith.constant 0 : i32
    %c0_i32_0 = arith.constant 0 : i32
    %c0_i32_1 = arith.constant 0 : i32
    %c0_i32_2 = arith.constant 0 : i32
    return %c0_i32, %c0_i32_0, %c0_i32_1 : i32, i32, i32
  }
  func.func @transform_2(%arg0: i32) -> (i32, i32, i32) {
    %c0_i32 = arith.constant 0 : i32
    %c0_i32_0 = arith.constant 0 : i32
    %c0_i32_1 = arith.constant 0 : i32
    %c0_i32_2 = arith.constant 0 : i32
    return %c0_i32, %c0_i32_0, %c0_i32_1 : i32, i32, i32
  }
  func.func @transform_3(%arg0: i32) -> (i32, i32, i32) {
    %c0_i32 = arith.constant 0 : i32
    %c0_i32_0 = arith.constant 0 : i32
    %c0_i32_1 = arith.constant 0 : i32
    %c0_i32_2 = arith.constant 0 : i32
    return %c0_i32, %c0_i32_0, %c0_i32_1 : i32, i32, i32
  }
  func.func @transform_4(%arg0: i32) -> (i32, i32, i32) {
    %c0_i32 = arith.constant 0 : i32
    %c0_i32_0 = arith.constant 0 : i32
    %c0_i32_1 = arith.constant 0 : i32
    %c0_i32_2 = arith.constant 0 : i32
    return %c0_i32, %c0_i32_0, %c0_i32_1 : i32, i32, i32
  }
  func.func @transform_5(%arg0: i32) -> (i32, i32, i32) {
    %c0_i32 = arith.constant 0 : i32
    %c0_i32_0 = arith.constant 0 : i32
    %c0_i32_1 = arith.constant 0 : i32
    %c0_i32_2 = arith.constant 0 : i32
    return %c0_i32, %c0_i32_0, %c0_i32_1 : i32, i32, i32
  }
  func.func @transform_6(%arg0: i32) -> (i32, i32, i32) {
    %c0_i32 = arith.constant 0 : i32
    %c0_i32_0 = arith.constant 0 : i32
    %c0_i32_1 = arith.constant 0 : i32
    %c0_i32_2 = arith.constant 0 : i32
    return %c0_i32, %c0_i32_0, %c0_i32_1 : i32, i32, i32
  }
  func.func @transform_7(%arg0: i32) -> (i32, i32, i32, i32) {
    %c0_i32 = arith.constant 0 : i32
    %c0_i32_0 = arith.constant 0 : i32
    %c0_i32_1 = arith.constant 0 : i32
    %c0_i32_2 = arith.constant 0 : i32
    %c0_i32_3 = arith.constant 0 : i32
    return %c0_i32, %c0_i32_0, %c0_i32_1, %c0_i32_2 : i32, i32, i32, i32
  }
  func.func @transform_8(%arg0: i32) -> (i32, i32, i32) {
    %c0_i32 = arith.constant 0 : i32
    %c0_i32_0 = arith.constant 0 : i32
    %c0_i32_1 = arith.constant 0 : i32
    %c0_i32_2 = arith.constant 0 : i32
    return %c0_i32, %c0_i32_0, %c0_i32_1 : i32, i32, i32
  }
  func.func @transform_9(%arg0: i32) -> (i32, i32) {
    %c0_i32 = arith.constant 0 : i32
    %c0_i32_0 = arith.constant 0 : i32
    %c0_i32_1 = arith.constant 0 : i32
    return %c0_i32, %c0_i32_0 : i32, i32
  }
  func.func @transform_10(%arg0: i32) -> (i32, i32, i32) {
    %c0_i32 = arith.constant 0 : i32
    %c0_i32_0 = arith.constant 0 : i32
    %c0_i32_1 = arith.constant 0 : i32
    return %arg0, %c0_i32, %c0_i32_0 : i32, i32, i32
  }
}

</mosaic_0001>

<bundles_post_ra>
// kernel: tpu_custom_call.1
= control target key start
LH: loop header
LB: loop body
LE: loop exit
PB: predicated region body
PF: predicated region fallthrough
CT: control target
= control target key end

     0   :  { %15 = vsyncpa [#allocation3], 0  ;;  %s22322_s0 = inlined_call_operand.vmem [shape: f32[8,64,128], index: 0, kind: input, shape index: {}]   ;;  %s22323_s1 = inlined_call_operand.vmem [shape: bf16[4,128,32], index: 1, kind: input, shape index: {}]   ;;  %s22324_s2 = inlined_call_operand.hbm [shape: f32[4,1,32], index: 2, kind: input, shape index: {}]   ;;  %s22325_s3 = inlined_call_operand.vmem [shape: bf16[4,128,32], index: 3, kind: input, shape index: {}]   ;;  %s22326_s4 = inlined_call_operand.vmem [shape: f32[4,1,32], index: 4, kind: input, shape index: {}]   ;;  %s22327_s5 = inlined_call_operand.vmem [shape: bf16[4,128,32], index: 5, kind: input, shape index: {}]   ;;  %s22328_s6 = inlined_call_operand.vmem [shape: f32[4,1,32], index: 6, kind: input, shape index: {}]   ;;  %s22329_s7 = inlined_call_operand.vmem [shape: f32[1,4,64,64], index: 7, kind: input, shape index: {}]   ;;  %s22330_s8 = inlined_call_operand.vmem [shape: bf16[4,32,128], index: 8, kind: input, shape index: {}]   ;;  %s22331_s9 = inlined_call_operand.vmem [shape: f32[1,128], index: 9, kind: input, shape index: {}]   ;;  %s22332_s10 = inlined_call_operand.hbm [shape: f32[8,64,128], index: 10, kind: output, shape index: {}]  }
   0x1   :  { %16 = vsyncpa [#allocation4], 0 }
   0x2   :  { %18 = vsyncpa [#allocation4 + $0x1], 0  ;;  %s18894_s13 = smov 0   ;;  %s18896_s14 = smov 0  }
   0x3   :  { %s18898_s15 = smov 0   ;;  %s18900_s16 = smov 0  }
   0x4 LB: > { %s18915_s17 = sadd.s32 4294967295, %s18831_s16   ;;  %s13340_s18 = sadd.s32 4294967294, %s18831_s16   ;;  %s18831_s16 = sphi %s18900_s16, %s22350_s16   ;;  %s18827_s15 = sphi %s18898_s15, %s22349_s15   ;;  %s18823_s14 = sphi %s18896_s14, %s22348_s14   ;;  %s18819_s13 = sphi %s18894_s13, %s22347_s13  }
   0x5   : > { %s18919_s19 = sadd.s32 1, %s18831_s16   ;;  %s246_s20 = sadd.s32 1, %s18827_s15 }
   0x6   : > { %s243_s21 = ssub.s32 %s18831_s16, %s18919_s19  ;;  %p256_p0 = scmp.ne.s32.totalorder %s18827_s15, %s18823_s14 }
   0x7   : > { %p244_p1 = scmp.eq.s32.totalorder %s243_s21, 0  ;;  %p257_p2 = scmp.eq.s32.totalorder %s18915_s17, 1 }
   0x8   : > { %p262_p3 = scmp.ne.s32.totalorder %s18823_s14, %s18819_s13  ;;  %p263_p4 = scmp.eq.s32.totalorder %s13340_s18, 1 }
   0x9   : > { %s18930_s22 = scalar_select %p244_p1, %s18827_s15, %s246_s20  }
   0xa   : > { %p18932_p5 = por %p257_p2, %p256_p0  ;;  %p18936_p6 = por %p263_p4, %p262_p3 }
   0xb   : > { %p13341_p7 = scmp.ge.s32.totalorder %s18831_s16, 1  ;;  %p270_p8 = scmp.lt.s32.totalorder %s18831_s16, 3 }
   0xc   : > { %s22337_s23 = scalar_select %p18932_p5, 1, 0 }
   0xd   : > { %s22338_s24 = scalar_select %p18936_p6, 1, 0 }
   0xe   : > { %p22333_p9 = scmp.eq.s32.totalorder %s18915_s17, 0  ;;  %p18943_p10 = pnand %p13341_p7, %p270_p8 }
   0xf   : > { %s18833_s26 = smov [#allocation2]   ;;  %s18737_s11 = scalar_lea.hbm %s22324_s2, 64 }
  0x10   : > { %s22339_s25 = scalar_select %p18943_p10, 1, 0 }
  0x11   : > { %s285_s27 = sshll.u32 %s18833_s26, 4  ;;  %p17758_p11 = pneg %p18943_p10  ;;  %s286_s27 = int_to_ptr.vmem [resolvable:$true] %s285_s27 }
  0x12   : > { %p18738_p13 = scmp.ne.s32.totalorder %s22324_s2, %s18737_s11  ;;  %p18744_p3 = scmp.lt.u32.totalorder %s18737_s11, %s22324_s2 }
  0x13   : > { %p18951_p12 = pnand %p22333_p9, %p17758_p11 }
  0x15   : > { %p18739_p0 = pneg %p18951_p12 }
  0x17   : > { %p18740_p1 = pnand %p18739_p0, %p18738_p13 }
  0x19   : > { %p18741_p2 = pneg %p18740_p1 }
  0x1b   : > { %p18746_p4 = pnand %p18744_p3, %p18741_p2 }
  0x1d   : > { %18749 = shalt.err (!%p18746_p4)
}
  0x1e   : > { %s18750_s26 = scalar_lea.vmem %s286_s27, 64  ;;  %p18758_p9 = scmp.lt.s32.totalorder %s286_s27, %s286_s27 }
  0x1f   : > { %p18751_p7 = scmp.ne.s32.totalorder %s286_s27, %s18750_s26  ;;  %p18759_p6 = scmp.lt.s32.totalorder %s18750_s26, %s18750_s26 }
  0x21   : > { %p18753_p8 = pnand %p18751_p7, %p18739_p0  ;;  %p18760_p5 = por %p18759_p6, %p18758_p9 }
  0x23   : > { %p18754_p11 = pneg %p18753_p8 }
  0x25   : > { %p18761_p10 = pnand %p18760_p5, %p18754_p11 }
  0x27   : > { %18764 = shalt.err (!%p18761_p10)
}
  0x28   : > { %s18834_s29 = smov 16   ;;  %s18835_s30 = smov 1  }
  0x29   : > { %17761 = dma.hbm_to_vmem [thread:$0]  (!%p18951_p12), %s22324_s2, 64, %s286_s27, [#allocation3], %s18834_s29, %s18834_s29, %s18835_s30  }
  0x2a   : > { %p22341_p13 = scmp.ne.s32.totalorder %s22339_s25, 0 }
  0x2b   : > { %p22342_p1 = scmp.eq.s32.totalorder (!%p22341_p13), %s18915_s17, 0 }
  0x2c   : > { %332 = sbr.rel (%p22341_p13) target bundleno = 15979 (0x3e6b), region = 60 }
  0x33   : > { %18810 = dma.done.wait (%p22342_p1), [#allocation3], 64   ;;  %p22343_p0 = pmov %p22342_p1 }
  0x34   : > { %s13347_s11 = sshll.u32 %s18915_s17, 2  ;;  %v17806_v0 = vld [vmem:[%s22325_s3] sm:$0xff]   ;;  %v17807_v1 = vld [vmem:[%s22325_s3 + $0x8] sm:$0xff]   ;;  %v17808_v2 = vld [vmem:[%s22325_s3 + $0x10] sm:$0xff]   ;;  %vm825_vm0 = vcmask 261120   ;;  %vm915_vm1 = vcmask 523264  }
  0x35   : > { %18812 = vsyncadd (%p22343_p0), [#allocation3], 4294967232  ;;  %p372_p5 = scmp.lt.s32.totalorder %s13347_s11, 7  ;;  %15760 = vmatprep.subr.bf16.mxu1 %v17806_v0  ;;  %v17813_v3 = vld [vmem:[%s22323_s1] sm:$0xff]   ;;  %v17809_v4 = vld [vmem:[%s22325_s3 + $0x18] sm:$0xff]   ;;  %s22336_s25 = sand.u32 1, %s18823_s14  }
  0x36   : > { %15761 = vmatpush3.bf16.msra.mxu1 %v17806_v0  ;;  %15736 = vmatprep.subr.bf16.mxu0 %v17813_v3  ;;  %v17815_v5 = vld [vmem:[%s22323_s1 + $0x8] sm:$0xff]   ;;  %v17810_v8 = vld [vmem:[%s22325_s3 + $0x20] sm:$0xff]   ;;  %v17816_v10 = vld [vmem:[%s22323_s1 + $0x10] sm:$0xff]   ;;  %s14807_s26 = sshll.u32 %s18915_s17, 12  ;;  %s22344_s17 = sand.u32 1, %s18823_s14  }
  0x37   : > { %s22352_s11 = smov (!%p372_p5, %s13347_s11), 7  ;;  %15762 = vmatprep.subr.bf16.mxu1 %v17807_v1  ;;  %15737 = vmatpush3.bf16.msra.mxu0 %v17813_v3  ;;  %v17817_v11 = vld [vmem:[%s22323_s1 + $0x18] sm:$0xff]   ;;  %v17811_v12 = vld [vmem:[%s22325_s3 + $0x28] sm:$0xff]   ;;  %v17812_v13 = vld [vmem:[%s22325_s3 + $0x30] sm:$0xff]   ;;  %s22272_s12 = scalar_lea.hbm %s22332_s10, %s14807_s26 }
  0x38   : > { %s14805_s29 = sshll.u32 %s22352_s11, 6  ;;  %15738 = vmatprep.subr.bf16.mxu0 %v17815_v5  ;;  %v17818_v14 = vld [vmem:[%s22323_s1 + $0x20] sm:$0xff]   ;;  %v17819_v15 = vld [vmem:[%s22323_s1 + $0x28] sm:$0xff]   ;;  %v17814_v16 = vld [vmem:[%s22325_s3 + $0x38] sm:$0xff]   ;;  %s13346_s11 = sshll.u32 %s22336_s25, 8 }
  0x39   : > { %s18993_s21 = scalar_lea.vmem %s22322_s0, %s14805_s29  ;;  %v17820_v19 = vld [vmem:[%s22323_s1 + $0x30] sm:$0xff]   ;;  %v17821_v22 = vld [vmem:[%s22323_s1 + $0x38] sm:$0xff]   ;;  %v13359_v28 = vld [vmem:[%s22326_s4] ss:$0 sm:$0xff]  ;;  %s19922_s29 = scalar_lea.vmem [#allocation5], %s13346_s11 }
  0x3a   : > { %15763 = vmatpush3.bf16.msra.mxu1 %v17807_v1  ;;  %v381_v6 = vld [vmem:[%s18993_s21] sm:$0xff]  ;;  %v382_v7 = vld [vmem:[%s18993_s21 + $0x8] sm:$0xff]  ;;  %v383_v17 = vld [vmem:[%s18993_s21 + $0x10] sm:$0xff]  ;;  %s13266_s11 = sshll.u32 %s19922_s29, 4  ;;  %s22281_s18 = scalar_lea.sflag [#allocation4], %s22344_s17  ;;  %s22274_s11 = int_to_ptr.vmem [resolvable:$true] %s13266_s11 }
  0x3b   : > { %15764 = vmatprep.subr.bf16.mxu1 %v17808_v2  ;;  %v19006_v9 = vpack.c.bf16 %v382_v7, %v381_v6  ;;  %15739 = vmatpush3.bf16.msra.mxu0 %v17815_v5  ;;  %v384_v18 = vld [vmem:[%s18993_s21 + $0x18] sm:$0xff]  ;;  %v385_v20 = vld [vmem:[%s18993_s21 + $0x20] sm:$0xff]  ;;  %v386_v21 = vld [vmem:[%s18993_s21 + $0x28] sm:$0xff]  ;;  %s18765_s20 = scalar_lea.vmem %s22274_s11, 4096  ;;  %p22345_p9 = scmp.ne.s32.totalorder %s22337_s23, 0 }
  0x3c   : > { %15740 = vmatprep.subr.bf16.mxu0 %v17816_v10  ;;  %v19041_v23 = vpack.c.bf16 %v384_v18, %v383_v17  ;;  %v19043_v24 = vpack.c.bf16 %v386_v21, %v385_v20  ;;  %v387_v25 = vld [vmem:[%s18993_s21 + $0x30] sm:$0xff]  ;;  %v388_v26 = vld [vmem:[%s18993_s21 + $0x38] sm:$0xff]  ;;  %v13350_v35 = vld [vmem:[#allocation2] ss:$0 sm:$0xff]  ;;  %p18766_p6 = scmp.ne.s32.totalorder %s22274_s11, %s18765_s20  ;;  %s18836_s25 = smov [#allocation5]  }
  0x3d   : > { %15776 = vmatprep.mubr.bf16.mxu1 %v19006_v9  ;;  %15752 = vmatprep.mubr.bf16.mxu0 %v19006_v9  ;;  %v19049_v27 = vpack.c.bf16 %v388_v26, %v387_v25  ;;  %v17823_v20 = vld [vmem:[%s22327_s5 + $0x8] sm:$0xff]   ;;  %v17824_v21 = vld [vmem:[%s22327_s5 + $0x10] sm:$0xff]   ;;  %v17826_v25 = vld [vmem:[%s22327_s5 + $0x20] sm:$0xff]  }
  0x3e   : > { %15765 = vmatpush3.bf16.msra.mxu1 %v17808_v2  ;;  %v17827_v26 = vld [vmem:[%s22327_s5 + $0x28] sm:$0xff]   ;;  %p18767_p10 = pnand %p18766_p6, %p22345_p9 }
  0x3f   : > { %15766 = vmatprep.subr.bf16.mxu1 %v17809_v4  ;;  %15741 = vmatpush3.bf16.msra.mxu0 %v17816_v10 }
  0x40   : > { %15742 = vmatprep.subr.bf16.mxu0 %v17817_v11  ;;  %p18768_p12 = pneg %p18767_p10 }
  0x42   : > { %15767 = vmatpush3.bf16.msra.mxu1 %v17809_v4 }
  0x43   : > { %15768 = vmatprep.subr.bf16.mxu1 %v17810_v8  ;;  %15743 = vmatpush3.bf16.msra.mxu0 %v17817_v11 }
  0x44   : > { %15744 = vmatprep.subr.bf16.mxu0 %v17818_v14 }
  0x46   : > { %15769 = vmatpush3.bf16.msra.mxu1 %v17810_v8 }
  0x47   : > { %15770 = vmatprep.subr.bf16.mxu1 %v17811_v12  ;;  %15745 = vmatpush3.bf16.msra.mxu0 %v17818_v14 }
  0x48   : > { %15746 = vmatprep.subr.bf16.mxu0 %v17819_v15 }
  0x4a   : > { %15771 = vmatpush3.bf16.msra.mxu1 %v17811_v12 }
  0x4b   : > { %15772 = vmatprep.subr.bf16.mxu1 %v17812_v13  ;;  %15747 = vmatpush3.bf16.msra.mxu0 %v17819_v15 }
  0x4c   : > { %15748 = vmatprep.subr.bf16.mxu0 %v17820_v19 }
  0x4e   : > { %15773 = vmatpush3.bf16.msra.mxu1 %v17812_v13 }
  0x4f   : > { %15774 = vmatprep.subr.bf16.mxu1 %v17814_v16  ;;  %15749 = vmatpush3.bf16.msra.mxu0 %v17820_v19  ;;  %v17822_v19 = vld [vmem:[%s22327_s5] sm:$0xff]  }
  0x50   : > { %15750 = vmatprep.subr.bf16.mxu0 %v17821_v22 }
  0x52   : > { %15775 = vmatpush3.bf16.msra.mxu1 %v17814_v16 }
  0x53   : > { %15751 = vmatpush3.bf16.msra.mxu0 %v17821_v22  ;;  %v17825_v22 = vld [vmem:[%s22327_s5 + $0x18] sm:$0xff]  }
  0x54   : > { %15784 = vmatprep.subr.bf16.mxu0 %v17822_v19 }
  0x55   : > { %15777 = vmatmul.mubr.bf16.vlgmr.msra.gmra.mrb[0].mxu1 %v19041_v23 }
  0x56   : > { %15780 = vmatprep.mubr.bf16.mxu1 %v19043_v24  ;;  %15753 = vmatmul.mubr.bf16.vlgmr.msra.gmra.mrb[0].mxu0 %v19041_v23 }
  0x57   : > { %15756 = vmatprep.mubr.bf16.mxu0 %v19043_v24  ;;  %15785 = vmatpush3.bf16.msra.mxu0 %v17822_v19 }
  0x58   : > { %15786 = vmatprep.subr.bf16.mxu0 %v17823_v20 }
  0x5b   : > { %15787 = vmatpush3.bf16.msra.mxu0 %v17823_v20 }
  0x5c   : > { %15788 = vmatprep.subr.bf16.mxu0 %v17824_v21 }
  0x5d   : > { %15781 = vmatmul.mubr.bf16.gmra.mrb[4].mxu1 %v19049_v27 }
  0x5e   : > { %15757 = vmatmul.mubr.bf16.gmra.mrb[4].mxu0 %v19049_v27 }
  0x5f   : > { %15800 = vmatprep.mubr.bf16.mxu0 %v19006_v9  ;;  %15789 = vmatpush3.bf16.msra.mxu0 %v17824_v21 }
  0x60   : > { %15790 = vmatprep.subr.bf16.mxu0 %v17825_v22 }
  0x63   : > { %15791 = vmatpush3.bf16.msra.mxu0 %v17825_v22 }
  0x64   : > { %15792 = vmatprep.subr.bf16.mxu0 %v17826_v25 }
  0x67   : > { %15793 = vmatpush3.bf16.msra.mxu0 %v17826_v25 }
  0x68   : > { %15794 = vmatprep.subr.bf16.mxu0 %v17827_v26 }
  0x6b   : > { %15795 = vmatpush3.bf16.msra.mxu0 %v17827_v26 }
 0x128   : > { %v15778_v29 = vpop.f32.mrb[0].mxu1 }
 0x129   : > { %v634_v30 = vpop.f32.mrb[1].mxu1  ;;  %v643_v32 = vadd.f32 %v15778_v29, %v13359_v28  ;;  %v15754_v40 = vpop.f32.mrb[0].mxu0  ;;  %v17829_v29 = vld [vmem:[%s22327_s5 + $0x38] sm:$0xff]  }
 0x12a   : > { %v15779_v31 = vpop.f32.mrb[2].mxu1  ;;  %v635_v36 = vadd.f32 %v13359_v28, %v634_v30  ;;  %v507_v43 = vadd.f32 %v15754_v40, %v13350_v35  ;;  %v498_v44 = vpop.f32.mrb[1].mxu0  ;;  %v819_v30 = vld [vmem:[%s22329_s7 + $0x10] sm:$0xff] }
 0x12b   : > { %v646_v33 = vadd.f32 %v15779_v31, %v13359_v28  ;;  %v637_v34 = vpop.f32.mrb[3].mxu1  ;;  %v499_v47 = vadd.f32 %v13350_v35, %v498_v44  ;;  %v15755_v48 = vpop.f32.mrb[2].mxu0  ;;  %v817_v31 = vld [vmem:[%s22329_s7] sm:$0xff] }
 0x12c   : > { %v638_v37 = vadd.f32 %v13359_v28, %v637_v34  ;;  %v803_v51 = vmul.f32 0.17677669, %v507_v43  ;;  %v510_v52 = vadd.f32 %v15755_v48, %v13350_v35  ;;  %v501_v53 = vpop.f32.mrb[3].mxu0 }
 0x12d   : > { %v814_v38 = vpack.c.bf16 %v646_v33, %v643_v32  ;;  %v801_v56 = vmul.f32 0.17677669, %v499_v47  ;;  %v502_v57 = vadd.f32 %v13350_v35, %v501_v53  ;;  %v820_v33 = vld [vmem:[%s22329_s7 + $0x18] sm:$0xff] }
 0x12e   : > { %v813_v39 = vpack.c.bf16 %v638_v37, %v635_v36  ;;  %v804_v59 = vmul.f32 0.17677669, %v510_v52  ;;  %v818_v36 = vld [vmem:[%s22329_s7 + $0x8] sm:$0xff] }
 0x12f   : > { %v802_v61 = vmul.f32 0.17677669, %v502_v57  ;;  %v842_v2 = vsel %vm825_vm0, %v814_v38, 0 }
 0x130   : > { %17688 = vmatprep.subr.msk.bf16.mxu1 %vm825_vm0, %v813_v39  ;;  %v839_v41 = vsel %vm825_vm0, %v813_v39, 0  ;;  %v15782_v42 = vpop.f32.mrb[4].mxu1  ;;  %v810_v63 = vpack.c.bf16 %v804_v59, %v803_v51  ;;  %v824_v51 = vld [vmem:[%s22329_s7 + $0x38] sm:$0xff] }
 0x131   : > { %15809 = vmatpush3.bf16.xpose.msra.mxu1 %v839_v41  ;;  %v659_v45 = vadd.f32 %v15782_v42, %v13359_v28  ;;  %v650_v46 = vpop.f32.mrb[5].mxu1  ;;  %v809_v0 = vpack.c.bf16 %v802_v61, %v801_v56  ;;  %v15758_v1 = vpop.f32.mrb[4].mxu0 }
 0x132   : > { %17689 = vmatprep.subr.msk.bf16.mxu1 %vm825_vm0, %v814_v38  ;;  %v651_v49 = vadd.f32 %v13359_v28, %v650_v46  ;;  %v15783_v50 = vpop.f32.mrb[6].mxu1  ;;  %v523_v3 = vadd.f32 %v15758_v1, %v13350_v35  ;;  %v514_v4 = vpop.f32.mrb[5].mxu0  ;;  %v823_v46 = vld [vmem:[%s22329_s7 + $0x30] sm:$0xff]  ;;  %v17833_v1 = vld [vmem:[%s22325_s3 + $0x58] sm:$0xff]  }
 0x133   : > { %v662_v54 = vadd.f32 %v15783_v50, %v13359_v28  ;;  %v653_v55 = vpop.f32.mrb[7].mxu1  ;;  %15816 = vmatprep.mubr.msk.bf16.mxu1 %vm825_vm0, %v809_v0  ;;  %v515_v6 = vadd.f32 %v13350_v35, %v514_v4  ;;  %v15759_v7 = vpop.f32.mrb[6].mxu0  ;;  %v822_v50 = vld [vmem:[%s22329_s7 + $0x28] sm:$0xff]  ;;  %v17832_v0 = vld [vmem:[%s22325_s3 + $0x50] sm:$0xff]  }
 0x134   : > { %v654_v58 = vadd.f32 %v13359_v28, %v653_v55  ;;  %v807_v10 = vmul.f32 0.17677669, %v523_v3  ;;  %v526_v11 = vadd.f32 %v15759_v7, %v13350_v35  ;;  %v517_v12 = vpop.f32.mrb[7].mxu0  ;;  %v17828_v28 = vld [vmem:[%s22327_s5 + $0x30] sm:$0xff]   ;;  %v19167_v3 = vld [vmem:[%s22328_s6] ss:$0 sm:$0xff] }
 0x135   : > { %v816_v60 = vpack.c.bf16 %v662_v54, %v659_v45  ;;  %v805_v13 = vmul.f32 0.17677669, %v515_v6  ;;  %v518_v14 = vadd.f32 %v13350_v35, %v517_v12  ;;  %15796 = vmatprep.subr.bf16.mxu0 %v17828_v28  ;;  %v821_v45 = vld [vmem:[%s22329_s7 + $0x20] sm:$0xff] }
 0x136   : > { %v815_v62 = vpack.c.bf16 %v654_v58, %v651_v49  ;;  %v808_v15 = vmul.f32 0.17677669, %v526_v11  ;;  %15797 = vmatpush3.bf16.msra.mxu0 %v17828_v28 }
 0x137   : > { %v848_v5 = vsel %vm825_vm0, %v816_v60, 0  ;;  %v806_v16 = vmul.f32 0.17677669, %v518_v14  ;;  %15798 = vmatprep.subr.bf16.mxu0 %v17829_v29 }
 0x138   : > { %v845_v8 = vsel %vm825_vm0, %v815_v62, 0  ;;  %v812_v17 = vpack.c.bf16 %v808_v15, %v807_v10 }
 0x139   : > { %15811 = vmatpush3.bf16.xpose.msra.mxu1 %v842_v2  ;;  %v811_v18 = vpack.c.bf16 %v806_v16, %v805_v13  ;;  %v17834_v2 = vld [vmem:[%s22325_s3 + $0x60] sm:$0xff]  }
 0x13a   : > { %17690 = vmatprep.subr.msk.bf16.mxu1 %vm825_vm0, %v815_v62  ;;  %15799 = vmatpush3.bf16.msra.mxu0 %v17829_v29  ;;  %v17830_v62 = vld [vmem:[%s22325_s3 + $0x40] sm:$0xff]  }
 0x13b   : > { %15864 = vmatprep.subr.bf16.mxu0 %v17830_v62 }
 0x13d   : > { %15801 = vmatmul.mubr.bf16.vlgmr.msra.gmra.mrb[8].mxu0 %v19041_v23 }
 0x13e   : > { %15804 = vmatprep.mubr.bf16.mxu0 %v19043_v24  ;;  %15865 = vmatpush3.bf16.msra.mxu0 %v17830_v62 }
 0x141   : > { %15813 = vmatpush3.bf16.xpose.msra.mxu1 %v845_v8 }
 0x142   : > { %17691 = vmatprep.subr.msk.bf16.mxu1 %vm825_vm0, %v816_v60 }
 0x145   : > { %15805 = vmatmul.mubr.bf16.gmra.mrb[12].mxu0 %v19049_v27 }
 0x146   : > { %15880 = vmatprep.mubr.bf16.mxu0 %v19006_v9 }
 0x149   : > { %15815 = vmatpush3.bf16.xpose.msra.mxu1 %v848_v5 }
 0x150   : > { %15817 = vmatmul.mubr.msk.bf16.vlgmr.msra.gmra.mrb[8].mxu1 %vm825_vm0, %v810_v63  ;;  %v17831_v63 = vld [vmem:[%s22325_s3 + $0x48] sm:$0xff]  }
 0x151   : > { %15820 = vmatprep.mubr.msk.bf16.mxu1 %vm825_vm0, %v811_v18  ;;  %15866 = vmatprep.subr.bf16.mxu0 %v17831_v63 }
 0x152   : > { %15867 = vmatpush3.bf16.msra.mxu0 %v17831_v63 }
 0x153   : > { %15868 = vmatprep.subr.bf16.mxu0 %v17832_v0 }
 0x156   : > { %15869 = vmatpush3.bf16.msra.mxu0 %v17832_v0 }
 0x157   : > { %15870 = vmatprep.subr.bf16.mxu0 %v17833_v1 }
 0x158   : > { %15821 = vmatmul.mubr.msk.bf16.gmra.mrb[12].mxu1 %vm825_vm0, %v812_v17 }
 0x15a   : > { %15871 = vmatpush3.bf16.msra.mxu0 %v17833_v1 }
 0x15b   : > { %15872 = vmatprep.subr.bf16.mxu0 %v17834_v2 }
 0x15e   : > { %15873 = vmatpush3.bf16.msra.mxu0 %v17834_v2 }
 0x210   : > { %v15802_v4 = vpop.f32.mrb[8].mxu0 }
 0x211   : > { %v770_v5 = vpop.f32.mrb[9].mxu0 }
 0x212   : > { %v771_v6 = vadd.f32 %v19167_v3, %v770_v5  ;;  %v15803_v7 = vpop.f32.mrb[10].mxu0  ;;  %v17836_v5 = vld [vmem:[%s22325_s3 + $0x70] sm:$0xff]  }
 0x213   : > { %v773_v8 = vpop.f32.mrb[11].mxu0 }
 0x214   : > { %v774_v10 = vadd.f32 %v19167_v3, %v773_v8 }
 0x216   : > { %v1008_v11 = vpack.c.bf16 %v774_v10, %v771_v6 }
 0x218   : > { %v19171_v12 = vpop.f32.mrb[12].mxu0  ;;  %15824 = vmatprep.subr.bf16.mxu1 %v1008_v11 }
 0x219   : > { %v786_v14 = vpop.f32.mrb[13].mxu0  ;;  %15825 = vmatpush3.bf16.msra.mxu1 %v1008_v11  ;;  %v795_v1 = vadd.f32 %v19171_v12, %v19167_v3 }
 0x21a   : > { %v787_v62 = vadd.f32 %v19167_v3, %v786_v14 }
 0x223   : > { %v15818_v32 = vpop.f32.mrb[8].mxu1 }
 0x224   : > { %v884_v34 = vpop.f32.mrb[9].mxu1  ;;  %v19108_v35 = vadd.f32 %v15818_v32, %v819_v30 }
 0x225   : > { %v15819_v37 = vpop.f32.mrb[10].mxu1  ;;  %v19113_v38 = vadd.f32 %v884_v34, %v817_v31 }
 0x226   : > { %v887_v39 = vpop.f32.mrb[11].mxu1  ;;  %v922_v40 = vsel %vm915_vm1, %v19108_v35, -inf  ;;  %v19117_v41 = vadd.f32 %v15819_v37, %v820_v33 }
 0x227   : > { %923 = vmax.xlane.f32.xlu1 %v922_v40  ;;  %v916_v42 = vsel %vm915_vm1, %v19113_v38, -inf  ;;  %v19121_v43 = vadd.f32 %v887_v39, %v818_v36 }
 0x228   : > { %917 = vmax.xlane.f32.xlu0 %v916_v42  ;;  %v925_v44 = vsel %vm915_vm1, %v19117_v41, -inf }
 0x229   : > { %v919_v48 = vsel %vm915_vm1, %v19121_v43, -inf }
 0x22b   : > { %926 = vmax.xlane.f32.xlu1 %v925_v44  ;;  %v15822_v47 = vpop.f32.mrb[12].mxu1 }
 0x22c   : > { %v900_v49 = vpop.f32.mrb[13].mxu1  ;;  %920 = vmax.xlane.f32.xlu0 %v919_v48  ;;  %v19139_v54 = vadd.f32 %v15822_v47, %v823_v46 }
 0x22d   : > { %v15823_v52 = vpop.f32.mrb[14].mxu1  ;;  %v901_v53 = vadd.f32 %v900_v49, %v821_v45 }
 0x22e   : > { %v903_v55 = vpop.f32.mrb[15].mxu1  ;;  %v19142_v58 = vadd.f32 %v15823_v52, %v824_v51  ;;  %v934_v60 = vsel %vm915_vm1, %v19139_v54, -inf }
 0x22f   : > { %v928_v56 = vsel %vm915_vm1, %v901_v53, -inf  ;;  %v904_v57 = vadd.f32 %v903_v55, %v822_v50 }
 0x230   : > { %929 = vmax.xlane.f32.xlu0 %v928_v56  ;;  %v937_v61 = vsel %vm915_vm1, %v19142_v58, -inf }
 0x231   : > { %v931_v59 = vsel %vm915_vm1, %v904_v57, -inf }
 0x232   : > { %932 = vmax.xlane.f32.xlu1 %v931_v59 }
 0x234   : > { %935 = vmax.xlane.f32.xlu0 %v934_v60  ;;  %v17835_v60 = vld [vmem:[%s22325_s3 + $0x68] sm:$0xff]  }
 0x235   : > { %15874 = vmatprep.subr.bf16.mxu0 %v17835_v60 }
 0x236   : > { %938 = vmax.xlane.f32.xlu1 %v937_v61  ;;  %15875 = vmatpush3.bf16.msra.mxu0 %v17835_v60 }
 0x237   : > { %15876 = vmatprep.subr.bf16.mxu0 %v17836_v5 }
 0x23a   : > { %15877 = vmatpush3.bf16.msra.mxu0 %v17836_v5 }
 0x2b4   : > { %v924_v13 = vpop.xlane.xlu1 %923 }
 0x2b5   : > { %v942_v15 = vsub.f32 %v19108_v35, %v924_v13  ;;  %v918_v16 = vpop.xlane.xlu0 %917 }
 0x2b6   : > { %v940_v17 = vsub.f32 %v19113_v38, %v918_v16 }
 0x2b7   : > { %v952_v18 = vmul.f32 1.442695, %v942_v15 }
 0x2b8   : > { %v948_v19 = vmul.f32 1.442695, %v940_v17  ;;  %v927_v20 = vpop.xlane.xlu1 %926 }
 0x2b9   : > { %v943_v21 = vsub.f32 %v19117_v41, %v927_v20  ;;  %v921_v22 = vpop.xlane.xlu0 %920 }
 0x2ba   : > { %18222 = vpow2.f32 %v948_v19  ;;  %v941_v25 = vsub.f32 %v19121_v43, %v921_v22 }
 0x2bb   : > { %18224 = vpow2.f32 %v952_v18  ;;  %v954_v26 = vmul.f32 1.442695, %v943_v21 }
 0x2bc   : > { %v950_v28 = vmul.f32 1.442695, %v941_v25 }
 0x2bd   : > { %v930_v29 = vpop.xlane.xlu0 %929 }
 0x2be   : > { %18226 = vpow2.f32 %v950_v28  ;;  %v944_v30 = vsub.f32 %v901_v53, %v930_v29  ;;  %v779_v53 = vadd.f32 %v15802_v4, %v19167_v3 }
 0x2bf   : > { %v933_v31 = vpop.xlane.xlu1 %932  ;;  %18228 = vpow2.f32 %v954_v26 }
 0x2c0   : > { %v956_v32 = vmul.f32 1.442695, %v944_v30  ;;  %v945_v33 = vsub.f32 %v904_v57, %v933_v31  ;;  %v17839_v31 = vld [vmem:[%s22323_s1 + $0x48] sm:$0xff]  }
 0x2c1   : > { %v936_v34 = vpop.xlane.xlu0 %935 }
 0x2c2   : > { %18230 = vpow2.f32 %v956_v32  ;;  %v958_v35 = vmul.f32 1.442695, %v945_v33  ;;  %v946_v36 = vsub.f32 %v19139_v54, %v936_v34  ;;  %v782_v54 = vadd.f32 %v15803_v7, %v19167_v3  ;;  %v17837_v7 = vld [vmem:[%s22325_s3 + $0x78] sm:$0xff]  }
 0x2c3   : > { %v939_v37 = vpop.xlane.xlu1 %938  ;;  %15878 = vmatprep.subr.bf16.mxu0 %v17837_v7 }
 0x2c4   : > { %v19178_v38 = vpop.eup %18222  ;;  %18232 = vpow2.f32 %v958_v35  ;;  %v960_v39 = vmul.f32 1.442695, %v946_v36  ;;  %v947_v40 = vsub.f32 %v19142_v58, %v939_v37  ;;  %v15807_v58 = vpop.f32.mrb[14].mxu0  ;;  %v1009_v59 = vpack.c.bf16 %v782_v54, %v779_v53  ;;  %15879 = vmatpush3.bf16.msra.mxu0 %v17837_v7  ;;  %v17840_v37 = vld [vmem:[%s22323_s1 + $0x50] sm:$0xff]  }
 0x2c5   : > { %v964_v41 = vsel %vm915_vm1, %v19178_v38, 0.0  ;;  %v19183_v42 = vpop.eup %18224  ;;  %v789_v63 = vpop.f32.mrb[15].mxu0  ;;  %v798_v2 = vadd.f32 %v15807_v58, %v19167_v3 }
 0x2c6   : > { %18234 = vpow2.f32 %v960_v39  ;;  %v962_v43 = vmul.f32 1.442695, %v947_v40  ;;  %965 = vadd.xlane.f32.xlu0 %v964_v41  ;;  %v970_v45 = vsel %vm915_vm1, %v19183_v42, 0.0  ;;  %v790_v0 = vadd.f32 %v19167_v3, %v789_v63  ;;  %15826 = vmatprep.subr.bf16.mxu1 %v1009_v59  ;;  %v17838_v3 = vld [vmem:[%s22323_s1 + $0x40] sm:$0xff]  }
 0x2c7   : > { %15827 = vmatpush3.bf16.msra.mxu1 %v1009_v59  ;;  %v1011_v6 = vpack.c.bf16 %v798_v2, %v795_v1  ;;  %15881 = vmatmul.mubr.bf16.vlgmr.msra.gmra.mrb[16].mxu0 %v19041_v23 }
 0x2c8   : > { %v19185_v44 = vpop.eup %18226  ;;  %18236 = vpow2.f32 %v962_v43  ;;  %v1010_v4 = vpack.c.bf16 %v790_v0, %v787_v62  ;;  %15884 = vmatprep.mubr.bf16.mxu0 %v19043_v24  ;;  %v17842_v43 = vld [vmem:[%s22323_s1 + $0x60] sm:$0xff]  }
 0x2c9   : > { %v967_v46 = vsel %vm915_vm1, %v19185_v44, 0.0  ;;  %v19191_v47 = vpop.eup %18228 }
 0x2ca   : > { %971 = vadd.xlane.f32.xlu0 %v970_v45  ;;  %968 = vadd.xlane.f32.xlu1 %v967_v46  ;;  %v973_v49 = vsel %vm915_vm1, %v19191_v47, 0.0  ;;  %v17844_v45 = vld [vmem:[%s22323_s1 + $0x70] sm:$0xff]   ;;  %v17845_v46 = vld [vmem:[%s22323_s1 + $0x78] sm:$0xff]  }
 0x2cb   : > { %15828 = vmatprep.subr.bf16.mxu1 %v1010_v4 }
 0x2cc   : > { %v19193_v48 = vpop.eup %18230  ;;  %15829 = vmatpush3.bf16.msra.mxu1 %v1010_v4 }
 0x2cd   : > { %v976_v50 = vsel %vm915_vm1, %v19193_v48, 0.0  ;;  %15830 = vmatprep.subr.bf16.mxu1 %v1011_v6 }
 0x2ce   : > { %v19199_v51 = vpop.eup %18232  ;;  %974 = vadd.xlane.f32.xlu1 %v973_v49  ;;  %977 = vadd.xlane.f32.xlu0 %v976_v50 }
 0x2cf   : > { %v979_v55 = vsel %vm915_vm1, %v19199_v51, 0.0  ;;  %15885 = vmatmul.mubr.bf16.gmra.mrb[20].mxu0 %v19049_v27 }
 0x2d0   : > { %v19201_v52 = vpop.eup %18234  ;;  %15831 = vmatpush3.bf16.msra.mxu1 %v1011_v6 }
 0x2d1   : > { %v982_v56 = vsel %vm915_vm1, %v19201_v52, 0.0  ;;  %15840 = vmatprep.subr.bf16.mxu1 %v17838_v3 }
 0x2d2   : > { %v19209_v57 = vpop.eup %18236  ;;  %980 = vadd.xlane.f32.xlu1 %v979_v55  ;;  %983 = vadd.xlane.f32.xlu0 %v982_v56 }
 0x2d3   : > { %v985_v61 = vsel %vm915_vm1, %v19209_v57, 0.0 }
 0x2d6   : > { %986 = vadd.xlane.f32.xlu1 %v985_v61 }
 0x353   : > { %v966_v8 = vpop.xlane.xlu0 %965 }
 0x354   : > { %18238 = vrcp.f32 %v966_v8 }
 0x357   : > { %v969_v10 = vpop.xlane.xlu1 %968  ;;  %v972_v11 = vpop.xlane.xlu0 %971 }
 0x358   : > { %18240 = vrcp.f32 %v969_v10 }
 0x359   : > { %18242 = vrcp.f32 %v972_v11 }
 0x35b   : > { %v975_v12 = vpop.xlane.xlu1 %974  ;;  %v978_v13 = vpop.xlane.xlu0 %977 }
 0x35c   : > { %18244 = vrcp.f32 %v975_v12 }
 0x35d   : > { %18246 = vrcp.f32 %v978_v13 }
 0x35e   : > { %v18239_v16 = vpop.eup %18238 }
 0x35f   : > { %v981_v14 = vpop.xlane.xlu1 %980  ;;  %v984_v15 = vpop.xlane.xlu0 %983  ;;  %v989_v19 = vmul.f32 %v18239_v16, %v19178_v38 }
 0x360   : > { %18248 = vrcp.f32 %v981_v14 }
 0x361   : > { %18250 = vrcp.f32 %v984_v15 }
 0x362   : > { %v18241_v17 = vpop.eup %18240 }
 0x363   : > { %v987_v18 = vpop.xlane.xlu1 %986  ;;  %v991_v20 = vmul.f32 %v18241_v17, %v19185_v44  ;;  %v18243_v21 = vpop.eup %18242  ;;  %v17843_v44 = vld [vmem:[%s22323_s1 + $0x68] sm:$0xff]  }
 0x364   : > { %18252 = vrcp.f32 %v987_v18  ;;  %v993_v26 = vmul.f32 %v18243_v21, %v19183_v42  ;;  %v17841_v42 = vld [vmem:[%s22323_s1 + $0x58] sm:$0xff]   ;;  %v13401_v21 = vld [vmem:[#allocation2 + $0x1] ss:$0 sm:$0xff] }
 0x365   : > { %v1004_v22 = vpack.c.bf16 %v991_v20, %v989_v19 }
 0x366   : > { %v18245_v25 = vpop.eup %18244 }
 0x367   : > { %v995_v28 = vmul.f32 %v18245_v25, %v19191_v47  ;;  %15832 = vmatprep.mubr.msk.bf16.mxu1 %vm915_vm1, %v1004_v22  ;;  %v18247_v29 = vpop.eup %18246  ;;  %v13427_v47 = vld [vmem:[%s22326_s4 + $0x1] ss:$0 sm:$0xff] }
 0x368   : > { %v997_v33 = vmul.f32 %v18247_v29, %v19193_v48 }
 0x369   : > { %v1005_v30 = vpack.c.bf16 %v995_v28, %v993_v26 }
 0x36a   : > { %v18249_v32 = vpop.eup %18248 }
 0x36b   : > { %15833 = vmatmul.mubr.msk.bf16.vlgmr.msra.gmra.mrb[16].mxu1 %vm915_vm1, %v1005_v30  ;;  %v999_v34 = vmul.f32 %v18249_v32, %v19199_v51  ;;  %v18251_v35 = vpop.eup %18250 }
 0x36c   : > { %15841 = vmatpush3.bf16.msra.mxu1 %v17838_v3  ;;  %v1001_v39 = vmul.f32 %v18251_v35, %v19201_v52 }
 0x36d   : > { %15842 = vmatprep.subr.bf16.mxu1 %v17839_v31  ;;  %v1006_v36 = vpack.c.bf16 %v999_v34, %v997_v33 }
 0x36e   : > { %v18253_v38 = vpop.eup %18252 }
 0x36f   : > { %15836 = vmatprep.mubr.msk.bf16.mxu1 %vm915_vm1, %v1006_v36  ;;  %v1003_v40 = vmul.f32 %v18253_v38, %v19209_v57 }
 0x370   : > { %15843 = vmatpush3.bf16.msra.mxu1 %v17839_v31 }
 0x371   : > { %15844 = vmatprep.subr.bf16.mxu1 %v17840_v37  ;;  %v1007_v41 = vpack.c.bf16 %v1003_v40, %v1001_v39 }
 0x373   : > { %15837 = vmatmul.mubr.msk.bf16.gmra.mrb[20].mxu1 %vm915_vm1, %v1007_v41 }
 0x374   : > { %15845 = vmatpush3.bf16.msra.mxu1 %v17840_v37  ;;  %15856 = vmatprep.mubr.bf16.mxu1 %v19006_v9 }
 0x375   : > { %15846 = vmatprep.subr.bf16.mxu1 %v17841_v42 }
 0x378   : > { %15847 = vmatpush3.bf16.msra.mxu1 %v17841_v42 }
 0x379   : > { %15848 = vmatprep.subr.bf16.mxu1 %v17842_v43 }
 0x37c   : > { %15849 = vmatpush3.bf16.msra.mxu1 %v17842_v43 }
 0x37d   : > { %15850 = vmatprep.subr.bf16.mxu1 %v17843_v44 }
 0x380   : > { %15851 = vmatpush3.bf16.msra.mxu1 %v17843_v44 }
 0x381   : > { %15852 = vmatprep.subr.bf16.mxu1 %v17844_v45 }
 0x384   : > { %15853 = vmatpush3.bf16.msra.mxu1 %v17844_v45 }
 0x385   : > { %15854 = vmatprep.subr.bf16.mxu1 %v17845_v46 }
 0x388   : > { %15855 = vmatpush3.bf16.msra.mxu1 %v17845_v46 }
 0x38b   : > { %15857 = vmatmul.mubr.bf16.vlgmr.msra.gmra.mrb[24].mxu1 %v19041_v23 }
 0x38c   : > { %15860 = vmatprep.mubr.bf16.mxu1 %v19043_v24 }
 0x393   : > { %15861 = vmatmul.mubr.bf16.gmra.mrb[28].mxu1 %v19049_v27 }
 0x394   : > { %15904 = vmatprep.mubr.bf16.mxu1 %v19006_v9 }
 0x39a   : > { %v15882_v48 = vpop.f32.mrb[16].mxu0 }
 0x39b   : > { %v1351_v49 = vadd.f32 %v15882_v48, %v13427_v47  ;;  %v1342_v50 = vpop.f32.mrb[17].mxu0 }
 0x39c   : > { %v1343_v51 = vadd.f32 %v13427_v47, %v1342_v50  ;;  %v15883_v52 = vpop.f32.mrb[18].mxu0 }
 0x39d   : > { %v1354_v53 = vadd.f32 %v15883_v52, %v13427_v47  ;;  %v1345_v54 = vpop.f32.mrb[19].mxu0 }
 0x39e   : > { %v1346_v55 = vadd.f32 %v13427_v47, %v1345_v54  ;;  %v17847_v54 = vld [vmem:[%s22327_s5 + $0x48] sm:$0xff]  }
 0x39f   : > { %v1524_v56 = vpack.c.bf16 %v1354_v53, %v1351_v49  ;;  %v17846_v53 = vld [vmem:[%s22327_s5 + $0x40] sm:$0xff]  }
 0x3a0   : > { %v1523_v57 = vpack.c.bf16 %v1346_v55, %v1343_v51  ;;  %15888 = vmatprep.subr.bf16.mxu1 %v17846_v53  ;;  %v17848_v55 = vld [vmem:[%s22327_s5 + $0x50] sm:$0xff]  }
 0x3a1   : > { %v1552_v62 = vsel %vm825_vm0, %v1524_v56, 0  ;;  %15889 = vmatpush3.bf16.msra.mxu1 %v17846_v53 }
 0x3a2   : > { %17692 = vmatprep.subr.msk.bf16.mxu0 %vm825_vm0, %v1523_v57  ;;  %v1549_v58 = vsel %vm825_vm0, %v1523_v57, 0  ;;  %v15886_v59 = vpop.f32.mrb[20].mxu0  ;;  %15890 = vmatprep.subr.bf16.mxu1 %v17847_v54  ;;  %v17850_v57 = vld [vmem:[%s22327_s5 + $0x60] sm:$0xff]  }
 0x3a3   : > { %15913 = vmatpush3.bf16.xpose.msra.mxu0 %v1549_v58  ;;  %v1367_v60 = vadd.f32 %v15886_v59, %v13427_v47  ;;  %v1358_v61 = vpop.f32.mrb[21].mxu0  ;;  %v17851_v58 = vld [vmem:[%s22327_s5 + $0x68] sm:$0xff]   ;;  %v17852_v59 = vld [vmem:[%s22327_s5 + $0x70] sm:$0xff]  }
 0x3a4   : > { %17693 = vmatprep.subr.msk.bf16.mxu0 %vm825_vm0, %v1524_v56  ;;  %v15887_v63 = vpop.f32.mrb[22].mxu0  ;;  %v1359_v0 = vadd.f32 %v13427_v47, %v1358_v61  ;;  %v17849_v56 = vld [vmem:[%s22327_s5 + $0x58] sm:$0xff]   ;;  %v13462_v61 = vld [vmem:[%s22329_s7 + $0x40] sm:$0xff] }
 0x3a5   : > { %v1370_v1 = vadd.f32 %v15887_v63, %v13427_v47  ;;  %v1361_v2 = vpop.f32.mrb[23].mxu0  ;;  %15891 = vmatpush3.bf16.msra.mxu1 %v17847_v54 }
 0x3a6   : > { %v1362_v5 = vadd.f32 %v13427_v47, %v1361_v2  ;;  %15892 = vmatprep.subr.bf16.mxu1 %v17848_v55 }
 0x3a7   : > { %v1526_v4 = vpack.c.bf16 %v1370_v1, %v1367_v60  ;;  %v17853_v60 = vld [vmem:[%s22327_s5 + $0x78] sm:$0xff]   ;;  %v13464_v1 = vld [vmem:[%s22329_s7 + $0x50] sm:$0xff] }
 0x3a8   : > { %v1525_v6 = vpack.c.bf16 %v1362_v5, %v1359_v0  ;;  %v13463_v0 = vld [vmem:[%s22329_s7 + $0x48] sm:$0xff] }
 0x3a9   : > { %v1558_v3 = vsel %vm825_vm0, %v1526_v4, 0  ;;  %15893 = vmatpush3.bf16.msra.mxu1 %v17848_v55 }
 0x3aa   : > { %v1555_v7 = vsel %vm825_vm0, %v1525_v6, 0  ;;  %15894 = vmatprep.subr.bf16.mxu1 %v17849_v56 }
 0x3ab   : > { %15915 = vmatpush3.bf16.xpose.msra.mxu0 %v1552_v62 }
 0x3ac   : > { %17694 = vmatprep.subr.msk.bf16.mxu0 %vm825_vm0, %v1525_v6  ;;  %v13465_v6 = vld [vmem:[%s22329_s7 + $0x58] sm:$0xff] }
 0x3ad   : > { %15895 = vmatpush3.bf16.msra.mxu1 %v17849_v56 }
 0x3ae   : > { %15896 = vmatprep.subr.bf16.mxu1 %v17850_v57 }
 0x3b1   : > { %15897 = vmatpush3.bf16.msra.mxu1 %v17850_v57 }
 0x3b2   : > { %15898 = vmatprep.subr.bf16.mxu1 %v17851_v58 }
 0x3b3   : > { %15917 = vmatpush3.bf16.xpose.msra.mxu0 %v1555_v7 }
 0x3b4   : > { %17695 = vmatprep.subr.msk.bf16.mxu0 %vm825_vm0, %v1526_v4 }
 0x3b5   : > { %15899 = vmatpush3.bf16.msra.mxu1 %v17851_v58 }
 0x3b6   : > { %15900 = vmatprep.subr.bf16.mxu1 %v17852_v59 }
 0x3b9   : > { %15901 = vmatpush3.bf16.msra.mxu1 %v17852_v59 }
 0x3ba   : > { %15902 = vmatprep.subr.bf16.mxu1 %v17853_v60 }
 0x3bb   : > { %15919 = vmatpush3.bf16.xpose.msra.mxu0 %v1558_v3 }
 0x3bd   : > { %15903 = vmatpush3.bf16.msra.mxu1 %v17853_v60 }
 0x3c0   : > { %15905 = vmatmul.mubr.bf16.vlgmr.msra.gmra.mrb[32].mxu1 %v19041_v23 }
 0x3c1   : > { %15908 = vmatprep.mubr.bf16.mxu1 %v19043_v24 }
 0x3c8   : > { %15909 = vmatmul.mubr.bf16.gmra.mrb[36].mxu1 %v19049_v27 }
 0x43e   : > { %v19282_v8 = vpop.f32.mrb[16].mxu1 }
 0x43f   : > { %v19284_v10 = vpop.f32.mrb[17].mxu1 }
 0x440   : > { %v19286_v11 = vpop.f32.mrb[18].mxu1 }
 0x441   : > { %v1090_v12 = vpack.c.bf16 %v19286_v11, %v19282_v8  ;;  %v19290_v13 = vpop.f32.mrb[19].mxu1  ;;  %v17862_v8 = vld [vmem:[%s22325_s3 + $0xa0] sm:$0xff]   ;;  %v17863_v11 = vld [vmem:[%s22325_s3 + $0xa8] sm:$0xff]  }
 0x442   : > { %v1089_v14 = vpack.c.bf16 %v19290_v13, %v19284_v10  ;;  %v17860_v10 = vld [vmem:[%s22325_s3 + $0x90] sm:$0xff]   ;;  %v17861_v13 = vld [vmem:[%s22325_s3 + $0x98] sm:$0xff]  }
 0x446   : > { %v19294_v15 = vpop.f32.mrb[20].mxu1 }
 0x447   : > { %v19296_v16 = vpop.f32.mrb[21].mxu1 }
 0x448   : > { %v19298_v17 = vpop.f32.mrb[22].mxu1 }
 0x449   : > { %v1092_v18 = vpack.c.bf16 %v19298_v17, %v19294_v15  ;;  %v19302_v19 = vpop.f32.mrb[23].mxu1  ;;  %v13510_v15 = vld [vmem:[#allocation2 + $0x2] ss:$0 sm:$0xff] }
 0x44a   : > { %v1091_v20 = vpack.c.bf16 %v19302_v19, %v19296_v16 }
 0x45e   : > { %v15858_v22 = vpop.f32.mrb[24].mxu1 }
 0x45f   : > { %v1213_v25 = vadd.f32 %v15858_v22, %v13401_v21  ;;  %v1204_v26 = vpop.f32.mrb[25].mxu1 }
 0x460   : > { %v1205_v28 = vadd.f32 %v13401_v21, %v1204_v26  ;;  %v15859_v29 = vpop.f32.mrb[26].mxu1  ;;  %v13466_v26 = vld [vmem:[%s22329_s7 + $0x60] sm:$0xff] }
 0x461   : > { %v1216_v30 = vadd.f32 %v15859_v29, %v13401_v21  ;;  %v1207_v31 = vpop.f32.mrb[27].mxu1  ;;  %v1513_v33 = vmul.f32 0.17677669, %v1213_v25 }
 0x462   : > { %v1208_v32 = vadd.f32 %v13401_v21, %v1207_v31  ;;  %v1511_v35 = vmul.f32 0.17677669, %v1205_v28  ;;  %v13467_v31 = vld [vmem:[%s22329_s7 + $0x68] sm:$0xff] }
 0x463   : > { %v1514_v34 = vmul.f32 0.17677669, %v1216_v30 }
 0x464   : > { %v1512_v36 = vmul.f32 0.17677669, %v1208_v32  ;;  %v13468_v32 = vld [vmem:[%s22329_s7 + $0x70] sm:$0xff] }
 0x465   : > { %v1520_v37 = vpack.c.bf16 %v1514_v34, %v1513_v33 }
 0x466   : > { %v1519_v38 = vpack.c.bf16 %v1512_v36, %v1511_v35  ;;  %v15862_v39 = vpop.f32.mrb[28].mxu1 }
 0x467   : > { %v1229_v40 = vadd.f32 %v15862_v39, %v13401_v21  ;;  %v1220_v41 = vpop.f32.mrb[29].mxu1 }
 0x468   : > { %v1221_v42 = vadd.f32 %v13401_v21, %v1220_v41  ;;  %v15863_v43 = vpop.f32.mrb[30].mxu1  ;;  %15920 = vmatprep.mubr.msk.bf16.mxu0 %vm825_vm0, %v1519_v38 }
 0x469   : > { %v1232_v44 = vadd.f32 %v15863_v43, %v13401_v21  ;;  %v1223_v45 = vpop.f32.mrb[31].mxu1  ;;  %15921 = vmatmul.mubr.msk.bf16.vlgmr.msra.gmra.mrb[24].mxu0 %vm825_vm0, %v1520_v37  ;;  %v1517_v47 = vmul.f32 0.17677669, %v1229_v40  ;;  %v13469_v37 = vld [vmem:[%s22329_s7 + $0x78] sm:$0xff] }
 0x46a   : > { %v1224_v46 = vadd.f32 %v13401_v21, %v1223_v45  ;;  %v1515_v49 = vmul.f32 0.17677669, %v1221_v42  ;;  %v19372_v45 = vld [vmem:[%s22328_s6 + $0x1] ss:$0 sm:$0xff] }
 0x46b   : > { %v1518_v48 = vmul.f32 0.17677669, %v1232_v44 }
 0x46c   : > { %v1516_v50 = vmul.f32 0.17677669, %v1224_v46 }
 0x46d   : > { %v1522_v51 = vpack.c.bf16 %v1518_v48, %v1517_v47 }
 0x46e   : > { %v1521_v52 = vpack.c.bf16 %v1516_v50, %v1515_v49 }
 0x470   : > { %15924 = vmatprep.mubr.msk.bf16.mxu0 %vm825_vm0, %v1521_v52 }
 0x471   : > { %15925 = vmatmul.mubr.msk.bf16.gmra.mrb[28].mxu0 %vm825_vm0, %v1522_v51 }
 0x493   : > { %v15906_v46 = vpop.f32.mrb[32].mxu1 }
 0x494   : > { %v1480_v47 = vpop.f32.mrb[33].mxu1 }
 0x495   : > { %v1481_v48 = vadd.f32 %v19372_v45, %v1480_v47  ;;  %v15907_v49 = vpop.f32.mrb[34].mxu1  ;;  %v1489_v47 = vadd.f32 %v15906_v46, %v19372_v45 }
 0x496   : > { %v1483_v50 = vpop.f32.mrb[35].mxu1 }
 0x497   : > { %v1484_v51 = vadd.f32 %v19372_v45, %v1483_v50 }
 0x499   : > { %v1717_v52 = vpack.c.bf16 %v1484_v51, %v1481_v48  ;;  %v1492_v48 = vadd.f32 %v15907_v49, %v19372_v45 }
 0x49b   : > { %v19376_v53 = vpop.f32.mrb[36].mxu1  ;;  %15928 = vmatprep.subr.bf16.mxu1 %v1717_v52 }
 0x49c   : > { %v1496_v54 = vpop.f32.mrb[37].mxu1  ;;  %15929 = vmatpush3.bf16.msra.mxu1 %v1717_v52  ;;  %v1505_v46 = vadd.f32 %v19376_v53, %v19372_v45 }
 0x49d   : > { %v19378_v56 = vpop.f32.mrb[38].mxu1 }
 0x49e   : > { %v1499_v58 = vpop.f32.mrb[39].mxu1  ;;  %v1508_v49 = vadd.f32 %v19378_v56, %v19372_v45 }
 0x53c   : > { %v15922_v62 = vpop.f32.mrb[24].mxu0 }
 0x53d   : > { %v1594_v63 = vpop.f32.mrb[25].mxu0  ;;  %v1603_v21 = vadd.f32 %v15922_v62, %v13464_v1 }
 0x53e   : > { %v15923_v2 = vpop.f32.mrb[26].mxu0  ;;  %v1595_v4 = vadd.f32 %v13462_v61, %v1594_v63 }
 0x53f   : > { %v1597_v5 = vpop.f32.mrb[27].mxu0  ;;  %v1606_v25 = vadd.f32 %v15923_v2, %v13465_v6  ;;  %v1631_v29 = vsel %vm915_vm1, %v1603_v21, -inf }
 0x540   : > { %v1625_v7 = vsel %vm915_vm1, %v1595_v4, -inf  ;;  %v1598_v3 = vadd.f32 %v13463_v0, %v1597_v5 }
 0x541   : > { %1626 = vmax.xlane.f32.xlu0 %v1625_v7  ;;  %v1634_v34 = vsel %vm915_vm1, %v1606_v25, -inf }
 0x542   : > { %v1628_v22 = vsel %vm915_vm1, %v1598_v3, -inf }
 0x543   : > { %1629 = vmax.xlane.f32.xlu1 %v1628_v22 }
 0x544   : > { %v15926_v28 = vpop.f32.mrb[28].mxu0 }
 0x545   : > { %v1610_v30 = vpop.f32.mrb[29].mxu0  ;;  %1632 = vmax.xlane.f32.xlu0 %v1631_v29  ;;  %v1619_v40 = vadd.f32 %v15926_v28, %v13468_v32 }
 0x546   : > { %v15927_v33 = vpop.f32.mrb[30].mxu0  ;;  %v1611_v35 = vadd.f32 %v13466_v26, %v1610_v30 }
 0x547   : > { %v1613_v36 = vpop.f32.mrb[31].mxu0  ;;  %1635 = vmax.xlane.f32.xlu1 %v1634_v34  ;;  %v1622_v42 = vadd.f32 %v15927_v33, %v13469_v37  ;;  %v1643_v43 = vsel %vm915_vm1, %v1619_v40, -inf }
 0x548   : > { %v1637_v38 = vsel %vm915_vm1, %v1611_v35, -inf  ;;  %v1614_v39 = vadd.f32 %v13467_v31, %v1613_v36 }
 0x549   : > { %1638 = vmax.xlane.f32.xlu0 %v1637_v38  ;;  %v1646_v44 = vsel %vm915_vm1, %v1622_v42, -inf }
 0x54a   : > { %v1640_v41 = vsel %vm915_vm1, %v1614_v39, -inf }
 0x54b   : > { %1641 = vmax.xlane.f32.xlu1 %v1640_v41 }
 0x54d   : > { %1644 = vmax.xlane.f32.xlu0 %v1643_v43 }
 0x54f   : > { %1647 = vmax.xlane.f32.xlu1 %v1646_v44 }
 0x5ce   : > { %v1627_v55 = vpop.xlane.xlu0 %1626 }
 0x5cf   : > { %v1649_v57 = vsub.f32 %v1595_v4, %v1627_v55 }
 0x5d0   : > { %v1630_v59 = vpop.xlane.xlu1 %1629 }
 0x5d1   : > { %v1657_v60 = vmul.f32 1.442695, %v1649_v57  ;;  %v1650_v61 = vsub.f32 %v1598_v3, %v1630_v59  ;;  %v1497_v57 = vadd.f32 %v19372_v45, %v1496_v54  ;;  %v1500_v59 = vadd.f32 %v19372_v45, %v1499_v58  ;;  %v17854_v54 = vld [vmem:[%s22330_s8 + $0x10] sm:$0xff]   ;;  %v17855_v58 = vld [vmem:[%s22330_s8 + $0x18] sm:$0xff]  }
 0x5d2   : > { %v1633_v62 = vpop.xlane.xlu0 %1632  ;;  %15944 = vmatprep.subr.bf16.mxu0 %v17854_v54 }
 0x5d3   : > { %18254 = vpow2.f32 %v1657_v60  ;;  %v1659_v63 = vmul.f32 1.442695, %v1650_v61  ;;  %v1651_v0 = vsub.f32 %v1603_v21, %v1633_v62  ;;  %v1718_v60 = vpack.c.bf16 %v1492_v48, %v1489_v47  ;;  %15945 = vmatpush3.bf16.msra.mxu0 %v17854_v54  ;;  %v17870_v47 = vld [vmem:[%s22323_s1 + $0xa0] sm:$0xff]   ;;  %v17871_v48 = vld [vmem:[%s22323_s1 + $0xa8] sm:$0xff]  }
 0x5d4   : > { %v1636_v1 = vpop.xlane.xlu1 %1635  ;;  %v1719_v61 = vpack.c.bf16 %v1500_v59, %v1497_v57  ;;  %v1720_v62 = vpack.c.bf16 %v1508_v49, %v1505_v46  ;;  %15946 = vmatprep.subr.bf16.mxu0 %v17855_v58  ;;  %v17857_v49 = vld [vmem:[%s22330_s8 + $0x8] sm:$0xff]   ;;  %v17858_v54 = vld [vmem:[%s22325_s3 + $0x80] sm:$0xff]  }
 0x5d5   : > { %18256 = vpow2.f32 %v1659_v63  ;;  %v1661_v2 = vmul.f32 1.442695, %v1651_v0  ;;  %v1652_v5 = vsub.f32 %v1606_v25, %v1636_v1  ;;  %15930 = vmatprep.subr.bf16.mxu1 %v1718_v60 }
 0x5d6   : > { %v1639_v6 = vpop.xlane.xlu0 %1638  ;;  %15931 = vmatpush3.bf16.msra.mxu1 %v1718_v60 }
 0x5d7   : > { %18258 = vpow2.f32 %v1661_v2  ;;  %v1663_v7 = vmul.f32 1.442695, %v1652_v5  ;;  %v1653_v22 = vsub.f32 %v1611_v35, %v1639_v6  ;;  %15932 = vmatprep.subr.bf16.mxu1 %v1719_v61  ;;  %15947 = vmatpush3.bf16.msra.mxu0 %v17855_v58 }
 0x5d8   : > { %v1642_v26 = vpop.xlane.xlu1 %1641 }
 0x5d9   : > { %18260 = vpow2.f32 %v1663_v7  ;;  %v1665_v28 = vmul.f32 1.442695, %v1653_v22  ;;  %v1654_v4 = vsub.f32 %v1614_v39, %v1642_v26 }
 0x5da   : > { %v1645_v29 = vpop.xlane.xlu0 %1644  ;;  %15933 = vmatpush3.bf16.msra.mxu1 %v1719_v61 }
 0x5db   : > { %18262 = vpow2.f32 %v1665_v28  ;;  %v1667_v30 = vmul.f32 1.442695, %v1654_v4  ;;  %v1655_v3 = vsub.f32 %v1619_v40, %v1645_v29  ;;  %15934 = vmatprep.subr.bf16.mxu1 %v1720_v62 }
 0x5dc   : > { %v1648_v31 = vpop.xlane.xlu1 %1647 }
 0x5dd   : > { %v19380_v32 = vpop.eup %18254  ;;  %18264 = vpow2.f32 %v1667_v30  ;;  %v1669_v21 = vmul.f32 1.442695, %v1655_v3  ;;  %v1656_v33 = vsub.f32 %v1622_v42, %v1648_v31 }
 0x5de   : > { %v1673_v25 = vsel %vm915_vm1, %v19380_v32, 0.0  ;;  %15935 = vmatpush3.bf16.msra.mxu1 %v1720_v62 }
 0x5df   : > { %v19384_v34 = vpop.eup %18256  ;;  %18266 = vpow2.f32 %v1669_v21  ;;  %v1671_v35 = vmul.f32 1.442695, %v1656_v33  ;;  %1674 = vadd.xlane.f32.xlu0 %v1673_v25 }
 0x5e0   : > { %v1676_v36 = vsel %vm915_vm1, %v19384_v34, 0.0 }
 0x5e1   : > { %v19388_v37 = vpop.eup %18258  ;;  %18268 = vpow2.f32 %v1671_v35  ;;  %1677 = vadd.xlane.f32.xlu1 %v1676_v36 }
 0x5e2   : > { %v1679_v38 = vsel %vm915_vm1, %v19388_v37, 0.0 }
 0x5e3   : > { %v18261_v39 = vpop.eup %18260  ;;  %1680 = vadd.xlane.f32.xlu0 %v1679_v38 }
 0x5e4   : > { %v1682_v40 = vsel %vm915_vm1, %v18261_v39, 0.0 }
 0x5e5   : > { %v19393_v41 = vpop.eup %18262  ;;  %1683 = vadd.xlane.f32.xlu1 %v1682_v40 }
 0x5e6   : > { %v1685_v42 = vsel %vm915_vm1, %v19393_v41, 0.0 }
 0x5e7   : > { %v18265_v43 = vpop.eup %18264  ;;  %1686 = vadd.xlane.f32.xlu0 %v1685_v42 }
 0x5e8   : > { %v1688_v44 = vsel %vm915_vm1, %v18265_v43, 0.0 }
 0x5e9   : > { %v18267_v50 = vpop.eup %18266  ;;  %1689 = vadd.xlane.f32.xlu1 %v1688_v44  ;;  %v17869_v44 = vld [vmem:[%s22323_s1 + $0x98] sm:$0xff]  }
 0x5ea   : > { %v1691_v51 = vsel %vm915_vm1, %v18267_v50, 0.0 }
 0x5eb   : > { %v18269_v52 = vpop.eup %18268  ;;  %1692 = vadd.xlane.f32.xlu0 %v1691_v51  ;;  %v17873_v51 = vld [vmem:[%s22323_s1 + $0xb8] sm:$0xff]  }
 0x5ec   : > { %v1694_v55 = vsel %vm915_vm1, %v18269_v52, 0.0 }
 0x5ed   : > { %1695 = vadd.xlane.f32.xlu1 %v1694_v55 }
 0x66c   : > { %v1675_v53 = vpop.xlane.xlu0 %1674 }
 0x66d   : > { %18270 = vrcp.f32 %v1675_v53 }
 0x66e   : > { %v1678_v45 = vpop.xlane.xlu1 %1677 }
 0x66f   : > { %18272 = vrcp.f32 %v1678_v45 }
 0x670   : > { %v1681_v56 = vpop.xlane.xlu0 %1680 }
 0x671   : > { %18274 = vrcp.f32 %v1681_v56 }
 0x672   : > { %v1684_v63 = vpop.xlane.xlu1 %1683 }
 0x673   : > { %18276 = vrcp.f32 %v1684_v63  ;;  %v17859_v63 = vld [vmem:[%s22325_s3 + $0x88] sm:$0xff]  }
 0x674   : > { %v1687_v0 = vpop.xlane.xlu0 %1686 }
 0x675   : > { %18278 = vrcp.f32 %v1687_v0 }
 0x676   : > { %v1690_v1 = vpop.xlane.xlu1 %1689 }
 0x677   : > { %v18271_v2 = vpop.eup %18270  ;;  %18280 = vrcp.f32 %v1690_v1 }
 0x678   : > { %v1693_v5 = vpop.xlane.xlu0 %1692  ;;  %v1698_v22 = vmul.f32 %v18271_v2, %v19380_v32 }
 0x679   : > { %v18273_v6 = vpop.eup %18272  ;;  %18282 = vrcp.f32 %v1693_v5 }
 0x67a   : > { %v1696_v7 = vpop.xlane.xlu1 %1695  ;;  %v1700_v26 = vmul.f32 %v18273_v6, %v19384_v34 }
 0x67b   : > { %v18275_v28 = vpop.eup %18274  ;;  %18284 = vrcp.f32 %v1696_v7 }
 0x67c   : > { %v1713_v4 = vpack.c.bf16 %v1700_v26, %v1698_v22  ;;  %v1702_v30 = vmul.f32 %v18275_v28, %v19388_v37  ;;  %v17856_v37 = vld [vmem:[%s22330_s8] sm:$0xff]  }
 0x67d   : > { %v18277_v29 = vpop.eup %18276  ;;  %15956 = vmatprep.subr.bf16.mxu0 %v17856_v37 }
 0x67e   : > { %v1704_v3 = vmul.f32 %v18277_v29, %v18261_v39  ;;  %15936 = vmatprep.mubr.msk.bf16.mxu1 %vm915_vm1, %v1713_v4  ;;  %v17865_v39 = vld [vmem:[%s22323_s1 + $0x80] sm:$0xff]  }
 0x67f   : > { %v18279_v31 = vpop.eup %18278  ;;  %15968 = vmatprep.subr.bf16.mxu1 %v17865_v39 }
 0x680   : > { %v1714_v21 = vpack.c.bf16 %v1704_v3, %v1702_v30  ;;  %v1706_v25 = vmul.f32 %v18279_v31, %v19393_v41  ;;  %v17867_v41 = vld [vmem:[%s22323_s1 + $0x88] sm:$0xff]  }
 0x681   : > { %v18281_v33 = vpop.eup %18280 }
 0x682   : > { %15937 = vmatmul.mubr.msk.bf16.vlgmr.msra.gmra.mrb[40].mxu1 %vm915_vm1, %v1714_v21  ;;  %v1708_v35 = vmul.f32 %v18281_v33, %v18265_v43  ;;  %v17868_v43 = vld [vmem:[%s22323_s1 + $0x90] sm:$0xff]  }
 0x683   : > { %v18283_v32 = vpop.eup %18282  ;;  %15969 = vmatpush3.bf16.msra.mxu1 %v17865_v39 }
 0x684   : > { %v1715_v36 = vpack.c.bf16 %v1708_v35, %v1706_v25  ;;  %v1710_v38 = vmul.f32 %v18283_v32, %v18267_v50  ;;  %15970 = vmatprep.subr.bf16.mxu1 %v17867_v41  ;;  %v17872_v50 = vld [vmem:[%s22323_s1 + $0xb0] sm:$0xff]  }
 0x685   : > { %v18285_v34 = vpop.eup %18284 }
 0x686   : > { %15940 = vmatprep.mubr.msk.bf16.mxu1 %vm915_vm1, %v1715_v36  ;;  %v1712_v40 = vmul.f32 %v18285_v34, %v18269_v52 }
 0x687   : > { %15971 = vmatpush3.bf16.msra.mxu1 %v17867_v41 }
 0x688   : > { %v1716_v42 = vpack.c.bf16 %v1712_v40, %v1710_v38  ;;  %15972 = vmatprep.subr.bf16.mxu1 %v17868_v43 }
 0x68a   : > { %15941 = vmatmul.mubr.msk.bf16.gmra.mrb[44].mxu1 %vm915_vm1, %v1716_v42 }
 0x68b   : > { %15984 = vmatprep.mubr.bf16.mxu1 %v19006_v9  ;;  %15973 = vmatpush3.bf16.msra.mxu1 %v17868_v43 }
 0x68c   : > { %15974 = vmatprep.subr.bf16.mxu1 %v17869_v44 }
 0x68f   : > { %15975 = vmatpush3.bf16.msra.mxu1 %v17869_v44 }
 0x690   : > { %15976 = vmatprep.subr.bf16.mxu1 %v17870_v47 }
 0x693   : > { %15977 = vmatpush3.bf16.msra.mxu1 %v17870_v47 }
 0x694   : > { %15978 = vmatprep.subr.bf16.mxu1 %v17871_v48 }
 0x697   : > { %15979 = vmatpush3.bf16.msra.mxu1 %v17871_v48 }
 0x698   : > { %15980 = vmatprep.subr.bf16.mxu1 %v17872_v50 }
 0x69b   : > { %15981 = vmatpush3.bf16.msra.mxu1 %v17872_v50 }
 0x69c   : > { %15982 = vmatprep.subr.bf16.mxu1 %v17873_v51 }
 0x69f   : > { %15983 = vmatpush3.bf16.msra.mxu1 %v17873_v51 }
 0x6a2   : > { %15985 = vmatmul.mubr.bf16.vlgmr.msra.gmra.mrb[48].mxu1 %v19041_v23 }
 0x6a3   : > { %15988 = vmatprep.mubr.bf16.mxu1 %v19043_v24 }
 0x6aa   : > { %15989 = vmatmul.mubr.bf16.gmra.mrb[52].mxu1 %v19049_v27 }
 0x6ab   : > { %16032 = vmatprep.mubr.bf16.mxu1 %v19006_v9 }
 0x755   : > { %v15938_v52 = vpop.f32.mrb[40].mxu1 }
 0x756   : > { %v1767_v55 = vpop.f32.mrb[41].mxu1 }
 0x757   : > { %v15939_v57 = vpop.f32.mrb[42].mxu1 }
 0x758   : > { %v1799_v59 = vpack.c.bf16 %v15939_v57, %v15938_v52  ;;  %v1770_v60 = vpop.f32.mrb[43].mxu1 }
 0x759   : > { %v1798_v46 = vpack.c.bf16 %v1770_v60, %v1767_v55 }
 0x75b   : > { %15948 = vmatprep.mubr.msk.bf16.mxu0 %vm825_vm0, %v1798_v46 }
 0x75c   : > { %15949 = vmatmul.mubr.msk.bf16.vlgmr.msra.gmra.mrb[32].mxu0 %vm825_vm0, %v1799_v59 }
 0x75d   : > { %15957 = vmatpush3.bf16.msra.mxu0 %v17856_v37  ;;  %v15942_v61 = vpop.f32.mrb[44].mxu1  ;;  %v13536_v37 = vld [vmem:[%s22326_s4 + $0x2] ss:$0 sm:$0xff] }
 0x75e   : > { %v1783_v62 = vpop.f32.mrb[45].mxu1  ;;  %15958 = vmatprep.subr.bf16.mxu0 %v17857_v49 }
 0x75f   : > { %v15943_v58 = vpop.f32.mrb[46].mxu1 }
 0x760   : > { %v1801_v53 = vpack.c.bf16 %v15943_v58, %v15942_v61  ;;  %v1786_v45 = vpop.f32.mrb[47].mxu1 }
 0x761   : > { %v1800_v56 = vpack.c.bf16 %v1786_v45, %v1783_v62  ;;  %15959 = vmatpush3.bf16.msra.mxu0 %v17857_v49 }
 0x762   : > { %15992 = vmatprep.subr.bf16.mxu0 %v17858_v54 }
 0x763   : > { %15952 = vmatprep.mubr.msk.bf16.mxu0 %vm825_vm0, %v1800_v56 }
 0x764   : > { %15953 = vmatmul.mubr.msk.bf16.gmra.mrb[36].mxu0 %vm825_vm0, %v1801_v53 }
 0x765   : > { %15960 = vmatprep.mubr.msk.bf16.mxu0 %vm825_vm0, %v1089_v14  ;;  %v17866_v14 = vld [vmem:[%s22325_s3 + $0xb8] sm:$0xff]  }
 0x76c   : > { %15961 = vmatmul.mubr.msk.bf16.vlgmr.msra.gmra.mrb[32].mxu0 %vm825_vm0, %v1090_v12  ;;  %v17864_v12 = vld [vmem:[%s22325_s3 + $0xb0] sm:$0xff]  }
 0x76d   : > { %15993 = vmatpush3.bf16.msra.mxu0 %v17858_v54  ;;  %15964 = vmatprep.mubr.msk.bf16.mxu0 %vm825_vm0, %v1091_v20 }
 0x76e   : > { %15994 = vmatprep.subr.bf16.mxu0 %v17859_v63 }
 0x771   : > { %15995 = vmatpush3.bf16.msra.mxu0 %v17859_v63 }
 0x772   : > { %15996 = vmatprep.subr.bf16.mxu0 %v17860_v10 }
 0x774   : > { %15965 = vmatmul.mubr.msk.bf16.gmra.mrb[36].mxu0 %vm825_vm0, %v1092_v18 }
 0x775   : > { %15997 = vmatpush3.bf16.msra.mxu0 %v17860_v10  ;;  %16008 = vmatprep.mubr.bf16.mxu0 %v19006_v9  ;;  %v15986_v16 = vpop.f32.mrb[48].mxu1  ;;  %v17874_v10 = vld [vmem:[%s22327_s5 + $0x80] sm:$0xff]  }
 0x776   : > { %15998 = vmatprep.subr.bf16.mxu0 %v17861_v13  ;;  %v2101_v17 = vadd.f32 %v15986_v16, %v13510_v15  ;;  %v2092_v18 = vpop.f32.mrb[49].mxu1  ;;  %16016 = vmatprep.subr.bf16.mxu1 %v17874_v10  ;;  %v17881_v16 = vld [vmem:[%s22327_s5 + $0xb8] sm:$0xff]  }
 0x777   : > { %v2093_v19 = vadd.f32 %v13510_v15, %v2092_v18  ;;  %v15987_v20 = vpop.f32.mrb[50].mxu1  ;;  %16017 = vmatpush3.bf16.msra.mxu1 %v17874_v10 }
 0x778   : > { %v2401_v0 = vmul.f32 0.17677669, %v2101_v17  ;;  %v2104_v1 = vadd.f32 %v15987_v20, %v13510_v15  ;;  %v2095_v2 = vpop.f32.mrb[51].mxu1  ;;  %v13571_v17 = vld [vmem:[%s22329_s7 + $0x80] sm:$0xff] }
 0x779   : > { %15999 = vmatpush3.bf16.msra.mxu0 %v17861_v13  ;;  %v2399_v5 = vmul.f32 0.17677669, %v2093_v19  ;;  %v2096_v6 = vadd.f32 %v13510_v15, %v2095_v2  ;;  %v17875_v13 = vld [vmem:[%s22327_s5 + $0x88] sm:$0xff]   ;;  %v13573_v19 = vld [vmem:[%s22329_s7 + $0x90] sm:$0xff] }
 0x77a   : > { %16000 = vmatprep.subr.bf16.mxu0 %v17862_v8  ;;  %v2402_v7 = vmul.f32 0.17677669, %v2104_v1  ;;  %16018 = vmatprep.subr.bf16.mxu1 %v17875_v13 }
 0x77b   : > { %v2400_v22 = vmul.f32 0.17677669, %v2096_v6  ;;  %16019 = vmatpush3.bf16.msra.mxu1 %v17875_v13 }
 0x77c   : > { %v2408_v26 = vpack.c.bf16 %v2402_v7, %v2401_v0  ;;  %v13572_v0 = vld [vmem:[%s22329_s7 + $0x88] sm:$0xff] }
 0x77d   : > { %16001 = vmatpush3.bf16.msra.mxu0 %v17862_v8  ;;  %v2407_v28 = vpack.c.bf16 %v2400_v22, %v2399_v5  ;;  %v15990_v4 = vpop.f32.mrb[52].mxu1  ;;  %v17876_v8 = vld [vmem:[%s22327_s5 + $0x90] sm:$0xff]   ;;  %v13574_v5 = vld [vmem:[%s22329_s7 + $0x98] sm:$0xff] }
 0x77e   : > { %16002 = vmatprep.subr.bf16.mxu0 %v17863_v11  ;;  %v2117_v29 = vadd.f32 %v15990_v4, %v13510_v15  ;;  %v2108_v30 = vpop.f32.mrb[53].mxu1  ;;  %16020 = vmatprep.subr.bf16.mxu1 %v17876_v8 }
 0x77f   : > { %v2109_v3 = vadd.f32 %v13510_v15, %v2108_v30  ;;  %v15991_v31 = vpop.f32.mrb[54].mxu1  ;;  %16021 = vmatpush3.bf16.msra.mxu1 %v17876_v8  ;;  %v13575_v30 = vld [vmem:[%s22329_s7 + $0xa0] sm:$0xff] }
 0x780   : > { %v2405_v21 = vmul.f32 0.17677669, %v2117_v29  ;;  %v2120_v33 = vadd.f32 %v15991_v31, %v13510_v15  ;;  %v2111_v25 = vpop.f32.mrb[55].mxu1  ;;  %v13577_v29 = vld [vmem:[%s22329_s7 + $0xb0] sm:$0xff] }
 0x781   : > { %16003 = vmatpush3.bf16.msra.mxu0 %v17863_v11  ;;  %v2403_v35 = vmul.f32 0.17677669, %v2109_v3  ;;  %v2112_v32 = vadd.f32 %v13510_v15, %v2111_v25  ;;  %v17877_v11 = vld [vmem:[%s22327_s5 + $0x98] sm:$0xff]   ;;  %v17880_v15 = vld [vmem:[%s22327_s5 + $0xb0] sm:$0xff]   ;;  %v13576_v25 = vld [vmem:[%s22329_s7 + $0xa8] sm:$0xff] }
 0x782   : > { %16004 = vmatprep.subr.bf16.mxu0 %v17864_v12  ;;  %v2406_v36 = vmul.f32 0.17677669, %v2120_v33  ;;  %16022 = vmatprep.subr.bf16.mxu1 %v17877_v11  ;;  %v13578_v33 = vld [vmem:[%s22329_s7 + $0xb8] sm:$0xff] }
 0x783   : > { %v2404_v34 = vmul.f32 0.17677669, %v2112_v32  ;;  %16023 = vmatpush3.bf16.msra.mxu1 %v17877_v11 }
 0x784   : > { %v2410_v38 = vpack.c.bf16 %v2406_v36, %v2405_v21 }
 0x785   : > { %16005 = vmatpush3.bf16.msra.mxu0 %v17864_v12  ;;  %v2409_v40 = vpack.c.bf16 %v2404_v34, %v2403_v35  ;;  %v17878_v12 = vld [vmem:[%s22327_s5 + $0xa0] sm:$0xff]  }
 0x786   : > { %16006 = vmatprep.subr.bf16.mxu0 %v17866_v14  ;;  %16024 = vmatprep.subr.bf16.mxu1 %v17878_v12 }
 0x787   : > { %16025 = vmatpush3.bf16.msra.mxu1 %v17878_v12 }
 0x789   : > { %16007 = vmatpush3.bf16.msra.mxu0 %v17866_v14  ;;  %v17879_v14 = vld [vmem:[%s22327_s5 + $0xa8] sm:$0xff]  }
 0x78a   : > { %16026 = vmatprep.subr.bf16.mxu1 %v17879_v14 }
 0x78b   : > { %16027 = vmatpush3.bf16.msra.mxu1 %v17879_v14 }
 0x78c   : > { %16009 = vmatmul.mubr.bf16.vlgmr.msra.gmra.mrb[40].mxu0 %v19041_v23  ;;  %16028 = vmatprep.subr.bf16.mxu1 %v17880_v15 }
 0x78d   : > { %16012 = vmatprep.mubr.bf16.mxu0 %v19043_v24 }
 0x78f   : > { %16029 = vmatpush3.bf16.msra.mxu1 %v17880_v15 }
 0x790   : > { %16030 = vmatprep.subr.bf16.mxu1 %v17881_v16 }
 0x793   : > { %16031 = vmatpush3.bf16.msra.mxu1 %v17881_v16 }
 0x794   : > { %16013 = vmatmul.mubr.bf16.gmra.mrb[44].mxu0 %v19049_v27 }
 0x795   : > { %16048 = vmatprep.mubr.msk.bf16.mxu0 %vm825_vm0, %v2407_v28 }
 0x796   : > { %16033 = vmatmul.mubr.bf16.vlgmr.msra.gmra.mrb[56].mxu1 %v19041_v23 }
 0x797   : > { %16036 = vmatprep.mubr.bf16.mxu1 %v19043_v24 }
 0x79e   : > { %16037 = vmatmul.mubr.bf16.gmra.mrb[60].mxu1 %v19049_v27 }
 0x85f   : > { %v16010_v42 = vpop.f32.mrb[40].mxu0 }
 0x860   : > { %v2230_v39 = vpop.f32.mrb[41].mxu0  ;;  %v2239_v43 = vadd.f32 %v16010_v42, %v13536_v37 }
 0x861   : > { %v16011_v41 = vpop.f32.mrb[42].mxu0  ;;  %v2231_v48 = vadd.f32 %v13536_v37, %v2230_v39 }
 0x862   : > { %v2242_v44 = vadd.f32 %v16011_v41, %v13536_v37  ;;  %v2233_v47 = vpop.f32.mrb[43].mxu0 }
 0x863   : > { %v2234_v50 = vadd.f32 %v13536_v37, %v2233_v47 }
 0x864   : > { %v2412_v51 = vpack.c.bf16 %v2242_v44, %v2239_v43  ;;  %v19582_v44 = vld [vmem:[%s22328_s6 + $0x2] ss:$0 sm:$0xff] }
 0x865   : > { %v2411_v52 = vpack.c.bf16 %v2234_v50, %v2231_v48 }
 0x866   : > { %v2440_v45 = vsel %vm825_vm0, %v2412_v51, 0 }
 0x867   : > { %17696 = vmatprep.subr.msk.bf16.mxu0 %vm825_vm0, %v2411_v52  ;;  %v2437_v55 = vsel %vm825_vm0, %v2411_v52, 0  ;;  %v16014_v57 = vpop.f32.mrb[44].mxu0 }
 0x868   : > { %16041 = vmatpush3.bf16.xpose.msra.mxu0 %v2437_v55  ;;  %v2255_v59 = vadd.f32 %v16014_v57, %v13536_v37  ;;  %v2246_v60 = vpop.f32.mrb[45].mxu0 }
 0x869   : > { %17697 = vmatprep.subr.msk.bf16.mxu0 %vm825_vm0, %v2412_v51  ;;  %v2247_v46 = vadd.f32 %v13536_v37, %v2246_v60  ;;  %v16015_v49 = vpop.f32.mrb[46].mxu0  ;;  %v16034_v47 = vpop.f32.mrb[56].mxu1 }
 0x86a   : > { %v2258_v61 = vadd.f32 %v16015_v49, %v13536_v37  ;;  %v2249_v62 = vpop.f32.mrb[47].mxu0  ;;  %v2368_v48 = vpop.f32.mrb[57].mxu1 }
 0x86b   : > { %v2250_v54 = vadd.f32 %v13536_v37, %v2249_v62  ;;  %v2369_v50 = vadd.f32 %v19582_v44, %v2368_v48  ;;  %v16035_v51 = vpop.f32.mrb[58].mxu1  ;;  %v17882_v48 = vld [vmem:[%s22330_s8 + $0x20] sm:$0xff]  }
 0x86c   : > { %v2414_v58 = vpack.c.bf16 %v2258_v61, %v2255_v59  ;;  %v2371_v52 = vpop.f32.mrb[59].mxu1 }
 0x86d   : > { %v2413_v53 = vpack.c.bf16 %v2250_v54, %v2247_v46  ;;  %v2372_v55 = vadd.f32 %v19582_v44, %v2371_v52 }
 0x86e   : > { %v2446_v63 = vsel %vm825_vm0, %v2414_v58, 0 }
 0x86f   : > { %v2443_v56 = vsel %vm825_vm0, %v2413_v53, 0  ;;  %v2605_v57 = vpack.c.bf16 %v2372_v55, %v2369_v50  ;;  %v17883_v50 = vld [vmem:[%s22330_s8 + $0x28] sm:$0xff]  }
 0x870   : > { %16043 = vmatpush3.bf16.xpose.msra.mxu0 %v2440_v45 }
 0x871   : > { %17698 = vmatprep.subr.msk.bf16.mxu0 %vm825_vm0, %v2413_v53  ;;  %v19586_v59 = vpop.f32.mrb[60].mxu1  ;;  %16056 = vmatprep.subr.bf16.mxu1 %v2605_v57 }
 0x872   : > { %v2384_v60 = vpop.f32.mrb[61].mxu1  ;;  %16057 = vmatpush3.bf16.msra.mxu1 %v2605_v57 }
 0x873   : > { %v19588_v49 = vpop.f32.mrb[62].mxu1 }
 0x874   : > { %v2387_v62 = vpop.f32.mrb[63].mxu1 }
 0x878   : > { %16045 = vmatpush3.bf16.xpose.msra.mxu0 %v2443_v56 }
 0x879   : > { %17699 = vmatprep.subr.msk.bf16.mxu0 %vm825_vm0, %v2414_v58 }
 0x880   : > { %16047 = vmatpush3.bf16.xpose.msra.mxu0 %v2446_v63 }
 0x881   : > { %16072 = vmatprep.subr.bf16.mxu0 %v17882_v48 }
 0x887   : > { %16049 = vmatmul.mubr.msk.bf16.vlgmr.msra.gmra.mrb[48].mxu0 %vm825_vm0, %v2408_v26 }
 0x888   : > { %16052 = vmatprep.mubr.msk.bf16.mxu0 %vm825_vm0, %v2409_v40  ;;  %16073 = vmatpush3.bf16.msra.mxu0 %v17882_v48 }
 0x889   : > { %16074 = vmatprep.subr.bf16.mxu0 %v17883_v50 }
 0x88c   : > { %16075 = vmatpush3.bf16.msra.mxu0 %v17883_v50 }
 0x88f   : > { %16053 = vmatmul.mubr.msk.bf16.gmra.mrb[52].mxu0 %vm825_vm0, %v2410_v38 }
 0x95a   : > { %v16050_v18 = vpop.f32.mrb[48].mxu0 }
 0x95b   : > { %v2482_v20 = vpop.f32.mrb[49].mxu0  ;;  %v2491_v7 = vadd.f32 %v16050_v18, %v13573_v19 }
 0x95c   : > { %v2483_v1 = vadd.f32 %v13571_v17, %v2482_v20  ;;  %v16051_v2 = vpop.f32.mrb[50].mxu0 }
 0x95d   : > { %v2485_v6 = vpop.f32.mrb[51].mxu0  ;;  %v2494_v28 = vadd.f32 %v16051_v2, %v13574_v5  ;;  %v2519_v31 = vsel %vm915_vm1, %v2491_v7, -inf }
 0x95e   : > { %v2486_v22 = vadd.f32 %v13572_v0, %v2485_v6  ;;  %v2513_v26 = vsel %vm915_vm1, %v2483_v1, -inf }
 0x95f   : > { %2514 = vmax.xlane.f32.xlu0 %v2513_v26  ;;  %v2522_v34 = vsel %vm915_vm1, %v2494_v28, -inf }
 0x960   : > { %v2516_v4 = vsel %vm915_vm1, %v2486_v22, -inf }
 0x961   : > { %2517 = vmax.xlane.f32.xlu1 %v2516_v4 }
 0x962   : > { %v16054_v3 = vpop.f32.mrb[52].mxu0 }
 0x963   : > { %v2498_v21 = vpop.f32.mrb[53].mxu0  ;;  %2520 = vmax.xlane.f32.xlu0 %v2519_v31  ;;  %v2507_v35 = vadd.f32 %v16054_v3, %v13577_v29 }
 0x964   : > { %v2499_v32 = vadd.f32 %v13575_v30, %v2498_v21  ;;  %v16055_v36 = vpop.f32.mrb[54].mxu0 }
 0x965   : > { %v2501_v38 = vpop.f32.mrb[55].mxu0  ;;  %2523 = vmax.xlane.f32.xlu1 %v2522_v34  ;;  %v2510_v40 = vadd.f32 %v16055_v36, %v13578_v33  ;;  %v2531_v41 = vsel %vm915_vm1, %v2507_v35, -inf }
 0x966   : > { %v2502_v42 = vadd.f32 %v13576_v25, %v2501_v38  ;;  %v2525_v37 = vsel %vm915_vm1, %v2499_v32, -inf  ;;  %v2377_v25 = vadd.f32 %v16034_v47, %v19582_v44 }
 0x967   : > { %2526 = vmax.xlane.f32.xlu0 %v2525_v37  ;;  %v2534_v43 = vsel %vm915_vm1, %v2510_v40, -inf }
 0x968   : > { %v2528_v39 = vsel %vm915_vm1, %v2502_v42, -inf }
 0x969   : > { %2529 = vmax.xlane.f32.xlu1 %v2528_v39  ;;  %v2393_v39 = vadd.f32 %v19586_v59, %v19582_v44 }
 0x96b   : > { %2532 = vmax.xlane.f32.xlu0 %v2531_v41  ;;  %v2396_v41 = vadd.f32 %v19588_v49, %v19582_v44 }
 0x96d   : > { %2535 = vmax.xlane.f32.xlu1 %v2534_v43  ;;  %v2608_v47 = vpack.c.bf16 %v2396_v41, %v2393_v39  ;;  %v17890_v39 = vld [vmem:[%s22325_s3 + $0xf0] sm:$0xff]   ;;  %v13613_v41 = vld [vmem:[#allocation2 + $0x3] ss:$0 sm:$0xff] }
 0x9ec   : > { %v2515_v46 = vpop.xlane.xlu0 %2514 }
 0x9ed   : > { %v2537_v61 = vsub.f32 %v2483_v1, %v2515_v46 }
 0x9ee   : > { %v2518_v54 = vpop.xlane.xlu1 %2517 }
 0x9ef   : > { %v2545_v58 = vmul.f32 1.442695, %v2537_v61  ;;  %v2538_v53 = vsub.f32 %v2486_v22, %v2518_v54 }
 0x9f0   : > { %v2521_v45 = vpop.xlane.xlu0 %2520 }
 0x9f1   : > { %18286 = vpow2.f32 %v2545_v58  ;;  %v2547_v56 = vmul.f32 1.442695, %v2538_v53  ;;  %v2539_v63 = vsub.f32 %v2491_v7, %v2521_v45 }
 0x9f2   : > { %v2524_v10 = vpop.xlane.xlu1 %2523 }
 0x9f3   : > { %18288 = vpow2.f32 %v2547_v56  ;;  %v2549_v13 = vmul.f32 1.442695, %v2539_v63  ;;  %v2540_v8 = vsub.f32 %v2494_v28, %v2524_v10 }
 0x9f4   : > { %v2527_v11 = vpop.xlane.xlu0 %2526 }
 0x9f5   : > { %18290 = vpow2.f32 %v2549_v13  ;;  %v2551_v12 = vmul.f32 1.442695, %v2540_v8  ;;  %v2541_v14 = vsub.f32 %v2499_v32, %v2527_v11 }
 0x9f6   : > { %v2530_v15 = vpop.xlane.xlu1 %2529 }
 0x9f7   : > { %18292 = vpow2.f32 %v2551_v12  ;;  %v2553_v16 = vmul.f32 1.442695, %v2541_v14  ;;  %v2542_v17 = vsub.f32 %v2502_v42, %v2530_v15  ;;  %v2388_v42 = vadd.f32 %v19582_v44, %v2387_v62 }
 0x9f8   : > { %v2533_v18 = vpop.xlane.xlu0 %2532 }
 0x9f9   : > { %18294 = vpow2.f32 %v2553_v16  ;;  %v2555_v19 = vmul.f32 1.442695, %v2542_v17  ;;  %v2543_v20 = vsub.f32 %v2507_v35, %v2533_v18  ;;  %v2380_v35 = vadd.f32 %v16035_v51, %v19582_v44 }
 0x9fa   : > { %v2536_v0 = vpop.xlane.xlu1 %2535 }
 0x9fb   : > { %v19590_v1 = vpop.eup %18286  ;;  %18296 = vpow2.f32 %v2555_v19  ;;  %v2557_v2 = vmul.f32 1.442695, %v2543_v20  ;;  %v2544_v5 = vsub.f32 %v2510_v40, %v2536_v0  ;;  %v2385_v40 = vadd.f32 %v19582_v44, %v2384_v60  ;;  %v17884_v20 = vld [vmem:[%s22325_s3 + $0xc0] sm:$0xff]  }
 0x9fc   : > { %v2561_v6 = vsel %vm915_vm1, %v19590_v1, 0.0  ;;  %v2606_v37 = vpack.c.bf16 %v2380_v35, %v2377_v25  ;;  %16108 = vmatprep.subr.bf16.mxu0 %v17884_v20  ;;  %v17891_v0 = vld [vmem:[%s22323_s1 + $0xc0] sm:$0xff]   ;;  %v17886_v35 = vld [vmem:[%s22325_s3 + $0xd0] sm:$0xff]  }
 0x9fd   : > { %v19594_v7 = vpop.eup %18288  ;;  %18298 = vpow2.f32 %v2557_v2  ;;  %v2559_v22 = vmul.f32 1.442695, %v2544_v5  ;;  %2562 = vadd.xlane.f32.xlu0 %v2561_v6  ;;  %v2607_v43 = vpack.c.bf16 %v2388_v42, %v2385_v40  ;;  %v17894_v2 = vld [vmem:[%s22323_s1 + $0xd0] sm:$0xff]   ;;  %v17895_v5 = vld [vmem:[%s22323_s1 + $0xd8] sm:$0xff]   ;;  %v17896_v6 = vld [vmem:[%s22323_s1 + $0xe0] sm:$0xff]  }
 0x9fe   : > { %v2564_v26 = vsel %vm915_vm1, %v19594_v7, 0.0  ;;  %16058 = vmatprep.subr.bf16.mxu1 %v2606_v37  ;;  %v17887_v40 = vld [vmem:[%s22325_s3 + $0xd8] sm:$0xff]   ;;  %v17888_v42 = vld [vmem:[%s22325_s3 + $0xe0] sm:$0xff]  }
 0x9ff   : > { %v19598_v28 = vpop.eup %18290  ;;  %18300 = vpow2.f32 %v2559_v22  ;;  %2565 = vadd.xlane.f32.xlu1 %v2564_v26  ;;  %16059 = vmatpush3.bf16.msra.mxu1 %v2606_v37  ;;  %v17898_v22 = vld [vmem:[%s22323_s1 + $0xf0] sm:$0xff]   ;;  %v17899_v26 = vld [vmem:[%s22323_s1 + $0xf8] sm:$0xff]   ;;  %v17889_v37 = vld [vmem:[%s22325_s3 + $0xe8] sm:$0xff]  }
 0xa00   : > { %v2567_v4 = vsel %vm915_vm1, %v19598_v28, 0.0  ;;  %16060 = vmatprep.subr.bf16.mxu1 %v2607_v43 }
 0xa01   : > { %v18293_v29 = vpop.eup %18292  ;;  %2568 = vadd.xlane.f32.xlu0 %v2567_v4 }
 0xa02   : > { %v2570_v30 = vsel %vm915_vm1, %v18293_v29, 0.0 }
 0xa03   : > { %v19603_v3 = vpop.eup %18294  ;;  %2571 = vadd.xlane.f32.xlu1 %v2570_v30  ;;  %16061 = vmatpush3.bf16.msra.mxu1 %v2607_v43 }
 0xa04   : > { %v2573_v31 = vsel %vm915_vm1, %v19603_v3, 0.0  ;;  %16062 = vmatprep.subr.bf16.mxu1 %v2608_v47 }
 0xa05   : > { %v18297_v21 = vpop.eup %18296  ;;  %2574 = vadd.xlane.f32.xlu0 %v2573_v31 }
 0xa06   : > { %v2576_v33 = vsel %vm915_vm1, %v18297_v21, 0.0 }
 0xa07   : > { %v18299_v32 = vpop.eup %18298  ;;  %2577 = vadd.xlane.f32.xlu1 %v2576_v33  ;;  %16063 = vmatpush3.bf16.msra.mxu1 %v2608_v47 }
 0xa08   : > { %v2579_v36 = vsel %vm915_vm1, %v18299_v32, 0.0  ;;  %16084 = vmatprep.subr.bf16.mxu1 %v17891_v0 }
 0xa09   : > { %v18301_v34 = vpop.eup %18300  ;;  %2580 = vadd.xlane.f32.xlu0 %v2579_v36 }
 0xa0a   : > { %v2582_v38 = vsel %vm915_vm1, %v18301_v34, 0.0 }
 0xa0b   : > { %2583 = vadd.xlane.f32.xlu1 %v2582_v38 }
 0xa8a   : > { %v2563_v51 = vpop.xlane.xlu0 %2562 }
 0xa8b   : > { %18302 = vrcp.f32 %v2563_v51 }
 0xa8c   : > { %v2566_v44 = vpop.xlane.xlu1 %2565 }
 0xa8d   : > { %18304 = vrcp.f32 %v2566_v44 }
 0xa8e   : > { %v2569_v52 = vpop.xlane.xlu0 %2568 }
 0xa8f   : > { %18306 = vrcp.f32 %v2569_v52 }
 0xa90   : > { %v2572_v55 = vpop.xlane.xlu1 %2571 }
 0xa91   : > { %18308 = vrcp.f32 %v2572_v55 }
 0xa92   : > { %v2575_v57 = vpop.xlane.xlu0 %2574 }
 0xa93   : > { %18310 = vrcp.f32 %v2575_v57 }
 0xa94   : > { %v2578_v59 = vpop.xlane.xlu1 %2577 }
 0xa95   : > { %v18303_v60 = vpop.eup %18302  ;;  %18312 = vrcp.f32 %v2578_v59 }
 0xa96   : > { %v2581_v46 = vpop.xlane.xlu0 %2580  ;;  %v2586_v62 = vmul.f32 %v18303_v60, %v19590_v1  ;;  %v17893_v1 = vld [vmem:[%s22323_s1 + $0xc8] sm:$0xff]  }
 0xa97   : > { %v18305_v49 = vpop.eup %18304  ;;  %18314 = vrcp.f32 %v2581_v46 }
 0xa98   : > { %v2584_v61 = vpop.xlane.xlu1 %2583  ;;  %v2588_v54 = vmul.f32 %v18305_v49, %v19594_v7  ;;  %v17897_v7 = vld [vmem:[%s22323_s1 + $0xe8] sm:$0xff]  }
 0xa99   : > { %v18307_v58 = vpop.eup %18306  ;;  %18316 = vrcp.f32 %v2584_v61 }
 0xa9a   : > { %v2601_v53 = vpack.c.bf16 %v2588_v54, %v2586_v62  ;;  %v2590_v56 = vmul.f32 %v18307_v58, %v19598_v28 }
 0xa9b   : > { %v18309_v45 = vpop.eup %18308 }
 0xa9c   : > { %v2592_v63 = vmul.f32 %v18309_v45, %v18293_v29  ;;  %16064 = vmatprep.mubr.msk.bf16.mxu1 %vm915_vm1, %v2601_v53 }
 0xa9d   : > { %v18311_v10 = vpop.eup %18310 }
 0xa9e   : > { %v2602_v13 = vpack.c.bf16 %v2592_v63, %v2590_v56  ;;  %v2594_v11 = vmul.f32 %v18311_v10, %v19603_v3 }
 0xa9f   : > { %v18313_v8 = vpop.eup %18312 }
 0xaa0   : > { %16065 = vmatmul.mubr.msk.bf16.vlgmr.msra.gmra.mrb[64].mxu1 %vm915_vm1, %v2602_v13  ;;  %v2596_v12 = vmul.f32 %v18313_v8, %v18297_v21  ;;  %v17885_v21 = vld [vmem:[%s22325_s3 + $0xc8] sm:$0xff]  }
 0xaa1   : > { %v18315_v14 = vpop.eup %18314  ;;  %16085 = vmatpush3.bf16.msra.mxu1 %v17891_v0 }
 0xaa2   : > { %v2603_v15 = vpack.c.bf16 %v2596_v12, %v2594_v11  ;;  %v2598_v17 = vmul.f32 %v18315_v14, %v18299_v32  ;;  %16086 = vmatprep.subr.bf16.mxu1 %v17893_v1 }
 0xaa3   : > { %v18317_v16 = vpop.eup %18316 }
 0xaa4   : > { %16068 = vmatprep.mubr.msk.bf16.mxu1 %vm915_vm1, %v2603_v15  ;;  %v2600_v18 = vmul.f32 %v18317_v16, %v18301_v34 }
 0xaa5   : > { %16087 = vmatpush3.bf16.msra.mxu1 %v17893_v1 }
 0xaa6   : > { %v2604_v19 = vpack.c.bf16 %v2600_v18, %v2598_v17  ;;  %16088 = vmatprep.subr.bf16.mxu1 %v17894_v2  ;;  %v13639_v17 = vld [vmem:[%s22326_s4 + $0x3] ss:$0 sm:$0xff] }
 0xaa8   : > { %16069 = vmatmul.mubr.msk.bf16.gmra.mrb[68].mxu1 %vm915_vm1, %v2604_v19 }
 0xaa9   : > { %16100 = vmatprep.mubr.bf16.mxu1 %v19006_v9  ;;  %16089 = vmatpush3.bf16.msra.mxu1 %v17894_v2 }
 0xaaa   : > { %16090 = vmatprep.subr.bf16.mxu1 %v17895_v5 }
 0xaad   : > { %16091 = vmatpush3.bf16.msra.mxu1 %v17895_v5 }
 0xaae   : > { %16092 = vmatprep.subr.bf16.mxu1 %v17896_v6 }
 0xab1   : > { %16093 = vmatpush3.bf16.msra.mxu1 %v17896_v6 }
 0xab2   : > { %16094 = vmatprep.subr.bf16.mxu1 %v17897_v7 }
 0xab5   : > { %16095 = vmatpush3.bf16.msra.mxu1 %v17897_v7 }
 0xab6   : > { %16096 = vmatprep.subr.bf16.mxu1 %v17898_v22 }
 0xab9   : > { %16097 = vmatpush3.bf16.msra.mxu1 %v17898_v22 }
 0xaba   : > { %16098 = vmatprep.subr.bf16.mxu1 %v17899_v26 }
 0xabd   : > { %16099 = vmatpush3.bf16.msra.mxu1 %v17899_v26 }
 0xac0   : > { %16101 = vmatmul.mubr.bf16.vlgmr.msra.gmra.mrb[72].mxu1 %v19041_v23 }
 0xac1   : > { %16104 = vmatprep.mubr.bf16.mxu1 %v19043_v24 }
 0xac8   : > { %16105 = vmatmul.mubr.bf16.gmra.mrb[76].mxu1 %v19049_v27 }
 0xac9   : > { %16148 = vmatprep.mubr.bf16.mxu1 %v19006_v9 }
 0xb73   : > { %v16066_v28 = vpop.f32.mrb[64].mxu1 }
 0xb74   : > { %v2655_v4 = vpop.f32.mrb[65].mxu1 }
 0xb75   : > { %v16067_v29 = vpop.f32.mrb[66].mxu1 }
 0xb76   : > { %v2687_v30 = vpack.c.bf16 %v16067_v29, %v16066_v28  ;;  %v2658_v3 = vpop.f32.mrb[67].mxu1 }
 0xb77   : > { %v2686_v31 = vpack.c.bf16 %v2658_v3, %v2655_v4 }
 0xb79   : > { %16076 = vmatprep.mubr.msk.bf16.mxu0 %vm825_vm0, %v2686_v31 }
 0xb7a   : > { %16077 = vmatmul.mubr.msk.bf16.vlgmr.msra.gmra.mrb[32].mxu0 %vm825_vm0, %v2687_v30 }
 0xb7b   : > { %16109 = vmatpush3.bf16.msra.mxu0 %v17884_v20  ;;  %v16070_v33 = vpop.f32.mrb[68].mxu1 }
 0xb7c   : > { %v2671_v25 = vpop.f32.mrb[69].mxu1  ;;  %16110 = vmatprep.subr.bf16.mxu0 %v17885_v21 }
 0xb7d   : > { %v16071_v32 = vpop.f32.mrb[70].mxu1 }
 0xb7e   : > { %v2689_v36 = vpack.c.bf16 %v16071_v32, %v16070_v33  ;;  %v2674_v34 = vpop.f32.mrb[71].mxu1 }
 0xb7f   : > { %v2688_v38 = vpack.c.bf16 %v2674_v34, %v2671_v25  ;;  %16111 = vmatpush3.bf16.msra.mxu0 %v17885_v21  ;;  %v17900_v34 = vld [vmem:[%s22327_s5 + $0xc0] sm:$0xff]  }
 0xb80   : > { %16112 = vmatprep.subr.bf16.mxu0 %v17886_v35  ;;  %16132 = vmatprep.subr.bf16.mxu1 %v17900_v34 }
 0xb81   : > { %16080 = vmatprep.mubr.msk.bf16.mxu0 %vm825_vm0, %v2688_v38  ;;  %v17901_v38 = vld [vmem:[%s22327_s5 + $0xc8] sm:$0xff]   ;;  %16133 = vmatpush3.bf16.msra.mxu1 %v17900_v34 }
 0xb82   : > { %16081 = vmatmul.mubr.msk.bf16.gmra.mrb[36].mxu0 %vm825_vm0, %v2689_v36  ;;  %16134 = vmatprep.subr.bf16.mxu1 %v17901_v38 }
 0xb83   : > { %16113 = vmatpush3.bf16.msra.mxu0 %v17886_v35  ;;  %16124 = vmatprep.mubr.bf16.mxu0 %v19006_v9  ;;  %v17892_v9 = vld [vmem:[%s22325_s3 + $0xf8] sm:$0xff]  }
 0xb84   : > { %16114 = vmatprep.subr.bf16.mxu0 %v17887_v40 }
 0xb85   : > { %16135 = vmatpush3.bf16.msra.mxu1 %v17901_v38 }
 0xb87   : > { %16115 = vmatpush3.bf16.msra.mxu0 %v17887_v40  ;;  %v17902_v40 = vld [vmem:[%s22327_s5 + $0xd0] sm:$0xff]  }
 0xb88   : > { %16116 = vmatprep.subr.bf16.mxu0 %v17888_v42  ;;  %16136 = vmatprep.subr.bf16.mxu1 %v17902_v40 }
 0xb89   : > { %16137 = vmatpush3.bf16.msra.mxu1 %v17902_v40 }
 0xb8b   : > { %16117 = vmatpush3.bf16.msra.mxu0 %v17888_v42  ;;  %v17903_v42 = vld [vmem:[%s22327_s5 + $0xd8] sm:$0xff]  }
 0xb8c   : > { %16118 = vmatprep.subr.bf16.mxu0 %v17889_v37  ;;  %16138 = vmatprep.subr.bf16.mxu1 %v17903_v42 }
 0xb8d   : > { %16139 = vmatpush3.bf16.msra.mxu1 %v17903_v42 }
 0xb8f   : > { %16119 = vmatpush3.bf16.msra.mxu0 %v17889_v37  ;;  %v17904_v37 = vld [vmem:[%s22327_s5 + $0xe0] sm:$0xff]  }
 0xb90   : > { %16120 = vmatprep.subr.bf16.mxu0 %v17890_v39  ;;  %16140 = vmatprep.subr.bf16.mxu1 %v17904_v37 }
 0xb91   : > { %16141 = vmatpush3.bf16.msra.mxu1 %v17904_v37 }
 0xb93   : > { %16121 = vmatpush3.bf16.msra.mxu0 %v17890_v39  ;;  %v16102_v43 = vpop.f32.mrb[72].mxu1  ;;  %v17905_v39 = vld [vmem:[%s22327_s5 + $0xe8] sm:$0xff]  }
 0xb94   : > { %16122 = vmatprep.subr.bf16.mxu0 %v17892_v9  ;;  %v2908_v47 = vadd.f32 %v16102_v43, %v13613_v41  ;;  %v2899_v48 = vpop.f32.mrb[73].mxu1  ;;  %16142 = vmatprep.subr.bf16.mxu1 %v17905_v39  ;;  %v13674_v43 = vld [vmem:[%s22329_s7 + $0xc0] sm:$0xff] }
 0xb95   : > { %v2900_v50 = vadd.f32 %v13613_v41, %v2899_v48  ;;  %v16103_v51 = vpop.f32.mrb[74].mxu1  ;;  %16143 = vmatpush3.bf16.msra.mxu1 %v17905_v39  ;;  %v13676_v48 = vld [vmem:[%s22329_s7 + $0xd0] sm:$0xff] }
 0xb96   : > { %v3208_v44 = vmul.f32 0.17677669, %v2908_v47  ;;  %v2911_v52 = vadd.f32 %v16103_v51, %v13613_v41  ;;  %v2902_v55 = vpop.f32.mrb[75].mxu1  ;;  %v13675_v51 = vld [vmem:[%s22329_s7 + $0xc8] sm:$0xff] }
 0xb97   : > { %16123 = vmatpush3.bf16.msra.mxu0 %v17892_v9  ;;  %v3206_v57 = vmul.f32 0.17677669, %v2900_v50  ;;  %v2903_v59 = vadd.f32 %v13613_v41, %v2902_v55  ;;  %v17906_v9 = vld [vmem:[%s22327_s5 + $0xf0] sm:$0xff]  }
 0xb98   : > { %v3209_v60 = vmul.f32 0.17677669, %v2911_v52  ;;  %16144 = vmatprep.subr.bf16.mxu1 %v17906_v9 }
 0xb99   : > { %v3207_v46 = vmul.f32 0.17677669, %v2903_v59  ;;  %16145 = vmatpush3.bf16.msra.mxu1 %v17906_v9 }
 0xb9a   : > { %16125 = vmatmul.mubr.bf16.vlgmr.msra.gmra.mrb[56].mxu0 %v19041_v23  ;;  %v3215_v49 = vpack.c.bf16 %v3209_v60, %v3208_v44 }
 0xb9b   : > { %16128 = vmatprep.mubr.bf16.mxu0 %v19043_v24  ;;  %v3214_v61 = vpack.c.bf16 %v3207_v46, %v3206_v57  ;;  %v16106_v62 = vpop.f32.mrb[76].mxu1  ;;  %v13680_v46 = vld [vmem:[%s22329_s7 + $0xf0] sm:$0xff] }
 0xb9c   : > { %v2924_v54 = vadd.f32 %v16106_v62, %v13613_v41  ;;  %v2915_v58 = vpop.f32.mrb[77].mxu1 }
 0xb9d   : > { %v2916_v53 = vadd.f32 %v13613_v41, %v2915_v58  ;;  %v16107_v45 = vpop.f32.mrb[78].mxu1  ;;  %v13681_v58 = vld [vmem:[%s22329_s7 + $0xf8] sm:$0xff] }
 0xb9e   : > { %v3212_v56 = vmul.f32 0.17677669, %v2924_v54  ;;  %v2927_v63 = vadd.f32 %v16107_v45, %v13613_v41  ;;  %v2918_v10 = vpop.f32.mrb[79].mxu1 }
 0xb9f   : > { %v3210_v13 = vmul.f32 0.17677669, %v2916_v53  ;;  %v2919_v8 = vadd.f32 %v13613_v41, %v2918_v10  ;;  %v17907_v41 = vld [vmem:[%s22327_s5 + $0xf8] sm:$0xff]   ;;  %v13679_v53 = vld [vmem:[%s22329_s7 + $0xe8] sm:$0xff] }
 0xba0   : > { %v3213_v11 = vmul.f32 0.17677669, %v2927_v63  ;;  %16146 = vmatprep.subr.bf16.mxu1 %v17907_v41 }
 0xba1   : > { %v3211_v12 = vmul.f32 0.17677669, %v2919_v8  ;;  %16147 = vmatpush3.bf16.msra.mxu1 %v17907_v41 }
 0xba2   : > { %16129 = vmatmul.mubr.bf16.gmra.mrb[60].mxu0 %v19049_v27  ;;  %v3217_v14 = vpack.c.bf16 %v3213_v11, %v3212_v56 }
 0xba3   : > { %16164 = vmatprep.mubr.msk.bf16.mxu0 %vm825_vm0, %v3214_v61  ;;  %v3216_v15 = vpack.c.bf16 %v3211_v12, %v3210_v13 }
 0xba4   : > { %16149 = vmatmul.mubr.bf16.vlgmr.msra.gmra.mrb[80].mxu1 %v19041_v23 }
 0xba5   : > { %16152 = vmatprep.mubr.bf16.mxu1 %v19043_v24  ;;  %v13677_v24 = vld [vmem:[%s22329_s7 + $0xd8] sm:$0xff] }
 0xbac   : > { %16153 = vmatmul.mubr.bf16.gmra.mrb[84].mxu1 %v19049_v27 }
 0xc6d   : > { %v16126_v16 = vpop.f32.mrb[56].mxu0 }
 0xc6e   : > { %v3037_v18 = vpop.f32.mrb[57].mxu0  ;;  %v3046_v20 = vadd.f32 %v16126_v16, %v13639_v17 }
 0xc6f   : > { %v16127_v19 = vpop.f32.mrb[58].mxu0  ;;  %v3038_v2 = vadd.f32 %v13639_v17, %v3037_v18 }
 0xc70   : > { %v3049_v0 = vadd.f32 %v16127_v19, %v13639_v17  ;;  %v3040_v1 = vpop.f32.mrb[59].mxu0 }
 0xc71   : > { %v3041_v5 = vadd.f32 %v13639_v17, %v3040_v1 }
 0xc72   : > { %v3219_v6 = vpack.c.bf16 %v3049_v0, %v3046_v20 }
 0xc73   : > { %v3218_v7 = vpack.c.bf16 %v3041_v5, %v3038_v2 }
 0xc74   : > { %v3247_v35 = vsel %vm825_vm0, %v3219_v6, 0 }
 0xc75   : > { %17700 = vmatprep.subr.msk.bf16.mxu0 %vm825_vm0, %v3218_v7  ;;  %v3244_v22 = vsel %vm825_vm0, %v3218_v7, 0  ;;  %v16130_v26 = vpop.f32.mrb[60].mxu0 }
 0xc76   : > { %16157 = vmatpush3.bf16.xpose.msra.mxu0 %v3244_v22  ;;  %v3062_v28 = vadd.f32 %v16130_v26, %v13639_v17  ;;  %v3053_v4 = vpop.f32.mrb[61].mxu0 }
 0xc77   : > { %17701 = vmatprep.subr.msk.bf16.mxu0 %vm825_vm0, %v3219_v6  ;;  %v3054_v29 = vadd.f32 %v13639_v17, %v3053_v4  ;;  %v16131_v30 = vpop.f32.mrb[62].mxu0  ;;  %v16150_v18 = vpop.f32.mrb[80].mxu1 }
 0xc78   : > { %v3065_v3 = vadd.f32 %v16131_v30, %v13639_v17  ;;  %v3056_v31 = vpop.f32.mrb[63].mxu0  ;;  %v3175_v19 = vpop.f32.mrb[81].mxu1 }
 0xc79   : > { %v3057_v21 = vadd.f32 %v13639_v17, %v3056_v31  ;;  %v19770_v17 = vld [vmem:[%s22328_s6 + $0x3] ss:$0 sm:$0xff]  ;;  %v16151_v0 = vpop.f32.mrb[82].mxu1 }
 0xc7a   : > { %v3221_v33 = vpack.c.bf16 %v3065_v3, %v3062_v28  ;;  %v3176_v20 = vadd.f32 %v19770_v17, %v3175_v19  ;;  %v3178_v1 = vpop.f32.mrb[83].mxu1 }
 0xc7b   : > { %v3220_v25 = vpack.c.bf16 %v3057_v21, %v3054_v29  ;;  %v3179_v2 = vadd.f32 %v19770_v17, %v3178_v1 }
 0xc7c   : > { %v3253_v36 = vsel %vm825_vm0, %v3221_v33, 0 }
 0xc7d   : > { %v3250_v32 = vsel %vm825_vm0, %v3220_v25, 0  ;;  %v3412_v5 = vpack.c.bf16 %v3179_v2, %v3176_v20 }
 0xc7e   : > { %16159 = vmatpush3.bf16.xpose.msra.mxu0 %v3247_v35 }
 0xc7f   : > { %17702 = vmatprep.subr.msk.bf16.mxu0 %vm825_vm0, %v3220_v25  ;;  %v19774_v6 = vpop.f32.mrb[84].mxu1  ;;  %16172 = vmatprep.subr.bf16.mxu1 %v3412_v5 }
 0xc80   : > { %v3191_v7 = vpop.f32.mrb[85].mxu1  ;;  %16173 = vmatpush3.bf16.msra.mxu1 %v3412_v5 }
 0xc81   : > { %v19776_v26 = vpop.f32.mrb[86].mxu1 }
 0xc82   : > { %v3194_v4 = vpop.f32.mrb[87].mxu1 }
 0xc86   : > { %16161 = vmatpush3.bf16.xpose.msra.mxu0 %v3250_v32 }
 0xc87   : > { %17703 = vmatprep.subr.msk.bf16.mxu0 %vm825_vm0, %v3221_v33 }
 0xc8e   : > { %16163 = vmatpush3.bf16.xpose.msra.mxu0 %v3253_v36 }
 0xc95   : > { %16165 = vmatmul.mubr.msk.bf16.vlgmr.msra.gmra.mrb[64].mxu0 %vm825_vm0, %v3215_v49  ;;  %v13678_v49 = vld [vmem:[%s22329_s7 + $0xe0] sm:$0xff] }
 0xc96   : > { %16168 = vmatprep.mubr.msk.bf16.mxu0 %vm825_vm0, %v3216_v15 }
 0xc9d   : > { %16169 = vmatmul.mubr.msk.bf16.gmra.mrb[68].mxu0 %vm825_vm0, %v3217_v14 }
 0xd68   : > { %v16166_v47 = vpop.f32.mrb[64].mxu0 }
 0xd69   : > { %v3289_v50 = vpop.f32.mrb[65].mxu0  ;;  %v3298_v52 = vadd.f32 %v16166_v47, %v13676_v48 }
 0xd6a   : > { %v3290_v44 = vadd.f32 %v13674_v43, %v3289_v50  ;;  %v16167_v23 = vpop.f32.mrb[66].mxu0 }
 0xd6b   : > { %v3292_v27 = vpop.f32.mrb[67].mxu0  ;;  %v3301_v59 = vadd.f32 %v16167_v23, %v13677_v24  ;;  %v3326_v62 = vsel %vm915_vm1, %v3298_v52, -inf }
 0xd6c   : > { %v3293_v55 = vadd.f32 %v13675_v51, %v3292_v27  ;;  %v3320_v57 = vsel %vm915_vm1, %v3290_v44, -inf }
 0xd6d   : > { %3321 = vmax.xlane.f32.xlu0 %v3320_v57  ;;  %v3329_v10 = vsel %vm915_vm1, %v3301_v59, -inf }
 0xd6e   : > { %v3323_v60 = vsel %vm915_vm1, %v3293_v55, -inf }
 0xd6f   : > { %3324 = vmax.xlane.f32.xlu1 %v3323_v60 }
 0xd70   : > { %v16170_v61 = vpop.f32.mrb[68].mxu0 }
 0xd71   : > { %v3305_v54 = vpop.f32.mrb[69].mxu0  ;;  %3327 = vmax.xlane.f32.xlu0 %v3326_v62  ;;  %v3314_v45 = vadd.f32 %v16170_v61, %v13680_v46  ;;  %v3184_v61 = vadd.f32 %v16150_v18, %v19770_v17  ;;  %v3187_v62 = vadd.f32 %v16151_v0, %v19770_v17 }
 0xd72   : > { %v3306_v56 = vadd.f32 %v13678_v49, %v3305_v54  ;;  %v16171_v63 = vpop.f32.mrb[70].mxu0 }
 0xd73   : > { %v3308_v13 = vpop.f32.mrb[71].mxu0  ;;  %3330 = vmax.xlane.f32.xlu1 %v3329_v10  ;;  %v3317_v8 = vadd.f32 %v16171_v63, %v13681_v58  ;;  %v3338_v15 = vsel %vm915_vm1, %v3314_v45, -inf  ;;  %v3195_v63 = vadd.f32 %v19770_v17, %v3194_v4  ;;  %v3413_v10 = vpack.c.bf16 %v3187_v62, %v3184_v61 }
 0xd74   : > { %v3309_v11 = vadd.f32 %v13679_v53, %v3308_v13  ;;  %v3332_v12 = vsel %vm915_vm1, %v3306_v56, -inf  ;;  %v3200_v13 = vadd.f32 %v19774_v6, %v19770_v17 }
 0xd75   : > { %3333 = vmax.xlane.f32.xlu0 %v3332_v12  ;;  %v3341_v16 = vsel %vm915_vm1, %v3317_v8, -inf  ;;  %16174 = vmatprep.subr.bf16.mxu1 %v3413_v10 }
 0xd76   : > { %v3335_v14 = vsel %vm915_vm1, %v3309_v11, -inf  ;;  %16175 = vmatpush3.bf16.msra.mxu1 %v3413_v10 }
 0xd77   : > { %3336 = vmax.xlane.f32.xlu1 %v3335_v14  ;;  %v17908_v14 = vld [vmem:[%s22330_s8 + $0x30] sm:$0xff]  }
 0xd78   : > { %16188 = vmatprep.subr.bf16.mxu0 %v17908_v14 }
 0xd79   : > { %3339 = vmax.xlane.f32.xlu0 %v3338_v15  ;;  %v17909_v15 = vld [vmem:[%s22330_s8 + $0x38] sm:$0xff]   ;;  %16189 = vmatpush3.bf16.msra.mxu0 %v17908_v14 }
 0xd7a   : > { %16190 = vmatprep.subr.bf16.mxu0 %v17909_v15 }
 0xd7b   : > { %3342 = vmax.xlane.f32.xlu1 %v3341_v16 }
 0xd7d   : > { %16191 = vmatpush3.bf16.msra.mxu0 %v17909_v15  ;;  %v17913_v15 = vld [vmem:[%s22325_s3 + $0x18] sm:$0xff]  }
 0xdfa   : > { %v3322_v22 = vpop.xlane.xlu0 %3321 }
 0xdfb   : > { %v3344_v28 = vsub.f32 %v3290_v44, %v3322_v22 }
 0xdfc   : > { %v3325_v29 = vpop.xlane.xlu1 %3324 }
 0xdfd   : > { %v3352_v30 = vmul.f32 1.442695, %v3344_v28  ;;  %v3345_v3 = vsub.f32 %v3293_v55, %v3325_v29 }
 0xdfe   : > { %v3328_v31 = vpop.xlane.xlu0 %3327 }
 0xdff   : > { %18318 = vpow2.f32 %v3352_v30  ;;  %v3354_v21 = vmul.f32 1.442695, %v3345_v3  ;;  %v3346_v33 = vsub.f32 %v3298_v52, %v3328_v31 }
 0xe00   : > { %v3331_v25 = vpop.xlane.xlu1 %3330 }
 0xe01   : > { %18320 = vpow2.f32 %v3354_v21  ;;  %v3356_v35 = vmul.f32 1.442695, %v3346_v33  ;;  %v3347_v32 = vsub.f32 %v3301_v59, %v3331_v25 }
 0xe02   : > { %v3334_v36 = vpop.xlane.xlu0 %3333 }
 0xe03   : > { %18322 = vpow2.f32 %v3356_v35  ;;  %v3358_v34 = vmul.f32 1.442695, %v3347_v32  ;;  %v3348_v38 = vsub.f32 %v3306_v56, %v3334_v36  ;;  %v3192_v56 = vadd.f32 %v19770_v17, %v3191_v7 }
 0xe04   : > { %v3337_v40 = vpop.xlane.xlu1 %3336 }
 0xe05   : > { %18324 = vpow2.f32 %v3358_v34  ;;  %v3360_v42 = vmul.f32 1.442695, %v3348_v38  ;;  %v3349_v37 = vsub.f32 %v3309_v11, %v3337_v40  ;;  %v3414_v11 = vpack.c.bf16 %v3195_v63, %v3192_v56  ;;  %v17911_v56 = vld [vmem:[%s22325_s3 + $0x8] sm:$0xff]  }
 0xe06   : > { %v3340_v39 = vpop.xlane.xlu0 %3339 }
 0xe07   : > { %18326 = vpow2.f32 %v3360_v42  ;;  %v3362_v9 = vmul.f32 1.442695, %v3349_v37  ;;  %v3350_v41 = vsub.f32 %v3314_v45, %v3340_v39  ;;  %16176 = vmatprep.subr.bf16.mxu1 %v3414_v11  ;;  %v17910_v42 = vld [vmem:[%s22325_s3] sm:$0xff]   ;;  %v17919_v39 = vld [vmem:[%s22323_s1 + $0x8] sm:$0xff]  }
 0xe08   : > { %v3343_v43 = vpop.xlane.xlu1 %3342  ;;  %16177 = vmatpush3.bf16.msra.mxu1 %v3414_v11  ;;  %16224 = vmatprep.subr.bf16.mxu0 %v17910_v42  ;;  %v17917_v37 = vld [vmem:[%s22323_s1] sm:$0xff]  }
 0xe09   : > { %v19778_v47 = vpop.eup %18318  ;;  %18328 = vpow2.f32 %v3362_v9  ;;  %v3364_v48 = vmul.f32 1.442695, %v3350_v41  ;;  %v3351_v50 = vsub.f32 %v3317_v8, %v3343_v43  ;;  %v3203_v8 = vadd.f32 %v19776_v26, %v19770_v17  ;;  %v13701_v9 = vld [vmem:[%s18993_s21 + $0x40] sm:$0xff]  ;;  %v13702_v41 = vld [vmem:[%s18993_s21 + $0x48] sm:$0xff] }
 0xe0a   : > { %v3368_v51 = vsel %vm915_vm1, %v19778_v47, 0.0  ;;  %v19831_v43 = vpack.c.bf16 %v13702_v41, %v13701_v9 }
 0xe0b   : > { %v19782_v44 = vpop.eup %18320  ;;  %18330 = vpow2.f32 %v3364_v48  ;;  %v3366_v23 = vmul.f32 1.442695, %v3351_v50  ;;  %3369 = vadd.xlane.f32.xlu0 %v3368_v51  ;;  %v3415_v12 = vpack.c.bf16 %v3203_v8, %v3200_v13  ;;  %v17921_v48 = vld [vmem:[%s22323_s1 + $0x18] sm:$0xff]   ;;  %v17922_v50 = vld [vmem:[%s22323_s1 + $0x20] sm:$0xff]   ;;  %v17923_v51 = vld [vmem:[%s22323_s1 + $0x28] sm:$0xff]  }
 0xe0c   : > { %v3371_v24 = vsel %vm915_vm1, %v19782_v44, 0.0  ;;  %v17912_v13 = vld [vmem:[%s22325_s3 + $0x10] sm:$0xff]  }
 0xe0d   : > { %v19786_v27 = vpop.eup %18322  ;;  %18332 = vpow2.f32 %v3366_v23  ;;  %3372 = vadd.xlane.f32.xlu1 %v3371_v24  ;;  %16178 = vmatprep.subr.bf16.mxu1 %v3415_v12  ;;  %v17925_v23 = vld [vmem:[%s22323_s1 + $0x38] sm:$0xff]   ;;  %v13703_v24 = vld [vmem:[%s18993_s21 + $0x50] sm:$0xff] }
 0xe0e   : > { %v3374_v52 = vsel %vm915_vm1, %v19786_v27, 0.0  ;;  %16179 = vmatpush3.bf16.msra.mxu1 %v3415_v12 }
 0xe0f   : > { %v18325_v55 = vpop.eup %18324  ;;  %3375 = vadd.xlane.f32.xlu0 %v3374_v52  ;;  %16200 = vmatprep.subr.bf16.mxu1 %v17917_v37  ;;  %v13705_v52 = vld [vmem:[%s18993_s21 + $0x60] sm:$0xff] }
 0xe10   : > { %v3377_v57 = vsel %vm915_vm1, %v18325_v55, 0.0 }
 0xe11   : > { %v19791_v59 = vpop.eup %18326  ;;  %3378 = vadd.xlane.f32.xlu1 %v3377_v57 }
 0xe12   : > { %v3380_v60 = vsel %vm915_vm1, %v19791_v59, 0.0 }
 0xe13   : > { %v18329_v46 = vpop.eup %18328  ;;  %3381 = vadd.xlane.f32.xlu0 %v3380_v60  ;;  %v13707_v60 = vld [vmem:[%s18993_s21 + $0x70] sm:$0xff] }
 0xe14   : > { %v3383_v49 = vsel %vm915_vm1, %v18329_v46, 0.0 }
 0xe15   : > { %v18331_v54 = vpop.eup %18330  ;;  %3384 = vadd.xlane.f32.xlu1 %v3383_v49 }
 0xe16   : > { %v3386_v58 = vsel %vm915_vm1, %v18331_v54, 0.0 }
 0xe17   : > { %v18333_v53 = vpop.eup %18332  ;;  %3387 = vadd.xlane.f32.xlu0 %v3386_v58 }
 0xe18   : > { %v3389_v45 = vsel %vm915_vm1, %v18333_v53, 0.0 }
 0xe19   : > { %3390 = vadd.xlane.f32.xlu1 %v3389_v45 }
 0xe98   : > { %v3370_v16 = vpop.xlane.xlu0 %3369 }
 0xe99   : > { %18334 = vrcp.f32 %v3370_v16  ;;  %v17914_v16 = vld [vmem:[%s22325_s3 + $0x20] sm:$0xff]  }
 0xe9a   : > { %v3373_v17 = vpop.xlane.xlu1 %3372 }
 0xe9b   : > { %18336 = vrcp.f32 %v3373_v17  ;;  %v17915_v17 = vld [vmem:[%s22325_s3 + $0x28] sm:$0xff]  }
 0xe9c   : > { %v3376_v18 = vpop.xlane.xlu0 %3375 }
 0xe9d   : > { %18338 = vrcp.f32 %v3376_v18  ;;  %v17916_v18 = vld [vmem:[%s22325_s3 + $0x30] sm:$0xff]  }
 0xe9e   : > { %v3379_v19 = vpop.xlane.xlu1 %3378 }
 0xe9f   : > { %18340 = vrcp.f32 %v3379_v19  ;;  %v17918_v19 = vld [vmem:[%s22325_s3 + $0x38] sm:$0xff]  }
 0xea0   : > { %v3382_v20 = vpop.xlane.xlu0 %3381 }
 0xea1   : > { %18342 = vrcp.f32 %v3382_v20  ;;  %v13709_v20 = vld [vmem:[#allocation2] ss:$0 sm:$0xff] }
 0xea2   : > { %v3385_v0 = vpop.xlane.xlu1 %3384 }
 0xea3   : > { %v18335_v1 = vpop.eup %18334  ;;  %18344 = vrcp.f32 %v3385_v0 }
 0xea4   : > { %v3388_v2 = vpop.xlane.xlu0 %3387  ;;  %v3393_v7 = vmul.f32 %v18335_v1, %v19778_v47  ;;  %v17920_v47 = vld [vmem:[%s22323_s1 + $0x10] sm:$0xff]  }
 0xea5   : > { %v18337_v5 = vpop.eup %18336  ;;  %18346 = vrcp.f32 %v3388_v2 }
 0xea6   : > { %v3391_v6 = vpop.xlane.xlu1 %3390  ;;  %v3395_v22 = vmul.f32 %v18337_v5, %v19782_v44  ;;  %v17924_v44 = vld [vmem:[%s22323_s1 + $0x30] sm:$0xff]  }
 0xea7   : > { %v18339_v26 = vpop.eup %18338  ;;  %18348 = vrcp.f32 %v3391_v6 }
 0xea8   : > { %v3408_v28 = vpack.c.bf16 %v3395_v22, %v3393_v7  ;;  %v3397_v29 = vmul.f32 %v18339_v26, %v19786_v27  ;;  %v13704_v27 = vld [vmem:[%s18993_s21 + $0x58] sm:$0xff] }
 0xea9   : > { %v18341_v4 = vpop.eup %18340  ;;  %v19856_v57 = vpack.c.bf16 %v13704_v27, %v13703_v24 }
 0xeaa   : > { %v3399_v30 = vmul.f32 %v18341_v4, %v18325_v55  ;;  %16180 = vmatprep.mubr.msk.bf16.mxu1 %vm915_vm1, %v3408_v28  ;;  %v13706_v55 = vld [vmem:[%s18993_s21 + $0x68] sm:$0xff] }
 0xeab   : > { %v18343_v3 = vpop.eup %18342 }
 0xeac   : > { %v3409_v31 = vpack.c.bf16 %v3399_v30, %v3397_v29  ;;  %v3401_v33 = vmul.f32 %v18343_v3, %v19791_v59  ;;  %v19858_v59 = vpack.c.bf16 %v13706_v55, %v13705_v52 }
 0xead   : > { %v18345_v21 = vpop.eup %18344 }
 0xeae   : > { %16181 = vmatmul.mubr.msk.bf16.vlgmr.msra.gmra.mrb[88].mxu1 %vm915_vm1, %v3409_v31  ;;  %v3403_v25 = vmul.f32 %v18345_v21, %v18329_v46  ;;  %v13708_v46 = vld [vmem:[%s18993_s21 + $0x78] sm:$0xff] }
 0xeaf   : > { %v18347_v35 = vpop.eup %18346  ;;  %16201 = vmatpush3.bf16.msra.mxu1 %v17917_v37  ;;  %v19864_v49 = vpack.c.bf16 %v13708_v46, %v13707_v60 }
 0xeb0   : > { %v3410_v32 = vpack.c.bf16 %v3403_v25, %v3401_v33  ;;  %v3405_v34 = vmul.f32 %v18347_v35, %v18331_v54  ;;  %16202 = vmatprep.subr.bf16.mxu1 %v17919_v39 }
 0xeb1   : > { %v18349_v36 = vpop.eup %18348 }
 0xeb2   : > { %16184 = vmatprep.mubr.msk.bf16.mxu1 %vm915_vm1, %v3410_v32  ;;  %v3407_v38 = vmul.f32 %v18349_v36, %v18333_v53 }
 0xeb3   : > { %16203 = vmatpush3.bf16.msra.mxu1 %v17919_v39 }
 0xeb4   : > { %v3411_v40 = vpack.c.bf16 %v3407_v38, %v3405_v34  ;;  %16204 = vmatprep.subr.bf16.mxu1 %v17920_v47 }
 0xeb6   : > { %16185 = vmatmul.mubr.msk.bf16.gmra.mrb[92].mxu1 %vm915_vm1, %v3411_v40 }
 0xeb7   : > { %16216 = vmatprep.mubr.bf16.mxu1 %v19831_v43  ;;  %16205 = vmatpush3.bf16.msra.mxu1 %v17920_v47  ;;  %v13700_v47 = vld [vmem:[%s22331_s9] ss:$0 sm:$0xff] }
 0xeb8   : > { %16206 = vmatprep.subr.bf16.mxu1 %v17921_v48 }
 0xebb   : > { %16207 = vmatpush3.bf16.msra.mxu1 %v17921_v48 }
 0xebc   : > { %16208 = vmatprep.subr.bf16.mxu1 %v17922_v50 }
 0xebf   : > { %16209 = vmatpush3.bf16.msra.mxu1 %v17922_v50 }
 0xec0   : > { %16210 = vmatprep.subr.bf16.mxu1 %v17923_v51 }
 0xec3   : > { %16211 = vmatpush3.bf16.msra.mxu1 %v17923_v51 }
 0xec4   : > { %16212 = vmatprep.subr.bf16.mxu1 %v17924_v44 }
 0xec7   : > { %16213 = vmatpush3.bf16.msra.mxu1 %v17924_v44 }
 0xec8   : > { %16214 = vmatprep.subr.bf16.mxu1 %v17925_v23 }
 0xecb   : > { %16215 = vmatpush3.bf16.msra.mxu1 %v17925_v23 }
 0xece   : > { %16217 = vmatmul.mubr.bf16.vlgmr.msra.gmra.mrb[96].mxu1 %v19856_v57 }
 0xecf   : > { %16220 = vmatprep.mubr.bf16.mxu1 %v19858_v59 }
 0xed6   : > { %16221 = vmatmul.mubr.bf16.gmra.mrb[100].mxu1 %v19864_v49 }
 0xed7   : > { %16264 = vmatprep.mubr.bf16.mxu1 %v19831_v43 }
 0xf81   : > { %v16182_v61 = vpop.f32.mrb[88].mxu1 }
 0xf82   : > { %v3462_v62 = vpop.f32.mrb[89].mxu1 }
 0xf83   : > { %v16183_v54 = vpop.f32.mrb[90].mxu1 }
 0xf84   : > { %v3494_v58 = vpack.c.bf16 %v16183_v54, %v16182_v61  ;;  %v3465_v53 = vpop.f32.mrb[91].mxu1 }
 0xf85   : > { %v3493_v45 = vpack.c.bf16 %v3465_v53, %v3462_v62 }
 0xf87   : > { %16192 = vmatprep.mubr.msk.bf16.mxu0 %vm825_vm0, %v3493_v45 }
 0xf88   : > { %16193 = vmatmul.mubr.msk.bf16.vlgmr.msra.gmra.mrb[32].mxu0 %vm825_vm0, %v3494_v58 }
 0xf89   : > { %16225 = vmatpush3.bf16.msra.mxu0 %v17910_v42  ;;  %v16186_v63 = vpop.f32.mrb[92].mxu1 }
 0xf8a   : > { %v3478_v10 = vpop.f32.mrb[93].mxu1  ;;  %16226 = vmatprep.subr.bf16.mxu0 %v17911_v56 }
 0xf8b   : > { %v16187_v8 = vpop.f32.mrb[94].mxu1 }
 0xf8c   : > { %v3496_v11 = vpack.c.bf16 %v16187_v8, %v16186_v63  ;;  %v3481_v12 = vpop.f32.mrb[95].mxu1 }
 0xf8d   : > { %v3495_v14 = vpack.c.bf16 %v3481_v12, %v3478_v10  ;;  %16227 = vmatpush3.bf16.msra.mxu0 %v17911_v56  ;;  %v13718_v56 = vld [vmem:[%s22326_s4] ss:$0 sm:$0xff] }
 0xf8e   : > { %16228 = vmatprep.subr.bf16.mxu0 %v17912_v13 }
 0xf8f   : > { %16196 = vmatprep.mubr.msk.bf16.mxu0 %vm825_vm0, %v3495_v14 }
 0xf90   : > { %16197 = vmatmul.mubr.msk.bf16.gmra.mrb[36].mxu0 %vm825_vm0, %v3496_v11 }
 0xf91   : > { %16229 = vmatpush3.bf16.msra.mxu0 %v17912_v13  ;;  %16240 = vmatprep.mubr.bf16.mxu0 %v19831_v43 }
 0xf92   : > { %16230 = vmatprep.subr.bf16.mxu0 %v17913_v15 }
 0xf95   : > { %16231 = vmatpush3.bf16.msra.mxu0 %v17913_v15 }
 0xf96   : > { %16232 = vmatprep.subr.bf16.mxu0 %v17914_v16 }
 0xf99   : > { %16233 = vmatpush3.bf16.msra.mxu0 %v17914_v16 }
 0xf9a   : > { %16234 = vmatprep.subr.bf16.mxu0 %v17915_v17 }
 0xf9d   : > { %16235 = vmatpush3.bf16.msra.mxu0 %v17915_v17 }
 0xf9e   : > { %16236 = vmatprep.subr.bf16.mxu0 %v17916_v18 }
 0xfa1   : > { %16237 = vmatpush3.bf16.msra.mxu0 %v17916_v18  ;;  %v16218_v0 = vpop.f32.mrb[96].mxu1 }
 0xfa2   : > { %16238 = vmatprep.subr.bf16.mxu0 %v17918_v19  ;;  %v3748_v1 = vadd.f32 %v16218_v0, %v13709_v20  ;;  %v3739_v2 = vpop.f32.mrb[97].mxu1 }
 0xfa3   : > { %v3740_v5 = vadd.f32 %v13709_v20, %v3739_v2  ;;  %v16219_v6 = vpop.f32.mrb[98].mxu1 }
 0xfa4   : > { %v19897_v7 = vmul.f32 0.17677669, %v3748_v1  ;;  %v3751_v22 = vadd.f32 %v16219_v6, %v13709_v20  ;;  %v3742_v26 = vpop.f32.mrb[99].mxu1 }
 0xfa5   : > { %16239 = vmatpush3.bf16.msra.mxu0 %v17918_v19  ;;  %v4042_v28 = vmul.f32 0.17677669, %v3740_v5  ;;  %v3743_v4 = vadd.f32 %v13709_v20, %v3742_v26 }
 0xfa6   : > { %v19899_v29 = vmul.f32 0.17677669, %v3751_v22 }
 0xfa7   : > { %v4043_v30 = vmul.f32 0.17677669, %v3743_v4 }
 0xfa8   : > { %16241 = vmatmul.mubr.bf16.vlgmr.msra.gmra.mrb[72].mxu0 %v19856_v57  ;;  %v4051_v3 = vpack.c.bf16 %v19899_v29, %v19897_v7  ;;  %v17927_v7 = vld [vmem:[%s22327_s5 + $0x8] sm:$0xff]   ;;  %v17928_v29 = vld [vmem:[%s22327_s5 + $0x10] sm:$0xff]  }
 0xfa9   : > { %16244 = vmatprep.mubr.bf16.mxu0 %v19858_v59  ;;  %v4050_v31 = vpack.c.bf16 %v4043_v30, %v4042_v28  ;;  %v16222_v21 = vpop.f32.mrb[100].mxu1 }
 0xfaa   : > { %v3764_v33 = vadd.f32 %v16222_v21, %v13709_v20  ;;  %v3755_v25 = vpop.f32.mrb[101].mxu1  ;;  %v17930_v21 = vld [vmem:[%s22327_s5 + $0x20] sm:$0xff]  }
 0xfab   : > { %v3756_v35 = vadd.f32 %v13709_v20, %v3755_v25  ;;  %v16223_v32 = vpop.f32.mrb[102].mxu1  ;;  %v17932_v25 = vld [vmem:[%s22327_s5 + $0x30] sm:$0xff]  }
 0xfac   : > { %v19904_v36 = vmul.f32 0.17677669, %v3764_v33  ;;  %v3767_v34 = vadd.f32 %v16223_v32, %v13709_v20  ;;  %v3758_v38 = vpop.f32.mrb[103].mxu1  ;;  %v17931_v33 = vld [vmem:[%s22327_s5 + $0x28] sm:$0xff]   ;;  %v4058_v32 = vld [vmem:[%s22329_s7] sm:$0xff] }
 0xfad   : > { %v19906_v40 = vmul.f32 0.17677669, %v3756_v35  ;;  %v3759_v42 = vadd.f32 %v13709_v20, %v3758_v38  ;;  %v17933_v35 = vld [vmem:[%s22327_s5 + $0x38] sm:$0xff]  }
 0xfae   : > { %v19908_v37 = vmul.f32 0.17677669, %v3767_v34  ;;  %v4060_v34 = vld [vmem:[%s22329_s7 + $0x10] sm:$0xff] }
 0xfaf   : > { %v19910_v39 = vmul.f32 0.17677669, %v3759_v42 }
 0xfb0   : > { %16245 = vmatmul.mubr.bf16.gmra.mrb[76].mxu0 %v19864_v49  ;;  %v4053_v9 = vpack.c.bf16 %v19908_v37, %v19904_v36 }
 0xfb1   : > { %16280 = vmatprep.mubr.msk.bf16.mxu0 %vm825_vm0, %v4050_v31  ;;  %v4052_v41 = vpack.c.bf16 %v19910_v39, %v19906_v40  ;;  %v17926_v31 = vld [vmem:[%s22327_s5] sm:$0xff]   ;;  %v4059_v40 = vld [vmem:[%s22329_s7 + $0x8] sm:$0xff]  ;;  %v4061_v39 = vld [vmem:[%s22329_s7 + $0x18] sm:$0xff] }
 0xfb2   : > { %16248 = vmatprep.subr.bf16.mxu1 %v17926_v31 }
 0xfb3   : > { %16249 = vmatpush3.bf16.msra.mxu1 %v17926_v31 }
 0xfb4   : > { %16250 = vmatprep.subr.bf16.mxu1 %v17927_v7 }
 0xfb7   : > { %16251 = vmatpush3.bf16.msra.mxu1 %v17927_v7 }
 0xfb8   : > { %16252 = vmatprep.subr.bf16.mxu1 %v17928_v29 }
 0xfbb   : > { %16253 = vmatpush3.bf16.msra.mxu1 %v17928_v29 }
0x105b   : > { %v16194_v48 = vpop.f32.mrb[32].mxu0 }
0x105c   : > { %v3607_v50 = vadd.f32 %v16194_v48, %v13700_v47  ;;  %v3560_v51 = vpop.f32.mrb[33].mxu0 }
0x105d   : > { %v3605_v44 = vadd.f32 %v13700_v47, %v3560_v51  ;;  %v16195_v23 = vpop.f32.mrb[34].mxu0 }
0x105e   : > { %3615 = vst [vmem:[%s19922_s29 + $0x10] sm:$0xff] %v3607_v50  ;;  %v3608_v24 = vadd.f32 %v16195_v23, %v13700_v47  ;;  %v3563_v27 = vpop.f32.mrb[35].mxu0  ;;  %v4062_v23 = vld [vmem:[%s22329_s7 + $0x20] sm:$0xff] }
0x105f   : > { %3613 = vst [vmem:[%s19922_s29] sm:$0xff] %v3605_v44  ;;  %v3606_v52 = vadd.f32 %v13700_v47, %v3563_v27  ;;  %v4064_v44 = vld [vmem:[%s22329_s7 + $0x30] sm:$0xff] }
0x1060   : > { %3616 = vst [vmem:[%s19922_s29 + $0x18] sm:$0xff] %v3608_v24 }
0x1061   : > { %3614 = vst [vmem:[%s19922_s29 + $0x8] sm:$0xff] %v3606_v52 }
0x1063   : > { %v16198_v55 = vpop.f32.mrb[36].mxu0 }
0x1064   : > { %v3611_v60 = vadd.f32 %v16198_v55, %v13700_v47  ;;  %v3576_v46 = vpop.f32.mrb[37].mxu0  ;;  %v4065_v55 = vld [vmem:[%s22329_s7 + $0x38] sm:$0xff] }
0x1065   : > { %v3609_v61 = vadd.f32 %v13700_v47, %v3576_v46  ;;  %v16199_v62 = vpop.f32.mrb[38].mxu0 }
0x1066   : > { %3619 = vst [vmem:[%s19922_s29 + $0x30] sm:$0xff] %v3611_v60  ;;  %v3612_v54 = vadd.f32 %v16199_v62, %v13700_v47  ;;  %v3579_v58 = vpop.f32.mrb[39].mxu0  ;;  %v4063_v60 = vld [vmem:[%s22329_s7 + $0x28] sm:$0xff] }
0x1067   : > { %3617 = vst [vmem:[%s19922_s29 + $0x20] sm:$0xff] %v3609_v61  ;;  %v3610_v53 = vadd.f32 %v13700_v47, %v3579_v58 }
0x1068   : > { %3620 = vst [vmem:[%s19922_s29 + $0x38] sm:$0xff] %v3612_v54 }
0x1069   : > { %3618 = vst [vmem:[%s19922_s29 + $0x28] sm:$0xff] %v3610_v53 }
0x107b   : > { %v16242_v45 = vpop.f32.mrb[72].mxu0 }
0x107c   : > { %v3875_v63 = vpop.f32.mrb[73].mxu0  ;;  %v3884_v13 = vadd.f32 %v16242_v45, %v13718_v56 }
0x107d   : > { %v16243_v10 = vpop.f32.mrb[74].mxu0  ;;  %v3876_v12 = vadd.f32 %v13718_v56, %v3875_v63 }
0x107e   : > { %v3887_v8 = vadd.f32 %v16243_v10, %v13718_v56  ;;  %v3878_v11 = vpop.f32.mrb[75].mxu0 }
0x107f   : > { %v3879_v14 = vadd.f32 %v13718_v56, %v3878_v11  ;;  %v17935_v11 = vld [vmem:[%s22325_s3 + $0x48] sm:$0xff]  }
0x1080   : > { %v4055_v15 = vpack.c.bf16 %v3887_v8, %v3884_v13  ;;  %v17934_v8 = vld [vmem:[%s22325_s3 + $0x40] sm:$0xff]  }
0x1081   : > { %v4054_v16 = vpack.c.bf16 %v3879_v14, %v3876_v12  ;;  %v17936_v12 = vld [vmem:[%s22325_s3 + $0x50] sm:$0xff]   ;;  %v17937_v14 = vld [vmem:[%s22325_s3 + $0x58] sm:$0xff]  }
0x1082   : > { %v4082_v28 = vsel %vm825_vm0, %v4055_v15, 0 }
0x1083   : > { %17704 = vmatprep.subr.msk.bf16.mxu0 %vm825_vm0, %v4054_v16  ;;  %v4079_v17 = vsel %vm825_vm0, %v4054_v16, 0  ;;  %v16246_v18 = vpop.f32.mrb[76].mxu0  ;;  %v20054_v16 = vld [vmem:[%s22328_s6] ss:$0 sm:$0xff] }
0x1084   : > { %16273 = vmatpush3.bf16.xpose.msra.mxu0 %v4079_v17  ;;  %v3900_v19 = vadd.f32 %v16246_v18, %v13718_v56  ;;  %v3891_v20 = vpop.f32.mrb[77].mxu0 }
0x1085   : > { %17705 = vmatprep.subr.msk.bf16.mxu0 %vm825_vm0, %v4055_v15  ;;  %v3892_v0 = vadd.f32 %v13718_v56, %v3891_v20  ;;  %v16247_v1 = vpop.f32.mrb[78].mxu0  ;;  %v17938_v15 = vld [vmem:[%s22325_s3 + $0x60] sm:$0xff]  }
0x1086   : > { %v3903_v2 = vadd.f32 %v16247_v1, %v13718_v56  ;;  %v3894_v5 = vpop.f32.mrb[79].mxu0 }
0x1087   : > { %v3895_v6 = vadd.f32 %v13718_v56, %v3894_v5 }
0x1088   : > { %v4057_v22 = vpack.c.bf16 %v3903_v2, %v3900_v19 }
0x1089   : > { %v4056_v26 = vpack.c.bf16 %v3895_v6, %v3892_v0 }
0x108a   : > { %v4088_v30 = vsel %vm825_vm0, %v4057_v22, 0 }
0x108b   : > { %v4085_v4 = vsel %vm825_vm0, %v4056_v26, 0 }
0x108c   : > { %16275 = vmatpush3.bf16.xpose.msra.mxu0 %v4082_v28 }
0x108d   : > { %17706 = vmatprep.subr.msk.bf16.mxu0 %vm825_vm0, %v4056_v26 }
0x1094   : > { %16277 = vmatpush3.bf16.xpose.msra.mxu0 %v4085_v4 }
0x1095   : > { %17707 = vmatprep.subr.msk.bf16.mxu0 %vm825_vm0, %v4057_v22 }
0x109c   : > { %16279 = vmatpush3.bf16.xpose.msra.mxu0 %v4088_v30 }
0x109d   : > { %16328 = vmatprep.subr.bf16.mxu0 %v17934_v8 }
0x10a3   : > { %16281 = vmatmul.mubr.msk.bf16.vlgmr.msra.gmra.mrb[80].mxu0 %vm825_vm0, %v4051_v3  ;;  %v17929_v3 = vld [vmem:[%s22327_s5 + $0x18] sm:$0xff]  }
0x10a4   : > { %16284 = vmatprep.mubr.msk.bf16.mxu0 %vm825_vm0, %v4052_v41  ;;  %16254 = vmatprep.subr.bf16.mxu1 %v17929_v3 }
0x10a5   : > { %16255 = vmatpush3.bf16.msra.mxu1 %v17929_v3  ;;  %16329 = vmatpush3.bf16.msra.mxu0 %v17934_v8 }
0x10a6   : > { %16256 = vmatprep.subr.bf16.mxu1 %v17930_v21  ;;  %16330 = vmatprep.subr.bf16.mxu0 %v17935_v11 }
0x10a9   : > { %16257 = vmatpush3.bf16.msra.mxu1 %v17930_v21  ;;  %16331 = vmatpush3.bf16.msra.mxu0 %v17935_v11  ;;  %v17939_v11 = vld [vmem:[%s22325_s3 + $0x68] sm:$0xff]  }
0x10aa   : > { %16258 = vmatprep.subr.bf16.mxu1 %v17931_v33  ;;  %16332 = vmatprep.subr.bf16.mxu0 %v17936_v12 }
0x10ab   : > { %16285 = vmatmul.mubr.msk.bf16.gmra.mrb[84].mxu0 %vm825_vm0, %v4053_v9 }
0x10ac   : > { %16344 = vmatprep.mubr.bf16.mxu0 %v19831_v43 }
0x10ad   : > { %16259 = vmatpush3.bf16.msra.mxu1 %v17931_v33  ;;  %16333 = vmatpush3.bf16.msra.mxu0 %v17936_v12 }
0x10ae   : > { %16260 = vmatprep.subr.bf16.mxu1 %v17932_v25  ;;  %16334 = vmatprep.subr.bf16.mxu0 %v17937_v14 }
0x10b1   : > { %16261 = vmatpush3.bf16.msra.mxu1 %v17932_v25  ;;  %16335 = vmatpush3.bf16.msra.mxu0 %v17937_v14 }
0x10b2   : > { %16262 = vmatprep.subr.bf16.mxu1 %v17933_v35  ;;  %16336 = vmatprep.subr.bf16.mxu0 %v17938_v15 }
0x10b5   : > { %16263 = vmatpush3.bf16.msra.mxu1 %v17933_v35  ;;  %16337 = vmatpush3.bf16.msra.mxu0 %v17938_v15 }
0x10b6   : > { %16338 = vmatprep.subr.bf16.mxu0 %v17939_v11 }
0x10b8   : > { %16265 = vmatmul.mubr.bf16.vlgmr.msra.gmra.mrb[104].mxu1 %v19856_v57 }
0x10b9   : > { %16268 = vmatprep.mubr.bf16.mxu1 %v19858_v59  ;;  %16339 = vmatpush3.bf16.msra.mxu0 %v17939_v11 }
0x10c0   : > { %16269 = vmatmul.mubr.bf16.gmra.mrb[108].mxu1 %v19864_v49 }
0x1176   : > { %v16282_v36 = vpop.f32.mrb[80].mxu0 }
0x1177   : > { %v4124_v38 = vpop.f32.mrb[81].mxu0  ;;  %v19997_v41 = vadd.f32 %v16282_v36, %v4060_v34 }
0x1178   : > { %v19992_v42 = vadd.f32 %v4124_v38, %v4058_v32  ;;  %v16283_v37 = vpop.f32.mrb[82].mxu0 }
0x1179   : > { %v4127_v9 = vpop.f32.mrb[83].mxu0  ;;  %v20003_v50 = vadd.f32 %v16283_v37, %v4061_v39  ;;  %v4161_v27 = vsel %vm915_vm1, %v19997_v41, -inf }
0x117a   : > { %v19999_v47 = vadd.f32 %v4127_v9, %v4059_v40  ;;  %v4155_v48 = vsel %vm915_vm1, %v19992_v42, -inf }
0x117b   : > { %4156 = vmax.xlane.f32.xlu0 %v4155_v48  ;;  %v4164_v54 = vsel %vm915_vm1, %v20003_v50, -inf }
0x117c   : > { %v4158_v51 = vsel %vm915_vm1, %v19999_v47, -inf }
0x117d   : > { %4159 = vmax.xlane.f32.xlu1 %v4158_v51 }
0x117e   : > { %v16286_v24 = vpop.f32.mrb[84].mxu0 }
0x117f   : > { %v4140_v52 = vpop.f32.mrb[85].mxu0  ;;  %4162 = vmax.xlane.f32.xlu0 %v4161_v27  ;;  %v20021_v46 = vadd.f32 %v16286_v24, %v4064_v44 }
0x1180   : > { %v20023_v61 = vadd.f32 %v4140_v52, %v4062_v23  ;;  %v16287_v62 = vpop.f32.mrb[86].mxu0 }
0x1181   : > { %v4143_v58 = vpop.f32.mrb[87].mxu0  ;;  %4165 = vmax.xlane.f32.xlu1 %v4164_v54  ;;  %v20027_v53 = vadd.f32 %v16287_v62, %v4065_v55  ;;  %v4173_v10 = vsel %vm915_vm1, %v20021_v46, -inf }
0x1182   : > { %v4144_v45 = vadd.f32 %v4143_v58, %v4063_v60  ;;  %v4167_v56 = vsel %vm915_vm1, %v20023_v61, -inf }
0x1183   : > { %4168 = vmax.xlane.f32.xlu0 %v4167_v56  ;;  %v4176_v13 = vsel %vm915_vm1, %v20027_v53, -inf }
0x1184   : > { %v4170_v63 = vsel %vm915_vm1, %v4144_v45, -inf }
0x1185   : > { %4171 = vmax.xlane.f32.xlu1 %v4170_v63 }
0x1187   : > { %4174 = vmax.xlane.f32.xlu0 %v4173_v10 }
0x1189   : > { %4177 = vmax.xlane.f32.xlu1 %v4176_v13 }
0x118b   : > { %v16266_v17 = vpop.f32.mrb[104].mxu1 }
0x118c   : > { %v4011_v18 = vpop.f32.mrb[105].mxu1  ;;  %v4020_v54 = vadd.f32 %v16266_v17, %v20054_v16 }
0x118d   : > { %v4012_v19 = vadd.f32 %v20054_v16, %v4011_v18  ;;  %v16267_v20 = vpop.f32.mrb[106].mxu1  ;;  %v17940_v18 = vld [vmem:[%s22325_s3 + $0x70] sm:$0xff]  }
0x118e   : > { %v4014_v0 = vpop.f32.mrb[107].mxu1  ;;  %v4023_v58 = vadd.f32 %v16267_v20, %v20054_v16  ;;  %16340 = vmatprep.subr.bf16.mxu0 %v17940_v18  ;;  %v17941_v20 = vld [vmem:[%s22325_s3 + $0x78] sm:$0xff]  }
0x118f   : > { %v4015_v1 = vadd.f32 %v20054_v16, %v4014_v0  ;;  %16341 = vmatpush3.bf16.msra.mxu0 %v17940_v18 }
0x1190   : > { %v4248_v8 = vpack.c.bf16 %v4023_v58, %v4020_v54  ;;  %16342 = vmatprep.subr.bf16.mxu0 %v17941_v20 }
0x1191   : > { %v4247_v2 = vpack.c.bf16 %v4015_v1, %v4012_v19 }
0x1193   : > { %v20058_v5 = vpop.f32.mrb[108].mxu1  ;;  %16288 = vmatprep.subr.bf16.mxu1 %v4247_v2  ;;  %16343 = vmatpush3.bf16.msra.mxu0 %v17941_v20 }
0x1194   : > { %v4027_v6 = vpop.f32.mrb[109].mxu1  ;;  %16289 = vmatpush3.bf16.msra.mxu1 %v4247_v2  ;;  %v4036_v14 = vadd.f32 %v20058_v5, %v20054_v16 }
0x1195   : > { %v20060_v26 = vpop.f32.mrb[110].mxu1  ;;  %v4028_v10 = vadd.f32 %v20054_v16, %v4027_v6  ;;  %16290 = vmatprep.subr.bf16.mxu1 %v4248_v8 }
0x1196   : > { %v4030_v4 = vpop.f32.mrb[111].mxu1  ;;  %v4039_v15 = vadd.f32 %v20060_v26, %v20054_v16  ;;  %16345 = vmatmul.mubr.bf16.vlgmr.msra.gmra.mrb[88].mxu0 %v19856_v57 }
0x1197   : > { %v4031_v13 = vadd.f32 %v20054_v16, %v4030_v4  ;;  %16348 = vmatprep.mubr.bf16.mxu0 %v19858_v59  ;;  %v17942_v16 = vld [vmem:[%s22323_s1 + $0x40] sm:$0xff]  }
0x1198   : > { %16291 = vmatpush3.bf16.msra.mxu1 %v4248_v8  ;;  %v4250_v19 = vpack.c.bf16 %v4039_v15, %v4036_v14 }
0x1199   : > { %v4249_v17 = vpack.c.bf16 %v4031_v13, %v4028_v10 }
0x119b   : > { %16292 = vmatprep.subr.bf16.mxu1 %v4249_v17 }
0x119c   : > { %16293 = vmatpush3.bf16.msra.mxu1 %v4249_v17 }
0x119d   : > { %16294 = vmatprep.subr.bf16.mxu1 %v4250_v19 }
0x119e   : > { %16349 = vmatmul.mubr.bf16.gmra.mrb[92].mxu0 %v19864_v49 }
0x11a0   : > { %16295 = vmatpush3.bf16.msra.mxu1 %v4250_v19 }
0x11a1   : > { %16304 = vmatprep.subr.bf16.mxu1 %v17942_v16 }
0x1208   : > { %v4157_v22 = vpop.xlane.xlu0 %4156 }
0x1209   : > { %v4179_v28 = vsub.f32 %v19992_v42, %v4157_v22 }
0x120a   : > { %v4160_v30 = vpop.xlane.xlu1 %4159 }
0x120b   : > { %v4187_v31 = vmul.f32 1.442695, %v4179_v28  ;;  %v4180_v7 = vsub.f32 %v19999_v47, %v4160_v30 }
0x120c   : > { %v4163_v29 = vpop.xlane.xlu0 %4162 }
0x120d   : > { %18350 = vpow2.f32 %v4187_v31  ;;  %v4189_v3 = vmul.f32 1.442695, %v4180_v7  ;;  %v4181_v21 = vsub.f32 %v19997_v41, %v4163_v29 }
0x120e   : > { %v4166_v33 = vpop.xlane.xlu1 %4165 }
0x120f   : > { %18352 = vpow2.f32 %v4189_v3  ;;  %v4191_v25 = vmul.f32 1.442695, %v4181_v21  ;;  %v4182_v35 = vsub.f32 %v20003_v50, %v4166_v33 }
0x1210   : > { %v4169_v32 = vpop.xlane.xlu0 %4168 }
0x1211   : > { %18354 = vpow2.f32 %v4191_v25  ;;  %v4193_v36 = vmul.f32 1.442695, %v4182_v35  ;;  %v4183_v34 = vsub.f32 %v20023_v61, %v4169_v32 }
0x1212   : > { %v4172_v38 = vpop.xlane.xlu1 %4171 }
0x1213   : > { %18356 = vpow2.f32 %v4193_v36  ;;  %v4195_v40 = vmul.f32 1.442695, %v4183_v34  ;;  %v4184_v42 = vsub.f32 %v4144_v45, %v4172_v38  ;;  %v17943_v36 = vld [vmem:[%s22323_s1 + $0x48] sm:$0xff]  }
0x1214   : > { %v4175_v37 = vpop.xlane.xlu0 %4174 }
0x1215   : > { %18358 = vpow2.f32 %v4195_v40  ;;  %v4197_v39 = vmul.f32 1.442695, %v4184_v42  ;;  %v4185_v9 = vsub.f32 %v20021_v46, %v4175_v37 }
0x1216   : > { %v4178_v41 = vpop.xlane.xlu1 %4177 }
0x1217   : > { %v20068_v47 = vpop.eup %18350  ;;  %18360 = vpow2.f32 %v4197_v39  ;;  %v4199_v48 = vmul.f32 1.442695, %v4185_v9  ;;  %v4186_v50 = vsub.f32 %v20027_v53, %v4178_v41  ;;  %v17944_v39 = vld [vmem:[%s22323_s1 + $0x50] sm:$0xff]  }
0x1218   : > { %v4203_v51 = vsel %vm915_vm1, %v20068_v47, 0.0 }
0x1219   : > { %v20073_v44 = vpop.eup %18352  ;;  %18362 = vpow2.f32 %v4199_v48  ;;  %v4201_v23 = vmul.f32 1.442695, %v4186_v50  ;;  %4204 = vadd.xlane.f32.xlu0 %v4203_v51  ;;  %v17945_v50 = vld [vmem:[%s22323_s1 + $0x58] sm:$0xff]   ;;  %v17946_v51 = vld [vmem:[%s22323_s1 + $0x60] sm:$0xff]  }
0x121a   : > { %v4206_v24 = vsel %vm915_vm1, %v20073_v44, 0.0 }
0x121b   : > { %v20077_v27 = vpop.eup %18354  ;;  %18364 = vpow2.f32 %v4201_v23  ;;  %4207 = vadd.xlane.f32.xlu1 %v4206_v24  ;;  %v17948_v23 = vld [vmem:[%s22323_s1 + $0x70] sm:$0xff]   ;;  %v17949_v24 = vld [vmem:[%s22323_s1 + $0x78] sm:$0xff]  }
0x121c   : > { %v4209_v52 = vsel %vm915_vm1, %v20077_v27, 0.0 }
0x121d   : > { %v20081_v55 = vpop.eup %18356  ;;  %4210 = vadd.xlane.f32.xlu0 %v4209_v52 }
0x121e   : > { %v4212_v60 = vsel %vm915_vm1, %v20081_v55, 0.0 }
0x121f   : > { %v20085_v46 = vpop.eup %18358  ;;  %4213 = vadd.xlane.f32.xlu1 %v4212_v60 }
0x1220   : > { %v4215_v61 = vsel %vm915_vm1, %v20085_v46, 0.0 }
0x1221   : > { %v20089_v62 = vpop.eup %18360  ;;  %4216 = vadd.xlane.f32.xlu0 %v4215_v61 }
0x1222   : > { %v4218_v53 = vsel %vm915_vm1, %v20089_v62, 0.0 }
0x1223   : > { %v20095_v45 = vpop.eup %18362  ;;  %4219 = vadd.xlane.f32.xlu1 %v4218_v53 }
0x1224   : > { %v4221_v56 = vsel %vm915_vm1, %v20095_v45, 0.0 }
0x1225   : > { %v20099_v63 = vpop.eup %18364  ;;  %4222 = vadd.xlane.f32.xlu0 %v4221_v56 }
0x1226   : > { %v4224_v12 = vsel %vm915_vm1, %v20099_v63, 0.0 }
0x1227   : > { %4225 = vadd.xlane.f32.xlu1 %v4224_v12 }
0x1269   : > { %v16346_v52 = vpop.f32.mrb[88].mxu0 }
0x126a   : > { %v4577_v60 = vpop.f32.mrb[89].mxu0 }
0x126b   : > { %v16347_v61 = vpop.f32.mrb[90].mxu0 }
0x126c   : > { %v4580_v54 = vpop.f32.mrb[91].mxu0 }
0x12a6   : > { %v4205_v0 = vpop.xlane.xlu0 %4204 }
0x12a7   : > { %18366 = vrcp.f32 %v4205_v0 }
0x12a8   : > { %v4208_v1 = vpop.xlane.xlu1 %4207 }
0x12a9   : > { %18368 = vrcp.f32 %v4208_v1 }
0x12aa   : > { %v4211_v2 = vpop.xlane.xlu0 %4210 }
0x12ab   : > { %18370 = vrcp.f32 %v4211_v2 }
0x12ac   : > { %v4214_v5 = vpop.xlane.xlu1 %4213 }
0x12ad   : > { %18372 = vrcp.f32 %v4214_v5 }
0x12ae   : > { %v4217_v6 = vpop.xlane.xlu0 %4216 }
0x12af   : > { %18374 = vrcp.f32 %v4217_v6 }
0x12b0   : > { %v4220_v22 = vpop.xlane.xlu1 %4219 }
0x12b1   : > { %v18367_v26 = vpop.eup %18366  ;;  %18376 = vrcp.f32 %v4220_v22 }
0x12b2   : > { %v4223_v28 = vpop.xlane.xlu0 %4222  ;;  %v4228_v31 = vmul.f32 %v18367_v26, %v20068_v47 }
0x12b3   : > { %v18369_v4 = vpop.eup %18368  ;;  %18378 = vrcp.f32 %v4223_v28 }
0x12b4   : > { %v4226_v30 = vpop.xlane.xlu1 %4225  ;;  %v4230_v7 = vmul.f32 %v18369_v4, %v20073_v44  ;;  %v17947_v44 = vld [vmem:[%s22323_s1 + $0x68] sm:$0xff]  }
0x12b5   : > { %v18371_v29 = vpop.eup %18370  ;;  %18380 = vrcp.f32 %v4226_v30 }
0x12b6   : > { %v4243_v3 = vpack.c.bf16 %v4230_v7, %v4228_v31  ;;  %v4232_v33 = vmul.f32 %v18371_v29, %v20077_v27  ;;  %v13786_v27 = vld [vmem:[%s22326_s4 + $0x1] ss:$0 sm:$0xff] }
0x12b7   : > { %v18373_v21 = vpop.eup %18372  ;;  %v4581_v58 = vadd.f32 %v13786_v27, %v4580_v54  ;;  %v13760_v29 = vld [vmem:[#allocation2 + $0x1] ss:$0 sm:$0xff]  ;;  %v17951_v54 = vld [vmem:[%s22327_s5 + $0x48] sm:$0xff]  }
0x12b8   : > { %v4234_v25 = vmul.f32 %v18373_v21, %v20081_v55  ;;  %16296 = vmatprep.mubr.msk.bf16.mxu1 %vm915_vm1, %v4243_v3  ;;  %v4586_v55 = vadd.f32 %v16346_v52, %v13786_v27 }
0x12b9   : > { %v18375_v35 = vpop.eup %18374 }
0x12ba   : > { %v4244_v32 = vpack.c.bf16 %v4234_v25, %v4232_v33  ;;  %v4236_v38 = vmul.f32 %v18375_v35, %v20085_v46  ;;  %v4578_v46 = vadd.f32 %v13786_v27, %v4577_v60 }
0x12bb   : > { %v18377_v34 = vpop.eup %18376 }
0x12bc   : > { %16297 = vmatmul.mubr.msk.bf16.vlgmr.msra.gmra.mrb[112].mxu1 %vm915_vm1, %v4244_v32  ;;  %v4238_v40 = vmul.f32 %v18377_v34, %v20089_v62  ;;  %v4589_v62 = vadd.f32 %v16347_v61, %v13786_v27 }
0x12bd   : > { %v18379_v42 = vpop.eup %18378  ;;  %16305 = vmatpush3.bf16.msra.mxu1 %v17942_v16 }
0x12be   : > { %16306 = vmatprep.subr.bf16.mxu1 %v17943_v36  ;;  %v4245_v37 = vpack.c.bf16 %v4238_v40, %v4236_v38  ;;  %v4240_v41 = vmul.f32 %v18379_v42, %v20095_v45  ;;  %v4757_v53 = vpack.c.bf16 %v4589_v62, %v4586_v55  ;;  %v4756_v45 = vpack.c.bf16 %v4581_v58, %v4578_v46  ;;  %v17950_v62 = vld [vmem:[%s22327_s5 + $0x40] sm:$0xff]   ;;  %v17952_v58 = vld [vmem:[%s22327_s5 + $0x50] sm:$0xff]  }
0x12bf   : > { %v18381_v9 = vpop.eup %18380 }
0x12c0   : > { %16300 = vmatprep.mubr.msk.bf16.mxu1 %vm915_vm1, %v4245_v37  ;;  %v4242_v47 = vmul.f32 %v18381_v9, %v20099_v63  ;;  %17708 = vmatprep.subr.msk.bf16.mxu0 %vm825_vm0, %v4756_v45  ;;  %v4781_v56 = vsel %vm825_vm0, %v4756_v45, 0  ;;  %v16350_v63 = vpop.f32.mrb[92].mxu0  ;;  %v4784_v8 = vsel %vm825_vm0, %v4757_v53, 0  ;;  %v17954_v45 = vld [vmem:[%s22327_s5 + $0x60] sm:$0xff]  }
0x12c1   : > { %16307 = vmatpush3.bf16.msra.mxu1 %v17943_v36  ;;  %16377 = vmatpush3.bf16.xpose.msra.mxu0 %v4781_v56  ;;  %v4602_v10 = vadd.f32 %v16350_v63, %v13786_v27  ;;  %v4593_v13 = vpop.f32.mrb[93].mxu0  ;;  %v17955_v56 = vld [vmem:[%s22327_s5 + $0x68] sm:$0xff]   ;;  %v17956_v63 = vld [vmem:[%s22327_s5 + $0x70] sm:$0xff]  }
0x12c2   : > { %16308 = vmatprep.subr.bf16.mxu1 %v17944_v39  ;;  %v4246_v48 = vpack.c.bf16 %v4242_v47, %v4240_v41  ;;  %17709 = vmatprep.subr.msk.bf16.mxu0 %vm825_vm0, %v4757_v53  ;;  %v16351_v11 = vpop.f32.mrb[94].mxu0  ;;  %v4594_v12 = vadd.f32 %v13786_v27, %v4593_v13  ;;  %v17953_v53 = vld [vmem:[%s22327_s5 + $0x58] sm:$0xff]   ;;  %v13821_v13 = vld [vmem:[%s22329_s7 + $0x40] sm:$0xff] }
0x12c3   : > { %v4605_v14 = vadd.f32 %v16351_v11, %v13786_v27  ;;  %v4596_v15 = vpop.f32.mrb[95].mxu0  ;;  %v13823_v11 = vld [vmem:[%s22329_s7 + $0x50] sm:$0xff] }
0x12c4   : > { %16301 = vmatmul.mubr.msk.bf16.gmra.mrb[116].mxu1 %vm915_vm1, %v4246_v48  ;;  %v4597_v18 = vadd.f32 %v13786_v27, %v4596_v15 }
0x12c5   : > { %16309 = vmatpush3.bf16.msra.mxu1 %v17944_v39  ;;  %16320 = vmatprep.mubr.bf16.mxu1 %v19831_v43  ;;  %v4759_v17 = vpack.c.bf16 %v4605_v14, %v4602_v10  ;;  %v17957_v10 = vld [vmem:[%s22327_s5 + $0x78] sm:$0xff]   ;;  %v13822_v14 = vld [vmem:[%s22329_s7 + $0x48] sm:$0xff] }
0x12c6   : > { %16310 = vmatprep.subr.bf16.mxu1 %v17945_v50  ;;  %v4758_v19 = vpack.c.bf16 %v4597_v18, %v4594_v12  ;;  %v13824_v18 = vld [vmem:[%s22329_s7 + $0x58] sm:$0xff] }
0x12c7   : > { %v4790_v16 = vsel %vm825_vm0, %v4759_v17, 0 }
0x12c8   : > { %v4787_v20 = vsel %vm825_vm0, %v4758_v19, 0 }
0x12c9   : > { %16311 = vmatpush3.bf16.msra.mxu1 %v17945_v50  ;;  %16379 = vmatpush3.bf16.xpose.msra.mxu0 %v4784_v8 }
0x12ca   : > { %16312 = vmatprep.subr.bf16.mxu1 %v17946_v51  ;;  %17710 = vmatprep.subr.msk.bf16.mxu0 %vm825_vm0, %v4758_v19 }
0x12cd   : > { %16313 = vmatpush3.bf16.msra.mxu1 %v17946_v51 }
0x12ce   : > { %16314 = vmatprep.subr.bf16.mxu1 %v17947_v44 }
0x12d1   : > { %16315 = vmatpush3.bf16.msra.mxu1 %v17947_v44  ;;  %16381 = vmatpush3.bf16.xpose.msra.mxu0 %v4787_v20 }
0x12d2   : > { %16316 = vmatprep.subr.bf16.mxu1 %v17948_v23  ;;  %17711 = vmatprep.subr.msk.bf16.mxu0 %vm825_vm0, %v4759_v17 }
0x12d5   : > { %16317 = vmatpush3.bf16.msra.mxu1 %v17948_v23 }
0x12d6   : > { %16318 = vmatprep.subr.bf16.mxu1 %v17949_v24 }
0x12d9   : > { %16319 = vmatpush3.bf16.msra.mxu1 %v17949_v24  ;;  %16383 = vmatpush3.bf16.xpose.msra.mxu0 %v4790_v16 }
0x12da   : > { %16352 = vmatprep.subr.bf16.mxu1 %v17950_v62 }
0x12dc   : > { %16321 = vmatmul.mubr.bf16.vlgmr.msra.gmra.mrb[120].mxu1 %v19856_v57 }
0x12dd   : > { %16324 = vmatprep.mubr.bf16.mxu1 %v19858_v59  ;;  %16353 = vmatpush3.bf16.msra.mxu1 %v17950_v62 }
0x12de   : > { %16354 = vmatprep.subr.bf16.mxu1 %v17951_v54 }
0x12e1   : > { %16355 = vmatpush3.bf16.msra.mxu1 %v17951_v54 }
0x12e2   : > { %16356 = vmatprep.subr.bf16.mxu1 %v17952_v58 }
0x12e4   : > { %16325 = vmatmul.mubr.bf16.gmra.mrb[124].mxu1 %v19864_v49 }
0x12e5   : > { %16368 = vmatprep.mubr.bf16.mxu1 %v19831_v43  ;;  %16357 = vmatpush3.bf16.msra.mxu1 %v17952_v58 }
0x12e6   : > { %16358 = vmatprep.subr.bf16.mxu1 %v17953_v53 }
0x12e9   : > { %16359 = vmatpush3.bf16.msra.mxu1 %v17953_v53 }
0x12ea   : > { %16360 = vmatprep.subr.bf16.mxu1 %v17954_v45 }
0x12ed   : > { %16361 = vmatpush3.bf16.msra.mxu1 %v17954_v45 }
0x12ee   : > { %16362 = vmatprep.subr.bf16.mxu1 %v17955_v56 }
0x12f1   : > { %16363 = vmatpush3.bf16.msra.mxu1 %v17955_v56 }
0x12f2   : > { %16364 = vmatprep.subr.bf16.mxu1 %v17956_v63 }
0x12f5   : > { %16365 = vmatpush3.bf16.msra.mxu1 %v17956_v63 }
0x12f6   : > { %16366 = vmatprep.subr.bf16.mxu1 %v17957_v10 }
0x12f9   : > { %16367 = vmatpush3.bf16.msra.mxu1 %v17957_v10 }
0x12fc   : > { %16369 = vmatmul.mubr.bf16.vlgmr.msra.gmra.mrb[128].mxu1 %v19856_v57 }
0x12fd   : > { %16372 = vmatprep.mubr.bf16.mxu1 %v19858_v59 }
0x1304   : > { %16373 = vmatmul.mubr.bf16.gmra.mrb[132].mxu1 %v19864_v49 }
0x138f   : > { %v20173_v0 = vpop.f32.mrb[112].mxu1 }
0x1390   : > { %v20175_v1 = vpop.f32.mrb[113].mxu1 }
0x1391   : > { %v20177_v2 = vpop.f32.mrb[114].mxu1 }
0x1392   : > { %v4329_v5 = vpack.c.bf16 %v20177_v2, %v20173_v0  ;;  %v20181_v6 = vpop.f32.mrb[115].mxu1  ;;  %v17966_v0 = vld [vmem:[%s22325_s3 + $0xa0] sm:$0xff]   ;;  %v17967_v2 = vld [vmem:[%s22325_s3 + $0xa8] sm:$0xff]  }
0x1393   : > { %v4328_v22 = vpack.c.bf16 %v20181_v6, %v20175_v1  ;;  %v17964_v1 = vld [vmem:[%s22325_s3 + $0x90] sm:$0xff]   ;;  %v17965_v6 = vld [vmem:[%s22325_s3 + $0x98] sm:$0xff]  }
0x1397   : > { %v20185_v26 = vpop.f32.mrb[116].mxu1 }
0x1398   : > { %v20187_v28 = vpop.f32.mrb[117].mxu1 }
0x1399   : > { %v20189_v4 = vpop.f32.mrb[118].mxu1 }
0x139a   : > { %v4331_v30 = vpack.c.bf16 %v20189_v4, %v20185_v26  ;;  %v20193_v31 = vpop.f32.mrb[119].mxu1  ;;  %v13869_v26 = vld [vmem:[#allocation2 + $0x2] ss:$0 sm:$0xff] }
0x139b   : > { %v4330_v7 = vpack.c.bf16 %v20193_v31, %v20187_v28 }
0x13af   : > { %v16322_v3 = vpop.f32.mrb[120].mxu1 }
0x13b0   : > { %v4450_v21 = vadd.f32 %v16322_v3, %v13760_v29  ;;  %v4441_v33 = vpop.f32.mrb[121].mxu1 }
0x13b1   : > { %v4442_v25 = vadd.f32 %v13760_v29, %v4441_v33  ;;  %v16323_v35 = vpop.f32.mrb[122].mxu1  ;;  %v13825_v33 = vld [vmem:[%s22329_s7 + $0x60] sm:$0xff] }
0x13b2   : > { %v4453_v32 = vadd.f32 %v16323_v35, %v13760_v29  ;;  %v4444_v36 = vpop.f32.mrb[123].mxu1  ;;  %v4746_v38 = vmul.f32 0.17677669, %v4450_v21 }
0x13b3   : > { %v4445_v34 = vadd.f32 %v13760_v29, %v4444_v36  ;;  %v4744_v42 = vmul.f32 0.17677669, %v4442_v25 }
0x13b4   : > { %v4747_v40 = vmul.f32 0.17677669, %v4453_v32  ;;  %v13827_v32 = vld [vmem:[%s22329_s7 + $0x70] sm:$0xff] }
0x13b5   : > { %v4745_v37 = vmul.f32 0.17677669, %v4445_v34  ;;  %v13826_v34 = vld [vmem:[%s22329_s7 + $0x68] sm:$0xff] }
0x13b6   : > { %v4753_v39 = vpack.c.bf16 %v4747_v40, %v4746_v38 }
0x13b7   : > { %v4752_v9 = vpack.c.bf16 %v4745_v37, %v4744_v42  ;;  %v16326_v41 = vpop.f32.mrb[124].mxu1  ;;  %v13828_v37 = vld [vmem:[%s22329_s7 + $0x78] sm:$0xff] }
0x13b8   : > { %v4466_v47 = vadd.f32 %v16326_v41, %v13760_v29  ;;  %v4457_v48 = vpop.f32.mrb[125].mxu1 }
0x13b9   : > { %v4458_v50 = vadd.f32 %v13760_v29, %v4457_v48  ;;  %v16327_v51 = vpop.f32.mrb[126].mxu1  ;;  %16384 = vmatprep.mubr.msk.bf16.mxu0 %vm825_vm0, %v4752_v9 }
0x13ba   : > { %v4469_v44 = vadd.f32 %v16327_v51, %v13760_v29  ;;  %v4460_v23 = vpop.f32.mrb[127].mxu1  ;;  %16385 = vmatmul.mubr.msk.bf16.vlgmr.msra.gmra.mrb[96].mxu0 %vm825_vm0, %v4753_v39  ;;  %v4750_v27 = vmul.f32 0.17677669, %v4466_v47 }
0x13bb   : > { %v4461_v24 = vadd.f32 %v13760_v29, %v4460_v23  ;;  %v4748_v55 = vmul.f32 0.17677669, %v4458_v50  ;;  %v13812_v23 = vld [vmem:[%s22328_s6 + $0x1] ss:$0 sm:$0xff] }
0x13bc   : > { %v4751_v52 = vmul.f32 0.17677669, %v4469_v44 }
0x13bd   : > { %v4749_v60 = vmul.f32 0.17677669, %v4461_v24 }
0x13be   : > { %v4755_v46 = vpack.c.bf16 %v4751_v52, %v4750_v27 }
0x13bf   : > { %v4754_v61 = vpack.c.bf16 %v4749_v60, %v4748_v55 }
0x13c1   : > { %16388 = vmatprep.mubr.msk.bf16.mxu0 %vm825_vm0, %v4754_v61 }
0x13c2   : > { %16389 = vmatmul.mubr.msk.bf16.gmra.mrb[100].mxu0 %vm825_vm0, %v4755_v46 }
0x13cf   : > { %v16370_v24 = vpop.f32.mrb[128].mxu1 }
0x13d0   : > { %v4722_v27 = vadd.f32 %v16370_v24, %v13812_v23  ;;  %v4713_v52 = vpop.f32.mrb[129].mxu1 }
0x13d1   : > { %v4714_v55 = vadd.f32 %v13812_v23, %v4713_v52  ;;  %v16371_v60 = vpop.f32.mrb[130].mxu1 }
0x13d2   : > { %v4725_v46 = vadd.f32 %v16371_v60, %v13812_v23  ;;  %v4716_v61 = vpop.f32.mrb[131].mxu1 }
0x13d3   : > { %v4717_v62 = vadd.f32 %v13812_v23, %v4716_v61 }
0x13d4   : > { %v4950_v54 = vpack.c.bf16 %v4725_v46, %v4722_v27 }
0x13d5   : > { %v4949_v58 = vpack.c.bf16 %v4717_v62, %v4714_v55 }
0x13d7   : > { %v16374_v53 = vpop.f32.mrb[132].mxu1  ;;  %16392 = vmatprep.subr.bf16.mxu1 %v4949_v58 }
0x13d8   : > { %v4738_v45 = vadd.f32 %v16374_v53, %v13812_v23  ;;  %v4729_v56 = vpop.f32.mrb[133].mxu1  ;;  %16393 = vmatpush3.bf16.msra.mxu1 %v4949_v58 }
0x13d9   : > { %v4730_v10 = vadd.f32 %v13812_v23, %v4729_v56  ;;  %16394 = vmatprep.subr.bf16.mxu1 %v4950_v54  ;;  %v17958_v56 = vld [vmem:[%s22330_s8 + $0x10] sm:$0xff]  }
0x13da   : > { %16408 = vmatprep.subr.bf16.mxu0 %v17958_v56 }
0x13db   : > { %16409 = vmatpush3.bf16.msra.mxu0 %v17958_v56  ;;  %v17962_v56 = vld [vmem:[%s22325_s3 + $0x80] sm:$0xff]  }
0x13dc   : > { %16395 = vmatpush3.bf16.msra.mxu1 %v4950_v54 }
0x148d   : > { %v16386_v8 = vpop.f32.mrb[96].mxu0 }
0x148e   : > { %v4826_v12 = vpop.f32.mrb[97].mxu0  ;;  %v20240_v20 = vadd.f32 %v16386_v8, %v13823_v11 }
0x148f   : > { %v4827_v15 = vadd.f32 %v13821_v13, %v4826_v12  ;;  %v16387_v17 = vpop.f32.mrb[98].mxu0  ;;  %v16375_v13 = vpop.f32.mrb[134].mxu1 }
0x1490   : > { %v4829_v19 = vpop.f32.mrb[99].mxu0  ;;  %v20243_v3 = vadd.f32 %v16387_v17, %v13824_v18  ;;  %v4863_v35 = vsel %vm915_vm1, %v20240_v20, -inf  ;;  %v4741_v11 = vadd.f32 %v16375_v13, %v13812_v23  ;;  %v4732_v12 = vpop.f32.mrb[135].mxu1 }
0x1491   : > { %v4830_v16 = vadd.f32 %v13822_v14, %v4829_v19  ;;  %v4857_v29 = vsel %vm915_vm1, %v4827_v15, -inf  ;;  %v4733_v17 = vadd.f32 %v13812_v23, %v4732_v12 }
0x1492   : > { %4858 = vmax.xlane.f32.xlu0 %v4857_v29  ;;  %v4866_v42 = vsel %vm915_vm1, %v20243_v3, -inf  ;;  %v4952_v29 = vpack.c.bf16 %v4741_v11, %v4738_v45 }
0x1493   : > { %v4860_v21 = vsel %vm915_vm1, %v4830_v16, -inf }
0x1494   : > { %4861 = vmax.xlane.f32.xlu1 %v4860_v21 }
0x1495   : > { %v16390_v25 = vpop.f32.mrb[100].mxu0 }
0x1496   : > { %v4842_v36 = vpop.f32.mrb[101].mxu0  ;;  %4864 = vmax.xlane.f32.xlu0 %v4863_v35  ;;  %v20264_v9 = vadd.f32 %v16390_v25, %v13827_v32 }
0x1497   : > { %v20257_v38 = vadd.f32 %v13825_v33, %v4842_v36  ;;  %v16391_v40 = vpop.f32.mrb[102].mxu0  ;;  %v4951_v33 = vpack.c.bf16 %v4733_v17, %v4730_v10 }
0x1498   : > { %v4845_v39 = vpop.f32.mrb[103].mxu0  ;;  %4867 = vmax.xlane.f32.xlu1 %v4866_v42  ;;  %v20268_v48 = vadd.f32 %v16391_v40, %v13828_v37  ;;  %v4875_v51 = vsel %vm915_vm1, %v20264_v9, -inf }
0x1499   : > { %v4846_v41 = vadd.f32 %v13826_v34, %v4845_v39  ;;  %v4869_v47 = vsel %vm915_vm1, %v20257_v38, -inf  ;;  %16396 = vmatprep.subr.bf16.mxu1 %v4951_v33 }
0x149a   : > { %4870 = vmax.xlane.f32.xlu0 %v4869_v47  ;;  %v4878_v44 = vsel %vm915_vm1, %v20268_v48, -inf  ;;  %16397 = vmatpush3.bf16.msra.mxu1 %v4951_v33 }
0x149b   : > { %v4872_v50 = vsel %vm915_vm1, %v4846_v41, -inf  ;;  %16398 = vmatprep.subr.bf16.mxu1 %v4952_v29 }
0x149c   : > { %4873 = vmax.xlane.f32.xlu1 %v4872_v50 }
0x149e   : > { %4876 = vmax.xlane.f32.xlu0 %v4875_v51  ;;  %16399 = vmatpush3.bf16.msra.mxu1 %v4952_v29 }
0x14a0   : > { %4879 = vmax.xlane.f32.xlu1 %v4878_v44 }
0x151f   : > { %v4859_v63 = vpop.xlane.xlu0 %4858 }
0x1520   : > { %v4881_v8 = vsub.f32 %v4827_v15, %v4859_v63  ;;  %v17959_v63 = vld [vmem:[%s22330_s8 + $0x18] sm:$0xff]  }
0x1521   : > { %v4862_v14 = vpop.xlane.xlu1 %4861  ;;  %16410 = vmatprep.subr.bf16.mxu0 %v17959_v63 }
0x1522   : > { %v4889_v18 = vmul.f32 1.442695, %v4881_v8  ;;  %v4882_v19 = vsub.f32 %v4830_v16, %v4862_v14  ;;  %16411 = vmatpush3.bf16.msra.mxu0 %v17959_v63 }
0x1523   : > { %v4865_v21 = vpop.xlane.xlu0 %4864 }
0x1524   : > { %18382 = vpow2.f32 %v4889_v18  ;;  %v4891_v25 = vmul.f32 1.442695, %v4882_v19  ;;  %v4883_v35 = vsub.f32 %v20240_v20, %v4865_v21 }
0x1525   : > { %v4868_v32 = vpop.xlane.xlu1 %4867 }
0x1526   : > { %18384 = vpow2.f32 %v4891_v25  ;;  %v4893_v36 = vmul.f32 1.442695, %v4883_v35  ;;  %v4884_v15 = vsub.f32 %v20243_v3, %v4868_v32 }
0x1527   : > { %v4871_v34 = vpop.xlane.xlu0 %4870 }
0x1528   : > { %18386 = vpow2.f32 %v4893_v36  ;;  %v4895_v40 = vmul.f32 1.442695, %v4884_v15  ;;  %v4885_v16 = vsub.f32 %v20257_v38, %v4871_v34 }
0x1529   : > { %v4874_v42 = vpop.xlane.xlu1 %4873 }
0x152a   : > { %18388 = vpow2.f32 %v4895_v40  ;;  %v4897_v37 = vmul.f32 1.442695, %v4885_v16  ;;  %v4886_v39 = vsub.f32 %v4846_v41, %v4874_v42 }
0x152b   : > { %v4877_v47 = vpop.xlane.xlu0 %4876 }
0x152c   : > { %18390 = vpow2.f32 %v4897_v37  ;;  %v4899_v20 = vmul.f32 1.442695, %v4886_v39  ;;  %v4887_v50 = vsub.f32 %v20264_v9, %v4877_v47 }
0x152d   : > { %v4880_v51 = vpop.xlane.xlu1 %4879 }
0x152e   : > { %v18383_v44 = vpop.eup %18382  ;;  %18392 = vpow2.f32 %v4899_v20  ;;  %v4901_v3 = vmul.f32 1.442695, %v4887_v50  ;;  %v4888_v23 = vsub.f32 %v20268_v48, %v4880_v51 }
0x152f   : > { %v4905_v24 = vsel %vm915_vm1, %v18383_v44, 0.0 }
0x1530   : > { %v18385_v27 = vpop.eup %18384  ;;  %18394 = vpow2.f32 %v4901_v3  ;;  %v4903_v38 = vmul.f32 1.442695, %v4888_v23  ;;  %4906 = vadd.xlane.f32.xlu0 %v4905_v24  ;;  %v17960_v3 = vld [vmem:[%s22330_s8] sm:$0xff]   ;;  %v17971_v24 = vld [vmem:[%s22323_s1 + $0x88] sm:$0xff]  }
0x1531   : > { %v4908_v41 = vsel %vm915_vm1, %v18385_v27, 0.0  ;;  %16420 = vmatprep.subr.bf16.mxu0 %v17960_v3  ;;  %v17969_v23 = vld [vmem:[%s22323_s1 + $0x80] sm:$0xff]  }
0x1532   : > { %v18387_v52 = vpop.eup %18386  ;;  %18396 = vpow2.f32 %v4903_v38  ;;  %4909 = vadd.xlane.f32.xlu1 %v4908_v41  ;;  %16432 = vmatprep.subr.bf16.mxu1 %v17969_v23  ;;  %v17973_v38 = vld [vmem:[%s22323_s1 + $0x98] sm:$0xff]   ;;  %v17974_v41 = vld [vmem:[%s22323_s1 + $0xa0] sm:$0xff]  }
0x1533   : > { %v4911_v55 = vsel %vm915_vm1, %v18387_v52, 0.0 }
0x1534   : > { %v18389_v9 = vpop.eup %18388  ;;  %4912 = vadd.xlane.f32.xlu0 %v4911_v55  ;;  %v17976_v55 = vld [vmem:[%s22323_s1 + $0xb0] sm:$0xff]  }
0x1535   : > { %v4914_v60 = vsel %vm915_vm1, %v18389_v9, 0.0 }
0x1536   : > { %v18391_v46 = vpop.eup %18390  ;;  %4915 = vadd.xlane.f32.xlu1 %v4914_v60 }
0x1537   : > { %v4917_v48 = vsel %vm915_vm1, %v18391_v46, 0.0 }
0x1538   : > { %v18393_v61 = vpop.eup %18392  ;;  %4918 = vadd.xlane.f32.xlu0 %v4917_v48 }
0x1539   : > { %v4920_v62 = vsel %vm915_vm1, %v18393_v61, 0.0 }
0x153a   : > { %v18395_v54 = vpop.eup %18394  ;;  %4921 = vadd.xlane.f32.xlu1 %v4920_v62 }
0x153b   : > { %v4923_v58 = vsel %vm915_vm1, %v18395_v54, 0.0 }
0x153c   : > { %v18397_v53 = vpop.eup %18396  ;;  %4924 = vadd.xlane.f32.xlu0 %v4923_v58  ;;  %v17961_v58 = vld [vmem:[%s22330_s8 + $0x8] sm:$0xff]  }
0x153d   : > { %v4926_v45 = vsel %vm915_vm1, %v18397_v53, 0.0 }
0x153e   : > { %4927 = vadd.xlane.f32.xlu1 %v4926_v45 }
0x15bd   : > { %v4907_v10 = vpop.xlane.xlu0 %4906 }
0x15be   : > { %18398 = vrcp.f32 %v4907_v10 }
0x15bf   : > { %v4910_v13 = vpop.xlane.xlu1 %4909 }
0x15c0   : > { %18400 = vrcp.f32 %v4910_v13 }
0x15c1   : > { %v4913_v8 = vpop.xlane.xlu0 %4912 }
0x15c2   : > { %18402 = vrcp.f32 %v4913_v8 }
0x15c3   : > { %v4916_v11 = vpop.xlane.xlu1 %4915 }
0x15c4   : > { %18404 = vrcp.f32 %v4916_v11  ;;  %v17963_v11 = vld [vmem:[%s22325_s3 + $0x88] sm:$0xff]  }
0x15c5   : > { %v4919_v12 = vpop.xlane.xlu0 %4918 }
0x15c6   : > { %18406 = vrcp.f32 %v4919_v12 }
0x15c7   : > { %v4922_v14 = vpop.xlane.xlu1 %4921 }
0x15c8   : > { %v18399_v17 = vpop.eup %18398  ;;  %18408 = vrcp.f32 %v4922_v14 }
0x15c9   : > { %v4925_v18 = vpop.xlane.xlu0 %4924  ;;  %v4930_v21 = vmul.f32 %v18399_v17, %v18383_v44 }
0x15ca   : > { %v18401_v19 = vpop.eup %18400  ;;  %18410 = vrcp.f32 %v4925_v18 }
0x15cb   : > { %v4928_v29 = vpop.xlane.xlu1 %4927  ;;  %v4932_v33 = vmul.f32 %v18401_v19, %v18385_v27  ;;  %v17972_v27 = vld [vmem:[%s22323_s1 + $0x90] sm:$0xff]  }
0x15cc   : > { %v18403_v25 = vpop.eup %18402  ;;  %18412 = vrcp.f32 %v4928_v29 }
0x15cd   : > { %v4945_v35 = vpack.c.bf16 %v4932_v33, %v4930_v21  ;;  %v4934_v36 = vmul.f32 %v18403_v25, %v18387_v52  ;;  %v17975_v52 = vld [vmem:[%s22323_s1 + $0xa8] sm:$0xff]  }
0x15ce   : > { %v18405_v32 = vpop.eup %18404 }
0x15cf   : > { %v4936_v15 = vmul.f32 %v18405_v32, %v18389_v9  ;;  %16400 = vmatprep.mubr.msk.bf16.mxu1 %vm915_vm1, %v4945_v35  ;;  %v17977_v9 = vld [vmem:[%s22323_s1 + $0xb8] sm:$0xff]  }
0x15d0   : > { %v18407_v34 = vpop.eup %18406 }
0x15d1   : > { %v4946_v40 = vpack.c.bf16 %v4936_v15, %v4934_v36  ;;  %v4938_v42 = vmul.f32 %v18407_v34, %v18391_v46 }
0x15d2   : > { %v18409_v16 = vpop.eup %18408 }
0x15d3   : > { %16401 = vmatmul.mubr.msk.bf16.vlgmr.msra.gmra.mrb[136].mxu1 %vm915_vm1, %v4946_v40  ;;  %v4940_v37 = vmul.f32 %v18409_v16, %v18393_v61 }
0x15d4   : > { %v18411_v39 = vpop.eup %18410  ;;  %16433 = vmatpush3.bf16.msra.mxu1 %v17969_v23 }
0x15d5   : > { %v4947_v47 = vpack.c.bf16 %v4940_v37, %v4938_v42  ;;  %v4942_v50 = vmul.f32 %v18411_v39, %v18395_v54  ;;  %16434 = vmatprep.subr.bf16.mxu1 %v17971_v24 }
0x15d6   : > { %v18413_v20 = vpop.eup %18412 }
0x15d7   : > { %16404 = vmatprep.mubr.msk.bf16.mxu1 %vm915_vm1, %v4947_v47  ;;  %v4944_v51 = vmul.f32 %v18413_v20, %v18397_v53 }
0x15d8   : > { %16435 = vmatpush3.bf16.msra.mxu1 %v17971_v24 }
0x15d9   : > { %v4948_v44 = vpack.c.bf16 %v4944_v51, %v4942_v50  ;;  %16436 = vmatprep.subr.bf16.mxu1 %v17972_v27 }
0x15db   : > { %16405 = vmatmul.mubr.msk.bf16.gmra.mrb[140].mxu1 %vm915_vm1, %v4948_v44 }
0x15dc   : > { %16448 = vmatprep.mubr.bf16.mxu1 %v19831_v43  ;;  %16437 = vmatpush3.bf16.msra.mxu1 %v17972_v27 }
0x15dd   : > { %16438 = vmatprep.subr.bf16.mxu1 %v17973_v38 }
0x15e0   : > { %16439 = vmatpush3.bf16.msra.mxu1 %v17973_v38 }
0x15e1   : > { %16440 = vmatprep.subr.bf16.mxu1 %v17974_v41 }
0x15e4   : > { %16441 = vmatpush3.bf16.msra.mxu1 %v17974_v41 }
0x15e5   : > { %16442 = vmatprep.subr.bf16.mxu1 %v17975_v52 }
0x15e8   : > { %16443 = vmatpush3.bf16.msra.mxu1 %v17975_v52 }
0x15e9   : > { %16444 = vmatprep.subr.bf16.mxu1 %v17976_v55 }
0x15ec   : > { %16445 = vmatpush3.bf16.msra.mxu1 %v17976_v55 }
0x15ed   : > { %16446 = vmatprep.subr.bf16.mxu1 %v17977_v9 }
0x15f0   : > { %16447 = vmatpush3.bf16.msra.mxu1 %v17977_v9 }
0x15f3   : > { %16449 = vmatmul.mubr.bf16.vlgmr.msra.gmra.mrb[144].mxu1 %v19856_v57 }
0x15f4   : > { %16452 = vmatprep.mubr.bf16.mxu1 %v19858_v59 }
0x15fb   : > { %16453 = vmatmul.mubr.bf16.gmra.mrb[148].mxu1 %v19864_v49 }
0x15fc   : > { %16496 = vmatprep.mubr.bf16.mxu1 %v19831_v43 }
0x16a6   : > { %v16402_v60 = vpop.f32.mrb[136].mxu1 }
0x16a7   : > { %v4999_v46 = vpop.f32.mrb[137].mxu1 }
0x16a8   : > { %v16403_v48 = vpop.f32.mrb[138].mxu1 }
0x16a9   : > { %v5031_v61 = vpack.c.bf16 %v16403_v48, %v16402_v60  ;;  %v5002_v62 = vpop.f32.mrb[139].mxu1 }
0x16aa   : > { %v5030_v54 = vpack.c.bf16 %v5002_v62, %v4999_v46 }
0x16ac   : > { %16412 = vmatprep.mubr.msk.bf16.mxu0 %vm825_vm0, %v5030_v54 }
0x16ad   : > { %16413 = vmatmul.mubr.msk.bf16.vlgmr.msra.gmra.mrb[104].mxu0 %vm825_vm0, %v5031_v61 }
0x16ae   : > { %16421 = vmatpush3.bf16.msra.mxu0 %v17960_v3  ;;  %v16406_v53 = vpop.f32.mrb[140].mxu1  ;;  %v13895_v3 = vld [vmem:[%s22326_s4 + $0x2] ss:$0 sm:$0xff] }
0x16af   : > { %v5015_v45 = vpop.f32.mrb[141].mxu1  ;;  %16422 = vmatprep.subr.bf16.mxu0 %v17961_v58 }
0x16b0   : > { %v16407_v63 = vpop.f32.mrb[142].mxu1 }
0x16b1   : > { %v5033_v10 = vpack.c.bf16 %v16407_v63, %v16406_v53  ;;  %v5018_v13 = vpop.f32.mrb[143].mxu1 }
0x16b2   : > { %v5032_v8 = vpack.c.bf16 %v5018_v13, %v5015_v45  ;;  %16423 = vmatpush3.bf16.msra.mxu0 %v17961_v58 }
0x16b3   : > { %16456 = vmatprep.subr.bf16.mxu0 %v17962_v56 }
0x16b4   : > { %16416 = vmatprep.mubr.msk.bf16.mxu0 %vm825_vm0, %v5032_v8 }
0x16b5   : > { %16417 = vmatmul.mubr.msk.bf16.gmra.mrb[108].mxu0 %vm825_vm0, %v5033_v10 }
0x16b6   : > { %16424 = vmatprep.mubr.msk.bf16.mxu0 %vm825_vm0, %v4328_v22  ;;  %v17970_v22 = vld [vmem:[%s22325_s3 + $0xb8] sm:$0xff]  }
0x16bd   : > { %16425 = vmatmul.mubr.msk.bf16.vlgmr.msra.gmra.mrb[104].mxu0 %vm825_vm0, %v4329_v5  ;;  %v17968_v5 = vld [vmem:[%s22325_s3 + $0xb0] sm:$0xff]  }
0x16be   : > { %16457 = vmatpush3.bf16.msra.mxu0 %v17962_v56  ;;  %16428 = vmatprep.mubr.msk.bf16.mxu0 %vm825_vm0, %v4330_v7 }
0x16bf   : > { %16458 = vmatprep.subr.bf16.mxu0 %v17963_v11 }
0x16c2   : > { %16459 = vmatpush3.bf16.msra.mxu0 %v17963_v11 }
0x16c3   : > { %16460 = vmatprep.subr.bf16.mxu0 %v17964_v1 }
0x16c5   : > { %16429 = vmatmul.mubr.msk.bf16.gmra.mrb[108].mxu0 %vm825_vm0, %v4331_v30 }
0x16c6   : > { %16461 = vmatpush3.bf16.msra.mxu0 %v17964_v1  ;;  %16472 = vmatprep.mubr.bf16.mxu0 %v19831_v43  ;;  %v16450_v28 = vpop.f32.mrb[144].mxu1  ;;  %v17978_v1 = vld [vmem:[%s22327_s5 + $0x80] sm:$0xff]  }
0x16c7   : > { %16462 = vmatprep.subr.bf16.mxu0 %v17965_v6  ;;  %v5330_v4 = vadd.f32 %v16450_v28, %v13869_v26  ;;  %v5321_v30 = vpop.f32.mrb[145].mxu1  ;;  %16480 = vmatprep.subr.bf16.mxu1 %v17978_v1  ;;  %v17985_v28 = vld [vmem:[%s22327_s5 + $0xb8] sm:$0xff]  }
0x16c8   : > { %v5322_v31 = vadd.f32 %v13869_v26, %v5321_v30  ;;  %v16451_v7 = vpop.f32.mrb[146].mxu1  ;;  %16481 = vmatpush3.bf16.msra.mxu1 %v17978_v1 }
0x16c9   : > { %v5626_v12 = vmul.f32 0.17677669, %v5330_v4  ;;  %v5333_v14 = vadd.f32 %v16451_v7, %v13869_v26  ;;  %v5324_v17 = vpop.f32.mrb[147].mxu1  ;;  %v13930_v4 = vld [vmem:[%s22329_s7 + $0x80] sm:$0xff] }
0x16ca   : > { %16463 = vmatpush3.bf16.msra.mxu0 %v17965_v6  ;;  %v5624_v18 = vmul.f32 0.17677669, %v5322_v31  ;;  %v5325_v19 = vadd.f32 %v13869_v26, %v5324_v17  ;;  %v17979_v6 = vld [vmem:[%s22327_s5 + $0x88] sm:$0xff]   ;;  %v13932_v31 = vld [vmem:[%s22329_s7 + $0x90] sm:$0xff] }
0x16cb   : > { %16464 = vmatprep.subr.bf16.mxu0 %v17966_v0  ;;  %v5627_v29 = vmul.f32 0.17677669, %v5333_v14  ;;  %16482 = vmatprep.subr.bf16.mxu1 %v17979_v6 }
0x16cc   : > { %v5625_v21 = vmul.f32 0.17677669, %v5325_v19  ;;  %16483 = vmatpush3.bf16.msra.mxu1 %v17979_v6 }
0x16cd   : > { %v5633_v33 = vpack.c.bf16 %v5627_v29, %v5626_v12  ;;  %v13931_v12 = vld [vmem:[%s22329_s7 + $0x88] sm:$0xff] }
0x16ce   : > { %16465 = vmatpush3.bf16.msra.mxu0 %v17966_v0  ;;  %v5632_v25 = vpack.c.bf16 %v5625_v21, %v5624_v18  ;;  %v16454_v35 = vpop.f32.mrb[148].mxu1  ;;  %v17980_v0 = vld [vmem:[%s22327_s5 + $0x90] sm:$0xff]   ;;  %v13933_v18 = vld [vmem:[%s22329_s7 + $0x98] sm:$0xff] }
0x16cf   : > { %16466 = vmatprep.subr.bf16.mxu0 %v17967_v2  ;;  %v5346_v32 = vadd.f32 %v16454_v35, %v13869_v26  ;;  %v5337_v36 = vpop.f32.mrb[149].mxu1  ;;  %16484 = vmatprep.subr.bf16.mxu1 %v17980_v0 }
0x16d0   : > { %v5338_v15 = vadd.f32 %v13869_v26, %v5337_v36  ;;  %v16455_v34 = vpop.f32.mrb[150].mxu1  ;;  %16485 = vmatpush3.bf16.msra.mxu1 %v17980_v0  ;;  %v13934_v36 = vld [vmem:[%s22329_s7 + $0xa0] sm:$0xff] }
0x16d1   : > { %v5630_v40 = vmul.f32 0.17677669, %v5346_v32  ;;  %v5349_v16 = vadd.f32 %v16455_v34, %v13869_v26  ;;  %v5340_v42 = vpop.f32.mrb[151].mxu1  ;;  %v13936_v32 = vld [vmem:[%s22329_s7 + $0xb0] sm:$0xff] }
0x16d2   : > { %16467 = vmatpush3.bf16.msra.mxu0 %v17967_v2  ;;  %v5628_v37 = vmul.f32 0.17677669, %v5338_v15  ;;  %v5341_v39 = vadd.f32 %v13869_v26, %v5340_v42  ;;  %v17981_v2 = vld [vmem:[%s22327_s5 + $0x98] sm:$0xff]   ;;  %v17984_v26 = vld [vmem:[%s22327_s5 + $0xb0] sm:$0xff]   ;;  %v13935_v42 = vld [vmem:[%s22329_s7 + $0xa8] sm:$0xff] }
0x16d3   : > { %16468 = vmatprep.subr.bf16.mxu0 %v17968_v5  ;;  %v5631_v47 = vmul.f32 0.17677669, %v5349_v16  ;;  %16486 = vmatprep.subr.bf16.mxu1 %v17981_v2  ;;  %v13937_v16 = vld [vmem:[%s22329_s7 + $0xb8] sm:$0xff] }
0x16d4   : > { %v5629_v20 = vmul.f32 0.17677669, %v5341_v39  ;;  %16487 = vmatpush3.bf16.msra.mxu1 %v17981_v2 }
0x16d5   : > { %v5635_v50 = vpack.c.bf16 %v5631_v47, %v5630_v40 }
0x16d6   : > { %16469 = vmatpush3.bf16.msra.mxu0 %v17968_v5  ;;  %v5634_v51 = vpack.c.bf16 %v5629_v20, %v5628_v37  ;;  %v17982_v5 = vld [vmem:[%s22327_s5 + $0xa0] sm:$0xff]  }
0x16d7   : > { %16470 = vmatprep.subr.bf16.mxu0 %v17970_v22  ;;  %16488 = vmatprep.subr.bf16.mxu1 %v17982_v5 }
0x16d8   : > { %16489 = vmatpush3.bf16.msra.mxu1 %v17982_v5 }
0x16da   : > { %16471 = vmatpush3.bf16.msra.mxu0 %v17970_v22  ;;  %v17983_v22 = vld [vmem:[%s22327_s5 + $0xa8] sm:$0xff]  }
0x16db   : > { %16490 = vmatprep.subr.bf16.mxu1 %v17983_v22 }
0x16dc   : > { %16491 = vmatpush3.bf16.msra.mxu1 %v17983_v22 }
0x16dd   : > { %16473 = vmatmul.mubr.bf16.vlgmr.msra.gmra.mrb[112].mxu0 %v19856_v57  ;;  %16492 = vmatprep.subr.bf16.mxu1 %v17984_v26 }
0x16de   : > { %16476 = vmatprep.mubr.bf16.mxu0 %v19858_v59 }
0x16e0   : > { %16493 = vmatpush3.bf16.msra.mxu1 %v17984_v26 }
0x16e1   : > { %16494 = vmatprep.subr.bf16.mxu1 %v17985_v28 }
0x16e4   : > { %16495 = vmatpush3.bf16.msra.mxu1 %v17985_v28 }
0x16e5   : > { %16477 = vmatmul.mubr.bf16.gmra.mrb[116].mxu0 %v19864_v49 }
0x16e6   : > { %16512 = vmatprep.mubr.msk.bf16.mxu0 %vm825_vm0, %v5632_v25 }
0x16e7   : > { %16497 = vmatmul.mubr.bf16.vlgmr.msra.gmra.mrb[152].mxu1 %v19856_v57 }
0x16e8   : > { %16500 = vmatprep.mubr.bf16.mxu1 %v19858_v59 }
0x16ef   : > { %16501 = vmatmul.mubr.bf16.gmra.mrb[156].mxu1 %v19864_v49 }
0x17b0   : > { %v16474_v44 = vpop.f32.mrb[112].mxu0 }
0x17b1   : > { %v5457_v23 = vpop.f32.mrb[113].mxu0  ;;  %v5466_v27 = vadd.f32 %v16474_v44, %v13895_v3 }
0x17b2   : > { %v16475_v24 = vpop.f32.mrb[114].mxu0  ;;  %v5458_v52 = vadd.f32 %v13895_v3, %v5457_v23 }
0x17b3   : > { %v5469_v38 = vadd.f32 %v16475_v24, %v13895_v3  ;;  %v5460_v41 = vpop.f32.mrb[115].mxu0 }
0x17b4   : > { %v5461_v55 = vadd.f32 %v13895_v3, %v5460_v41 }
0x17b5   : > { %v5637_v9 = vpack.c.bf16 %v5469_v38, %v5466_v27  ;;  %v13921_v38 = vld [vmem:[%s22328_s6 + $0x2] ss:$0 sm:$0xff] }
0x17b6   : > { %v5636_v60 = vpack.c.bf16 %v5461_v55, %v5458_v52 }
0x17b7   : > { %v5664_v13 = vsel %vm825_vm0, %v5637_v9, 0 }
0x17b8   : > { %17712 = vmatprep.subr.msk.bf16.mxu0 %vm825_vm0, %v5636_v60  ;;  %v5661_v46 = vsel %vm825_vm0, %v5636_v60, 0  ;;  %v16478_v48 = vpop.f32.mrb[116].mxu0 }
0x17b9   : > { %16505 = vmatpush3.bf16.xpose.msra.mxu0 %v5661_v46  ;;  %v5482_v61 = vadd.f32 %v16478_v48, %v13895_v3  ;;  %v5473_v62 = vpop.f32.mrb[117].mxu0 }
0x17ba   : > { %17713 = vmatprep.subr.msk.bf16.mxu0 %vm825_vm0, %v5637_v9  ;;  %v5474_v54 = vadd.f32 %v13895_v3, %v5473_v62  ;;  %v16479_v58 = vpop.f32.mrb[118].mxu0  ;;  %v16498_v41 = vpop.f32.mrb[152].mxu1 }
0x17bb   : > { %v5485_v53 = vadd.f32 %v16479_v58, %v13895_v3  ;;  %v5476_v45 = vpop.f32.mrb[119].mxu0  ;;  %v5602_v52 = vadd.f32 %v16498_v41, %v13921_v38  ;;  %v5593_v55 = vpop.f32.mrb[153].mxu1  ;;  %v17986_v41 = vld [vmem:[%s22330_s8 + $0x20] sm:$0xff]  }
0x17bc   : > { %v5477_v56 = vadd.f32 %v13895_v3, %v5476_v45  ;;  %v5594_v9 = vadd.f32 %v13921_v38, %v5593_v55  ;;  %v16499_v60 = vpop.f32.mrb[154].mxu1 }
0x17bd   : > { %v5639_v63 = vpack.c.bf16 %v5485_v53, %v5482_v61  ;;  %v5605_v46 = vadd.f32 %v16499_v60, %v13921_v38  ;;  %v5596_v48 = vpop.f32.mrb[155].mxu1 }
0x17be   : > { %v5638_v10 = vpack.c.bf16 %v5477_v56, %v5474_v54  ;;  %v5597_v61 = vadd.f32 %v13921_v38, %v5596_v48 }
0x17bf   : > { %v5670_v11 = vsel %vm825_vm0, %v5639_v63, 0  ;;  %v5830_v62 = vpack.c.bf16 %v5605_v46, %v5602_v52  ;;  %v17987_v52 = vld [vmem:[%s22330_s8 + $0x28] sm:$0xff]  }
0x17c0   : > { %v5667_v8 = vsel %vm825_vm0, %v5638_v10, 0  ;;  %v5829_v54 = vpack.c.bf16 %v5597_v61, %v5594_v9 }
0x17c1   : > { %16507 = vmatpush3.bf16.xpose.msra.mxu0 %v5664_v13 }
0x17c2   : > { %17714 = vmatprep.subr.msk.bf16.mxu0 %vm825_vm0, %v5638_v10  ;;  %v16502_v58 = vpop.f32.mrb[156].mxu1  ;;  %16520 = vmatprep.subr.bf16.mxu1 %v5829_v54 }
0x17c3   : > { %v5618_v53 = vadd.f32 %v16502_v58, %v13921_v38  ;;  %v5609_v45 = vpop.f32.mrb[157].mxu1  ;;  %16521 = vmatpush3.bf16.msra.mxu1 %v5829_v54 }
0x17c4   : > { %v16503_v10 = vpop.f32.mrb[158].mxu1  ;;  %16522 = vmatprep.subr.bf16.mxu1 %v5830_v62 }
0x17c7   : > { %16523 = vmatpush3.bf16.msra.mxu1 %v5830_v62 }
0x17c9   : > { %16509 = vmatpush3.bf16.xpose.msra.mxu0 %v5667_v8  ;;  %v5621_v8 = vadd.f32 %v16503_v10, %v13921_v38 }
0x17ca   : > { %17715 = vmatprep.subr.msk.bf16.mxu0 %vm825_vm0, %v5639_v63  ;;  %v5610_v63 = vadd.f32 %v13921_v38, %v5609_v45 }
0x17cb   : > { %v5832_v5 = vpack.c.bf16 %v5621_v8, %v5618_v53 }
0x17d1   : > { %16511 = vmatpush3.bf16.xpose.msra.mxu0 %v5670_v11  ;;  %v5612_v11 = vpop.f32.mrb[159].mxu1 }
0x17d2   : > { %v5613_v6 = vadd.f32 %v13921_v38, %v5612_v11  ;;  %16536 = vmatprep.subr.bf16.mxu0 %v17986_v41 }
0x17d4   : > { %v5831_v26 = vpack.c.bf16 %v5613_v6, %v5610_v63 }
0x17d6   : > { %16524 = vmatprep.subr.bf16.mxu1 %v5831_v26 }
0x17d7   : > { %16525 = vmatpush3.bf16.msra.mxu1 %v5831_v26 }
0x17d8   : > { %16513 = vmatmul.mubr.msk.bf16.vlgmr.msra.gmra.mrb[120].mxu0 %vm825_vm0, %v5633_v33  ;;  %16526 = vmatprep.subr.bf16.mxu1 %v5832_v5 }
0x17d9   : > { %16516 = vmatprep.mubr.msk.bf16.mxu0 %vm825_vm0, %v5634_v51  ;;  %16537 = vmatpush3.bf16.msra.mxu0 %v17986_v41 }
0x17da   : > { %16538 = vmatprep.subr.bf16.mxu0 %v17987_v52 }
0x17db   : > { %16527 = vmatpush3.bf16.msra.mxu1 %v5832_v5 }
0x17dd   : > { %16539 = vmatpush3.bf16.msra.mxu0 %v17987_v52 }
0x17e0   : > { %16517 = vmatmul.mubr.msk.bf16.gmra.mrb[124].mxu0 %vm825_vm0, %v5635_v50 }
0x18ab   : > { %v16514_v30 = vpop.f32.mrb[120].mxu0 }
0x18ac   : > { %v5706_v7 = vpop.f32.mrb[121].mxu0  ;;  %v20438_v29 = vadd.f32 %v16514_v30, %v13932_v31 }
0x18ad   : > { %v5707_v14 = vadd.f32 %v13930_v4, %v5706_v7  ;;  %v16515_v17 = vpop.f32.mrb[122].mxu0 }
0x18ae   : > { %v5709_v19 = vpop.f32.mrb[123].mxu0  ;;  %v20441_v25 = vadd.f32 %v16515_v17, %v13933_v18  ;;  %v5743_v34 = vsel %vm915_vm1, %v20438_v29, -inf }
0x18af   : > { %v5710_v21 = vadd.f32 %v13931_v12, %v5709_v19  ;;  %v5737_v33 = vsel %vm915_vm1, %v5707_v14, -inf }
0x18b0   : > { %5738 = vmax.xlane.f32.xlu0 %v5737_v33  ;;  %v5746_v20 = vsel %vm915_vm1, %v20441_v25, -inf }
0x18b1   : > { %v5740_v35 = vsel %vm915_vm1, %v5710_v21, -inf }
0x18b2   : > { %5741 = vmax.xlane.f32.xlu1 %v5740_v35 }
0x18b3   : > { %v16518_v15 = vpop.f32.mrb[124].mxu0 }
0x18b4   : > { %v5722_v40 = vpop.f32.mrb[125].mxu0  ;;  %5744 = vmax.xlane.f32.xlu0 %v5743_v34  ;;  %v20458_v37 = vadd.f32 %v16518_v15, %v13936_v32 }
0x18b5   : > { %v5723_v39 = vadd.f32 %v13934_v36, %v5722_v40  ;;  %v16519_v47 = vpop.f32.mrb[126].mxu0 }
0x18b6   : > { %v5725_v50 = vpop.f32.mrb[127].mxu0  ;;  %5747 = vmax.xlane.f32.xlu1 %v5746_v20  ;;  %v20462_v51 = vadd.f32 %v16519_v47, %v13937_v16  ;;  %v5755_v24 = vsel %vm915_vm1, %v20458_v37, -inf }
0x18b7   : > { %v5726_v44 = vadd.f32 %v13935_v42, %v5725_v50  ;;  %v5749_v3 = vsel %vm915_vm1, %v5723_v39, -inf }
0x18b8   : > { %5750 = vmax.xlane.f32.xlu0 %v5749_v3  ;;  %v5758_v27 = vsel %vm915_vm1, %v20462_v51, -inf }
0x18b9   : > { %v5752_v23 = vsel %vm915_vm1, %v5726_v44, -inf }
0x18ba   : > { %5753 = vmax.xlane.f32.xlu1 %v5752_v23 }
0x18bc   : > { %5756 = vmax.xlane.f32.xlu0 %v5755_v24 }
0x18be   : > { %5759 = vmax.xlane.f32.xlu1 %v5758_v27 }
0x193d   : > { %v5739_v56 = vpop.xlane.xlu0 %5738 }
0x193e   : > { %v5761_v13 = vsub.f32 %v5707_v14, %v5739_v56 }
0x193f   : > { %v5742_v1 = vpop.xlane.xlu1 %5741 }
0x1940   : > { %v5769_v0 = vmul.f32 1.442695, %v5761_v13  ;;  %v5762_v2 = vsub.f32 %v5710_v21, %v5742_v1 }
0x1941   : > { %v5745_v22 = vpop.xlane.xlu0 %5744 }
0x1942   : > { %18414 = vpow2.f32 %v5769_v0  ;;  %v5771_v28 = vmul.f32 1.442695, %v5762_v2  ;;  %v5763_v4 = vsub.f32 %v20438_v29, %v5745_v22 }
0x1943   : > { %v5748_v30 = vpop.xlane.xlu1 %5747 }
0x1944   : > { %18416 = vpow2.f32 %v5771_v28  ;;  %v5773_v31 = vmul.f32 1.442695, %v5763_v4  ;;  %v5764_v7 = vsub.f32 %v20441_v25, %v5748_v30 }
0x1945   : > { %v5751_v12 = vpop.xlane.xlu0 %5750 }
0x1946   : > { %18418 = vpow2.f32 %v5773_v31  ;;  %v5775_v14 = vmul.f32 1.442695, %v5764_v7  ;;  %v5765_v17 = vsub.f32 %v5723_v39, %v5751_v12  ;;  %v17988_v7 = vld [vmem:[%s22325_s3 + $0xc0] sm:$0xff]  }
0x1947   : > { %v5754_v18 = vpop.xlane.xlu1 %5753  ;;  %16572 = vmatprep.subr.bf16.mxu0 %v17988_v7  ;;  %v17995_v12 = vld [vmem:[%s22323_s1 + $0xc0] sm:$0xff]  }
0x1948   : > { %18420 = vpow2.f32 %v5775_v14  ;;  %v5777_v19 = vmul.f32 1.442695, %v5765_v17  ;;  %v5766_v21 = vsub.f32 %v5726_v44, %v5754_v18  ;;  %16548 = vmatprep.subr.bf16.mxu1 %v17995_v12  ;;  %v17997_v14 = vld [vmem:[%s22323_s1 + $0xc8] sm:$0xff]   ;;  %v17998_v17 = vld [vmem:[%s22323_s1 + $0xd0] sm:$0xff]   ;;  %v17999_v18 = vld [vmem:[%s22323_s1 + $0xd8] sm:$0xff]  }
0x1949   : > { %v5757_v33 = vpop.xlane.xlu0 %5756 }
0x194a   : > { %18422 = vpow2.f32 %v5777_v19  ;;  %v5779_v29 = vmul.f32 1.442695, %v5766_v21  ;;  %v5767_v35 = vsub.f32 %v20458_v37, %v5757_v33  ;;  %v18000_v19 = vld [vmem:[%s22323_s1 + $0xe0] sm:$0xff]   ;;  %v18001_v21 = vld [vmem:[%s22323_s1 + $0xe8] sm:$0xff]   ;;  %v18002_v33 = vld [vmem:[%s22323_s1 + $0xf0] sm:$0xff]  }
0x194b   : > { %v5760_v32 = vpop.xlane.xlu1 %5759 }
0x194c   : > { %v18415_v36 = vpop.eup %18414  ;;  %18424 = vpow2.f32 %v5779_v29  ;;  %v5781_v25 = vmul.f32 1.442695, %v5767_v35  ;;  %v5768_v15 = vsub.f32 %v20462_v51, %v5760_v32  ;;  %v18003_v29 = vld [vmem:[%s22323_s1 + $0xf8] sm:$0xff]  }
0x194d   : > { %v5785_v34 = vsel %vm915_vm1, %v18415_v36, 0.0 }
0x194e   : > { %v18417_v40 = vpop.eup %18416  ;;  %18426 = vpow2.f32 %v5781_v25  ;;  %v5783_v16 = vmul.f32 1.442695, %v5768_v15  ;;  %5786 = vadd.xlane.f32.xlu0 %v5785_v34 }
0x194f   : > { %v5788_v42 = vsel %vm915_vm1, %v18417_v40, 0.0 }
0x1950   : > { %v18419_v39 = vpop.eup %18418  ;;  %18428 = vpow2.f32 %v5783_v16  ;;  %5789 = vadd.xlane.f32.xlu1 %v5788_v42 }
0x1951   : > { %v5791_v47 = vsel %vm915_vm1, %v18419_v39, 0.0 }
0x1952   : > { %v18421_v37 = vpop.eup %18420  ;;  %5792 = vadd.xlane.f32.xlu0 %v5791_v47 }
0x1953   : > { %v5794_v20 = vsel %vm915_vm1, %v18421_v37, 0.0 }
0x1954   : > { %v18423_v50 = vpop.eup %18422  ;;  %5795 = vadd.xlane.f32.xlu1 %v5794_v20 }
0x1955   : > { %v5797_v51 = vsel %vm915_vm1, %v18423_v50, 0.0 }
0x1956   : > { %v18425_v44 = vpop.eup %18424  ;;  %5798 = vadd.xlane.f32.xlu0 %v5797_v51  ;;  %v17991_v51 = vld [vmem:[%s22325_s3 + $0xd8] sm:$0xff]  }
0x1957   : > { %v5800_v3 = vsel %vm915_vm1, %v18425_v44, 0.0 }
0x1958   : > { %v18427_v23 = vpop.eup %18426  ;;  %5801 = vadd.xlane.f32.xlu1 %v5800_v3  ;;  %v17993_v3 = vld [vmem:[%s22325_s3 + $0xe8] sm:$0xff]  }
0x1959   : > { %v5803_v24 = vsel %vm915_vm1, %v18427_v23, 0.0 }
0x195a   : > { %v18429_v27 = vpop.eup %18428  ;;  %5804 = vadd.xlane.f32.xlu0 %v5803_v24  ;;  %v13972_v24 = vld [vmem:[#allocation2 + $0x3] ss:$0 sm:$0xff] }
0x195b   : > { %v5806_v38 = vsel %vm915_vm1, %v18429_v27, 0.0 }
0x195c   : > { %5807 = vadd.xlane.f32.xlu1 %v5806_v38 }
0x19db   : > { %v5787_v55 = vpop.xlane.xlu0 %5786 }
0x19dc   : > { %18430 = vrcp.f32 %v5787_v55 }
0x19dd   : > { %v5790_v9 = vpop.xlane.xlu1 %5789 }
0x19de   : > { %18432 = vrcp.f32 %v5790_v9 }
0x19df   : > { %v5793_v60 = vpop.xlane.xlu0 %5792 }
0x19e0   : > { %18434 = vrcp.f32 %v5793_v60 }
0x19e1   : > { %v5796_v46 = vpop.xlane.xlu1 %5795 }
0x19e2   : > { %18436 = vrcp.f32 %v5796_v46 }
0x19e3   : > { %v5799_v48 = vpop.xlane.xlu0 %5798 }
0x19e4   : > { %18438 = vrcp.f32 %v5799_v48 }
0x19e5   : > { %v5802_v61 = vpop.xlane.xlu1 %5801 }
0x19e6   : > { %v18431_v62 = vpop.eup %18430  ;;  %18440 = vrcp.f32 %v5802_v61 }
0x19e7   : > { %v5805_v54 = vpop.xlane.xlu0 %5804  ;;  %v5810_v45 = vmul.f32 %v18431_v62, %v18415_v36 }
0x19e8   : > { %v18433_v58 = vpop.eup %18432  ;;  %18442 = vrcp.f32 %v5805_v54 }
0x19e9   : > { %v5808_v53 = vpop.xlane.xlu1 %5807  ;;  %v5812_v56 = vmul.f32 %v18433_v58, %v18417_v40  ;;  %v17989_v40 = vld [vmem:[%s22325_s3 + $0xc8] sm:$0xff]  }
0x19ea   : > { %v18435_v63 = vpop.eup %18434  ;;  %18444 = vrcp.f32 %v5808_v53 }
0x19eb   : > { %v5825_v10 = vpack.c.bf16 %v5812_v56, %v5810_v45  ;;  %v5814_v8 = vmul.f32 %v18435_v63, %v18419_v39  ;;  %v17990_v39 = vld [vmem:[%s22325_s3 + $0xd0] sm:$0xff]  }
0x19ec   : > { %v18437_v13 = vpop.eup %18436 }
0x19ed   : > { %v5816_v11 = vmul.f32 %v18437_v13, %v18421_v37  ;;  %16528 = vmatprep.mubr.msk.bf16.mxu1 %vm915_vm1, %v5825_v10 }
0x19ee   : > { %v18439_v1 = vpop.eup %18438 }
0x19ef   : > { %v5826_v6 = vpack.c.bf16 %v5816_v11, %v5814_v8  ;;  %v5818_v2 = vmul.f32 %v18439_v1, %v18423_v50 }
0x19f0   : > { %v18441_v0 = vpop.eup %18440 }
0x19f1   : > { %16529 = vmatmul.mubr.msk.bf16.vlgmr.msra.gmra.mrb[160].mxu1 %vm915_vm1, %v5826_v6  ;;  %v5820_v5 = vmul.f32 %v18441_v0, %v18425_v44  ;;  %v17992_v44 = vld [vmem:[%s22325_s3 + $0xe0] sm:$0xff]  }
0x19f2   : > { %v18443_v22 = vpop.eup %18442  ;;  %16549 = vmatpush3.bf16.msra.mxu1 %v17995_v12 }
0x19f3   : > { %v5827_v26 = vpack.c.bf16 %v5820_v5, %v5818_v2  ;;  %v5822_v4 = vmul.f32 %v18443_v22, %v18427_v23  ;;  %16550 = vmatprep.subr.bf16.mxu1 %v17997_v14  ;;  %v17994_v23 = vld [vmem:[%s22325_s3 + $0xf0] sm:$0xff]  }
0x19f4   : > { %v18445_v28 = vpop.eup %18444 }
0x19f5   : > { %16532 = vmatprep.mubr.msk.bf16.mxu1 %vm915_vm1, %v5827_v26  ;;  %v5824_v30 = vmul.f32 %v18445_v28, %v18429_v27 }
0x19f6   : > { %16551 = vmatpush3.bf16.msra.mxu1 %v17997_v14 }
0x19f7   : > { %v5828_v31 = vpack.c.bf16 %v5824_v30, %v5822_v4  ;;  %16552 = vmatprep.subr.bf16.mxu1 %v17998_v17  ;;  %v13998_v4 = vld [vmem:[%s22326_s4 + $0x3] ss:$0 sm:$0xff] }
0x19f9   : > { %16533 = vmatmul.mubr.msk.bf16.gmra.mrb[164].mxu1 %vm915_vm1, %v5828_v31 }
0x19fa   : > { %16564 = vmatprep.mubr.bf16.mxu1 %v19831_v43  ;;  %16553 = vmatpush3.bf16.msra.mxu1 %v17998_v17 }
0x19fb   : > { %16554 = vmatprep.subr.bf16.mxu1 %v17999_v18 }
0x19fe   : > { %16555 = vmatpush3.bf16.msra.mxu1 %v17999_v18 }
0x19ff   : > { %16556 = vmatprep.subr.bf16.mxu1 %v18000_v19 }
0x1a02   : > { %16557 = vmatpush3.bf16.msra.mxu1 %v18000_v19 }
0x1a03   : > { %16558 = vmatprep.subr.bf16.mxu1 %v18001_v21 }
0x1a06   : > { %16559 = vmatpush3.bf16.msra.mxu1 %v18001_v21 }
0x1a07   : > { %16560 = vmatprep.subr.bf16.mxu1 %v18002_v33 }
0x1a0a   : > { %16561 = vmatpush3.bf16.msra.mxu1 %v18002_v33 }
0x1a0b   : > { %16562 = vmatprep.subr.bf16.mxu1 %v18003_v29 }
0x1a0e   : > { %16563 = vmatpush3.bf16.msra.mxu1 %v18003_v29 }
0x1a11   : > { %16565 = vmatmul.mubr.bf16.vlgmr.msra.gmra.mrb[168].mxu1 %v19856_v57 }
0x1a12   : > { %16568 = vmatprep.mubr.bf16.mxu1 %v19858_v59 }
0x1a19   : > { %16569 = vmatmul.mubr.bf16.gmra.mrb[172].mxu1 %v19864_v49 }
0x1a1a   : > { %16612 = vmatprep.mubr.bf16.mxu1 %v19831_v43 }
0x1ac4   : > { %v16530_v35 = vpop.f32.mrb[160].mxu1 }
0x1ac5   : > { %v5879_v32 = vpop.f32.mrb[161].mxu1 }
0x1ac6   : > { %v16531_v36 = vpop.f32.mrb[162].mxu1 }
0x1ac7   : > { %v5911_v25 = vpack.c.bf16 %v16531_v36, %v16530_v35  ;;  %v5882_v15 = vpop.f32.mrb[163].mxu1 }
0x1ac8   : > { %v5910_v34 = vpack.c.bf16 %v5882_v15, %v5879_v32 }
0x1aca   : > { %16540 = vmatprep.mubr.msk.bf16.mxu0 %vm825_vm0, %v5910_v34 }
0x1acb   : > { %16541 = vmatmul.mubr.msk.bf16.vlgmr.msra.gmra.mrb[104].mxu0 %vm825_vm0, %v5911_v25 }
0x1acc   : > { %16573 = vmatpush3.bf16.msra.mxu0 %v17988_v7  ;;  %v16534_v16 = vpop.f32.mrb[164].mxu1 }
0x1acd   : > { %v5895_v42 = vpop.f32.mrb[165].mxu1  ;;  %16574 = vmatprep.subr.bf16.mxu0 %v17989_v40 }
0x1ace   : > { %v16535_v47 = vpop.f32.mrb[166].mxu1 }
0x1acf   : > { %v5913_v37 = vpack.c.bf16 %v16535_v47, %v16534_v16  ;;  %v5898_v20 = vpop.f32.mrb[167].mxu1 }
0x1ad0   : > { %v5912_v50 = vpack.c.bf16 %v5898_v20, %v5895_v42  ;;  %16575 = vmatpush3.bf16.msra.mxu0 %v17989_v40  ;;  %v18004_v20 = vld [vmem:[%s22327_s5 + $0xc0] sm:$0xff]  }
0x1ad1   : > { %16576 = vmatprep.subr.bf16.mxu0 %v17990_v39  ;;  %16596 = vmatprep.subr.bf16.mxu1 %v18004_v20 }
0x1ad2   : > { %16544 = vmatprep.mubr.msk.bf16.mxu0 %vm825_vm0, %v5912_v50  ;;  %v18005_v50 = vld [vmem:[%s22327_s5 + $0xc8] sm:$0xff]   ;;  %16597 = vmatpush3.bf16.msra.mxu1 %v18004_v20 }
0x1ad3   : > { %16545 = vmatmul.mubr.msk.bf16.gmra.mrb[108].mxu0 %vm825_vm0, %v5913_v37  ;;  %16598 = vmatprep.subr.bf16.mxu1 %v18005_v50 }
0x1ad4   : > { %16577 = vmatpush3.bf16.msra.mxu0 %v17990_v39  ;;  %16588 = vmatprep.mubr.bf16.mxu0 %v19831_v43  ;;  %v17996_v43 = vld [vmem:[%s22325_s3 + $0xf8] sm:$0xff]  }
0x1ad5   : > { %16578 = vmatprep.subr.bf16.mxu0 %v17991_v51 }
0x1ad6   : > { %16599 = vmatpush3.bf16.msra.mxu1 %v18005_v50 }
0x1ad8   : > { %16579 = vmatpush3.bf16.msra.mxu0 %v17991_v51  ;;  %v18006_v51 = vld [vmem:[%s22327_s5 + $0xd0] sm:$0xff]  }
0x1ad9   : > { %16580 = vmatprep.subr.bf16.mxu0 %v17992_v44  ;;  %16600 = vmatprep.subr.bf16.mxu1 %v18006_v51 }
0x1ada   : > { %16601 = vmatpush3.bf16.msra.mxu1 %v18006_v51 }
0x1adc   : > { %16581 = vmatpush3.bf16.msra.mxu0 %v17992_v44  ;;  %v18007_v44 = vld [vmem:[%s22327_s5 + $0xd8] sm:$0xff]  }
0x1add   : > { %16582 = vmatprep.subr.bf16.mxu0 %v17993_v3  ;;  %16602 = vmatprep.subr.bf16.mxu1 %v18007_v44 }
0x1ade   : > { %16603 = vmatpush3.bf16.msra.mxu1 %v18007_v44 }
0x1ae0   : > { %16583 = vmatpush3.bf16.msra.mxu0 %v17993_v3  ;;  %v18008_v3 = vld [vmem:[%s22327_s5 + $0xe0] sm:$0xff]  }
0x1ae1   : > { %16584 = vmatprep.subr.bf16.mxu0 %v17994_v23  ;;  %16604 = vmatprep.subr.bf16.mxu1 %v18008_v3 }
0x1ae2   : > { %16605 = vmatpush3.bf16.msra.mxu1 %v18008_v3 }
0x1ae4   : > { %16585 = vmatpush3.bf16.msra.mxu0 %v17994_v23  ;;  %v16566_v27 = vpop.f32.mrb[168].mxu1  ;;  %v18009_v23 = vld [vmem:[%s22327_s5 + $0xe8] sm:$0xff]  }
0x1ae5   : > { %16586 = vmatprep.subr.bf16.mxu0 %v17996_v43  ;;  %v6129_v38 = vadd.f32 %v16566_v27, %v13972_v24  ;;  %v6120_v41 = vpop.f32.mrb[169].mxu1  ;;  %16606 = vmatprep.subr.bf16.mxu1 %v18009_v23  ;;  %v14033_v27 = vld [vmem:[%s22329_s7 + $0xc0] sm:$0xff] }
0x1ae6   : > { %v6121_v52 = vadd.f32 %v13972_v24, %v6120_v41  ;;  %v16567_v55 = vpop.f32.mrb[170].mxu1  ;;  %16607 = vmatpush3.bf16.msra.mxu1 %v18009_v23  ;;  %v14035_v41 = vld [vmem:[%s22329_s7 + $0xd0] sm:$0xff] }
0x1ae7   : > { %v6425_v9 = vmul.f32 0.17677669, %v6129_v38  ;;  %v6132_v60 = vadd.f32 %v16567_v55, %v13972_v24  ;;  %v6123_v46 = vpop.f32.mrb[171].mxu1  ;;  %v14034_v55 = vld [vmem:[%s22329_s7 + $0xc8] sm:$0xff] }
0x1ae8   : > { %16587 = vmatpush3.bf16.msra.mxu0 %v17996_v43  ;;  %v6423_v48 = vmul.f32 0.17677669, %v6121_v52  ;;  %v6124_v61 = vadd.f32 %v13972_v24, %v6123_v46  ;;  %v18010_v43 = vld [vmem:[%s22327_s5 + $0xf0] sm:$0xff]  }
0x1ae9   : > { %v6426_v62 = vmul.f32 0.17677669, %v6132_v60  ;;  %16608 = vmatprep.subr.bf16.mxu1 %v18010_v43 }
0x1aea   : > { %v6424_v54 = vmul.f32 0.17677669, %v6124_v61  ;;  %16609 = vmatpush3.bf16.msra.mxu1 %v18010_v43 }
0x1aeb   : > { %16589 = vmatmul.mubr.bf16.vlgmr.msra.gmra.mrb[128].mxu0 %v19856_v57  ;;  %v6432_v58 = vpack.c.bf16 %v6426_v62, %v6425_v9 }
0x1aec   : > { %16592 = vmatprep.mubr.bf16.mxu0 %v19858_v59  ;;  %v6431_v53 = vpack.c.bf16 %v6424_v54, %v6423_v48  ;;  %v16570_v45 = vpop.f32.mrb[172].mxu1  ;;  %v14039_v54 = vld [vmem:[%s22329_s7 + $0xf0] sm:$0xff] }
0x1aed   : > { %v6145_v56 = vadd.f32 %v16570_v45, %v13972_v24  ;;  %v6136_v63 = vpop.f32.mrb[173].mxu1 }
0x1aee   : > { %v6137_v10 = vadd.f32 %v13972_v24, %v6136_v63  ;;  %v16571_v13 = vpop.f32.mrb[174].mxu1  ;;  %v14040_v63 = vld [vmem:[%s22329_s7 + $0xf8] sm:$0xff] }
0x1aef   : > { %v6429_v8 = vmul.f32 0.17677669, %v6145_v56  ;;  %v6148_v11 = vadd.f32 %v16571_v13, %v13972_v24  ;;  %v6139_v1 = vpop.f32.mrb[175].mxu1 }
0x1af0   : > { %v6427_v6 = vmul.f32 0.17677669, %v6137_v10  ;;  %v6140_v0 = vadd.f32 %v13972_v24, %v6139_v1  ;;  %v18011_v24 = vld [vmem:[%s22327_s5 + $0xf8] sm:$0xff]   ;;  %v14038_v10 = vld [vmem:[%s22329_s7 + $0xe8] sm:$0xff] }
0x1af1   : > { %v6430_v2 = vmul.f32 0.17677669, %v6148_v11  ;;  %16610 = vmatprep.subr.bf16.mxu1 %v18011_v24 }
0x1af2   : > { %v6428_v5 = vmul.f32 0.17677669, %v6140_v0  ;;  %16611 = vmatpush3.bf16.msra.mxu1 %v18011_v24 }
0x1af3   : > { %16593 = vmatmul.mubr.bf16.gmra.mrb[132].mxu0 %v19864_v49  ;;  %v6434_v22 = vpack.c.bf16 %v6430_v2, %v6429_v8 }
0x1af4   : > { %16628 = vmatprep.mubr.msk.bf16.mxu0 %vm825_vm0, %v6431_v53  ;;  %v6433_v26 = vpack.c.bf16 %v6428_v5, %v6427_v6 }
0x1af5   : > { %16613 = vmatmul.mubr.bf16.vlgmr.msra.gmra.mrb[176].mxu1 %v19856_v57 }
0x1af6   : > { %16616 = vmatprep.mubr.bf16.mxu1 %v19858_v59  ;;  %v14036_v59 = vld [vmem:[%s22329_s7 + $0xd8] sm:$0xff] }
0x1afd   : > { %16617 = vmatmul.mubr.bf16.gmra.mrb[180].mxu1 %v19864_v49 }
0x1bbe   : > { %v16590_v28 = vpop.f32.mrb[128].mxu0 }
0x1bbf   : > { %v6256_v30 = vpop.f32.mrb[129].mxu0  ;;  %v6265_v7 = vadd.f32 %v16590_v28, %v13998_v4 }
0x1bc0   : > { %v16591_v31 = vpop.f32.mrb[130].mxu0  ;;  %v6257_v17 = vadd.f32 %v13998_v4, %v6256_v30 }
0x1bc1   : > { %v6268_v12 = vadd.f32 %v16591_v31, %v13998_v4  ;;  %v6259_v14 = vpop.f32.mrb[131].mxu0 }
0x1bc2   : > { %v6260_v18 = vadd.f32 %v13998_v4, %v6259_v14 }
0x1bc3   : > { %v6436_v19 = vpack.c.bf16 %v6268_v12, %v6265_v7 }
0x1bc4   : > { %v6435_v21 = vpack.c.bf16 %v6260_v18, %v6257_v17 }
0x1bc5   : > { %v6463_v39 = vsel %vm825_vm0, %v6436_v19, 0 }
0x1bc6   : > { %17716 = vmatprep.subr.msk.bf16.mxu0 %vm825_vm0, %v6435_v21  ;;  %v6460_v33 = vsel %vm825_vm0, %v6435_v21, 0  ;;  %v16594_v29 = vpop.f32.mrb[132].mxu0 }
0x1bc7   : > { %16621 = vmatpush3.bf16.xpose.msra.mxu0 %v6460_v33  ;;  %v6281_v35 = vadd.f32 %v16594_v29, %v13998_v4  ;;  %v6272_v32 = vpop.f32.mrb[133].mxu0 }
0x1bc8   : > { %17717 = vmatprep.subr.msk.bf16.mxu0 %vm825_vm0, %v6436_v19  ;;  %v6273_v36 = vadd.f32 %v13998_v4, %v6272_v32  ;;  %v16595_v25 = vpop.f32.mrb[134].mxu0  ;;  %v16614_v30 = vpop.f32.mrb[176].mxu1 }
0x1bc9   : > { %v6284_v15 = vadd.f32 %v16595_v25, %v13998_v4  ;;  %v6275_v34 = vpop.f32.mrb[135].mxu0  ;;  %v6392_v7 = vpop.f32.mrb[177].mxu1 }
0x1bca   : > { %v6276_v40 = vadd.f32 %v13998_v4, %v6275_v34  ;;  %v14024_v4 = vld [vmem:[%s22328_s6 + $0x3] ss:$0 sm:$0xff]  ;;  %v16615_v14 = vpop.f32.mrb[178].mxu1 }
0x1bcb   : > { %v6438_v16 = vpack.c.bf16 %v6284_v15, %v6281_v35  ;;  %v6401_v31 = vadd.f32 %v16614_v30, %v14024_v4  ;;  %v6393_v12 = vadd.f32 %v14024_v4, %v6392_v7  ;;  %v6404_v17 = vadd.f32 %v16615_v14, %v14024_v4  ;;  %v6395_v18 = vpop.f32.mrb[179].mxu1 }
0x1bcc   : > { %v6437_v42 = vpack.c.bf16 %v6276_v40, %v6273_v36  ;;  %v6396_v19 = vadd.f32 %v14024_v4, %v6395_v18 }
0x1bcd   : > { %v6469_v37 = vsel %vm825_vm0, %v6438_v16, 0  ;;  %v6629_v21 = vpack.c.bf16 %v6404_v17, %v6401_v31 }
0x1bce   : > { %v6466_v47 = vsel %vm825_vm0, %v6437_v42, 0  ;;  %v6628_v33 = vpack.c.bf16 %v6396_v19, %v6393_v12 }
0x1bcf   : > { %16623 = vmatpush3.bf16.xpose.msra.mxu0 %v6463_v39 }
0x1bd0   : > { %17718 = vmatprep.subr.msk.bf16.mxu0 %vm825_vm0, %v6437_v42  ;;  %v16618_v29 = vpop.f32.mrb[180].mxu1  ;;  %16636 = vmatprep.subr.bf16.mxu1 %v6628_v33 }
0x1bd1   : > { %v6417_v35 = vadd.f32 %v16618_v29, %v14024_v4  ;;  %v6408_v32 = vpop.f32.mrb[181].mxu1  ;;  %16637 = vmatpush3.bf16.msra.mxu1 %v6628_v33 }
0x1bd2   : > { %v6409_v25 = vadd.f32 %v14024_v4, %v6408_v32  ;;  %v16619_v15 = vpop.f32.mrb[182].mxu1  ;;  %16638 = vmatprep.subr.bf16.mxu1 %v6629_v21 }
0x1bd3   : > { %v6420_v40 = vadd.f32 %v16619_v15, %v14024_v4 }
0x1bd5   : > { %v6631_v20 = vpack.c.bf16 %v6420_v40, %v6417_v35  ;;  %16639 = vmatpush3.bf16.msra.mxu1 %v6629_v21 }
0x1bd7   : > { %16625 = vmatpush3.bf16.xpose.msra.mxu0 %v6466_v47 }
0x1bd8   : > { %17719 = vmatprep.subr.msk.bf16.mxu0 %vm825_vm0, %v6438_v16  ;;  %v6411_v16 = vpop.f32.mrb[183].mxu1 }
0x1bd9   : > { %v6412_v39 = vadd.f32 %v14024_v4, %v6411_v16 }
0x1bdb   : > { %v6630_v51 = vpack.c.bf16 %v6412_v39, %v6409_v25 }
0x1bdd   : > { %16640 = vmatprep.subr.bf16.mxu1 %v6630_v51 }
0x1bde   : > { %16641 = vmatpush3.bf16.msra.mxu1 %v6630_v51 }
0x1bdf   : > { %16627 = vmatpush3.bf16.xpose.msra.mxu0 %v6469_v37  ;;  %16642 = vmatprep.subr.bf16.mxu1 %v6631_v20 }
0x1be2   : > { %16643 = vmatpush3.bf16.msra.mxu1 %v6631_v20 }
0x1be6   : > { %16629 = vmatmul.mubr.msk.bf16.vlgmr.msra.gmra.mrb[136].mxu0 %vm825_vm0, %v6432_v58  ;;  %v14037_v58 = vld [vmem:[%s22329_s7 + $0xe0] sm:$0xff] }
0x1be7   : > { %16632 = vmatprep.mubr.msk.bf16.mxu0 %vm825_vm0, %v6433_v26 }
0x1bee   : > { %16633 = vmatmul.mubr.msk.bf16.gmra.mrb[140].mxu0 %vm825_vm0, %v6434_v22 }
0x1cb9   : > { %v16630_v38 = vpop.f32.mrb[136].mxu0 }
0x1cba   : > { %v6505_v52 = vpop.f32.mrb[137].mxu0  ;;  %v20610_v60 = vadd.f32 %v16630_v38, %v14035_v41 }
0x1cbb   : > { %v6506_v9 = vadd.f32 %v14033_v27, %v6505_v52  ;;  %v16631_v57 = vpop.f32.mrb[138].mxu0 }
0x1cbc   : > { %v6508_v49 = vpop.f32.mrb[139].mxu0  ;;  %v20613_v61 = vadd.f32 %v16631_v57, %v14036_v59  ;;  %v6542_v45 = vsel %vm915_vm1, %v20610_v60, -inf }
0x1cbd   : > { %v6509_v46 = vadd.f32 %v14034_v55, %v6508_v49  ;;  %v6536_v48 = vsel %vm915_vm1, %v6506_v9, -inf }
0x1cbe   : > { %6537 = vmax.xlane.f32.xlu0 %v6536_v48  ;;  %v6545_v1 = vsel %vm915_vm1, %v20613_v61, -inf }
0x1cbf   : > { %v6539_v62 = vsel %vm915_vm1, %v6509_v46, -inf }
0x1cc0   : > { %6540 = vmax.xlane.f32.xlu1 %v6539_v62 }
0x1cc1   : > { %v16634_v53 = vpop.f32.mrb[140].mxu0 }
0x1cc2   : > { %v6521_v56 = vpop.f32.mrb[141].mxu0  ;;  %6543 = vmax.xlane.f32.xlu0 %v6542_v45  ;;  %v20630_v13 = vadd.f32 %v16634_v53, %v14039_v54 }
0x1cc3   : > { %v6522_v8 = vadd.f32 %v14037_v58, %v6521_v56  ;;  %v16635_v11 = vpop.f32.mrb[142].mxu0 }
0x1cc4   : > { %v6524_v6 = vpop.f32.mrb[143].mxu0  ;;  %6546 = vmax.xlane.f32.xlu1 %v6545_v1  ;;  %v20634_v0 = vadd.f32 %v16635_v11, %v14040_v63  ;;  %v6554_v26 = vsel %vm915_vm1, %v20630_v13, -inf }
0x1cc5   : > { %v6525_v2 = vadd.f32 %v14038_v10, %v6524_v6  ;;  %v6548_v5 = vsel %vm915_vm1, %v6522_v8, -inf }
0x1cc6   : > { %6549 = vmax.xlane.f32.xlu0 %v6548_v5  ;;  %v6557_v28 = vsel %vm915_vm1, %v20634_v0, -inf }
0x1cc7   : > { %v6551_v22 = vsel %vm915_vm1, %v6525_v2, -inf }
0x1cc8   : > { %6552 = vmax.xlane.f32.xlu1 %v6551_v22  ;;  %v18012_v22 = vld [vmem:[%s22330_s8 + $0x30] sm:$0xff]  }
0x1cc9   : > { %16652 = vmatprep.subr.bf16.mxu0 %v18012_v22 }
0x1cca   : > { %6555 = vmax.xlane.f32.xlu0 %v6554_v26  ;;  %v18013_v26 = vld [vmem:[%s22330_s8 + $0x38] sm:$0xff]   ;;  %16653 = vmatpush3.bf16.msra.mxu0 %v18012_v22 }
0x1ccb   : > { %16654 = vmatprep.subr.bf16.mxu0 %v18013_v26 }
0x1ccc   : > { %6558 = vmax.xlane.f32.xlu1 %v6557_v28 }
0x1cce   : > { %16655 = vmatpush3.bf16.msra.mxu0 %v18013_v26  ;;  %v18017_v26 = vld [vmem:[%s22325_s3 + $0x18] sm:$0xff]  }
0x1d4b   : > { %v6538_v36 = vpop.xlane.xlu0 %6537 }
0x1d4c   : > { %v6560_v34 = vsub.f32 %v6506_v9, %v6538_v36 }
0x1d4d   : > { %v6541_v42 = vpop.xlane.xlu1 %6540 }
0x1d4e   : > { %v6568_v47 = vmul.f32 1.442695, %v6560_v34  ;;  %v6561_v37 = vsub.f32 %v6509_v46, %v6541_v42 }
0x1d4f   : > { %v6544_v50 = vpop.xlane.xlu0 %6543 }
0x1d50   : > { %18446 = vpow2.f32 %v6568_v47  ;;  %v6570_v44 = vmul.f32 1.442695, %v6561_v37  ;;  %v6562_v3 = vsub.f32 %v20610_v60, %v6544_v50 }
0x1d51   : > { %v6547_v23 = vpop.xlane.xlu1 %6546 }
0x1d52   : > { %18448 = vpow2.f32 %v6570_v44  ;;  %v6572_v43 = vmul.f32 1.442695, %v6562_v3  ;;  %v6563_v24 = vsub.f32 %v20613_v61, %v6547_v23  ;;  %v18014_v44 = vld [vmem:[%s22325_s3] sm:$0xff]   ;;  %v18023_v23 = vld [vmem:[%s22323_s1 + $0x8] sm:$0xff]  }
0x1d53   : > { %v6550_v27 = vpop.xlane.xlu0 %6549  ;;  %16688 = vmatprep.subr.bf16.mxu0 %v18014_v44  ;;  %v18021_v3 = vld [vmem:[%s22323_s1] sm:$0xff]  }
0x1d54   : > { %18450 = vpow2.f32 %v6572_v43  ;;  %v6574_v38 = vmul.f32 1.442695, %v6563_v24  ;;  %v6564_v41 = vsub.f32 %v6522_v8, %v6550_v27  ;;  %16664 = vmatprep.subr.bf16.mxu1 %v18021_v3  ;;  %v14067_v43 = vld [vmem:[%s18993_s21 + $0x80] sm:$0xff]  ;;  %v14068_v24 = vld [vmem:[%s18993_s21 + $0x88] sm:$0xff] }
0x1d55   : > { %v6553_v52 = vpop.xlane.xlu1 %6552  ;;  %v20678_v27 = vpack.c.bf16 %v14068_v24, %v14067_v43 }
0x1d56   : > { %18452 = vpow2.f32 %v6574_v38  ;;  %v6576_v55 = vmul.f32 1.442695, %v6564_v41  ;;  %v6565_v9 = vsub.f32 %v6525_v2, %v6553_v52  ;;  %v18024_v38 = vld [vmem:[%s22323_s1 + $0x10] sm:$0xff]   ;;  %v18025_v41 = vld [vmem:[%s22323_s1 + $0x18] sm:$0xff]   ;;  %v18026_v52 = vld [vmem:[%s22323_s1 + $0x20] sm:$0xff]  }
0x1d57   : > { %v6556_v57 = vpop.xlane.xlu0 %6555 }
0x1d58   : > { %18454 = vpow2.f32 %v6576_v55  ;;  %v6578_v59 = vmul.f32 1.442695, %v6565_v9  ;;  %v6566_v49 = vsub.f32 %v20630_v13, %v6556_v57  ;;  %v18027_v55 = vld [vmem:[%s22323_s1 + $0x28] sm:$0xff]   ;;  %v18028_v9 = vld [vmem:[%s22323_s1 + $0x30] sm:$0xff]   ;;  %v18029_v57 = vld [vmem:[%s22323_s1 + $0x38] sm:$0xff]  }
0x1d59   : > { %v6559_v60 = vpop.xlane.xlu1 %6558 }
0x1d5a   : > { %v18447_v46 = vpop.eup %18446  ;;  %18456 = vpow2.f32 %v6578_v59  ;;  %v6580_v48 = vmul.f32 1.442695, %v6566_v49  ;;  %v6567_v61 = vsub.f32 %v20634_v0, %v6559_v60  ;;  %v14069_v59 = vld [vmem:[%s18993_s21 + $0x90] sm:$0xff]  ;;  %v14070_v49 = vld [vmem:[%s18993_s21 + $0x98] sm:$0xff]  ;;  %v14071_v60 = vld [vmem:[%s18993_s21 + $0xa0] sm:$0xff] }
0x1d5b   : > { %v6584_v62 = vsel %vm915_vm1, %v18447_v46, 0.0 }
0x1d5c   : > { %v18449_v54 = vpop.eup %18448  ;;  %18458 = vpow2.f32 %v6580_v48  ;;  %v6582_v58 = vmul.f32 1.442695, %v6567_v61  ;;  %6585 = vadd.xlane.f32.xlu0 %v6584_v62  ;;  %v20703_v48 = vpack.c.bf16 %v14070_v49, %v14069_v59  ;;  %v14073_v62 = vld [vmem:[%s18993_s21 + $0xb0] sm:$0xff] }
0x1d5d   : > { %v6587_v53 = vsel %vm915_vm1, %v18449_v54, 0.0 }
0x1d5e   : > { %v18451_v45 = vpop.eup %18450  ;;  %18460 = vpow2.f32 %v6582_v58  ;;  %6588 = vadd.xlane.f32.xlu1 %v6587_v53 }
0x1d5f   : > { %v6590_v56 = vsel %vm915_vm1, %v18451_v45, 0.0 }
0x1d60   : > { %v18453_v63 = vpop.eup %18452  ;;  %6591 = vadd.xlane.f32.xlu0 %v6590_v56 }
0x1d61   : > { %v6593_v10 = vsel %vm915_vm1, %v18453_v63, 0.0 }
0x1d62   : > { %v18455_v13 = vpop.eup %18454  ;;  %6594 = vadd.xlane.f32.xlu1 %v6593_v10 }
0x1d63   : > { %v6596_v8 = vsel %vm915_vm1, %v18455_v13, 0.0 }
0x1d64   : > { %v18457_v11 = vpop.eup %18456  ;;  %6597 = vadd.xlane.f32.xlu0 %v6596_v8  ;;  %v18015_v8 = vld [vmem:[%s22325_s3 + $0x8] sm:$0xff]  }
0x1d65   : > { %v6599_v1 = vsel %vm915_vm1, %v18457_v11, 0.0 }
0x1d66   : > { %v18459_v6 = vpop.eup %18458  ;;  %6600 = vadd.xlane.f32.xlu1 %v6599_v1 }
0x1d67   : > { %v6602_v0 = vsel %vm915_vm1, %v18459_v6, 0.0 }
0x1d68   : > { %v18461_v2 = vpop.eup %18460  ;;  %6603 = vadd.xlane.f32.xlu0 %v6602_v0 }
0x1d69   : > { %v6605_v5 = vsel %vm915_vm1, %v18461_v2, 0.0 }
0x1d6a   : > { %6606 = vadd.xlane.f32.xlu1 %v6605_v5 }
0x1de9   : > { %v6586_v28 = vpop.xlane.xlu0 %6585 }
0x1dea   : > { %18462 = vrcp.f32 %v6586_v28  ;;  %v18018_v28 = vld [vmem:[%s22325_s3 + $0x20] sm:$0xff]  }
0x1deb   : > { %v6589_v4 = vpop.xlane.xlu1 %6588 }
0x1dec   : > { %18464 = vrcp.f32 %v6589_v4  ;;  %v18019_v4 = vld [vmem:[%s22325_s3 + $0x28] sm:$0xff]  }
0x1ded   : > { %v6592_v30 = vpop.xlane.xlu0 %6591 }
0x1dee   : > { %18466 = vrcp.f32 %v6592_v30  ;;  %v18020_v30 = vld [vmem:[%s22325_s3 + $0x30] sm:$0xff]  }
0x1def   : > { %v6595_v31 = vpop.xlane.xlu1 %6594 }
0x1df0   : > { %18468 = vrcp.f32 %v6595_v31  ;;  %v18022_v31 = vld [vmem:[%s22325_s3 + $0x38] sm:$0xff]  }
0x1df1   : > { %v6598_v7 = vpop.xlane.xlu0 %6597 }
0x1df2   : > { %18470 = vrcp.f32 %v6598_v7  ;;  %v14075_v7 = vld [vmem:[#allocation2] ss:$0 sm:$0xff] }
0x1df3   : > { %v6601_v12 = vpop.xlane.xlu1 %6600 }
0x1df4   : > { %v18463_v14 = vpop.eup %18462  ;;  %18472 = vrcp.f32 %v6601_v12 }
0x1df5   : > { %v6604_v17 = vpop.xlane.xlu0 %6603  ;;  %v6609_v21 = vmul.f32 %v18463_v14, %v18447_v46  ;;  %v14072_v46 = vld [vmem:[%s18993_s21 + $0xa8] sm:$0xff] }
0x1df6   : > { %v18465_v18 = vpop.eup %18464  ;;  %18474 = vrcp.f32 %v6604_v17  ;;  %v20705_v61 = vpack.c.bf16 %v14072_v46, %v14071_v60 }
0x1df7   : > { %v6607_v19 = vpop.xlane.xlu1 %6606  ;;  %v6611_v33 = vmul.f32 %v18465_v18, %v18449_v54  ;;  %v14074_v54 = vld [vmem:[%s18993_s21 + $0xb8] sm:$0xff] }
0x1df8   : > { %v18467_v29 = vpop.eup %18466  ;;  %18476 = vrcp.f32 %v6607_v19  ;;  %v20711_v58 = vpack.c.bf16 %v14074_v54, %v14073_v62 }
0x1df9   : > { %v6624_v35 = vpack.c.bf16 %v6611_v33, %v6609_v21  ;;  %v6613_v36 = vmul.f32 %v18467_v29, %v18451_v45 }
0x1dfa   : > { %v18469_v32 = vpop.eup %18468 }
0x1dfb   : > { %v6615_v25 = vmul.f32 %v18469_v32, %v18453_v63  ;;  %16644 = vmatprep.mubr.msk.bf16.mxu1 %vm915_vm1, %v6624_v35 }
0x1dfc   : > { %v18471_v15 = vpop.eup %18470 }
0x1dfd   : > { %v6625_v34 = vpack.c.bf16 %v6615_v25, %v6613_v36  ;;  %v6617_v16 = vmul.f32 %v18471_v15, %v18455_v13 }
0x1dfe   : > { %v18473_v40 = vpop.eup %18472 }
0x1dff   : > { %16645 = vmatmul.mubr.msk.bf16.vlgmr.msra.gmra.mrb[184].mxu1 %vm915_vm1, %v6625_v34  ;;  %v6619_v42 = vmul.f32 %v18473_v40, %v18457_v11 }
0x1e00   : > { %v18475_v39 = vpop.eup %18474  ;;  %16665 = vmatpush3.bf16.msra.mxu1 %v18021_v3 }
0x1e01   : > { %v6626_v47 = vpack.c.bf16 %v6619_v42, %v6617_v16  ;;  %v6621_v20 = vmul.f32 %v18475_v39, %v18459_v6  ;;  %16666 = vmatprep.subr.bf16.mxu1 %v18023_v23  ;;  %v18016_v6 = vld [vmem:[%s22325_s3 + $0x10] sm:$0xff]  }
0x1e02   : > { %v18477_v37 = vpop.eup %18476 }
0x1e03   : > { %16648 = vmatprep.mubr.msk.bf16.mxu1 %vm915_vm1, %v6626_v47  ;;  %v6623_v50 = vmul.f32 %v18477_v37, %v18461_v2 }
0x1e04   : > { %16667 = vmatpush3.bf16.msra.mxu1 %v18023_v23 }
0x1e05   : > { %v6627_v51 = vpack.c.bf16 %v6623_v50, %v6621_v20  ;;  %16668 = vmatprep.subr.bf16.mxu1 %v18024_v38 }
0x1e07   : > { %16649 = vmatmul.mubr.msk.bf16.gmra.mrb[188].mxu1 %vm915_vm1, %v6627_v51 }
0x1e08   : > { %16680 = vmatprep.mubr.bf16.mxu1 %v20678_v27  ;;  %16669 = vmatpush3.bf16.msra.mxu1 %v18024_v38 }
0x1e09   : > { %16670 = vmatprep.subr.bf16.mxu1 %v18025_v41 }
0x1e0c   : > { %16671 = vmatpush3.bf16.msra.mxu1 %v18025_v41  ;;  %v18734_v41 = vld [vmem:[%s22331_s9] ss:$0 sm:$0xff] }
0x1e0d   : > { %16672 = vmatprep.subr.bf16.mxu1 %v18026_v52 }
0x1e10   : > { %16673 = vmatpush3.bf16.msra.mxu1 %v18026_v52 }
0x1e11   : > { %16674 = vmatprep.subr.bf16.mxu1 %v18027_v55 }
0x1e14   : > { %16675 = vmatpush3.bf16.msra.mxu1 %v18027_v55 }
0x1e15   : > { %16676 = vmatprep.subr.bf16.mxu1 %v18028_v9 }
0x1e18   : > { %16677 = vmatpush3.bf16.msra.mxu1 %v18028_v9 }
0x1e19   : > { %16678 = vmatprep.subr.bf16.mxu1 %v18029_v57 }
0x1e1c   : > { %16679 = vmatpush3.bf16.msra.mxu1 %v18029_v57 }
0x1e1f   : > { %16681 = vmatmul.mubr.bf16.vlgmr.msra.gmra.mrb[192].mxu1 %v20703_v48 }
0x1e20   : > { %16684 = vmatprep.mubr.bf16.mxu1 %v20705_v61 }
0x1e27   : > { %16685 = vmatmul.mubr.bf16.gmra.mrb[196].mxu1 %v20711_v58 }
0x1e28   : > { %16728 = vmatprep.mubr.bf16.mxu1 %v20678_v27 }
0x1ed2   : > { %v16646_v53 = vpop.f32.mrb[184].mxu1 }
0x1ed3   : > { %v6678_v45 = vpop.f32.mrb[185].mxu1 }
0x1ed4   : > { %v16647_v56 = vpop.f32.mrb[186].mxu1 }
0x1ed5   : > { %v6710_v63 = vpack.c.bf16 %v16647_v56, %v16646_v53  ;;  %v6681_v10 = vpop.f32.mrb[187].mxu1 }
0x1ed6   : > { %v6709_v13 = vpack.c.bf16 %v6681_v10, %v6678_v45 }
0x1ed8   : > { %16656 = vmatprep.mubr.msk.bf16.mxu0 %vm825_vm0, %v6709_v13 }
0x1ed9   : > { %16657 = vmatmul.mubr.msk.bf16.vlgmr.msra.gmra.mrb[104].mxu0 %vm825_vm0, %v6710_v63 }
0x1eda   : > { %16689 = vmatpush3.bf16.msra.mxu0 %v18014_v44  ;;  %v16650_v11 = vpop.f32.mrb[188].mxu1 }
0x1edb   : > { %v6694_v1 = vpop.f32.mrb[189].mxu1  ;;  %16690 = vmatprep.subr.bf16.mxu0 %v18015_v8 }
0x1edc   : > { %v16651_v0 = vpop.f32.mrb[190].mxu1 }
0x1edd   : > { %v6712_v2 = vpack.c.bf16 %v16651_v0, %v16650_v11  ;;  %v6697_v5 = vpop.f32.mrb[191].mxu1 }
0x1ede   : > { %v6711_v22 = vpack.c.bf16 %v6697_v5, %v6694_v1  ;;  %16691 = vmatpush3.bf16.msra.mxu0 %v18015_v8  ;;  %v14084_v8 = vld [vmem:[%s22326_s4] ss:$0 sm:$0xff] }
0x1edf   : > { %16692 = vmatprep.subr.bf16.mxu0 %v18016_v6 }
0x1ee0   : > { %16660 = vmatprep.mubr.msk.bf16.mxu0 %vm825_vm0, %v6711_v22 }
0x1ee1   : > { %16661 = vmatmul.mubr.msk.bf16.gmra.mrb[108].mxu0 %vm825_vm0, %v6712_v2 }
0x1ee2   : > { %16693 = vmatpush3.bf16.msra.mxu0 %v18016_v6  ;;  %16704 = vmatprep.mubr.bf16.mxu0 %v20678_v27 }
0x1ee3   : > { %16694 = vmatprep.subr.bf16.mxu0 %v18017_v26 }
0x1ee6   : > { %16695 = vmatpush3.bf16.msra.mxu0 %v18017_v26 }
0x1ee7   : > { %16696 = vmatprep.subr.bf16.mxu0 %v18018_v28 }
0x1eea   : > { %16697 = vmatpush3.bf16.msra.mxu0 %v18018_v28 }
0x1eeb   : > { %16698 = vmatprep.subr.bf16.mxu0 %v18019_v4 }
0x1eee   : > { %16699 = vmatpush3.bf16.msra.mxu0 %v18019_v4 }
0x1eef   : > { %16700 = vmatprep.subr.bf16.mxu0 %v18020_v30 }
0x1ef2   : > { %16701 = vmatpush3.bf16.msra.mxu0 %v18020_v30  ;;  %v16682_v12 = vpop.f32.mrb[192].mxu1 }
0x1ef3   : > { %16702 = vmatprep.subr.bf16.mxu0 %v18022_v31  ;;  %v6958_v14 = vadd.f32 %v16682_v12, %v14075_v7  ;;  %v6949_v17 = vpop.f32.mrb[193].mxu1 }
0x1ef4   : > { %v6950_v18 = vadd.f32 %v14075_v7, %v6949_v17  ;;  %v16683_v19 = vpop.f32.mrb[194].mxu1 }
0x1ef5   : > { %v20744_v21 = vmul.f32 0.17677669, %v6958_v14  ;;  %v6961_v33 = vadd.f32 %v16683_v19, %v14075_v7  ;;  %v6952_v29 = vpop.f32.mrb[195].mxu1 }
0x1ef6   : > { %16703 = vmatpush3.bf16.msra.mxu0 %v18022_v31  ;;  %v7252_v35 = vmul.f32 0.17677669, %v6950_v18  ;;  %v6953_v32 = vadd.f32 %v14075_v7, %v6952_v29 }
0x1ef7   : > { %v20746_v36 = vmul.f32 0.17677669, %v6961_v33 }
0x1ef8   : > { %v7253_v25 = vmul.f32 0.17677669, %v6953_v32 }
0x1ef9   : > { %16705 = vmatmul.mubr.bf16.vlgmr.msra.gmra.mrb[144].mxu0 %v20703_v48  ;;  %v7261_v15 = vpack.c.bf16 %v20746_v36, %v20744_v21  ;;  %v18032_v21 = vld [vmem:[%s22327_s5 + $0x10] sm:$0xff]   ;;  %v18033_v36 = vld [vmem:[%s22327_s5 + $0x18] sm:$0xff]  }
0x1efa   : > { %16708 = vmatprep.mubr.bf16.mxu0 %v20705_v61  ;;  %v7260_v34 = vpack.c.bf16 %v7253_v25, %v7252_v35  ;;  %v16686_v40 = vpop.f32.mrb[196].mxu1 }
0x1efb   : > { %v6974_v16 = vadd.f32 %v16686_v40, %v14075_v7  ;;  %v6965_v42 = vpop.f32.mrb[197].mxu1  ;;  %v18031_v40 = vld [vmem:[%s22327_s5 + $0x8] sm:$0xff]  }
0x1efc   : > { %v6966_v39 = vadd.f32 %v14075_v7, %v6965_v42  ;;  %v16687_v47 = vpop.f32.mrb[198].mxu1  ;;  %v18036_v42 = vld [vmem:[%s22327_s5 + $0x30] sm:$0xff]  }
0x1efd   : > { %v20751_v37 = vmul.f32 0.17677669, %v6974_v16  ;;  %v6977_v20 = vadd.f32 %v16687_v47, %v14075_v7  ;;  %v6968_v50 = vpop.f32.mrb[199].mxu1  ;;  %v18035_v16 = vld [vmem:[%s22327_s5 + $0x28] sm:$0xff]   ;;  %v7268_v47 = vld [vmem:[%s22329_s7] sm:$0xff] }
0x1efe   : > { %v20753_v51 = vmul.f32 0.17677669, %v6966_v39  ;;  %v6969_v44 = vadd.f32 %v14075_v7, %v6968_v50  ;;  %v18037_v39 = vld [vmem:[%s22327_s5 + $0x38] sm:$0xff]  }
0x1eff   : > { %v20755_v3 = vmul.f32 0.17677669, %v6977_v20  ;;  %v7270_v20 = vld [vmem:[%s22329_s7 + $0x10] sm:$0xff] }
0x1f00   : > { %v20757_v23 = vmul.f32 0.17677669, %v6969_v44 }
0x1f01   : > { %16709 = vmatmul.mubr.bf16.gmra.mrb[148].mxu0 %v20711_v58  ;;  %v7263_v43 = vpack.c.bf16 %v20755_v3, %v20751_v37 }
0x1f02   : > { %16744 = vmatprep.mubr.msk.bf16.mxu0 %vm825_vm0, %v7260_v34  ;;  %v7262_v24 = vpack.c.bf16 %v20757_v23, %v20753_v51  ;;  %v18030_v34 = vld [vmem:[%s22327_s5] sm:$0xff]   ;;  %v7269_v51 = vld [vmem:[%s22329_s7 + $0x8] sm:$0xff]  ;;  %v7271_v23 = vld [vmem:[%s22329_s7 + $0x18] sm:$0xff] }
0x1f03   : > { %16712 = vmatprep.subr.bf16.mxu1 %v18030_v34 }
0x1f04   : > { %16713 = vmatpush3.bf16.msra.mxu1 %v18030_v34 }
0x1f05   : > { %16714 = vmatprep.subr.bf16.mxu1 %v18031_v40 }
0x1f08   : > { %16715 = vmatpush3.bf16.msra.mxu1 %v18031_v40 }
0x1f09   : > { %16716 = vmatprep.subr.bf16.mxu1 %v18032_v21 }
0x1f0c   : > { %16717 = vmatpush3.bf16.msra.mxu1 %v18032_v21 }
0x1f0d   : > { %16718 = vmatprep.subr.bf16.mxu1 %v18033_v36 }
0x1f10   : > { %16719 = vmatpush3.bf16.msra.mxu1 %v18033_v36 }
0x1fac   : > { %v16658_v38 = vpop.f32.mrb[104].mxu0 }
0x1fad   : > { %v6816_v52 = vadd.f32 %v18734_v41, %v16658_v38  ;;  %v6775_v55 = vpop.f32.mrb[105].mxu0 }
0x1fae   : > { %v6814_v9 = vadd.f32 %v18734_v41, %v6775_v55  ;;  %v16659_v57 = vpop.f32.mrb[106].mxu0 }
0x1faf   : > { %14061 = vst [vmem:[%s19922_s29 + $0x50] sm:$0xff] %v6816_v52  ;;  %v6817_v59 = vadd.f32 %v18734_v41, %v16659_v57  ;;  %v6778_v49 = vpop.f32.mrb[107].mxu0  ;;  %v7272_v57 = vld [vmem:[%s22329_s7 + $0x20] sm:$0xff] }
0x1fb0   : > { %14059 = vst [vmem:[%s19922_s29 + $0x40] sm:$0xff] %v6814_v9  ;;  %v6815_v60 = vadd.f32 %v18734_v41, %v6778_v49  ;;  %v7274_v9 = vld [vmem:[%s22329_s7 + $0x30] sm:$0xff] }
0x1fb1   : > { %14062 = vst [vmem:[%s19922_s29 + $0x58] sm:$0xff] %v6817_v59 }
0x1fb2   : > { %14060 = vst [vmem:[%s19922_s29 + $0x48] sm:$0xff] %v6815_v60 }
0x1fb4   : > { %v16662_v46 = vpop.f32.mrb[108].mxu0 }
0x1fb5   : > { %v6820_v62 = vadd.f32 %v18734_v41, %v16662_v46  ;;  %v6791_v54 = vpop.f32.mrb[109].mxu0  ;;  %v7275_v46 = vld [vmem:[%s22329_s7 + $0x38] sm:$0xff] }
0x1fb6   : > { %v6818_v53 = vadd.f32 %v18734_v41, %v6791_v54  ;;  %v16663_v45 = vpop.f32.mrb[110].mxu0 }
0x1fb7   : > { %14065 = vst [vmem:[%s19922_s29 + $0x70] sm:$0xff] %v6820_v62  ;;  %v6821_v56 = vadd.f32 %v18734_v41, %v16663_v45  ;;  %v6794_v63 = vpop.f32.mrb[111].mxu0  ;;  %v7273_v62 = vld [vmem:[%s22329_s7 + $0x28] sm:$0xff] }
0x1fb8   : > { %14063 = vst [vmem:[%s19922_s29 + $0x60] sm:$0xff] %v6818_v53  ;;  %v6819_v10 = vadd.f32 %v18734_v41, %v6794_v63 }
0x1fb9   : > { %14066 = vst [vmem:[%s19922_s29 + $0x78] sm:$0xff] %v6821_v56 }
0x1fba   : > { %14064 = vst [vmem:[%s19922_s29 + $0x68] sm:$0xff] %v6819_v10 }
0x1fcc   : > { %v16706_v13 = vpop.f32.mrb[144].mxu0 }
0x1fcd   : > { %v7085_v11 = vpop.f32.mrb[145].mxu0  ;;  %v7094_v6 = vadd.f32 %v16706_v13, %v14084_v8 }
0x1fce   : > { %v16707_v1 = vpop.f32.mrb[146].mxu0  ;;  %v7086_v5 = vadd.f32 %v14084_v8, %v7085_v11 }
0x1fcf   : > { %v7097_v0 = vadd.f32 %v16707_v1, %v14084_v8  ;;  %v7088_v2 = vpop.f32.mrb[147].mxu0 }
0x1fd0   : > { %v7089_v22 = vadd.f32 %v14084_v8, %v7088_v2  ;;  %v18039_v2 = vld [vmem:[%s22325_s3 + $0x48] sm:$0xff]  }
0x1fd1   : > { %v7265_v26 = vpack.c.bf16 %v7097_v0, %v7094_v6  ;;  %v18038_v0 = vld [vmem:[%s22325_s3 + $0x40] sm:$0xff]  }
0x1fd2   : > { %v7264_v28 = vpack.c.bf16 %v7089_v22, %v7086_v5  ;;  %v18040_v5 = vld [vmem:[%s22325_s3 + $0x50] sm:$0xff]   ;;  %v18041_v22 = vld [vmem:[%s22325_s3 + $0x58] sm:$0xff]  }
0x1fd3   : > { %v7292_v35 = vsel %vm825_vm0, %v7265_v26, 0 }
0x1fd4   : > { %17720 = vmatprep.subr.msk.bf16.mxu0 %vm825_vm0, %v7264_v28  ;;  %v7289_v4 = vsel %vm825_vm0, %v7264_v28, 0  ;;  %v16710_v30 = vpop.f32.mrb[148].mxu0  ;;  %v14093_v28 = vld [vmem:[%s22328_s6] ss:$0 sm:$0xff] }
0x1fd5   : > { %16737 = vmatpush3.bf16.xpose.msra.mxu0 %v7289_v4  ;;  %v7110_v31 = vadd.f32 %v16710_v30, %v14084_v8  ;;  %v7101_v7 = vpop.f32.mrb[149].mxu0 }
0x1fd6   : > { %17721 = vmatprep.subr.msk.bf16.mxu0 %vm825_vm0, %v7265_v26  ;;  %v7102_v12 = vadd.f32 %v14084_v8, %v7101_v7  ;;  %v16711_v14 = vpop.f32.mrb[150].mxu0  ;;  %v18042_v26 = vld [vmem:[%s22325_s3 + $0x60] sm:$0xff]  }
0x1fd7   : > { %v7113_v17 = vadd.f32 %v16711_v14, %v14084_v8  ;;  %v7104_v18 = vpop.f32.mrb[151].mxu0 }
0x1fd8   : > { %v7105_v19 = vadd.f32 %v14084_v8, %v7104_v18 }
0x1fd9   : > { %v7267_v33 = vpack.c.bf16 %v7113_v17, %v7110_v31 }
0x1fda   : > { %v7266_v29 = vpack.c.bf16 %v7105_v19, %v7102_v12 }
0x1fdb   : > { %v7298_v25 = vsel %vm825_vm0, %v7267_v33, 0 }
0x1fdc   : > { %v7295_v32 = vsel %vm825_vm0, %v7266_v29, 0 }
0x1fdd   : > { %16739 = vmatpush3.bf16.xpose.msra.mxu0 %v7292_v35 }
0x1fde   : > { %17722 = vmatprep.subr.msk.bf16.mxu0 %vm825_vm0, %v7266_v29 }
0x1fe5   : > { %16741 = vmatpush3.bf16.xpose.msra.mxu0 %v7295_v32 }
0x1fe6   : > { %17723 = vmatprep.subr.msk.bf16.mxu0 %vm825_vm0, %v7267_v33 }
0x1fed   : > { %16743 = vmatpush3.bf16.xpose.msra.mxu0 %v7298_v25 }
0x1fee   : > { %16792 = vmatprep.subr.bf16.mxu0 %v18038_v0 }
0x1ff4   : > { %16745 = vmatmul.mubr.msk.bf16.vlgmr.msra.gmra.mrb[152].mxu0 %vm825_vm0, %v7261_v15  ;;  %v18034_v15 = vld [vmem:[%s22327_s5 + $0x20] sm:$0xff]  }
0x1ff5   : > { %16748 = vmatprep.mubr.msk.bf16.mxu0 %vm825_vm0, %v7262_v24  ;;  %16720 = vmatprep.subr.bf16.mxu1 %v18034_v15 }
0x1ff6   : > { %16721 = vmatpush3.bf16.msra.mxu1 %v18034_v15  ;;  %16793 = vmatpush3.bf16.msra.mxu0 %v18038_v0 }
0x1ff7   : > { %16722 = vmatprep.subr.bf16.mxu1 %v18035_v16  ;;  %16794 = vmatprep.subr.bf16.mxu0 %v18039_v2 }
0x1ffa   : > { %16723 = vmatpush3.bf16.msra.mxu1 %v18035_v16  ;;  %16795 = vmatpush3.bf16.msra.mxu0 %v18039_v2 }
0x1ffb   : > { %16724 = vmatprep.subr.bf16.mxu1 %v18036_v42  ;;  %16796 = vmatprep.subr.bf16.mxu0 %v18040_v5 }
0x1ffc   : > { %16749 = vmatmul.mubr.msk.bf16.gmra.mrb[156].mxu0 %vm825_vm0, %v7263_v43 }
0x1ffd   : > { %16808 = vmatprep.mubr.bf16.mxu0 %v20678_v27 }
0x1ffe   : > { %16725 = vmatpush3.bf16.msra.mxu1 %v18036_v42  ;;  %16797 = vmatpush3.bf16.msra.mxu0 %v18040_v5 }
0x1fff   : > { %16726 = vmatprep.subr.bf16.mxu1 %v18037_v39  ;;  %16798 = vmatprep.subr.bf16.mxu0 %v18041_v22 }
0x2002   : > { %16727 = vmatpush3.bf16.msra.mxu1 %v18037_v39  ;;  %16799 = vmatpush3.bf16.msra.mxu0 %v18041_v22 }
0x2003   : > { %16800 = vmatprep.subr.bf16.mxu0 %v18042_v26 }
0x2005   : > { %16729 = vmatmul.mubr.bf16.vlgmr.msra.gmra.mrb[200].mxu1 %v20703_v48 }
0x2006   : > { %16732 = vmatprep.mubr.bf16.mxu1 %v20705_v61  ;;  %16801 = vmatpush3.bf16.msra.mxu0 %v18042_v26 }
0x200d   : > { %16733 = vmatmul.mubr.bf16.gmra.mrb[204].mxu1 %v20711_v58 }
0x20c7   : > { %v16746_v37 = vpop.f32.mrb[152].mxu0 }
0x20c8   : > { %v7334_v50 = vpop.f32.mrb[153].mxu0  ;;  %v20833_v24 = vadd.f32 %v16746_v37, %v7270_v20 }
0x20c9   : > { %v20828_v44 = vadd.f32 %v7334_v50, %v7268_v47  ;;  %v16747_v3 = vpop.f32.mrb[154].mxu0 }
0x20ca   : > { %v7337_v43 = vpop.f32.mrb[155].mxu0  ;;  %v20839_v52 = vadd.f32 %v16747_v3, %v7271_v23  ;;  %v7371_v49 = vsel %vm915_vm1, %v20833_v24, -inf }
0x20cb   : > { %v20835_v38 = vadd.f32 %v7337_v43, %v7269_v51  ;;  %v7365_v41 = vsel %vm915_vm1, %v20828_v44, -inf }
0x20cc   : > { %7366 = vmax.xlane.f32.xlu0 %v7365_v41  ;;  %v7374_v56 = vsel %vm915_vm1, %v20839_v52, -inf }
0x20cd   : > { %v7368_v55 = vsel %vm915_vm1, %v20835_v38, -inf }
0x20ce   : > { %7369 = vmax.xlane.f32.xlu1 %v7368_v55 }
0x20cf   : > { %v16750_v59 = vpop.f32.mrb[156].mxu0 }
0x20d0   : > { %v7350_v60 = vpop.f32.mrb[157].mxu0  ;;  %7372 = vmax.xlane.f32.xlu0 %v7371_v49  ;;  %v20857_v54 = vadd.f32 %v16750_v59, %v7274_v9 }
0x20d1   : > { %v20859_v53 = vadd.f32 %v7350_v60, %v7272_v57  ;;  %v16751_v45 = vpop.f32.mrb[158].mxu0 }
0x20d2   : > { %v7353_v63 = vpop.f32.mrb[159].mxu0  ;;  %7375 = vmax.xlane.f32.xlu1 %v7374_v56  ;;  %v20863_v10 = vadd.f32 %v16751_v45, %v7275_v46  ;;  %v7383_v1 = vsel %vm915_vm1, %v20857_v54, -inf }
0x20d3   : > { %v20865_v13 = vadd.f32 %v7353_v63, %v7273_v62  ;;  %v7377_v8 = vsel %vm915_vm1, %v20859_v53, -inf }
0x20d4   : > { %7378 = vmax.xlane.f32.xlu0 %v7377_v8  ;;  %v7386_v6 = vsel %vm915_vm1, %v20863_v10, -inf }
0x20d5   : > { %v7380_v11 = vsel %vm915_vm1, %v20865_v13, -inf }
0x20d6   : > { %7381 = vmax.xlane.f32.xlu1 %v7380_v11 }
0x20d8   : > { %7384 = vmax.xlane.f32.xlu0 %v7383_v1  ;;  %v16730_v4 = vpop.f32.mrb[200].mxu1 }
0x20d9   : > { %v7230_v30 = vadd.f32 %v16730_v4, %v14093_v28  ;;  %v7221_v31 = vpop.f32.mrb[201].mxu1 }
0x20da   : > { %7387 = vmax.xlane.f32.xlu1 %v7386_v6  ;;  %v7222_v7 = vadd.f32 %v14093_v28, %v7221_v31  ;;  %v16731_v12 = vpop.f32.mrb[202].mxu1  ;;  %v18045_v31 = vld [vmem:[%s22325_s3 + $0x78] sm:$0xff]  }
0x20db   : > { %v7233_v14 = vadd.f32 %v16731_v12, %v14093_v28  ;;  %v7224_v17 = vpop.f32.mrb[203].mxu1 }
0x20dc   : > { %v7225_v18 = vadd.f32 %v14093_v28, %v7224_v17 }
0x20dd   : > { %v7458_v19 = vpack.c.bf16 %v7233_v14, %v7230_v30  ;;  %v18044_v30 = vld [vmem:[%s22325_s3 + $0x70] sm:$0xff]  }
0x20de   : > { %v7457_v33 = vpack.c.bf16 %v7225_v18, %v7222_v7  ;;  %v18046_v7 = vld [vmem:[%s22323_s1 + $0x40] sm:$0xff]  }
0x20e0   : > { %v16734_v29 = vpop.f32.mrb[204].mxu1  ;;  %16752 = vmatprep.subr.bf16.mxu1 %v7457_v33 }
0x20e1   : > { %v7246_v35 = vadd.f32 %v16734_v29, %v14093_v28  ;;  %v7237_v32 = vpop.f32.mrb[205].mxu1  ;;  %16753 = vmatpush3.bf16.msra.mxu1 %v7457_v33 }
0x20e2   : > { %v7238_v34 = vadd.f32 %v14093_v28, %v7237_v32  ;;  %v16735_v40 = vpop.f32.mrb[206].mxu1  ;;  %16754 = vmatprep.subr.bf16.mxu1 %v7458_v19 }
0x20e3   : > { %v7249_v36 = vadd.f32 %v16735_v40, %v14093_v28  ;;  %v7240_v15 = vpop.f32.mrb[207].mxu1 }
0x20e4   : > { %v7241_v42 = vadd.f32 %v14093_v28, %v7240_v15  ;;  %v18043_v28 = vld [vmem:[%s22325_s3 + $0x68] sm:$0xff]  }
0x20e5   : > { %v7460_v37 = vpack.c.bf16 %v7249_v36, %v7246_v35  ;;  %16755 = vmatpush3.bf16.msra.mxu1 %v7458_v19  ;;  %16802 = vmatprep.subr.bf16.mxu0 %v18043_v28 }
0x20e6   : > { %v7459_v50 = vpack.c.bf16 %v7241_v42, %v7238_v34  ;;  %16803 = vmatpush3.bf16.msra.mxu0 %v18043_v28 }
0x20e7   : > { %16804 = vmatprep.subr.bf16.mxu0 %v18044_v30 }
0x20e8   : > { %16756 = vmatprep.subr.bf16.mxu1 %v7459_v50 }
0x20e9   : > { %16757 = vmatpush3.bf16.msra.mxu1 %v7459_v50 }
0x20ea   : > { %16758 = vmatprep.subr.bf16.mxu1 %v7460_v37  ;;  %16805 = vmatpush3.bf16.msra.mxu0 %v18044_v30 }
0x20eb   : > { %16806 = vmatprep.subr.bf16.mxu0 %v18045_v31 }
0x20ed   : > { %16759 = vmatpush3.bf16.msra.mxu1 %v7460_v37  ;;  %v18047_v37 = vld [vmem:[%s22323_s1 + $0x48] sm:$0xff]  }
0x20ee   : > { %16807 = vmatpush3.bf16.msra.mxu0 %v18045_v31  ;;  %16768 = vmatprep.subr.bf16.mxu1 %v18046_v7 }
0x20f1   : > { %16809 = vmatmul.mubr.bf16.vlgmr.msra.gmra.mrb[160].mxu0 %v20703_v48 }
0x20f2   : > { %16812 = vmatprep.mubr.bf16.mxu0 %v20705_v61 }
0x20f9   : > { %16813 = vmatmul.mubr.bf16.gmra.mrb[164].mxu0 %v20711_v58 }
0x2159   : > { %v7367_v25 = vpop.xlane.xlu0 %7366 }
0x215a   : > { %v7389_v21 = vsub.f32 %v20828_v44, %v7367_v25 }
0x215b   : > { %v7370_v16 = vpop.xlane.xlu1 %7369 }
0x215c   : > { %v7397_v39 = vmul.f32 1.442695, %v7389_v21  ;;  %v7390_v47 = vsub.f32 %v20835_v38, %v7370_v16 }
0x215d   : > { %v7373_v20 = vpop.xlane.xlu0 %7372 }
0x215e   : > { %18478 = vpow2.f32 %v7397_v39  ;;  %v7399_v51 = vmul.f32 1.442695, %v7390_v47  ;;  %v7391_v3 = vsub.f32 %v20833_v24, %v7373_v20 }
0x215f   : > { %v7376_v23 = vpop.xlane.xlu1 %7375 }
0x2160   : > { %18480 = vpow2.f32 %v7399_v51  ;;  %v7401_v43 = vmul.f32 1.442695, %v7391_v3  ;;  %v7392_v44 = vsub.f32 %v20839_v52, %v7376_v23 }
0x2161   : > { %v7379_v41 = vpop.xlane.xlu0 %7378 }
0x2162   : > { %18482 = vpow2.f32 %v7401_v43  ;;  %v7403_v55 = vmul.f32 1.442695, %v7392_v44  ;;  %v7393_v38 = vsub.f32 %v20859_v53, %v7379_v41  ;;  %v18048_v43 = vld [vmem:[%s22323_s1 + $0x50] sm:$0xff]  }
0x2163   : > { %v7382_v9 = vpop.xlane.xlu1 %7381 }
0x2164   : > { %18484 = vpow2.f32 %v7403_v55  ;;  %v7405_v57 = vmul.f32 1.442695, %v7393_v38  ;;  %v7394_v59 = vsub.f32 %v20865_v13, %v7382_v9  ;;  %v18049_v9 = vld [vmem:[%s22323_s1 + $0x58] sm:$0xff]  }
0x2165   : > { %v7385_v24 = vpop.xlane.xlu0 %7384 }
0x2166   : > { %18486 = vpow2.f32 %v7405_v57  ;;  %v7407_v49 = vmul.f32 1.442695, %v7394_v59  ;;  %v7395_v60 = vsub.f32 %v20857_v54, %v7385_v24  ;;  %v18050_v57 = vld [vmem:[%s22323_s1 + $0x60] sm:$0xff]   ;;  %v18051_v59 = vld [vmem:[%s22323_s1 + $0x68] sm:$0xff]   ;;  %v18052_v24 = vld [vmem:[%s22323_s1 + $0x70] sm:$0xff]  }
0x2167   : > { %v7388_v46 = vpop.xlane.xlu1 %7387 }
0x2168   : > { %v18479_v52 = vpop.eup %18478  ;;  %18488 = vpow2.f32 %v7407_v49  ;;  %v7409_v62 = vmul.f32 1.442695, %v7395_v60  ;;  %v7396_v45 = vsub.f32 %v20863_v10, %v7388_v46  ;;  %v18053_v49 = vld [vmem:[%s22323_s1 + $0x78] sm:$0xff]   ;;  %v14152_v60 = vld [vmem:[%s22326_s4 + $0x1] ss:$0 sm:$0xff] }
0x2169   : > { %v7413_v56 = vsel %vm915_vm1, %v18479_v52, 0.0 }
0x216a   : > { %v18481_v53 = vpop.eup %18480  ;;  %18490 = vpow2.f32 %v7409_v62  ;;  %v7411_v63 = vmul.f32 1.442695, %v7396_v45  ;;  %7414 = vadd.xlane.f32.xlu0 %v7413_v56 }
0x216b   : > { %v7416_v13 = vsel %vm915_vm1, %v18481_v53, 0.0 }
0x216c   : > { %v18483_v8 = vpop.eup %18482  ;;  %18492 = vpow2.f32 %v7411_v63  ;;  %7417 = vadd.xlane.f32.xlu1 %v7416_v13 }
0x216d   : > { %v7419_v11 = vsel %vm915_vm1, %v18483_v8, 0.0 }
0x216e   : > { %v18485_v54 = vpop.eup %18484  ;;  %7420 = vadd.xlane.f32.xlu0 %v7419_v11 }
0x216f   : > { %v7422_v1 = vsel %vm915_vm1, %v18485_v54, 0.0 }
0x2170   : > { %v18487_v6 = vpop.eup %18486  ;;  %7423 = vadd.xlane.f32.xlu1 %v7422_v1 }
0x2171   : > { %v7425_v10 = vsel %vm915_vm1, %v18487_v6, 0.0 }
0x2172   : > { %v18489_v0 = vpop.eup %18488  ;;  %7426 = vadd.xlane.f32.xlu0 %v7425_v10 }
0x2173   : > { %v7428_v2 = vsel %vm915_vm1, %v18489_v0, 0.0 }
0x2174   : > { %v18491_v5 = vpop.eup %18490  ;;  %7429 = vadd.xlane.f32.xlu1 %v7428_v2 }
0x2175   : > { %v7431_v22 = vsel %vm915_vm1, %v18491_v5, 0.0 }
0x2176   : > { %v18493_v26 = vpop.eup %18492  ;;  %7432 = vadd.xlane.f32.xlu0 %v7431_v22 }
0x2177   : > { %v7434_v4 = vsel %vm915_vm1, %v18493_v26, 0.0 }
0x2178   : > { %7435 = vadd.xlane.f32.xlu1 %v7434_v4 }
0x21c4   : > { %v16810_v46 = vpop.f32.mrb[160].mxu0 }
0x21c5   : > { %v7787_v62 = vpop.f32.mrb[161].mxu0 }
0x21c6   : > { %v7788_v45 = vadd.f32 %v14152_v60, %v7787_v62  ;;  %v16811_v56 = vpop.f32.mrb[162].mxu0 }
0x21c7   : > { %v7790_v63 = vpop.f32.mrb[163].mxu0 }
0x21c8   : > { %v7791_v13 = vadd.f32 %v14152_v60, %v7790_v63  ;;  %v18055_v63 = vld [vmem:[%s22327_s5 + $0x48] sm:$0xff]  }
0x21ca   : > { %v7966_v11 = vpack.c.bf16 %v7791_v13, %v7788_v45  ;;  %v18056_v13 = vld [vmem:[%s22327_s5 + $0x50] sm:$0xff]  }
0x21cc   : > { %17724 = vmatprep.subr.msk.bf16.mxu0 %vm825_vm0, %v7966_v11  ;;  %v16814_v1 = vpop.f32.mrb[164].mxu0 }
0x21cd   : > { %v7803_v10 = vpop.f32.mrb[165].mxu0 }
0x21ce   : > { %v16815_v2 = vpop.f32.mrb[166].mxu0 }
0x21cf   : > { %v7815_v22 = vadd.f32 %v16815_v2, %v14152_v60  ;;  %v14189_v2 = vld [vmem:[%s22329_s7 + $0x50] sm:$0xff] }
0x21f7   : > { %v7415_v12 = vpop.xlane.xlu0 %7414 }
0x21f8   : > { %18494 = vrcp.f32 %v7415_v12 }
0x21f9   : > { %v7418_v14 = vpop.xlane.xlu1 %7417 }
0x21fa   : > { %18496 = vrcp.f32 %v7418_v14 }
0x21fb   : > { %v7421_v17 = vpop.xlane.xlu0 %7420 }
0x21fc   : > { %18498 = vrcp.f32 %v7421_v17 }
0x21fd   : > { %v7424_v18 = vpop.xlane.xlu1 %7423 }
0x21fe   : > { %18500 = vrcp.f32 %v7424_v18 }
0x21ff   : > { %v7427_v19 = vpop.xlane.xlu0 %7426 }
0x2200   : > { %18502 = vrcp.f32 %v7427_v19 }
0x2201   : > { %v7430_v33 = vpop.xlane.xlu1 %7429 }
0x2202   : > { %v18495_v29 = vpop.eup %18494  ;;  %18504 = vrcp.f32 %v7430_v33 }
0x2203   : > { %v7433_v35 = vpop.xlane.xlu0 %7432  ;;  %v7438_v34 = vmul.f32 %v18495_v29, %v18479_v52  ;;  %v7796_v52 = vadd.f32 %v16810_v46, %v14152_v60 }
0x2204   : > { %v18497_v32 = vpop.eup %18496  ;;  %18506 = vrcp.f32 %v7433_v35 }
0x2205   : > { %v7436_v25 = vpop.xlane.xlu1 %7435  ;;  %v7440_v40 = vmul.f32 %v18497_v32, %v18481_v53  ;;  %v7799_v53 = vadd.f32 %v16811_v56, %v14152_v60 }
0x2206   : > { %v18499_v21 = vpop.eup %18498  ;;  %18508 = vrcp.f32 %v7436_v25 }
0x2207   : > { %v7453_v36 = vpack.c.bf16 %v7440_v40, %v7438_v34  ;;  %v7442_v16 = vmul.f32 %v18499_v21, %v18483_v8  ;;  %v7967_v8 = vpack.c.bf16 %v7799_v53, %v7796_v52  ;;  %v14126_v21 = vld [vmem:[#allocation2 + $0x1] ss:$0 sm:$0xff] }
0x2208   : > { %v18501_v15 = vpop.eup %18500  ;;  %v18054_v53 = vld [vmem:[%s22327_s5 + $0x40] sm:$0xff]  }
0x2209   : > { %v7444_v42 = vmul.f32 %v18501_v15, %v18485_v54  ;;  %16760 = vmatprep.mubr.msk.bf16.mxu1 %vm915_vm1, %v7453_v36  ;;  %v7991_v54 = vsel %vm825_vm0, %v7966_v11, 0  ;;  %v18058_v11 = vld [vmem:[%s22327_s5 + $0x60] sm:$0xff]  }
0x220a   : > { %v18503_v39 = vpop.eup %18502  ;;  %16841 = vmatpush3.bf16.xpose.msra.mxu0 %v7991_v54  ;;  %v18059_v54 = vld [vmem:[%s22327_s5 + $0x68] sm:$0xff]  }
0x220b   : > { %v7454_v47 = vpack.c.bf16 %v7444_v42, %v7442_v16  ;;  %v7446_v50 = vmul.f32 %v18503_v39, %v18487_v6  ;;  %17725 = vmatprep.subr.msk.bf16.mxu0 %vm825_vm0, %v7967_v8  ;;  %v7812_v6 = vadd.f32 %v16814_v1, %v14152_v60  ;;  %v18060_v1 = vld [vmem:[%s22327_s5 + $0x70] sm:$0xff]  }
0x220c   : > { %v18505_v20 = vpop.eup %18504 }
0x220d   : > { %16761 = vmatmul.mubr.msk.bf16.vlgmr.msra.gmra.mrb[208].mxu1 %vm915_vm1, %v7454_v47  ;;  %v7448_v51 = vmul.f32 %v18505_v20, %v18489_v0  ;;  %v7994_v0 = vsel %vm825_vm0, %v7967_v8, 0  ;;  %v7969_v28 = vpack.c.bf16 %v7815_v22, %v7812_v6  ;;  %v18057_v8 = vld [vmem:[%s22327_s5 + $0x58] sm:$0xff]   ;;  %v14188_v22 = vld [vmem:[%s22329_s7 + $0x48] sm:$0xff] }
0x220e   : > { %v18507_v3 = vpop.eup %18506  ;;  %16769 = vmatpush3.bf16.msra.mxu1 %v18046_v7  ;;  %v18061_v6 = vld [vmem:[%s22327_s5 + $0x78] sm:$0xff]  }
0x220f   : > { %16770 = vmatprep.subr.bf16.mxu1 %v18047_v37  ;;  %v7455_v23 = vpack.c.bf16 %v7448_v51, %v7446_v50  ;;  %v7450_v41 = vmul.f32 %v18507_v3, %v18491_v5  ;;  %v7804_v5 = vadd.f32 %v14152_v60, %v7803_v10  ;;  %v8000_v7 = vsel %vm825_vm0, %v7969_v28, 0  ;;  %v14187_v10 = vld [vmem:[%s22329_s7 + $0x40] sm:$0xff] }
0x2210   : > { %v18509_v44 = vpop.eup %18508 }
0x2211   : > { %16764 = vmatprep.mubr.msk.bf16.mxu1 %vm915_vm1, %v7455_v23  ;;  %v7452_v55 = vmul.f32 %v18509_v44, %v18493_v26  ;;  %v7806_v26 = vpop.f32.mrb[167].mxu0 }
0x2212   : > { %16771 = vmatpush3.bf16.msra.mxu1 %v18047_v37  ;;  %16843 = vmatpush3.bf16.xpose.msra.mxu0 %v7994_v0  ;;  %v7807_v4 = vadd.f32 %v14152_v60, %v7806_v26 }
0x2213   : > { %16772 = vmatprep.subr.bf16.mxu1 %v18048_v43  ;;  %v7456_v38 = vpack.c.bf16 %v7452_v55, %v7450_v41 }
0x2214   : > { %v7968_v30 = vpack.c.bf16 %v7807_v4, %v7804_v5  ;;  %v14190_v4 = vld [vmem:[%s22329_s7 + $0x58] sm:$0xff] }
0x2215   : > { %16765 = vmatmul.mubr.msk.bf16.gmra.mrb[212].mxu1 %vm915_vm1, %v7456_v38 }
0x2216   : > { %16773 = vmatpush3.bf16.msra.mxu1 %v18048_v43  ;;  %16784 = vmatprep.mubr.bf16.mxu1 %v20678_v27  ;;  %v7997_v31 = vsel %vm825_vm0, %v7968_v30, 0 }
0x2217   : > { %16774 = vmatprep.subr.bf16.mxu1 %v18049_v9  ;;  %17726 = vmatprep.subr.msk.bf16.mxu0 %vm825_vm0, %v7968_v30 }
0x221a   : > { %16775 = vmatpush3.bf16.msra.mxu1 %v18049_v9  ;;  %16845 = vmatpush3.bf16.xpose.msra.mxu0 %v7997_v31 }
0x221b   : > { %16776 = vmatprep.subr.bf16.mxu1 %v18050_v57  ;;  %17727 = vmatprep.subr.msk.bf16.mxu0 %vm825_vm0, %v7969_v28 }
0x221e   : > { %16777 = vmatpush3.bf16.msra.mxu1 %v18050_v57 }
0x221f   : > { %16778 = vmatprep.subr.bf16.mxu1 %v18051_v59 }
0x2222   : > { %16779 = vmatpush3.bf16.msra.mxu1 %v18051_v59  ;;  %16847 = vmatpush3.bf16.xpose.msra.mxu0 %v8000_v7 }
0x2223   : > { %16780 = vmatprep.subr.bf16.mxu1 %v18052_v24 }
0x2226   : > { %16781 = vmatpush3.bf16.msra.mxu1 %v18052_v24 }
0x2227   : > { %16782 = vmatprep.subr.bf16.mxu1 %v18053_v49 }
0x222a   : > { %16783 = vmatpush3.bf16.msra.mxu1 %v18053_v49 }
0x222b   : > { %16816 = vmatprep.subr.bf16.mxu1 %v18054_v53 }
0x222d   : > { %16785 = vmatmul.mubr.bf16.vlgmr.msra.gmra.mrb[216].mxu1 %v20703_v48 }
0x222e   : > { %16788 = vmatprep.mubr.bf16.mxu1 %v20705_v61  ;;  %16817 = vmatpush3.bf16.msra.mxu1 %v18054_v53 }
0x222f   : > { %16818 = vmatprep.subr.bf16.mxu1 %v18055_v63 }
0x2232   : > { %16819 = vmatpush3.bf16.msra.mxu1 %v18055_v63 }
0x2233   : > { %16820 = vmatprep.subr.bf16.mxu1 %v18056_v13 }
0x2235   : > { %16789 = vmatmul.mubr.bf16.gmra.mrb[220].mxu1 %v20711_v58 }
0x2236   : > { %16832 = vmatprep.mubr.bf16.mxu1 %v20678_v27  ;;  %16821 = vmatpush3.bf16.msra.mxu1 %v18056_v13 }
0x2237   : > { %16822 = vmatprep.subr.bf16.mxu1 %v18057_v8 }
0x223a   : > { %16823 = vmatpush3.bf16.msra.mxu1 %v18057_v8 }
0x223b   : > { %16824 = vmatprep.subr.bf16.mxu1 %v18058_v11 }
0x223e   : > { %16825 = vmatpush3.bf16.msra.mxu1 %v18058_v11 }
0x223f   : > { %16826 = vmatprep.subr.bf16.mxu1 %v18059_v54 }
0x2242   : > { %16827 = vmatpush3.bf16.msra.mxu1 %v18059_v54 }
0x2243   : > { %16828 = vmatprep.subr.bf16.mxu1 %v18060_v1 }
0x2246   : > { %16829 = vmatpush3.bf16.msra.mxu1 %v18060_v1 }
0x2247   : > { %16830 = vmatprep.subr.bf16.mxu1 %v18061_v6 }
0x224a   : > { %16831 = vmatpush3.bf16.msra.mxu1 %v18061_v6 }
0x224d   : > { %16833 = vmatmul.mubr.bf16.vlgmr.msra.gmra.mrb[224].mxu1 %v20703_v48 }
0x224e   : > { %16836 = vmatprep.mubr.bf16.mxu1 %v20705_v61 }
0x2255   : > { %16837 = vmatmul.mubr.bf16.gmra.mrb[228].mxu1 %v20711_v58 }
0x22e0   : > { %v20965_v12 = vpop.f32.mrb[208].mxu1 }
0x22e1   : > { %v20967_v14 = vpop.f32.mrb[209].mxu1 }
0x22e2   : > { %v20969_v17 = vpop.f32.mrb[210].mxu1 }
0x22e3   : > { %v7539_v18 = vpack.c.bf16 %v20969_v17, %v20965_v12  ;;  %v20973_v19 = vpop.f32.mrb[211].mxu1  ;;  %v18070_v12 = vld [vmem:[%s22325_s3 + $0xa0] sm:$0xff]   ;;  %v18071_v17 = vld [vmem:[%s22325_s3 + $0xa8] sm:$0xff]  }
0x22e4   : > { %v7538_v33 = vpack.c.bf16 %v20973_v19, %v20967_v14  ;;  %v18068_v14 = vld [vmem:[%s22325_s3 + $0x90] sm:$0xff]   ;;  %v18069_v19 = vld [vmem:[%s22325_s3 + $0x98] sm:$0xff]  }
0x22e8   : > { %v20977_v29 = vpop.f32.mrb[212].mxu1 }
0x22e9   : > { %v20979_v35 = vpop.f32.mrb[213].mxu1 }
0x22ea   : > { %v20981_v32 = vpop.f32.mrb[214].mxu1 }
0x22eb   : > { %v7541_v25 = vpack.c.bf16 %v20981_v32, %v20977_v29  ;;  %v20985_v34 = vpop.f32.mrb[215].mxu1  ;;  %v14235_v29 = vld [vmem:[#allocation2 + $0x2] ss:$0 sm:$0xff] }
0x22ec   : > { %v7540_v40 = vpack.c.bf16 %v20985_v34, %v20979_v35 }
0x2300   : > { %v16786_v36 = vpop.f32.mrb[216].mxu1 }
0x2301   : > { %v7660_v15 = vadd.f32 %v16786_v36, %v14126_v21  ;;  %v7651_v16 = vpop.f32.mrb[217].mxu1 }
0x2302   : > { %v7652_v42 = vadd.f32 %v14126_v21, %v7651_v16  ;;  %v16787_v39 = vpop.f32.mrb[218].mxu1  ;;  %v14191_v16 = vld [vmem:[%s22329_s7 + $0x60] sm:$0xff] }
0x2303   : > { %v7663_v47 = vadd.f32 %v16787_v39, %v14126_v21  ;;  %v7654_v37 = vpop.f32.mrb[219].mxu1  ;;  %v7956_v50 = vmul.f32 0.17677669, %v7660_v15 }
0x2304   : > { %v7655_v20 = vadd.f32 %v14126_v21, %v7654_v37  ;;  %v7954_v3 = vmul.f32 0.17677669, %v7652_v42 }
0x2305   : > { %v7957_v51 = vmul.f32 0.17677669, %v7663_v47  ;;  %v14193_v47 = vld [vmem:[%s22329_s7 + $0x70] sm:$0xff] }
0x2306   : > { %v7955_v23 = vmul.f32 0.17677669, %v7655_v20  ;;  %v14192_v20 = vld [vmem:[%s22329_s7 + $0x68] sm:$0xff] }
0x2307   : > { %v7963_v43 = vpack.c.bf16 %v7957_v51, %v7956_v50 }
0x2308   : > { %v7962_v44 = vpack.c.bf16 %v7955_v23, %v7954_v3  ;;  %v16790_v41 = vpop.f32.mrb[220].mxu1  ;;  %v14194_v23 = vld [vmem:[%s22329_s7 + $0x78] sm:$0xff] }
0x2309   : > { %v7676_v55 = vadd.f32 %v16790_v41, %v14126_v21  ;;  %v7667_v38 = vpop.f32.mrb[221].mxu1 }
0x230a   : > { %v7668_v9 = vadd.f32 %v14126_v21, %v7667_v38  ;;  %v16791_v57 = vpop.f32.mrb[222].mxu1  ;;  %16848 = vmatprep.mubr.msk.bf16.mxu0 %vm825_vm0, %v7962_v44 }
0x230b   : > { %v7679_v59 = vadd.f32 %v16791_v57, %v14126_v21  ;;  %v7670_v24 = vpop.f32.mrb[223].mxu1  ;;  %16849 = vmatmul.mubr.msk.bf16.vlgmr.msra.gmra.mrb[168].mxu0 %vm825_vm0, %v7963_v43  ;;  %v7960_v60 = vmul.f32 0.17677669, %v7676_v55 }
0x230c   : > { %v7671_v49 = vadd.f32 %v14126_v21, %v7670_v24  ;;  %v7958_v52 = vmul.f32 0.17677669, %v7668_v9  ;;  %v14178_v24 = vld [vmem:[%s22328_s6 + $0x1] ss:$0 sm:$0xff] }
0x230d   : > { %v7961_v46 = vmul.f32 0.17677669, %v7679_v59 }
0x230e   : > { %v7959_v62 = vmul.f32 0.17677669, %v7671_v49 }
0x230f   : > { %v7965_v45 = vpack.c.bf16 %v7961_v46, %v7960_v60 }
0x2310   : > { %v7964_v56 = vpack.c.bf16 %v7959_v62, %v7958_v52 }
0x2312   : > { %16852 = vmatprep.mubr.msk.bf16.mxu0 %vm825_vm0, %v7964_v56 }
0x2313   : > { %16853 = vmatmul.mubr.msk.bf16.gmra.mrb[172].mxu0 %vm825_vm0, %v7965_v45 }
0x2320   : > { %v16834_v49 = vpop.f32.mrb[224].mxu1 }
0x2321   : > { %v7932_v60 = vadd.f32 %v16834_v49, %v14178_v24  ;;  %v7923_v46 = vpop.f32.mrb[225].mxu1 }
0x2322   : > { %v7924_v52 = vadd.f32 %v14178_v24, %v7923_v46  ;;  %v16835_v62 = vpop.f32.mrb[226].mxu1 }
0x2323   : > { %v7935_v45 = vadd.f32 %v16835_v62, %v14178_v24  ;;  %v7926_v56 = vpop.f32.mrb[227].mxu1 }
0x2324   : > { %v7927_v53 = vadd.f32 %v14178_v24, %v7926_v56 }
0x2325   : > { %v8160_v63 = vpack.c.bf16 %v7935_v45, %v7932_v60 }
0x2326   : > { %v8159_v13 = vpack.c.bf16 %v7927_v53, %v7924_v52 }
0x2328   : > { %v16838_v8 = vpop.f32.mrb[228].mxu1  ;;  %16856 = vmatprep.subr.bf16.mxu1 %v8159_v13 }
0x2329   : > { %v7948_v11 = vadd.f32 %v16838_v8, %v14178_v24  ;;  %v7939_v54 = vpop.f32.mrb[229].mxu1  ;;  %16857 = vmatpush3.bf16.msra.mxu1 %v8159_v13 }
0x232a   : > { %v7940_v6 = vadd.f32 %v14178_v24, %v7939_v54  ;;  %16858 = vmatprep.subr.bf16.mxu1 %v8160_v63  ;;  %v18062_v54 = vld [vmem:[%s22330_s8 + $0x10] sm:$0xff]  }
0x232b   : > { %16872 = vmatprep.subr.bf16.mxu0 %v18062_v54 }
0x232c   : > { %16873 = vmatpush3.bf16.msra.mxu0 %v18062_v54  ;;  %v18066_v54 = vld [vmem:[%s22325_s3 + $0x80] sm:$0xff]  }
0x232d   : > { %16859 = vmatpush3.bf16.msra.mxu1 %v8160_v63 }
0x23de   : > { %v16850_v0 = vpop.f32.mrb[168].mxu0 }
0x23df   : > { %v8036_v5 = vpop.f32.mrb[169].mxu0  ;;  %v21032_v31 = vadd.f32 %v16850_v0, %v14189_v2 }
0x23e0   : > { %v8037_v26 = vadd.f32 %v14187_v10, %v8036_v5  ;;  %v16851_v28 = vpop.f32.mrb[170].mxu0  ;;  %v16839_v10 = vpop.f32.mrb[230].mxu1 }
0x23e1   : > { %v8039_v30 = vpop.f32.mrb[171].mxu0  ;;  %v21035_v36 = vadd.f32 %v16851_v28, %v14190_v4  ;;  %v8073_v39 = vsel %vm915_vm1, %v21032_v31, -inf  ;;  %v7951_v2 = vadd.f32 %v16839_v10, %v14178_v24  ;;  %v7942_v5 = vpop.f32.mrb[231].mxu1 }
0x23e2   : > { %v8040_v7 = vadd.f32 %v14188_v22, %v8039_v30  ;;  %v8067_v21 = vsel %vm915_vm1, %v8037_v26, -inf  ;;  %v7943_v28 = vadd.f32 %v14178_v24, %v7942_v5 }
0x23e3   : > { %8068 = vmax.xlane.f32.xlu0 %v8067_v21  ;;  %v8076_v3 = vsel %vm915_vm1, %v21035_v36, -inf  ;;  %v8162_v21 = vpack.c.bf16 %v7951_v2, %v7948_v11 }
0x23e4   : > { %v8070_v15 = vsel %vm915_vm1, %v8040_v7, -inf }
0x23e5   : > { %8071 = vmax.xlane.f32.xlu1 %v8070_v15 }
0x23e6   : > { %v16854_v42 = vpop.f32.mrb[172].mxu0 }
0x23e7   : > { %v8052_v37 = vpop.f32.mrb[173].mxu0  ;;  %8074 = vmax.xlane.f32.xlu0 %v8073_v39  ;;  %v21056_v44 = vadd.f32 %v16854_v42, %v14193_v47 }
0x23e8   : > { %v21049_v50 = vadd.f32 %v14191_v16, %v8052_v37  ;;  %v16855_v51 = vpop.f32.mrb[174].mxu0  ;;  %v8161_v16 = vpack.c.bf16 %v7943_v28, %v7940_v6 }
0x23e9   : > { %v8055_v43 = vpop.f32.mrb[175].mxu0  ;;  %8077 = vmax.xlane.f32.xlu1 %v8076_v3  ;;  %v21060_v38 = vadd.f32 %v16855_v51, %v14194_v23  ;;  %v8085_v57 = vsel %vm915_vm1, %v21056_v44, -inf }
0x23ea   : > { %v8056_v41 = vadd.f32 %v14192_v20, %v8055_v43  ;;  %v8079_v55 = vsel %vm915_vm1, %v21049_v50, -inf  ;;  %16860 = vmatprep.subr.bf16.mxu1 %v8161_v16 }
0x23eb   : > { %8080 = vmax.xlane.f32.xlu0 %v8079_v55  ;;  %v8088_v59 = vsel %vm915_vm1, %v21060_v38, -inf  ;;  %16861 = vmatpush3.bf16.msra.mxu1 %v8161_v16 }
0x23ec   : > { %v8082_v9 = vsel %vm915_vm1, %v8056_v41, -inf  ;;  %16862 = vmatprep.subr.bf16.mxu1 %v8162_v21 }
0x23ed   : > { %8083 = vmax.xlane.f32.xlu1 %v8082_v9 }
0x23ef   : > { %8086 = vmax.xlane.f32.xlu0 %v8085_v57  ;;  %16863 = vmatpush3.bf16.msra.mxu1 %v8162_v21 }
0x23f1   : > { %8089 = vmax.xlane.f32.xlu1 %v8088_v59 }
0x2470   : > { %v8069_v1 = vpop.xlane.xlu0 %8068 }
0x2471   : > { %v8091_v0 = vsub.f32 %v8037_v26, %v8069_v1  ;;  %v18063_v1 = vld [vmem:[%s22330_s8 + $0x18] sm:$0xff]  }
0x2472   : > { %v8072_v22 = vpop.xlane.xlu1 %8071  ;;  %16874 = vmatprep.subr.bf16.mxu0 %v18063_v1 }
0x2473   : > { %v8099_v4 = vmul.f32 1.442695, %v8091_v0  ;;  %v8092_v30 = vsub.f32 %v8040_v7, %v8072_v22  ;;  %16875 = vmatpush3.bf16.msra.mxu0 %v18063_v1 }
0x2474   : > { %v8075_v15 = vpop.xlane.xlu0 %8074 }
0x2475   : > { %18510 = vpow2.f32 %v8099_v4  ;;  %v8101_v42 = vmul.f32 1.442695, %v8092_v30  ;;  %v8093_v39 = vsub.f32 %v21032_v31, %v8075_v15 }
0x2476   : > { %v8078_v47 = vpop.xlane.xlu1 %8077 }
0x2477   : > { %18512 = vpow2.f32 %v8101_v42  ;;  %v8103_v37 = vmul.f32 1.442695, %v8093_v39  ;;  %v8094_v26 = vsub.f32 %v21035_v36, %v8078_v47 }
0x2478   : > { %v8081_v20 = vpop.xlane.xlu0 %8080 }
0x2479   : > { %18514 = vpow2.f32 %v8103_v37  ;;  %v8105_v51 = vmul.f32 1.442695, %v8094_v26  ;;  %v8095_v7 = vsub.f32 %v21049_v50, %v8081_v20 }
0x247a   : > { %v8084_v3 = vpop.xlane.xlu1 %8083 }
0x247b   : > { %18516 = vpow2.f32 %v8105_v51  ;;  %v8107_v23 = vmul.f32 1.442695, %v8095_v7  ;;  %v8096_v43 = vsub.f32 %v8056_v41, %v8084_v3 }
0x247c   : > { %v8087_v55 = vpop.xlane.xlu0 %8086 }
0x247d   : > { %18518 = vpow2.f32 %v8107_v23  ;;  %v8109_v31 = vmul.f32 1.442695, %v8096_v43  ;;  %v8097_v9 = vsub.f32 %v21056_v44, %v8087_v55 }
0x247e   : > { %v8090_v57 = vpop.xlane.xlu1 %8089 }
0x247f   : > { %v18511_v59 = vpop.eup %18510  ;;  %18520 = vpow2.f32 %v8109_v31  ;;  %v8111_v36 = vmul.f32 1.442695, %v8097_v9  ;;  %v8098_v24 = vsub.f32 %v21060_v38, %v8090_v57 }
0x2480   : > { %v8115_v49 = vsel %vm915_vm1, %v18511_v59, 0.0 }
0x2481   : > { %v18513_v60 = vpop.eup %18512  ;;  %18522 = vpow2.f32 %v8111_v36  ;;  %v8113_v50 = vmul.f32 1.442695, %v8098_v24  ;;  %8116 = vadd.xlane.f32.xlu0 %v8115_v49  ;;  %v18064_v36 = vld [vmem:[%s22330_s8] sm:$0xff]   ;;  %v18075_v49 = vld [vmem:[%s22323_s1 + $0x88] sm:$0xff]  }
0x2482   : > { %v8118_v41 = vsel %vm915_vm1, %v18513_v60, 0.0  ;;  %16884 = vmatprep.subr.bf16.mxu0 %v18064_v36  ;;  %v18073_v24 = vld [vmem:[%s22323_s1 + $0x80] sm:$0xff]  }
0x2483   : > { %v18515_v46 = vpop.eup %18514  ;;  %18524 = vpow2.f32 %v8113_v50  ;;  %8119 = vadd.xlane.f32.xlu1 %v8118_v41  ;;  %16896 = vmatprep.subr.bf16.mxu1 %v18073_v24  ;;  %v18077_v50 = vld [vmem:[%s22323_s1 + $0x98] sm:$0xff]   ;;  %v18078_v41 = vld [vmem:[%s22323_s1 + $0xa0] sm:$0xff]  }
0x2484   : > { %v8121_v52 = vsel %vm915_vm1, %v18515_v46, 0.0 }
0x2485   : > { %v18517_v44 = vpop.eup %18516  ;;  %8122 = vadd.xlane.f32.xlu0 %v8121_v52  ;;  %v18080_v52 = vld [vmem:[%s22323_s1 + $0xb0] sm:$0xff]  }
0x2486   : > { %v8124_v62 = vsel %vm915_vm1, %v18517_v44, 0.0 }
0x2487   : > { %v18519_v45 = vpop.eup %18518  ;;  %8125 = vadd.xlane.f32.xlu1 %v8124_v62 }
0x2488   : > { %v8127_v38 = vsel %vm915_vm1, %v18519_v45, 0.0 }
0x2489   : > { %v18521_v56 = vpop.eup %18520  ;;  %8128 = vadd.xlane.f32.xlu0 %v8127_v38 }
0x248a   : > { %v8130_v53 = vsel %vm915_vm1, %v18521_v56, 0.0 }
0x248b   : > { %v18523_v63 = vpop.eup %18522  ;;  %8131 = vadd.xlane.f32.xlu1 %v8130_v53 }
0x248c   : > { %v8133_v13 = vsel %vm915_vm1, %v18523_v63, 0.0 }
0x248d   : > { %v18525_v8 = vpop.eup %18524  ;;  %8134 = vadd.xlane.f32.xlu0 %v8133_v13  ;;  %v18065_v13 = vld [vmem:[%s22330_s8 + $0x8] sm:$0xff]  }
0x248e   : > { %v8136_v11 = vsel %vm915_vm1, %v18525_v8, 0.0 }
0x248f   : > { %8137 = vadd.xlane.f32.xlu1 %v8136_v11 }
0x250e   : > { %v8117_v6 = vpop.xlane.xlu0 %8116 }
0x250f   : > { %18526 = vrcp.f32 %v8117_v6 }
0x2510   : > { %v8120_v10 = vpop.xlane.xlu1 %8119 }
0x2511   : > { %18528 = vrcp.f32 %v8120_v10 }
0x2512   : > { %v8123_v0 = vpop.xlane.xlu0 %8122 }
0x2513   : > { %18530 = vrcp.f32 %v8123_v0 }
0x2514   : > { %v8126_v2 = vpop.xlane.xlu1 %8125 }
0x2515   : > { %18532 = vrcp.f32 %v8126_v2  ;;  %v18067_v2 = vld [vmem:[%s22325_s3 + $0x88] sm:$0xff]  }
0x2516   : > { %v8129_v5 = vpop.xlane.xlu0 %8128 }
0x2517   : > { %18534 = vrcp.f32 %v8129_v5 }
0x2518   : > { %v8132_v22 = vpop.xlane.xlu1 %8131 }
0x2519   : > { %v18527_v28 = vpop.eup %18526  ;;  %18536 = vrcp.f32 %v8132_v22 }
0x251a   : > { %v8135_v4 = vpop.xlane.xlu0 %8134  ;;  %v8140_v15 = vmul.f32 %v18527_v28, %v18511_v59 }
0x251b   : > { %v18529_v30 = vpop.eup %18528  ;;  %18538 = vrcp.f32 %v8135_v4 }
0x251c   : > { %v8138_v21 = vpop.xlane.xlu1 %8137  ;;  %v8142_v16 = vmul.f32 %v18529_v30, %v18513_v60  ;;  %v18076_v60 = vld [vmem:[%s22323_s1 + $0x90] sm:$0xff]  }
0x251d   : > { %v18531_v42 = vpop.eup %18530  ;;  %18540 = vrcp.f32 %v8138_v21 }
0x251e   : > { %v8155_v39 = vpack.c.bf16 %v8142_v16, %v8140_v15  ;;  %v8144_v37 = vmul.f32 %v18531_v42, %v18515_v46  ;;  %v18079_v46 = vld [vmem:[%s22323_s1 + $0xa8] sm:$0xff]  }
0x251f   : > { %v18533_v47 = vpop.eup %18532 }
0x2520   : > { %v8146_v26 = vmul.f32 %v18533_v47, %v18517_v44  ;;  %16864 = vmatprep.mubr.msk.bf16.mxu1 %vm915_vm1, %v8155_v39  ;;  %v18081_v44 = vld [vmem:[%s22323_s1 + $0xb8] sm:$0xff]  }
0x2521   : > { %v18535_v20 = vpop.eup %18534 }
0x2522   : > { %v8156_v51 = vpack.c.bf16 %v8146_v26, %v8144_v37  ;;  %v8148_v3 = vmul.f32 %v18535_v20, %v18519_v45 }
0x2523   : > { %v18537_v7 = vpop.eup %18536 }
0x2524   : > { %16865 = vmatmul.mubr.msk.bf16.vlgmr.msra.gmra.mrb[232].mxu1 %vm915_vm1, %v8156_v51  ;;  %v8150_v23 = vmul.f32 %v18537_v7, %v18521_v56 }
0x2525   : > { %v18539_v43 = vpop.eup %18538  ;;  %16897 = vmatpush3.bf16.msra.mxu1 %v18073_v24 }
0x2526   : > { %v8157_v55 = vpack.c.bf16 %v8150_v23, %v8148_v3  ;;  %v8152_v9 = vmul.f32 %v18539_v43, %v18523_v63  ;;  %16898 = vmatprep.subr.bf16.mxu1 %v18075_v49 }
0x2527   : > { %v18541_v31 = vpop.eup %18540 }
0x2528   : > { %16868 = vmatprep.mubr.msk.bf16.mxu1 %vm915_vm1, %v8157_v55  ;;  %v8154_v57 = vmul.f32 %v18541_v31, %v18525_v8 }
0x2529   : > { %16899 = vmatpush3.bf16.msra.mxu1 %v18075_v49 }
0x252a   : > { %v8158_v59 = vpack.c.bf16 %v8154_v57, %v8152_v9  ;;  %16900 = vmatprep.subr.bf16.mxu1 %v18076_v60 }
0x252c   : > { %16869 = vmatmul.mubr.msk.bf16.gmra.mrb[236].mxu1 %vm915_vm1, %v8158_v59 }
0x252d   : > { %16912 = vmatprep.mubr.bf16.mxu1 %v20678_v27  ;;  %16901 = vmatpush3.bf16.msra.mxu1 %v18076_v60 }
0x252e   : > { %16902 = vmatprep.subr.bf16.mxu1 %v18077_v50 }
0x2531   : > { %16903 = vmatpush3.bf16.msra.mxu1 %v18077_v50 }
0x2532   : > { %16904 = vmatprep.subr.bf16.mxu1 %v18078_v41 }
0x2535   : > { %16905 = vmatpush3.bf16.msra.mxu1 %v18078_v41 }
0x2536   : > { %16906 = vmatprep.subr.bf16.mxu1 %v18079_v46 }
0x2539   : > { %16907 = vmatpush3.bf16.msra.mxu1 %v18079_v46 }
0x253a   : > { %16908 = vmatprep.subr.bf16.mxu1 %v18080_v52 }
0x253d   : > { %16909 = vmatpush3.bf16.msra.mxu1 %v18080_v52 }
0x253e   : > { %16910 = vmatprep.subr.bf16.mxu1 %v18081_v44 }
0x2541   : > { %16911 = vmatpush3.bf16.msra.mxu1 %v18081_v44 }
0x2544   : > { %16913 = vmatmul.mubr.bf16.vlgmr.msra.gmra.mrb[240].mxu1 %v20703_v48 }
0x2545   : > { %16916 = vmatprep.mubr.bf16.mxu1 %v20705_v61 }
0x254c   : > { %16917 = vmatmul.mubr.bf16.gmra.mrb[244].mxu1 %v20711_v58 }
0x254d   : > { %16960 = vmatprep.mubr.bf16.mxu1 %v20678_v27 }
0x25f7   : > { %v16866_v62 = vpop.f32.mrb[232].mxu1 }
0x25f8   : > { %v8209_v45 = vpop.f32.mrb[233].mxu1 }
0x25f9   : > { %v16867_v38 = vpop.f32.mrb[234].mxu1 }
0x25fa   : > { %v8241_v56 = vpack.c.bf16 %v16867_v38, %v16866_v62  ;;  %v8212_v53 = vpop.f32.mrb[235].mxu1 }
0x25fb   : > { %v8240_v63 = vpack.c.bf16 %v8212_v53, %v8209_v45 }
0x25fd   : > { %16876 = vmatprep.mubr.msk.bf16.mxu0 %vm825_vm0, %v8240_v63 }
0x25fe   : > { %16877 = vmatmul.mubr.msk.bf16.vlgmr.msra.gmra.mrb[176].mxu0 %vm825_vm0, %v8241_v56 }
0x25ff   : > { %16885 = vmatpush3.bf16.msra.mxu0 %v18064_v36  ;;  %v16870_v8 = vpop.f32.mrb[236].mxu1  ;;  %v14261_v36 = vld [vmem:[%s22326_s4 + $0x2] ss:$0 sm:$0xff] }
0x2600   : > { %v8225_v11 = vpop.f32.mrb[237].mxu1  ;;  %16886 = vmatprep.subr.bf16.mxu0 %v18065_v13 }
0x2601   : > { %v16871_v1 = vpop.f32.mrb[238].mxu1 }
0x2602   : > { %v8243_v6 = vpack.c.bf16 %v16871_v1, %v16870_v8  ;;  %v8228_v10 = vpop.f32.mrb[239].mxu1 }
0x2603   : > { %v8242_v0 = vpack.c.bf16 %v8228_v10, %v8225_v11  ;;  %16887 = vmatpush3.bf16.msra.mxu0 %v18065_v13 }
0x2604   : > { %16920 = vmatprep.subr.bf16.mxu0 %v18066_v54 }
0x2605   : > { %16880 = vmatprep.mubr.msk.bf16.mxu0 %vm825_vm0, %v8242_v0 }
0x2606   : > { %16881 = vmatmul.mubr.msk.bf16.gmra.mrb[180].mxu0 %vm825_vm0, %v8243_v6 }
0x2607   : > { %16888 = vmatprep.mubr.msk.bf16.mxu0 %vm825_vm0, %v7538_v33  ;;  %v18074_v33 = vld [vmem:[%s22325_s3 + $0xb8] sm:$0xff]  }
0x260e   : > { %16889 = vmatmul.mubr.msk.bf16.vlgmr.msra.gmra.mrb[176].mxu0 %vm825_vm0, %v7539_v18  ;;  %v18072_v18 = vld [vmem:[%s22325_s3 + $0xb0] sm:$0xff]  }
0x260f   : > { %16921 = vmatpush3.bf16.msra.mxu0 %v18066_v54  ;;  %16892 = vmatprep.mubr.msk.bf16.mxu0 %vm825_vm0, %v7540_v40 }
0x2610   : > { %16922 = vmatprep.subr.bf16.mxu0 %v18067_v2 }
0x2613   : > { %16923 = vmatpush3.bf16.msra.mxu0 %v18067_v2 }
0x2614   : > { %16924 = vmatprep.subr.bf16.mxu0 %v18068_v14 }
0x2616   : > { %16893 = vmatmul.mubr.msk.bf16.gmra.mrb[180].mxu0 %vm825_vm0, %v7541_v25 }
0x2617   : > { %16925 = vmatpush3.bf16.msra.mxu0 %v18068_v14  ;;  %16936 = vmatprep.mubr.bf16.mxu0 %v20678_v27  ;;  %v16914_v35 = vpop.f32.mrb[240].mxu1  ;;  %v18082_v14 = vld [vmem:[%s22327_s5 + $0x80] sm:$0xff]  }
0x2618   : > { %16926 = vmatprep.subr.bf16.mxu0 %v18069_v19  ;;  %v8540_v32 = vadd.f32 %v16914_v35, %v14235_v29  ;;  %v8531_v25 = vpop.f32.mrb[241].mxu1  ;;  %16944 = vmatprep.subr.bf16.mxu1 %v18082_v14  ;;  %v18089_v35 = vld [vmem:[%s22327_s5 + $0xb8] sm:$0xff]  }
0x2619   : > { %v8532_v34 = vadd.f32 %v14235_v29, %v8531_v25  ;;  %v16915_v40 = vpop.f32.mrb[242].mxu1  ;;  %16945 = vmatpush3.bf16.msra.mxu1 %v18082_v14 }
0x261a   : > { %v8836_v5 = vmul.f32 0.17677669, %v8540_v32  ;;  %v8543_v22 = vadd.f32 %v16915_v40, %v14235_v29  ;;  %v8534_v28 = vpop.f32.mrb[243].mxu1  ;;  %v14296_v32 = vld [vmem:[%s22329_s7 + $0x80] sm:$0xff] }
0x261b   : > { %16927 = vmatpush3.bf16.msra.mxu0 %v18069_v19  ;;  %v8834_v4 = vmul.f32 0.17677669, %v8532_v34  ;;  %v8535_v30 = vadd.f32 %v14235_v29, %v8534_v28  ;;  %v18083_v19 = vld [vmem:[%s22327_s5 + $0x88] sm:$0xff]   ;;  %v14298_v34 = vld [vmem:[%s22329_s7 + $0x90] sm:$0xff] }
0x261c   : > { %16928 = vmatprep.subr.bf16.mxu0 %v18070_v12  ;;  %v8837_v21 = vmul.f32 0.17677669, %v8543_v22  ;;  %16946 = vmatprep.subr.bf16.mxu1 %v18083_v19 }
0x261d   : > { %v8835_v15 = vmul.f32 0.17677669, %v8535_v30  ;;  %16947 = vmatpush3.bf16.msra.mxu1 %v18083_v19 }
0x261e   : > { %v8843_v16 = vpack.c.bf16 %v8837_v21, %v8836_v5  ;;  %v14297_v5 = vld [vmem:[%s22329_s7 + $0x88] sm:$0xff] }
0x261f   : > { %16929 = vmatpush3.bf16.msra.mxu0 %v18070_v12  ;;  %v8842_v42 = vpack.c.bf16 %v8835_v15, %v8834_v4  ;;  %v16918_v39 = vpop.f32.mrb[244].mxu1  ;;  %v18084_v12 = vld [vmem:[%s22327_s5 + $0x90] sm:$0xff]   ;;  %v14299_v4 = vld [vmem:[%s22329_s7 + $0x98] sm:$0xff] }
0x2620   : > { %16930 = vmatprep.subr.bf16.mxu0 %v18071_v17  ;;  %v8556_v47 = vadd.f32 %v16918_v39, %v14235_v29  ;;  %v8547_v37 = vpop.f32.mrb[245].mxu1  ;;  %16948 = vmatprep.subr.bf16.mxu1 %v18084_v12 }
0x2621   : > { %v8548_v26 = vadd.f32 %v14235_v29, %v8547_v37  ;;  %v16919_v20 = vpop.f32.mrb[246].mxu1  ;;  %16949 = vmatpush3.bf16.msra.mxu1 %v18084_v12  ;;  %v14300_v37 = vld [vmem:[%s22329_s7 + $0xa0] sm:$0xff] }
0x2622   : > { %v8840_v51 = vmul.f32 0.17677669, %v8556_v47  ;;  %v8559_v7 = vadd.f32 %v16919_v20, %v14235_v29  ;;  %v8550_v3 = vpop.f32.mrb[247].mxu1  ;;  %v14302_v47 = vld [vmem:[%s22329_s7 + $0xb0] sm:$0xff] }
0x2623   : > { %16931 = vmatpush3.bf16.msra.mxu0 %v18071_v17  ;;  %v8838_v23 = vmul.f32 0.17677669, %v8548_v26  ;;  %v8551_v43 = vadd.f32 %v14235_v29, %v8550_v3  ;;  %v18085_v17 = vld [vmem:[%s22327_s5 + $0x98] sm:$0xff]   ;;  %v18088_v29 = vld [vmem:[%s22327_s5 + $0xb0] sm:$0xff]   ;;  %v14301_v3 = vld [vmem:[%s22329_s7 + $0xa8] sm:$0xff] }
0x2624   : > { %16932 = vmatprep.subr.bf16.mxu0 %v18072_v18  ;;  %v8841_v55 = vmul.f32 0.17677669, %v8559_v7  ;;  %16950 = vmatprep.subr.bf16.mxu1 %v18085_v17  ;;  %v14303_v7 = vld [vmem:[%s22329_s7 + $0xb8] sm:$0xff] }
0x2625   : > { %v8839_v31 = vmul.f32 0.17677669, %v8551_v43  ;;  %16951 = vmatpush3.bf16.msra.mxu1 %v18085_v17 }
0x2626   : > { %v8845_v9 = vpack.c.bf16 %v8841_v55, %v8840_v51 }
0x2627   : > { %16933 = vmatpush3.bf16.msra.mxu0 %v18072_v18  ;;  %v8844_v57 = vpack.c.bf16 %v8839_v31, %v8838_v23  ;;  %v18086_v18 = vld [vmem:[%s22327_s5 + $0xa0] sm:$0xff]  }
0x2628   : > { %16934 = vmatprep.subr.bf16.mxu0 %v18074_v33  ;;  %16952 = vmatprep.subr.bf16.mxu1 %v18086_v18 }
0x2629   : > { %16953 = vmatpush3.bf16.msra.mxu1 %v18086_v18 }
0x262b   : > { %16935 = vmatpush3.bf16.msra.mxu0 %v18074_v33  ;;  %v18087_v33 = vld [vmem:[%s22327_s5 + $0xa8] sm:$0xff]  }
0x262c   : > { %16954 = vmatprep.subr.bf16.mxu1 %v18087_v33 }
0x262d   : > { %16955 = vmatpush3.bf16.msra.mxu1 %v18087_v33 }
0x262e   : > { %16937 = vmatmul.mubr.bf16.vlgmr.msra.gmra.mrb[184].mxu0 %v20703_v48  ;;  %16956 = vmatprep.subr.bf16.mxu1 %v18088_v29 }
0x262f   : > { %16940 = vmatprep.mubr.bf16.mxu0 %v20705_v61 }
0x2631   : > { %16957 = vmatpush3.bf16.msra.mxu1 %v18088_v29 }
0x2632   : > { %16958 = vmatprep.subr.bf16.mxu1 %v18089_v35 }
0x2635   : > { %16959 = vmatpush3.bf16.msra.mxu1 %v18089_v35 }
0x2636   : > { %16941 = vmatmul.mubr.bf16.gmra.mrb[188].mxu0 %v20711_v58 }
0x2637   : > { %16976 = vmatprep.mubr.msk.bf16.mxu0 %vm825_vm0, %v8842_v42 }
0x2638   : > { %16961 = vmatmul.mubr.bf16.vlgmr.msra.gmra.mrb[248].mxu1 %v20703_v48 }
0x2639   : > { %16964 = vmatprep.mubr.bf16.mxu1 %v20705_v61 }
0x2640   : > { %16965 = vmatmul.mubr.bf16.gmra.mrb[252].mxu1 %v20711_v58 }
0x2701   : > { %v16938_v59 = vpop.f32.mrb[184].mxu0 }
0x2702   : > { %v8667_v24 = vpop.f32.mrb[185].mxu0  ;;  %v8676_v60 = vadd.f32 %v16938_v59, %v14261_v36 }
0x2703   : > { %v16939_v49 = vpop.f32.mrb[186].mxu0  ;;  %v8668_v46 = vadd.f32 %v14261_v36, %v8667_v24 }
0x2704   : > { %v8679_v50 = vadd.f32 %v16939_v49, %v14261_v36  ;;  %v8670_v41 = vpop.f32.mrb[187].mxu0 }
0x2705   : > { %v8671_v52 = vadd.f32 %v14261_v36, %v8670_v41 }
0x2706   : > { %v8847_v44 = vpack.c.bf16 %v8679_v50, %v8676_v60  ;;  %v14287_v50 = vld [vmem:[%s22328_s6 + $0x2] ss:$0 sm:$0xff] }
0x2707   : > { %v8846_v62 = vpack.c.bf16 %v8671_v52, %v8668_v46 }
0x2708   : > { %v8874_v10 = vsel %vm825_vm0, %v8847_v44, 0 }
0x2709   : > { %17728 = vmatprep.subr.msk.bf16.mxu0 %vm825_vm0, %v8846_v62  ;;  %v8871_v45 = vsel %vm825_vm0, %v8846_v62, 0  ;;  %v16942_v38 = vpop.f32.mrb[188].mxu0 }
0x270a   : > { %16969 = vmatpush3.bf16.xpose.msra.mxu0 %v8871_v45  ;;  %v8692_v56 = vadd.f32 %v16942_v38, %v14261_v36  ;;  %v8683_v53 = vpop.f32.mrb[189].mxu0 }
0x270b   : > { %17729 = vmatprep.subr.msk.bf16.mxu0 %vm825_vm0, %v8847_v44  ;;  %v8684_v63 = vadd.f32 %v14261_v36, %v8683_v53  ;;  %v16943_v13 = vpop.f32.mrb[190].mxu0  ;;  %v16962_v41 = vpop.f32.mrb[248].mxu1 }
0x270c   : > { %v8695_v8 = vadd.f32 %v16943_v13, %v14261_v36  ;;  %v8686_v11 = vpop.f32.mrb[191].mxu0  ;;  %v8812_v46 = vadd.f32 %v16962_v41, %v14287_v50  ;;  %v8803_v52 = vpop.f32.mrb[249].mxu1  ;;  %v18090_v41 = vld [vmem:[%s22330_s8 + $0x20] sm:$0xff]  }
0x270d   : > { %v8687_v54 = vadd.f32 %v14261_v36, %v8686_v11  ;;  %v8804_v44 = vadd.f32 %v14287_v50, %v8803_v52  ;;  %v16963_v62 = vpop.f32.mrb[250].mxu1 }
0x270e   : > { %v8849_v1 = vpack.c.bf16 %v8695_v8, %v8692_v56  ;;  %v8815_v45 = vadd.f32 %v16963_v62, %v14287_v50  ;;  %v8806_v38 = vpop.f32.mrb[251].mxu1 }
0x270f   : > { %v8848_v6 = vpack.c.bf16 %v8687_v54, %v8684_v63  ;;  %v8807_v56 = vadd.f32 %v14287_v50, %v8806_v38 }
0x2710   : > { %v8880_v2 = vsel %vm825_vm0, %v8849_v1, 0  ;;  %v9040_v53 = vpack.c.bf16 %v8815_v45, %v8812_v46  ;;  %v18091_v46 = vld [vmem:[%s22330_s8 + $0x28] sm:$0xff]  }
0x2711   : > { %v8877_v0 = vsel %vm825_vm0, %v8848_v6, 0  ;;  %v9039_v63 = vpack.c.bf16 %v8807_v56, %v8804_v44 }
0x2712   : > { %16971 = vmatpush3.bf16.xpose.msra.mxu0 %v8874_v10 }
0x2713   : > { %17730 = vmatprep.subr.msk.bf16.mxu0 %vm825_vm0, %v8848_v6  ;;  %v16966_v13 = vpop.f32.mrb[252].mxu1  ;;  %16984 = vmatprep.subr.bf16.mxu1 %v9039_v63 }
0x2714   : > { %v8828_v8 = vadd.f32 %v16966_v13, %v14287_v50  ;;  %v8819_v11 = vpop.f32.mrb[253].mxu1  ;;  %16985 = vmatpush3.bf16.msra.mxu1 %v9039_v63 }
0x2715   : > { %v16967_v6 = vpop.f32.mrb[254].mxu1  ;;  %16986 = vmatprep.subr.bf16.mxu1 %v9040_v53 }
0x2718   : > { %16987 = vmatpush3.bf16.msra.mxu1 %v9040_v53 }
0x271a   : > { %16973 = vmatpush3.bf16.xpose.msra.mxu0 %v8877_v0  ;;  %v8831_v0 = vadd.f32 %v16967_v6, %v14287_v50 }
0x271b   : > { %17731 = vmatprep.subr.msk.bf16.mxu0 %vm825_vm0, %v8849_v1  ;;  %v8820_v1 = vadd.f32 %v14287_v50, %v8819_v11 }
0x271c   : > { %v9042_v18 = vpack.c.bf16 %v8831_v0, %v8828_v8 }
0x2722   : > { %16975 = vmatpush3.bf16.xpose.msra.mxu0 %v8880_v2  ;;  %v8822_v2 = vpop.f32.mrb[255].mxu1 }
0x2723   : > { %v8823_v19 = vadd.f32 %v14287_v50, %v8822_v2  ;;  %17000 = vmatprep.subr.bf16.mxu0 %v18090_v41 }
0x2725   : > { %v9041_v29 = vpack.c.bf16 %v8823_v19, %v8820_v1 }
0x2727   : > { %16988 = vmatprep.subr.bf16.mxu1 %v9041_v29 }
0x2728   : > { %16989 = vmatpush3.bf16.msra.mxu1 %v9041_v29 }
0x2729   : > { %16977 = vmatmul.mubr.msk.bf16.vlgmr.msra.gmra.mrb[192].mxu0 %vm825_vm0, %v8843_v16  ;;  %16990 = vmatprep.subr.bf16.mxu1 %v9042_v18 }
0x272a   : > { %16980 = vmatprep.mubr.msk.bf16.mxu0 %vm825_vm0, %v8844_v57  ;;  %17001 = vmatpush3.bf16.msra.mxu0 %v18090_v41 }
0x272b   : > { %17002 = vmatprep.subr.bf16.mxu0 %v18091_v46 }
0x272c   : > { %16991 = vmatpush3.bf16.msra.mxu1 %v9042_v18 }
0x272e   : > { %17003 = vmatpush3.bf16.msra.mxu0 %v18091_v46 }
0x2731   : > { %16981 = vmatmul.mubr.msk.bf16.gmra.mrb[196].mxu0 %vm825_vm0, %v8845_v9 }
0x27fc   : > { %v16978_v25 = vpop.f32.mrb[192].mxu0 }
0x27fd   : > { %v8916_v40 = vpop.f32.mrb[193].mxu0  ;;  %v21230_v21 = vadd.f32 %v16978_v25, %v14298_v34 }
0x27fe   : > { %v8917_v22 = vadd.f32 %v14296_v32, %v8916_v40  ;;  %v16979_v28 = vpop.f32.mrb[194].mxu0 }
0x27ff   : > { %v8919_v30 = vpop.f32.mrb[195].mxu0  ;;  %v21233_v42 = vadd.f32 %v16979_v28, %v14299_v4  ;;  %v8953_v20 = vsel %vm915_vm1, %v21230_v21, -inf }
0x2800   : > { %v8920_v15 = vadd.f32 %v14297_v5, %v8919_v30  ;;  %v8947_v16 = vsel %vm915_vm1, %v8917_v22, -inf }
0x2801   : > { %8948 = vmax.xlane.f32.xlu0 %v8947_v16  ;;  %v8956_v31 = vsel %vm915_vm1, %v21233_v42, -inf }
0x2802   : > { %v8950_v39 = vsel %vm915_vm1, %v8920_v15, -inf }
0x2803   : > { %8951 = vmax.xlane.f32.xlu1 %v8950_v39 }
0x2804   : > { %v16982_v26 = vpop.f32.mrb[196].mxu0 }
0x2805   : > { %v8932_v51 = vpop.f32.mrb[197].mxu0  ;;  %8954 = vmax.xlane.f32.xlu0 %v8953_v20  ;;  %v21250_v23 = vadd.f32 %v16982_v26, %v14302_v47 }
0x2806   : > { %v8933_v43 = vadd.f32 %v14300_v37, %v8932_v51  ;;  %v16983_v55 = vpop.f32.mrb[198].mxu0 }
0x2807   : > { %v8935_v9 = vpop.f32.mrb[199].mxu0  ;;  %8957 = vmax.xlane.f32.xlu1 %v8956_v31  ;;  %v21254_v57 = vadd.f32 %v16983_v55, %v14303_v7  ;;  %v8965_v49 = vsel %vm915_vm1, %v21250_v23, -inf }
0x2808   : > { %v8936_v59 = vadd.f32 %v14301_v3, %v8935_v9  ;;  %v8959_v36 = vsel %vm915_vm1, %v8933_v43, -inf }
0x2809   : > { %8960 = vmax.xlane.f32.xlu0 %v8959_v36  ;;  %v8968_v60 = vsel %vm915_vm1, %v21254_v57, -inf }
0x280a   : > { %v8962_v24 = vsel %vm915_vm1, %v8936_v59, -inf }
0x280b   : > { %8963 = vmax.xlane.f32.xlu1 %v8962_v24 }
0x280d   : > { %8966 = vmax.xlane.f32.xlu0 %v8965_v49 }
0x280f   : > { %8969 = vmax.xlane.f32.xlu1 %v8968_v60 }
0x288e   : > { %v8949_v54 = vpop.xlane.xlu0 %8948 }
0x288f   : > { %v8971_v10 = vsub.f32 %v8917_v22, %v8949_v54 }
0x2890   : > { %v8952_v14 = vpop.xlane.xlu1 %8951 }
0x2891   : > { %v8979_v12 = vmul.f32 1.442695, %v8971_v10  ;;  %v8972_v17 = vsub.f32 %v8920_v15, %v8952_v14 }
0x2892   : > { %v8955_v33 = vpop.xlane.xlu0 %8954 }
0x2893   : > { %18542 = vpow2.f32 %v8979_v12  ;;  %v8981_v35 = vmul.f32 1.442695, %v8972_v17  ;;  %v8973_v32 = vsub.f32 %v21230_v21, %v8955_v33 }
0x2894   : > { %v8958_v25 = vpop.xlane.xlu1 %8957 }
0x2895   : > { %18544 = vpow2.f32 %v8981_v35  ;;  %v8983_v34 = vmul.f32 1.442695, %v8973_v32  ;;  %v8974_v40 = vsub.f32 %v21233_v42, %v8958_v25 }
0x2896   : > { %v8961_v5 = vpop.xlane.xlu0 %8960 }
0x2897   : > { %18546 = vpow2.f32 %v8983_v34  ;;  %v8985_v22 = vmul.f32 1.442695, %v8974_v40  ;;  %v8975_v28 = vsub.f32 %v8933_v43, %v8961_v5  ;;  %v18092_v40 = vld [vmem:[%s22325_s3 + $0xc0] sm:$0xff]  }
0x2898   : > { %v8964_v4 = vpop.xlane.xlu1 %8963  ;;  %17036 = vmatprep.subr.bf16.mxu0 %v18092_v40  ;;  %v18099_v5 = vld [vmem:[%s22323_s1 + $0xc0] sm:$0xff]  }
0x2899   : > { %18548 = vpow2.f32 %v8985_v22  ;;  %v8987_v30 = vmul.f32 1.442695, %v8975_v28  ;;  %v8976_v15 = vsub.f32 %v8936_v59, %v8964_v4  ;;  %17012 = vmatprep.subr.bf16.mxu1 %v18099_v5  ;;  %v18101_v22 = vld [vmem:[%s22323_s1 + $0xc8] sm:$0xff]   ;;  %v18102_v28 = vld [vmem:[%s22323_s1 + $0xd0] sm:$0xff]   ;;  %v18103_v4 = vld [vmem:[%s22323_s1 + $0xd8] sm:$0xff]  }
0x289a   : > { %v8967_v16 = vpop.xlane.xlu0 %8966 }
0x289b   : > { %18550 = vpow2.f32 %v8987_v30  ;;  %v8989_v21 = vmul.f32 1.442695, %v8976_v15  ;;  %v8977_v39 = vsub.f32 %v21250_v23, %v8967_v16  ;;  %v18104_v30 = vld [vmem:[%s22323_s1 + $0xe0] sm:$0xff]   ;;  %v18105_v15 = vld [vmem:[%s22323_s1 + $0xe8] sm:$0xff]   ;;  %v18106_v16 = vld [vmem:[%s22323_s1 + $0xf0] sm:$0xff]  }
0x289c   : > { %v8970_v47 = vpop.xlane.xlu1 %8969 }
0x289d   : > { %v18543_v37 = vpop.eup %18542  ;;  %18552 = vpow2.f32 %v8989_v21  ;;  %v8991_v42 = vmul.f32 1.442695, %v8977_v39  ;;  %v8978_v26 = vsub.f32 %v21254_v57, %v8970_v47  ;;  %v18107_v21 = vld [vmem:[%s22323_s1 + $0xf8] sm:$0xff]  }
0x289e   : > { %v8995_v20 = vsel %vm915_vm1, %v18543_v37, 0.0 }
0x289f   : > { %v18545_v51 = vpop.eup %18544  ;;  %18554 = vpow2.f32 %v8991_v42  ;;  %v8993_v7 = vmul.f32 1.442695, %v8978_v26  ;;  %8996 = vadd.xlane.f32.xlu0 %v8995_v20 }
0x28a0   : > { %v8998_v3 = vsel %vm915_vm1, %v18545_v51, 0.0 }
0x28a1   : > { %v18547_v43 = vpop.eup %18546  ;;  %18556 = vpow2.f32 %v8993_v7  ;;  %8999 = vadd.xlane.f32.xlu1 %v8998_v3 }
0x28a2   : > { %v9001_v55 = vsel %vm915_vm1, %v18547_v43, 0.0 }
0x28a3   : > { %v18549_v23 = vpop.eup %18548  ;;  %9002 = vadd.xlane.f32.xlu0 %v9001_v55 }
0x28a4   : > { %v9004_v31 = vsel %vm915_vm1, %v18549_v23, 0.0 }
0x28a5   : > { %v18551_v9 = vpop.eup %18550  ;;  %9005 = vadd.xlane.f32.xlu1 %v9004_v31 }
0x28a6   : > { %v9007_v57 = vsel %vm915_vm1, %v18551_v9, 0.0 }
0x28a7   : > { %v18553_v59 = vpop.eup %18552  ;;  %9008 = vadd.xlane.f32.xlu0 %v9007_v57  ;;  %v18095_v57 = vld [vmem:[%s22325_s3 + $0xd8] sm:$0xff]  }
0x28a8   : > { %v9010_v36 = vsel %vm915_vm1, %v18553_v59, 0.0 }
0x28a9   : > { %v18555_v24 = vpop.eup %18554  ;;  %9011 = vadd.xlane.f32.xlu1 %v9010_v36  ;;  %v18097_v36 = vld [vmem:[%s22325_s3 + $0xe8] sm:$0xff]  }
0x28aa   : > { %v9013_v49 = vsel %vm915_vm1, %v18555_v24, 0.0 }
0x28ab   : > { %v18557_v60 = vpop.eup %18556  ;;  %9014 = vadd.xlane.f32.xlu0 %v9013_v49  ;;  %v14338_v49 = vld [vmem:[#allocation2 + $0x3] ss:$0 sm:$0xff] }
0x28ac   : > { %v9016_v50 = vsel %vm915_vm1, %v18557_v60, 0.0 }
0x28ad   : > { %9017 = vadd.xlane.f32.xlu1 %v9016_v50 }
0x292c   : > { %v8997_v52 = vpop.xlane.xlu0 %8996 }
0x292d   : > { %18558 = vrcp.f32 %v8997_v52 }
0x292e   : > { %v9000_v44 = vpop.xlane.xlu1 %8999 }
0x292f   : > { %18560 = vrcp.f32 %v9000_v44 }
0x2930   : > { %v9003_v62 = vpop.xlane.xlu0 %9002 }
0x2931   : > { %18562 = vrcp.f32 %v9003_v62 }
0x2932   : > { %v9006_v45 = vpop.xlane.xlu1 %9005 }
0x2933   : > { %18564 = vrcp.f32 %v9006_v45 }
0x2934   : > { %v9009_v38 = vpop.xlane.xlu0 %9008 }
0x2935   : > { %18566 = vrcp.f32 %v9009_v38 }
0x2936   : > { %v9012_v56 = vpop.xlane.xlu1 %9011 }
0x2937   : > { %v18559_v53 = vpop.eup %18558  ;;  %18568 = vrcp.f32 %v9012_v56 }
0x2938   : > { %v9015_v63 = vpop.xlane.xlu0 %9014  ;;  %v9020_v11 = vmul.f32 %v18559_v53, %v18543_v37 }
0x2939   : > { %v18561_v13 = vpop.eup %18560  ;;  %18570 = vrcp.f32 %v9015_v63 }
0x293a   : > { %v9018_v8 = vpop.xlane.xlu1 %9017  ;;  %v9022_v54 = vmul.f32 %v18561_v13, %v18545_v51  ;;  %v18093_v51 = vld [vmem:[%s22325_s3 + $0xc8] sm:$0xff]  }
0x293b   : > { %v18563_v1 = vpop.eup %18562  ;;  %18572 = vrcp.f32 %v9018_v8 }
0x293c   : > { %v9035_v6 = vpack.c.bf16 %v9022_v54, %v9020_v11  ;;  %v9024_v0 = vmul.f32 %v18563_v1, %v18547_v43  ;;  %v18094_v43 = vld [vmem:[%s22325_s3 + $0xd0] sm:$0xff]  }
0x293d   : > { %v18565_v10 = vpop.eup %18564 }
0x293e   : > { %v9026_v2 = vmul.f32 %v18565_v10, %v18549_v23  ;;  %16992 = vmatprep.mubr.msk.bf16.mxu1 %vm915_vm1, %v9035_v6 }
0x293f   : > { %v18567_v14 = vpop.eup %18566 }
0x2940   : > { %v9036_v19 = vpack.c.bf16 %v9026_v2, %v9024_v0  ;;  %v9028_v17 = vmul.f32 %v18567_v14, %v18551_v9 }
0x2941   : > { %v18569_v12 = vpop.eup %18568 }
0x2942   : > { %16993 = vmatmul.mubr.msk.bf16.vlgmr.msra.gmra.mrb[0].mxu1 %vm915_vm1, %v9036_v19  ;;  %v9030_v18 = vmul.f32 %v18569_v12, %v18553_v59  ;;  %v18096_v59 = vld [vmem:[%s22325_s3 + $0xe0] sm:$0xff]  }
0x2943   : > { %v18571_v33 = vpop.eup %18570  ;;  %17013 = vmatpush3.bf16.msra.mxu1 %v18099_v5 }
0x2944   : > { %v9037_v29 = vpack.c.bf16 %v9030_v18, %v9028_v17  ;;  %v9032_v32 = vmul.f32 %v18571_v33, %v18555_v24  ;;  %17014 = vmatprep.subr.bf16.mxu1 %v18101_v22  ;;  %v18098_v24 = vld [vmem:[%s22325_s3 + $0xf0] sm:$0xff]  }
0x2945   : > { %v18573_v35 = vpop.eup %18572 }
0x2946   : > { %v9034_v25 = vmul.f32 %v18573_v35, %v18557_v60  ;;  %16996 = vmatprep.mubr.msk.bf16.mxu1 %vm915_vm1, %v9037_v29 }
0x2947   : > { %17015 = vmatpush3.bf16.msra.mxu1 %v18101_v22 }
0x2948   : > { %v9038_v34 = vpack.c.bf16 %v9034_v25, %v9032_v32  ;;  %17016 = vmatprep.subr.bf16.mxu1 %v18102_v28  ;;  %v14364_v32 = vld [vmem:[%s22326_s4 + $0x3] ss:$0 sm:$0xff] }
0x294a   : > { %16997 = vmatmul.mubr.msk.bf16.gmra.mrb[4].mxu1 %vm915_vm1, %v9038_v34 }
0x294b   : > { %17028 = vmatprep.mubr.bf16.mxu1 %v20678_v27  ;;  %17017 = vmatpush3.bf16.msra.mxu1 %v18102_v28 }
0x294c   : > { %17018 = vmatprep.subr.bf16.mxu1 %v18103_v4 }
0x294f   : > { %17019 = vmatpush3.bf16.msra.mxu1 %v18103_v4 }
0x2950   : > { %17020 = vmatprep.subr.bf16.mxu1 %v18104_v30 }
0x2953   : > { %17021 = vmatpush3.bf16.msra.mxu1 %v18104_v30 }
0x2954   : > { %17022 = vmatprep.subr.bf16.mxu1 %v18105_v15 }
0x2957   : > { %17023 = vmatpush3.bf16.msra.mxu1 %v18105_v15 }
0x2958   : > { %17024 = vmatprep.subr.bf16.mxu1 %v18106_v16 }
0x295b   : > { %17025 = vmatpush3.bf16.msra.mxu1 %v18106_v16 }
0x295c   : > { %17026 = vmatprep.subr.bf16.mxu1 %v18107_v21 }
0x295f   : > { %17027 = vmatpush3.bf16.msra.mxu1 %v18107_v21 }
0x2962   : > { %17029 = vmatmul.mubr.bf16.vlgmr.msra.gmra.mrb[8].mxu1 %v20703_v48 }
0x2963   : > { %17032 = vmatprep.mubr.bf16.mxu1 %v20705_v61 }
0x296a   : > { %17033 = vmatmul.mubr.bf16.gmra.mrb[12].mxu1 %v20711_v58 }
0x296b   : > { %17076 = vmatprep.mubr.bf16.mxu1 %v20678_v27 }
0x2a15   : > { %v16994_v39 = vpop.f32.mrb[0].mxu1 }
0x2a16   : > { %v9089_v47 = vpop.f32.mrb[1].mxu1 }
0x2a17   : > { %v16995_v37 = vpop.f32.mrb[2].mxu1 }
0x2a18   : > { %v9121_v42 = vpack.c.bf16 %v16995_v37, %v16994_v39  ;;  %v9092_v26 = vpop.f32.mrb[3].mxu1 }
0x2a19   : > { %v9120_v20 = vpack.c.bf16 %v9092_v26, %v9089_v47 }
0x2a1b   : > { %17004 = vmatprep.mubr.msk.bf16.mxu0 %vm825_vm0, %v9120_v20 }
0x2a1c   : > { %17005 = vmatmul.mubr.msk.bf16.vlgmr.msra.gmra.mrb[176].mxu0 %vm825_vm0, %v9121_v42 }
0x2a1d   : > { %17037 = vmatpush3.bf16.msra.mxu0 %v18092_v40  ;;  %v16998_v7 = vpop.f32.mrb[4].mxu1 }
0x2a1e   : > { %v9105_v3 = vpop.f32.mrb[5].mxu1  ;;  %17038 = vmatprep.subr.bf16.mxu0 %v18093_v51 }
0x2a1f   : > { %v16999_v55 = vpop.f32.mrb[6].mxu1 }
0x2a20   : > { %v9123_v23 = vpack.c.bf16 %v16999_v55, %v16998_v7  ;;  %v9108_v31 = vpop.f32.mrb[7].mxu1 }
0x2a21   : > { %v9122_v9 = vpack.c.bf16 %v9108_v31, %v9105_v3  ;;  %17039 = vmatpush3.bf16.msra.mxu0 %v18093_v51  ;;  %v18108_v31 = vld [vmem:[%s22327_s5 + $0xc0] sm:$0xff]  }
0x2a22   : > { %17040 = vmatprep.subr.bf16.mxu0 %v18094_v43  ;;  %17060 = vmatprep.subr.bf16.mxu1 %v18108_v31 }
0x2a23   : > { %17008 = vmatprep.mubr.msk.bf16.mxu0 %vm825_vm0, %v9122_v9  ;;  %v18109_v9 = vld [vmem:[%s22327_s5 + $0xc8] sm:$0xff]   ;;  %17061 = vmatpush3.bf16.msra.mxu1 %v18108_v31 }
0x2a24   : > { %17009 = vmatmul.mubr.msk.bf16.gmra.mrb[180].mxu0 %vm825_vm0, %v9123_v23  ;;  %17062 = vmatprep.subr.bf16.mxu1 %v18109_v9 }
0x2a25   : > { %17041 = vmatpush3.bf16.msra.mxu0 %v18094_v43  ;;  %17052 = vmatprep.mubr.bf16.mxu0 %v20678_v27  ;;  %v18100_v27 = vld [vmem:[%s22325_s3 + $0xf8] sm:$0xff]  }
0x2a26   : > { %17042 = vmatprep.subr.bf16.mxu0 %v18095_v57 }
0x2a27   : > { %17063 = vmatpush3.bf16.msra.mxu1 %v18109_v9 }
0x2a29   : > { %17043 = vmatpush3.bf16.msra.mxu0 %v18095_v57  ;;  %v18110_v57 = vld [vmem:[%s22327_s5 + $0xd0] sm:$0xff]  }
0x2a2a   : > { %17044 = vmatprep.subr.bf16.mxu0 %v18096_v59  ;;  %17064 = vmatprep.subr.bf16.mxu1 %v18110_v57 }
0x2a2b   : > { %17065 = vmatpush3.bf16.msra.mxu1 %v18110_v57 }
0x2a2d   : > { %17045 = vmatpush3.bf16.msra.mxu0 %v18096_v59  ;;  %v18111_v59 = vld [vmem:[%s22327_s5 + $0xd8] sm:$0xff]  }
0x2a2e   : > { %17046 = vmatprep.subr.bf16.mxu0 %v18097_v36  ;;  %17066 = vmatprep.subr.bf16.mxu1 %v18111_v59 }
0x2a2f   : > { %17067 = vmatpush3.bf16.msra.mxu1 %v18111_v59 }
0x2a31   : > { %17047 = vmatpush3.bf16.msra.mxu0 %v18097_v36  ;;  %v18112_v36 = vld [vmem:[%s22327_s5 + $0xe0] sm:$0xff]  }
0x2a32   : > { %17048 = vmatprep.subr.bf16.mxu0 %v18098_v24  ;;  %17068 = vmatprep.subr.bf16.mxu1 %v18112_v36 }
0x2a33   : > { %17069 = vmatpush3.bf16.msra.mxu1 %v18112_v36 }
0x2a35   : > { %17049 = vmatpush3.bf16.msra.mxu0 %v18098_v24  ;;  %v17030_v60 = vpop.f32.mrb[8].mxu1  ;;  %v18113_v24 = vld [vmem:[%s22327_s5 + $0xe8] sm:$0xff]  }
0x2a36   : > { %17050 = vmatprep.subr.bf16.mxu0 %v18100_v27  ;;  %v9339_v50 = vadd.f32 %v17030_v60, %v14338_v49  ;;  %v9330_v41 = vpop.f32.mrb[9].mxu1  ;;  %17070 = vmatprep.subr.bf16.mxu1 %v18113_v24  ;;  %v14399_v60 = vld [vmem:[%s22329_s7 + $0xc0] sm:$0xff] }
0x2a37   : > { %v9331_v46 = vadd.f32 %v14338_v49, %v9330_v41  ;;  %v17031_v52 = vpop.f32.mrb[10].mxu1  ;;  %17071 = vmatpush3.bf16.msra.mxu1 %v18113_v24  ;;  %v14401_v41 = vld [vmem:[%s22329_s7 + $0xd0] sm:$0xff] }
0x2a38   : > { %v9635_v44 = vmul.f32 0.17677669, %v9339_v50  ;;  %v9342_v62 = vadd.f32 %v17031_v52, %v14338_v49  ;;  %v9333_v45 = vpop.f32.mrb[11].mxu1  ;;  %v14400_v52 = vld [vmem:[%s22329_s7 + $0xc8] sm:$0xff] }
0x2a39   : > { %17051 = vmatpush3.bf16.msra.mxu0 %v18100_v27  ;;  %v9633_v38 = vmul.f32 0.17677669, %v9331_v46  ;;  %v9334_v56 = vadd.f32 %v14338_v49, %v9333_v45  ;;  %v18114_v27 = vld [vmem:[%s22327_s5 + $0xf0] sm:$0xff]  }
0x2a3a   : > { %v9636_v53 = vmul.f32 0.17677669, %v9342_v62  ;;  %17072 = vmatprep.subr.bf16.mxu1 %v18114_v27 }
0x2a3b   : > { %v9634_v63 = vmul.f32 0.17677669, %v9334_v56  ;;  %17073 = vmatpush3.bf16.msra.mxu1 %v18114_v27 }
0x2a3c   : > { %17053 = vmatmul.mubr.bf16.vlgmr.msra.gmra.mrb[200].mxu0 %v20703_v48  ;;  %v9642_v13 = vpack.c.bf16 %v9636_v53, %v9635_v44 }
0x2a3d   : > { %17056 = vmatprep.mubr.bf16.mxu0 %v20705_v61  ;;  %v9641_v8 = vpack.c.bf16 %v9634_v63, %v9633_v38  ;;  %v17034_v11 = vpop.f32.mrb[12].mxu1  ;;  %v14405_v63 = vld [vmem:[%s22329_s7 + $0xf0] sm:$0xff] }
0x2a3e   : > { %v9355_v54 = vadd.f32 %v17034_v11, %v14338_v49  ;;  %v9346_v1 = vpop.f32.mrb[13].mxu1 }
0x2a3f   : > { %v9347_v6 = vadd.f32 %v14338_v49, %v9346_v1  ;;  %v17035_v10 = vpop.f32.mrb[14].mxu1  ;;  %v14406_v1 = vld [vmem:[%s22329_s7 + $0xf8] sm:$0xff] }
0x2a40   : > { %v9639_v0 = vmul.f32 0.17677669, %v9355_v54  ;;  %v9358_v2 = vadd.f32 %v17035_v10, %v14338_v49  ;;  %v9349_v14 = vpop.f32.mrb[15].mxu1 }
0x2a41   : > { %v9637_v19 = vmul.f32 0.17677669, %v9347_v6  ;;  %v9350_v12 = vadd.f32 %v14338_v49, %v9349_v14  ;;  %v18115_v49 = vld [vmem:[%s22327_s5 + $0xf8] sm:$0xff]   ;;  %v14404_v6 = vld [vmem:[%s22329_s7 + $0xe8] sm:$0xff] }
0x2a42   : > { %v9640_v17 = vmul.f32 0.17677669, %v9358_v2  ;;  %17074 = vmatprep.subr.bf16.mxu1 %v18115_v49 }
0x2a43   : > { %v9638_v18 = vmul.f32 0.17677669, %v9350_v12  ;;  %17075 = vmatpush3.bf16.msra.mxu1 %v18115_v49 }
0x2a44   : > { %17057 = vmatmul.mubr.bf16.gmra.mrb[204].mxu0 %v20711_v58  ;;  %v9644_v33 = vpack.c.bf16 %v9640_v17, %v9639_v0 }
0x2a45   : > { %17092 = vmatprep.mubr.msk.bf16.mxu0 %vm825_vm0, %v9641_v8  ;;  %v9643_v29 = vpack.c.bf16 %v9638_v18, %v9637_v19 }
0x2a46   : > { %17077 = vmatmul.mubr.bf16.vlgmr.msra.gmra.mrb[16].mxu1 %v20703_v48 }
0x2a47   : > { %17080 = vmatprep.mubr.bf16.mxu1 %v20705_v61  ;;  %v14402_v61 = vld [vmem:[%s22329_s7 + $0xd8] sm:$0xff] }
0x2a4e   : > { %17081 = vmatmul.mubr.bf16.gmra.mrb[20].mxu1 %v20711_v58 }
0x2b0f   : > { %v17054_v35 = vpop.f32.mrb[200].mxu0 }
0x2b10   : > { %v9466_v25 = vpop.f32.mrb[201].mxu0  ;;  %v9475_v40 = vadd.f32 %v17054_v35, %v14364_v32 }
0x2b11   : > { %v17055_v34 = vpop.f32.mrb[202].mxu0  ;;  %v9467_v28 = vadd.f32 %v14364_v32, %v9466_v25 }
0x2b12   : > { %v9478_v5 = vadd.f32 %v17055_v34, %v14364_v32  ;;  %v9469_v22 = vpop.f32.mrb[203].mxu0 }
0x2b13   : > { %v9470_v4 = vadd.f32 %v14364_v32, %v9469_v22 }
0x2b14   : > { %v9646_v30 = vpack.c.bf16 %v9478_v5, %v9475_v40 }
0x2b15   : > { %v9645_v15 = vpack.c.bf16 %v9470_v4, %v9467_v28 }
0x2b16   : > { %v9673_v43 = vsel %vm825_vm0, %v9646_v30, 0 }
0x2b17   : > { %17732 = vmatprep.subr.msk.bf16.mxu0 %vm825_vm0, %v9645_v15  ;;  %v9670_v16 = vsel %vm825_vm0, %v9645_v15, 0  ;;  %v17058_v21 = vpop.f32.mrb[204].mxu0 }
0x2b18   : > { %17085 = vmatpush3.bf16.xpose.msra.mxu0 %v9670_v16  ;;  %v9491_v39 = vadd.f32 %v17058_v21, %v14364_v32  ;;  %v9482_v47 = vpop.f32.mrb[205].mxu0 }
0x2b19   : > { %17733 = vmatprep.subr.msk.bf16.mxu0 %vm825_vm0, %v9646_v30  ;;  %v9483_v37 = vadd.f32 %v14364_v32, %v9482_v47  ;;  %v17059_v42 = vpop.f32.mrb[206].mxu0  ;;  %v17078_v25 = vpop.f32.mrb[16].mxu1 }
0x2b1a   : > { %v9494_v26 = vadd.f32 %v17059_v42, %v14364_v32  ;;  %v9485_v20 = vpop.f32.mrb[207].mxu0  ;;  %v9602_v40 = vpop.f32.mrb[17].mxu1 }
0x2b1b   : > { %v9486_v51 = vadd.f32 %v14364_v32, %v9485_v20  ;;  %v14390_v32 = vld [vmem:[%s22328_s6 + $0x3] ss:$0 sm:$0xff]  ;;  %v17079_v22 = vpop.f32.mrb[18].mxu1 }
0x2b1c   : > { %v9648_v7 = vpack.c.bf16 %v9494_v26, %v9491_v39  ;;  %v9611_v34 = vadd.f32 %v17078_v25, %v14390_v32  ;;  %v9603_v5 = vadd.f32 %v14390_v32, %v9602_v40  ;;  %v9614_v28 = vadd.f32 %v17079_v22, %v14390_v32  ;;  %v9605_v4 = vpop.f32.mrb[19].mxu1 }
0x2b1d   : > { %v9647_v3 = vpack.c.bf16 %v9486_v51, %v9483_v37  ;;  %v9606_v30 = vadd.f32 %v14390_v32, %v9605_v4 }
0x2b1e   : > { %v9679_v23 = vsel %vm825_vm0, %v9648_v7, 0  ;;  %v9839_v15 = vpack.c.bf16 %v9614_v28, %v9611_v34 }
0x2b1f   : > { %v9676_v55 = vsel %vm825_vm0, %v9647_v3, 0  ;;  %v9838_v16 = vpack.c.bf16 %v9606_v30, %v9603_v5 }
0x2b20   : > { %17087 = vmatpush3.bf16.xpose.msra.mxu0 %v9673_v43 }
0x2b21   : > { %17734 = vmatprep.subr.msk.bf16.mxu0 %vm825_vm0, %v9647_v3  ;;  %v17082_v21 = vpop.f32.mrb[20].mxu1  ;;  %17100 = vmatprep.subr.bf16.mxu1 %v9838_v16 }
0x2b22   : > { %v9627_v39 = vadd.f32 %v17082_v21, %v14390_v32  ;;  %v9618_v47 = vpop.f32.mrb[21].mxu1  ;;  %17101 = vmatpush3.bf16.msra.mxu1 %v9838_v16 }
0x2b23   : > { %v9619_v42 = vadd.f32 %v14390_v32, %v9618_v47  ;;  %v17083_v26 = vpop.f32.mrb[22].mxu1  ;;  %17102 = vmatprep.subr.bf16.mxu1 %v9839_v15 }
0x2b24   : > { %v9630_v51 = vadd.f32 %v17083_v26, %v14390_v32 }
0x2b26   : > { %v9841_v31 = vpack.c.bf16 %v9630_v51, %v9627_v39  ;;  %17103 = vmatpush3.bf16.msra.mxu1 %v9839_v15 }
0x2b28   : > { %17089 = vmatpush3.bf16.xpose.msra.mxu0 %v9676_v55 }
0x2b29   : > { %17735 = vmatprep.subr.msk.bf16.mxu0 %vm825_vm0, %v9648_v7  ;;  %v9621_v7 = vpop.f32.mrb[23].mxu1 }
0x2b2a   : > { %v9622_v43 = vadd.f32 %v14390_v32, %v9621_v7 }
0x2b2c   : > { %v9840_v57 = vpack.c.bf16 %v9622_v43, %v9619_v42 }
0x2b2e   : > { %17104 = vmatprep.subr.bf16.mxu1 %v9840_v57 }
0x2b2f   : > { %17105 = vmatpush3.bf16.msra.mxu1 %v9840_v57 }
0x2b30   : > { %17091 = vmatpush3.bf16.xpose.msra.mxu0 %v9679_v23  ;;  %17106 = vmatprep.subr.bf16.mxu1 %v9841_v31 }
0x2b33   : > { %17107 = vmatpush3.bf16.msra.mxu1 %v9841_v31 }
0x2b37   : > { %17093 = vmatmul.mubr.msk.bf16.vlgmr.msra.gmra.mrb[208].mxu0 %vm825_vm0, %v9642_v13  ;;  %v14403_v13 = vld [vmem:[%s22329_s7 + $0xe0] sm:$0xff] }
0x2b38   : > { %17096 = vmatprep.mubr.msk.bf16.mxu0 %vm825_vm0, %v9643_v29 }
0x2b3f   : > { %17097 = vmatmul.mubr.msk.bf16.gmra.mrb[212].mxu0 %vm825_vm0, %v9644_v33 }
0x2c0a   : > { %v17094_v50 = vpop.f32.mrb[208].mxu0 }
0x2c0b   : > { %v9715_v46 = vpop.f32.mrb[209].mxu0  ;;  %v21402_v62 = vadd.f32 %v17094_v50, %v14401_v41 }
0x2c0c   : > { %v9716_v44 = vadd.f32 %v14399_v60, %v9715_v46  ;;  %v17095_v48 = vpop.f32.mrb[210].mxu0 }
0x2c0d   : > { %v9718_v58 = vpop.f32.mrb[211].mxu0  ;;  %v21405_v56 = vadd.f32 %v17095_v48, %v14402_v61  ;;  %v9752_v11 = vsel %vm915_vm1, %v21402_v62, -inf }
0x2c0e   : > { %v9719_v45 = vadd.f32 %v14400_v52, %v9718_v58  ;;  %v9746_v38 = vsel %vm915_vm1, %v9716_v44, -inf }
0x2c0f   : > { %9747 = vmax.xlane.f32.xlu0 %v9746_v38  ;;  %v9755_v14 = vsel %vm915_vm1, %v21405_v56, -inf }
0x2c10   : > { %v9749_v53 = vsel %vm915_vm1, %v9719_v45, -inf }
0x2c11   : > { %9750 = vmax.xlane.f32.xlu1 %v9749_v53 }
0x2c12   : > { %v17098_v8 = vpop.f32.mrb[212].mxu0 }
0x2c13   : > { %v9731_v54 = vpop.f32.mrb[213].mxu0  ;;  %9753 = vmax.xlane.f32.xlu0 %v9752_v11  ;;  %v21422_v10 = vadd.f32 %v17098_v8, %v14405_v63 }
0x2c14   : > { %v9732_v0 = vadd.f32 %v14403_v13, %v9731_v54  ;;  %v17099_v2 = vpop.f32.mrb[214].mxu0 }
0x2c15   : > { %v9734_v19 = vpop.f32.mrb[215].mxu0  ;;  %9756 = vmax.xlane.f32.xlu1 %v9755_v14  ;;  %v21426_v12 = vadd.f32 %v17099_v2, %v14406_v1  ;;  %v9764_v29 = vsel %vm915_vm1, %v21422_v10, -inf }
0x2c16   : > { %v9735_v17 = vadd.f32 %v14404_v6, %v9734_v19  ;;  %v9758_v18 = vsel %vm915_vm1, %v9732_v0, -inf }
0x2c17   : > { %9759 = vmax.xlane.f32.xlu0 %v9758_v18  ;;  %v9767_v35 = vsel %vm915_vm1, %v21426_v12, -inf }
0x2c18   : > { %v9761_v33 = vsel %vm915_vm1, %v9735_v17, -inf }
0x2c19   : > { %9762 = vmax.xlane.f32.xlu1 %v9761_v33  ;;  %v18116_v33 = vld [vmem:[%s22330_s8 + $0x30] sm:$0xff]  }
0x2c1a   : > { %17116 = vmatprep.subr.bf16.mxu0 %v18116_v33 }
0x2c1b   : > { %9765 = vmax.xlane.f32.xlu0 %v9764_v29  ;;  %v18117_v29 = vld [vmem:[%s22330_s8 + $0x38] sm:$0xff]   ;;  %17117 = vmatpush3.bf16.msra.mxu0 %v18116_v33 }
0x2c1c   : > { %17118 = vmatprep.subr.bf16.mxu0 %v18117_v29 }
0x2c1d   : > { %9768 = vmax.xlane.f32.xlu1 %v9767_v35 }
0x2c1f   : > { %17119 = vmatpush3.bf16.msra.mxu0 %v18117_v29  ;;  %v18121_v29 = vld [vmem:[%s22325_s3 + $0x18] sm:$0xff]  }
0x2c9c   : > { %v9748_v37 = vpop.xlane.xlu0 %9747 }
0x2c9d   : > { %v9770_v20 = vsub.f32 %v9716_v44, %v9748_v37 }
0x2c9e   : > { %v9751_v3 = vpop.xlane.xlu1 %9750 }
0x2c9f   : > { %v9778_v55 = vmul.f32 1.442695, %v9770_v20  ;;  %v9771_v23 = vsub.f32 %v9719_v45, %v9751_v3 }
0x2ca0   : > { %v9754_v9 = vpop.xlane.xlu0 %9753 }
0x2ca1   : > { %18574 = vpow2.f32 %v9778_v55  ;;  %v9780_v59 = vmul.f32 1.442695, %v9771_v23  ;;  %v9772_v36 = vsub.f32 %v21402_v62, %v9754_v9 }
0x2ca2   : > { %v9757_v24 = vpop.xlane.xlu1 %9756 }
0x2ca3   : > { %18576 = vpow2.f32 %v9780_v59  ;;  %v9782_v27 = vmul.f32 1.442695, %v9772_v36  ;;  %v9773_v49 = vsub.f32 %v21405_v56, %v9757_v24  ;;  %v18118_v59 = vld [vmem:[%s22325_s3] sm:$0xff]   ;;  %v18127_v24 = vld [vmem:[%s22323_s1 + $0x8] sm:$0xff]  }
0x2ca4   : > { %v9760_v60 = vpop.xlane.xlu0 %9759  ;;  %17152 = vmatprep.subr.bf16.mxu0 %v18118_v59  ;;  %v18125_v36 = vld [vmem:[%s22323_s1] sm:$0xff]  }
0x2ca5   : > { %18578 = vpow2.f32 %v9782_v27  ;;  %v9784_v50 = vmul.f32 1.442695, %v9773_v49  ;;  %v9774_v41 = vsub.f32 %v9732_v0, %v9760_v60  ;;  %17128 = vmatprep.subr.bf16.mxu1 %v18125_v36  ;;  %v14433_v27 = vld [vmem:[%s18993_s21 + $0xc0] sm:$0xff]  ;;  %v14434_v49 = vld [vmem:[%s18993_s21 + $0xc8] sm:$0xff] }
0x2ca6   : > { %v9763_v46 = vpop.xlane.xlu1 %9762  ;;  %v21470_v60 = vpack.c.bf16 %v14434_v49, %v14433_v27 }
0x2ca7   : > { %18580 = vpow2.f32 %v9784_v50  ;;  %v9786_v52 = vmul.f32 1.442695, %v9774_v41  ;;  %v9775_v44 = vsub.f32 %v9735_v17, %v9763_v46  ;;  %v18128_v50 = vld [vmem:[%s22323_s1 + $0x10] sm:$0xff]   ;;  %v18129_v41 = vld [vmem:[%s22323_s1 + $0x18] sm:$0xff]   ;;  %v18130_v46 = vld [vmem:[%s22323_s1 + $0x20] sm:$0xff]  }
0x2ca8   : > { %v9766_v48 = vpop.xlane.xlu0 %9765 }
0x2ca9   : > { %18582 = vpow2.f32 %v9786_v52  ;;  %v9788_v61 = vmul.f32 1.442695, %v9775_v44  ;;  %v9776_v58 = vsub.f32 %v21422_v10, %v9766_v48  ;;  %v18131_v52 = vld [vmem:[%s22323_s1 + $0x28] sm:$0xff]   ;;  %v18132_v44 = vld [vmem:[%s22323_s1 + $0x30] sm:$0xff]   ;;  %v18133_v48 = vld [vmem:[%s22323_s1 + $0x38] sm:$0xff]  }
0x2caa   : > { %v9769_v62 = vpop.xlane.xlu1 %9768 }
0x2cab   : > { %v18575_v45 = vpop.eup %18574  ;;  %18584 = vpow2.f32 %v9788_v61  ;;  %v9790_v38 = vmul.f32 1.442695, %v9776_v58  ;;  %v9777_v56 = vsub.f32 %v21426_v12, %v9769_v62  ;;  %v14435_v61 = vld [vmem:[%s18993_s21 + $0xd0] sm:$0xff]  ;;  %v14436_v58 = vld [vmem:[%s18993_s21 + $0xd8] sm:$0xff]  ;;  %v14437_v62 = vld [vmem:[%s18993_s21 + $0xe0] sm:$0xff] }
0x2cac   : > { %v9794_v53 = vsel %vm915_vm1, %v18575_v45, 0.0 }
0x2cad   : > { %v18577_v63 = vpop.eup %18576  ;;  %18586 = vpow2.f32 %v9790_v38  ;;  %v9792_v13 = vmul.f32 1.442695, %v9777_v56  ;;  %9795 = vadd.xlane.f32.xlu0 %v9794_v53  ;;  %v21495_v38 = vpack.c.bf16 %v14436_v58, %v14435_v61  ;;  %v14439_v53 = vld [vmem:[%s18993_s21 + $0xf0] sm:$0xff] }
0x2cae   : > { %v9797_v8 = vsel %vm915_vm1, %v18577_v63, 0.0 }
0x2caf   : > { %v18579_v11 = vpop.eup %18578  ;;  %18588 = vpow2.f32 %v9792_v13  ;;  %9798 = vadd.xlane.f32.xlu1 %v9797_v8 }
0x2cb0   : > { %v9800_v54 = vsel %vm915_vm1, %v18579_v11, 0.0 }
0x2cb1   : > { %v18581_v1 = vpop.eup %18580  ;;  %9801 = vadd.xlane.f32.xlu0 %v9800_v54 }
0x2cb2   : > { %v9803_v6 = vsel %vm915_vm1, %v18581_v1, 0.0 }
0x2cb3   : > { %v18583_v10 = vpop.eup %18582  ;;  %9804 = vadd.xlane.f32.xlu1 %v9803_v6 }
0x2cb4   : > { %v9806_v0 = vsel %vm915_vm1, %v18583_v10, 0.0 }
0x2cb5   : > { %v18585_v2 = vpop.eup %18584  ;;  %9807 = vadd.xlane.f32.xlu0 %v9806_v0  ;;  %v18119_v0 = vld [vmem:[%s22325_s3 + $0x8] sm:$0xff]  }
0x2cb6   : > { %v9809_v14 = vsel %vm915_vm1, %v18585_v2, 0.0 }
0x2cb7   : > { %v18587_v19 = vpop.eup %18586  ;;  %9810 = vadd.xlane.f32.xlu1 %v9809_v14 }
0x2cb8   : > { %v9812_v12 = vsel %vm915_vm1, %v18587_v19, 0.0 }
0x2cb9   : > { %v18589_v17 = vpop.eup %18588  ;;  %9813 = vadd.xlane.f32.xlu0 %v9812_v12 }
0x2cba   : > { %v9815_v18 = vsel %vm915_vm1, %v18589_v17, 0.0 }
0x2cbb   : > { %9816 = vadd.xlane.f32.xlu1 %v9815_v18 }
0x2d3a   : > { %v9796_v35 = vpop.xlane.xlu0 %9795 }
0x2d3b   : > { %18590 = vrcp.f32 %v9796_v35  ;;  %v18122_v35 = vld [vmem:[%s22325_s3 + $0x20] sm:$0xff]  }
0x2d3c   : > { %v9799_v32 = vpop.xlane.xlu1 %9798 }
0x2d3d   : > { %18592 = vrcp.f32 %v9799_v32  ;;  %v18123_v32 = vld [vmem:[%s22325_s3 + $0x28] sm:$0xff]  }
0x2d3e   : > { %v9802_v25 = vpop.xlane.xlu0 %9801 }
0x2d3f   : > { %18594 = vrcp.f32 %v9802_v25  ;;  %v18124_v25 = vld [vmem:[%s22325_s3 + $0x30] sm:$0xff]  }
0x2d40   : > { %v9805_v34 = vpop.xlane.xlu1 %9804 }
0x2d41   : > { %18596 = vrcp.f32 %v9805_v34  ;;  %v18126_v34 = vld [vmem:[%s22325_s3 + $0x38] sm:$0xff]  }
0x2d42   : > { %v9808_v40 = vpop.xlane.xlu0 %9807 }
0x2d43   : > { %18598 = vrcp.f32 %v9808_v40  ;;  %v14441_v40 = vld [vmem:[#allocation2] ss:$0 sm:$0xff] }
0x2d44   : > { %v9811_v5 = vpop.xlane.xlu1 %9810 }
0x2d45   : > { %v18591_v22 = vpop.eup %18590  ;;  %18600 = vrcp.f32 %v9811_v5 }
0x2d46   : > { %v9814_v28 = vpop.xlane.xlu0 %9813  ;;  %v9819_v15 = vmul.f32 %v18591_v22, %v18575_v45  ;;  %v14438_v45 = vld [vmem:[%s18993_s21 + $0xe8] sm:$0xff] }
0x2d47   : > { %v18593_v4 = vpop.eup %18592  ;;  %18602 = vrcp.f32 %v9814_v28  ;;  %v21497_v56 = vpack.c.bf16 %v14438_v45, %v14437_v62 }
0x2d48   : > { %v9817_v30 = vpop.xlane.xlu1 %9816  ;;  %v9821_v16 = vmul.f32 %v18593_v4, %v18577_v63  ;;  %v14440_v63 = vld [vmem:[%s18993_s21 + $0xf8] sm:$0xff]  ;;  %s18769_s21 = sshll.u32 %s18836_s25, 4  ;;  %s18770_s21 = int_to_ptr.vmem [resolvable:$false] %s18769_s21 }
0x2d49   : > { %v18595_v21 = vpop.eup %18594  ;;  %18604 = vrcp.f32 %v9817_v30  ;;  %v21503_v13 = vpack.c.bf16 %v14440_v63, %v14439_v53  ;;  %s18771_s28 = scalar_lea.vmem %s18770_s21, 8192  ;;  %p18772_p2 = scmp.lt.s32.totalorder %s22274_s11, %s18770_s21 }
0x2d4a   : > { %v9834_v39 = vpack.c.bf16 %v9821_v16, %v9819_v15  ;;  %v9823_v37 = vmul.f32 %v18595_v21, %v18579_v11  ;;  %p18773_p3 = scmp.lt.s32.totalorder %s18771_s28, %s18765_s20 }
0x2d4b   : > { %v18597_v47 = vpop.eup %18596 }
0x2d4c   : > { %v9825_v42 = vmul.f32 %v18597_v47, %v18581_v1  ;;  %17108 = vmatprep.mubr.msk.bf16.mxu1 %vm915_vm1, %v9834_v39  ;;  %p18774_p4 = por %p18773_p3, %p18772_p2 }
0x2d4d   : > { %v18599_v26 = vpop.eup %18598 }
0x2d4e   : > { %v9835_v20 = vpack.c.bf16 %v9825_v42, %v9823_v37  ;;  %v9827_v7 = vmul.f32 %v18599_v26, %v18583_v10  ;;  %p18775_p7 = pnand %p18774_p4, %p18768_p12 }
0x2d4f   : > { %v18601_v51 = vpop.eup %18600 }
0x2d50   : > { %17109 = vmatmul.mubr.msk.bf16.vlgmr.msra.gmra.mrb[24].mxu1 %vm915_vm1, %v9835_v20  ;;  %v9829_v3 = vmul.f32 %v18601_v51, %v18585_v2 }
0x2d51   : > { %v18603_v43 = vpop.eup %18602  ;;  %17129 = vmatpush3.bf16.msra.mxu1 %v18125_v36 }
0x2d52   : > { %v9836_v55 = vpack.c.bf16 %v9829_v3, %v9827_v7  ;;  %v9831_v31 = vmul.f32 %v18603_v43, %v18587_v19  ;;  %17130 = vmatprep.subr.bf16.mxu1 %v18127_v24  ;;  %v18120_v19 = vld [vmem:[%s22325_s3 + $0x10] sm:$0xff]  }
0x2d53   : > { %v18605_v23 = vpop.eup %18604 }
0x2d54   : > { %v9833_v9 = vmul.f32 %v18605_v23, %v18589_v17  ;;  %17112 = vmatprep.mubr.msk.bf16.mxu1 %vm915_vm1, %v9836_v55 }
0x2d55   : > { %17131 = vmatpush3.bf16.msra.mxu1 %v18127_v24 }
0x2d56   : > { %v9837_v57 = vpack.c.bf16 %v9833_v9, %v9831_v31  ;;  %17132 = vmatprep.subr.bf16.mxu1 %v18128_v50 }
0x2d58   : > { %17113 = vmatmul.mubr.msk.bf16.gmra.mrb[28].mxu1 %vm915_vm1, %v9837_v57 }
0x2d59   : > { %17144 = vmatprep.mubr.bf16.mxu1 %v21470_v60  ;;  %17133 = vmatpush3.bf16.msra.mxu1 %v18128_v50 }
0x2d5a   : > { %17134 = vmatprep.subr.bf16.mxu1 %v18129_v41 }
0x2d5d   : > { %17135 = vmatpush3.bf16.msra.mxu1 %v18129_v41  ;;  %v18735_v41 = vld [vmem:[%s22331_s9] ss:$0 sm:$0xff] }
0x2d5e   : > { %17136 = vmatprep.subr.bf16.mxu1 %v18130_v46 }
0x2d61   : > { %17137 = vmatpush3.bf16.msra.mxu1 %v18130_v46 }
0x2d62   : > { %17138 = vmatprep.subr.bf16.mxu1 %v18131_v52 }
0x2d65   : > { %17139 = vmatpush3.bf16.msra.mxu1 %v18131_v52 }
0x2d66   : > { %17140 = vmatprep.subr.bf16.mxu1 %v18132_v44 }
0x2d69   : > { %17141 = vmatpush3.bf16.msra.mxu1 %v18132_v44 }
0x2d6a   : > { %17142 = vmatprep.subr.bf16.mxu1 %v18133_v48 }
0x2d6d   : > { %17143 = vmatpush3.bf16.msra.mxu1 %v18133_v48 }
0x2d70   : > { %17145 = vmatmul.mubr.bf16.vlgmr.msra.gmra.mrb[32].mxu1 %v21495_v38 }
0x2d71   : > { %17148 = vmatprep.mubr.bf16.mxu1 %v21497_v56 }
0x2d78   : > { %17149 = vmatmul.mubr.bf16.gmra.mrb[36].mxu1 %v21503_v13 }
0x2d79   : > { %17192 = vmatprep.mubr.bf16.mxu1 %v21470_v60 }
0x2e23   : > { %v17110_v8 = vpop.f32.mrb[24].mxu1 }
0x2e24   : > { %v9888_v11 = vpop.f32.mrb[25].mxu1 }
0x2e25   : > { %v17111_v54 = vpop.f32.mrb[26].mxu1 }
0x2e26   : > { %v9920_v1 = vpack.c.bf16 %v17111_v54, %v17110_v8  ;;  %v9891_v6 = vpop.f32.mrb[27].mxu1 }
0x2e27   : > { %v9919_v10 = vpack.c.bf16 %v9891_v6, %v9888_v11 }
0x2e29   : > { %17120 = vmatprep.mubr.msk.bf16.mxu0 %vm825_vm0, %v9919_v10 }
0x2e2a   : > { %17121 = vmatmul.mubr.msk.bf16.vlgmr.msra.gmra.mrb[176].mxu0 %vm825_vm0, %v9920_v1 }
0x2e2b   : > { %17153 = vmatpush3.bf16.msra.mxu0 %v18118_v59  ;;  %v17114_v2 = vpop.f32.mrb[28].mxu1 }
0x2e2c   : > { %v9904_v14 = vpop.f32.mrb[29].mxu1  ;;  %17154 = vmatprep.subr.bf16.mxu0 %v18119_v0 }
0x2e2d   : > { %v17115_v12 = vpop.f32.mrb[30].mxu1 }
0x2e2e   : > { %v9922_v17 = vpack.c.bf16 %v17115_v12, %v17114_v2  ;;  %v9907_v18 = vpop.f32.mrb[31].mxu1 }
0x2e2f   : > { %v9921_v33 = vpack.c.bf16 %v9907_v18, %v9904_v14  ;;  %17155 = vmatpush3.bf16.msra.mxu0 %v18119_v0  ;;  %v14450_v0 = vld [vmem:[%s22326_s4] ss:$0 sm:$0xff] }
0x2e30   : > { %17156 = vmatprep.subr.bf16.mxu0 %v18120_v19 }
0x2e31   : > { %17124 = vmatprep.mubr.msk.bf16.mxu0 %vm825_vm0, %v9921_v33 }
0x2e32   : > { %17125 = vmatmul.mubr.msk.bf16.gmra.mrb[180].mxu0 %vm825_vm0, %v9922_v17 }
0x2e33   : > { %17157 = vmatpush3.bf16.msra.mxu0 %v18120_v19  ;;  %17168 = vmatprep.mubr.bf16.mxu0 %v21470_v60 }
0x2e34   : > { %17158 = vmatprep.subr.bf16.mxu0 %v18121_v29 }
0x2e37   : > { %17159 = vmatpush3.bf16.msra.mxu0 %v18121_v29 }
0x2e38   : > { %17160 = vmatprep.subr.bf16.mxu0 %v18122_v35 }
0x2e3b   : > { %17161 = vmatpush3.bf16.msra.mxu0 %v18122_v35 }
0x2e3c   : > { %17162 = vmatprep.subr.bf16.mxu0 %v18123_v32 }
0x2e3f   : > { %17163 = vmatpush3.bf16.msra.mxu0 %v18123_v32 }
0x2e40   : > { %17164 = vmatprep.subr.bf16.mxu0 %v18124_v25 }
0x2e43   : > { %17165 = vmatpush3.bf16.msra.mxu0 %v18124_v25  ;;  %v17146_v5 = vpop.f32.mrb[32].mxu1 }
0x2e44   : > { %17166 = vmatprep.subr.bf16.mxu0 %v18126_v34  ;;  %v10168_v22 = vadd.f32 %v17146_v5, %v14441_v40  ;;  %v10159_v28 = vpop.f32.mrb[33].mxu1 }
0x2e45   : > { %v10160_v4 = vadd.f32 %v14441_v40, %v10159_v28  ;;  %v17147_v30 = vpop.f32.mrb[34].mxu1 }
0x2e46   : > { %v21536_v15 = vmul.f32 0.17677669, %v10168_v22  ;;  %v10171_v16 = vadd.f32 %v17147_v30, %v14441_v40  ;;  %v10162_v21 = vpop.f32.mrb[35].mxu1 }
0x2e47   : > { %17167 = vmatpush3.bf16.msra.mxu0 %v18126_v34  ;;  %v10462_v39 = vmul.f32 0.17677669, %v10160_v4  ;;  %v10163_v47 = vadd.f32 %v14441_v40, %v10162_v21 }
0x2e48   : > { %v21538_v37 = vmul.f32 0.17677669, %v10171_v16 }
0x2e49   : > { %v10463_v42 = vmul.f32 0.17677669, %v10163_v47 }
0x2e4a   : > { %17169 = vmatmul.mubr.bf16.vlgmr.msra.gmra.mrb[216].mxu0 %v21495_v38  ;;  %v10471_v26 = vpack.c.bf16 %v21538_v37, %v21536_v15  ;;  %v18136_v15 = vld [vmem:[%s22327_s5 + $0x10] sm:$0xff]   ;;  %v18137_v37 = vld [vmem:[%s22327_s5 + $0x18] sm:$0xff]  }
0x2e4b   : > { %17172 = vmatprep.mubr.bf16.mxu0 %v21497_v56  ;;  %v10470_v20 = vpack.c.bf16 %v10463_v42, %v10462_v39  ;;  %v17150_v51 = vpop.f32.mrb[36].mxu1 }
0x2e4c   : > { %v10184_v7 = vadd.f32 %v17150_v51, %v14441_v40  ;;  %v10175_v3 = vpop.f32.mrb[37].mxu1  ;;  %v18135_v51 = vld [vmem:[%s22327_s5 + $0x8] sm:$0xff]  }
0x2e4d   : > { %v10176_v43 = vadd.f32 %v14441_v40, %v10175_v3  ;;  %v17151_v55 = vpop.f32.mrb[38].mxu1  ;;  %v18140_v3 = vld [vmem:[%s22327_s5 + $0x30] sm:$0xff]  }
0x2e4e   : > { %v21543_v23 = vmul.f32 0.17677669, %v10184_v7  ;;  %v10187_v31 = vadd.f32 %v17151_v55, %v14441_v40  ;;  %v10178_v9 = vpop.f32.mrb[39].mxu1  ;;  %v18139_v7 = vld [vmem:[%s22327_s5 + $0x28] sm:$0xff]   ;;  %v10478_v55 = vld [vmem:[%s22329_s7] sm:$0xff] }
0x2e4f   : > { %v21545_v57 = vmul.f32 0.17677669, %v10176_v43  ;;  %v10179_v59 = vadd.f32 %v14441_v40, %v10178_v9  ;;  %v18141_v43 = vld [vmem:[%s22327_s5 + $0x38] sm:$0xff]  }
0x2e50   : > { %v21547_v36 = vmul.f32 0.17677669, %v10187_v31  ;;  %v10480_v31 = vld [vmem:[%s22329_s7 + $0x10] sm:$0xff] }
0x2e51   : > { %v21549_v24 = vmul.f32 0.17677669, %v10179_v59 }
0x2e52   : > { %17173 = vmatmul.mubr.bf16.gmra.mrb[220].mxu0 %v21503_v13  ;;  %v10473_v27 = vpack.c.bf16 %v21547_v36, %v21543_v23 }
0x2e53   : > { %17208 = vmatprep.mubr.msk.bf16.mxu0 %vm825_vm0, %v10470_v20  ;;  %v10472_v49 = vpack.c.bf16 %v21549_v24, %v21545_v57  ;;  %v18134_v20 = vld [vmem:[%s22327_s5] sm:$0xff]   ;;  %v10479_v57 = vld [vmem:[%s22329_s7 + $0x8] sm:$0xff]  ;;  %v10481_v24 = vld [vmem:[%s22329_s7 + $0x18] sm:$0xff] }
0x2e54   : > { %17176 = vmatprep.subr.bf16.mxu1 %v18134_v20 }
0x2e55   : > { %17177 = vmatpush3.bf16.msra.mxu1 %v18134_v20 }
0x2e56   : > { %17178 = vmatprep.subr.bf16.mxu1 %v18135_v51 }
0x2e59   : > { %17179 = vmatpush3.bf16.msra.mxu1 %v18135_v51 }
0x2e5a   : > { %17180 = vmatprep.subr.bf16.mxu1 %v18136_v15 }
0x2e5d   : > { %17181 = vmatpush3.bf16.msra.mxu1 %v18136_v15 }
0x2e5e   : > { %17182 = vmatprep.subr.bf16.mxu1 %v18137_v37 }
0x2e61   : > { %17183 = vmatpush3.bf16.msra.mxu1 %v18137_v37 }
0x2efd   : > { %v17122_v50 = vpop.f32.mrb[176].mxu0 }
0x2efe   : > { %v10026_v46 = vadd.f32 %v18735_v41, %v17122_v50  ;;  %v9985_v52 = vpop.f32.mrb[177].mxu0 }
0x2eff   : > { %v10024_v44 = vadd.f32 %v18735_v41, %v9985_v52  ;;  %v17123_v48 = vpop.f32.mrb[178].mxu0 }
0x2f00   : > { %14427 = vst [vmem:[%s19922_s29 + $0x90] sm:$0xff] %v10026_v46  ;;  %v10027_v61 = vadd.f32 %v18735_v41, %v17123_v48  ;;  %v9988_v58 = vpop.f32.mrb[179].mxu0  ;;  %v10482_v48 = vld [vmem:[%s22329_s7 + $0x20] sm:$0xff] }
0x2f01   : > { %14425 = vst [vmem:[%s19922_s29 + $0x80] sm:$0xff] %v10024_v44  ;;  %v10025_v62 = vadd.f32 %v18735_v41, %v9988_v58  ;;  %v10484_v44 = vld [vmem:[%s22329_s7 + $0x30] sm:$0xff] }
0x2f02   : > { %14428 = vst [vmem:[%s19922_s29 + $0x98] sm:$0xff] %v10027_v61 }
0x2f03   : > { %14426 = vst [vmem:[%s19922_s29 + $0x88] sm:$0xff] %v10025_v62 }
0x2f05   : > { %v17126_v45 = vpop.f32.mrb[180].mxu0 }
0x2f06   : > { %v10030_v53 = vadd.f32 %v18735_v41, %v17126_v45  ;;  %v10001_v63 = vpop.f32.mrb[181].mxu0  ;;  %v10485_v45 = vld [vmem:[%s22329_s7 + $0x38] sm:$0xff] }
0x2f07   : > { %v10028_v8 = vadd.f32 %v18735_v41, %v10001_v63  ;;  %v17127_v11 = vpop.f32.mrb[182].mxu0 }
0x2f08   : > { %14431 = vst [vmem:[%s19922_s29 + $0xb0] sm:$0xff] %v10030_v53  ;;  %v10031_v54 = vadd.f32 %v18735_v41, %v17127_v11  ;;  %v10004_v1 = vpop.f32.mrb[183].mxu0  ;;  %v10483_v53 = vld [vmem:[%s22329_s7 + $0x28] sm:$0xff] }
0x2f09   : > { %14429 = vst [vmem:[%s19922_s29 + $0xa0] sm:$0xff] %v10028_v8  ;;  %v10029_v6 = vadd.f32 %v18735_v41, %v10004_v1 }
0x2f0a   : > { %14432 = vst [vmem:[%s19922_s29 + $0xb8] sm:$0xff] %v10031_v54 }
0x2f0b   : > { %14430 = vst [vmem:[%s19922_s29 + $0xa8] sm:$0xff] %v10029_v6 }
0x2f1d   : > { %v17170_v10 = vpop.f32.mrb[216].mxu0 }
0x2f1e   : > { %v10295_v2 = vpop.f32.mrb[217].mxu0  ;;  %v10304_v19 = vadd.f32 %v17170_v10, %v14450_v0 }
0x2f1f   : > { %v17171_v14 = vpop.f32.mrb[218].mxu0  ;;  %v10296_v18 = vadd.f32 %v14450_v0, %v10295_v2 }
0x2f20   : > { %v10307_v12 = vadd.f32 %v17171_v14, %v14450_v0  ;;  %v10298_v17 = vpop.f32.mrb[219].mxu0 }
0x2f21   : > { %v10299_v33 = vadd.f32 %v14450_v0, %v10298_v17  ;;  %v18143_v17 = vld [vmem:[%s22325_s3 + $0x48] sm:$0xff]  }
0x2f22   : > { %v10475_v29 = vpack.c.bf16 %v10307_v12, %v10304_v19  ;;  %v18142_v12 = vld [vmem:[%s22325_s3 + $0x40] sm:$0xff]  }
0x2f23   : > { %v10474_v35 = vpack.c.bf16 %v10299_v33, %v10296_v18  ;;  %v18144_v18 = vld [vmem:[%s22325_s3 + $0x50] sm:$0xff]   ;;  %v18145_v33 = vld [vmem:[%s22325_s3 + $0x58] sm:$0xff]  }
0x2f24   : > { %v10502_v39 = vsel %vm825_vm0, %v10475_v29, 0 }
0x2f25   : > { %17736 = vmatprep.subr.msk.bf16.mxu0 %vm825_vm0, %v10474_v35  ;;  %v10499_v32 = vsel %vm825_vm0, %v10474_v35, 0  ;;  %v17174_v25 = vpop.f32.mrb[220].mxu0  ;;  %v14459_v35 = vld [vmem:[%s22328_s6] ss:$0 sm:$0xff] }
0x2f26   : > { %17201 = vmatpush3.bf16.xpose.msra.mxu0 %v10499_v32  ;;  %v10320_v34 = vadd.f32 %v17174_v25, %v14450_v0  ;;  %v10311_v40 = vpop.f32.mrb[221].mxu0 }
0x2f27   : > { %17737 = vmatprep.subr.msk.bf16.mxu0 %vm825_vm0, %v10475_v29  ;;  %v10312_v5 = vadd.f32 %v14450_v0, %v10311_v40  ;;  %v17175_v22 = vpop.f32.mrb[222].mxu0  ;;  %v18146_v29 = vld [vmem:[%s22325_s3 + $0x60] sm:$0xff]  }
0x2f28   : > { %v10323_v28 = vadd.f32 %v17175_v22, %v14450_v0  ;;  %v10314_v4 = vpop.f32.mrb[223].mxu0 }
0x2f29   : > { %v10315_v30 = vadd.f32 %v14450_v0, %v10314_v4 }
0x2f2a   : > { %v10477_v16 = vpack.c.bf16 %v10323_v28, %v10320_v34 }
0x2f2b   : > { %v10476_v21 = vpack.c.bf16 %v10315_v30, %v10312_v5 }
0x2f2c   : > { %v10508_v42 = vsel %vm825_vm0, %v10477_v16, 0 }
0x2f2d   : > { %v10505_v47 = vsel %vm825_vm0, %v10476_v21, 0 }
0x2f2e   : > { %17203 = vmatpush3.bf16.xpose.msra.mxu0 %v10502_v39 }
0x2f2f   : > { %17738 = vmatprep.subr.msk.bf16.mxu0 %vm825_vm0, %v10476_v21 }
0x2f36   : > { %17205 = vmatpush3.bf16.xpose.msra.mxu0 %v10505_v47 }
0x2f37   : > { %17739 = vmatprep.subr.msk.bf16.mxu0 %vm825_vm0, %v10477_v16 }
0x2f3e   : > { %17207 = vmatpush3.bf16.xpose.msra.mxu0 %v10508_v42 }
0x2f3f   : > { %17256 = vmatprep.subr.bf16.mxu0 %v18142_v12 }
0x2f45   : > { %17209 = vmatmul.mubr.msk.bf16.vlgmr.msra.gmra.mrb[224].mxu0 %vm825_vm0, %v10471_v26  ;;  %v18138_v26 = vld [vmem:[%s22327_s5 + $0x20] sm:$0xff]  }
0x2f46   : > { %17212 = vmatprep.mubr.msk.bf16.mxu0 %vm825_vm0, %v10472_v49  ;;  %17184 = vmatprep.subr.bf16.mxu1 %v18138_v26 }
0x2f47   : > { %17185 = vmatpush3.bf16.msra.mxu1 %v18138_v26  ;;  %17257 = vmatpush3.bf16.msra.mxu0 %v18142_v12 }
0x2f48   : > { %17186 = vmatprep.subr.bf16.mxu1 %v18139_v7  ;;  %17258 = vmatprep.subr.bf16.mxu0 %v18143_v17 }
0x2f4b   : > { %17187 = vmatpush3.bf16.msra.mxu1 %v18139_v7  ;;  %17259 = vmatpush3.bf16.msra.mxu0 %v18143_v17 }
0x2f4c   : > { %17188 = vmatprep.subr.bf16.mxu1 %v18140_v3  ;;  %17260 = vmatprep.subr.bf16.mxu0 %v18144_v18 }
0x2f4d   : > { %17213 = vmatmul.mubr.msk.bf16.gmra.mrb[228].mxu0 %vm825_vm0, %v10473_v27 }
0x2f4e   : > { %17272 = vmatprep.mubr.bf16.mxu0 %v21470_v60 }
0x2f4f   : > { %17189 = vmatpush3.bf16.msra.mxu1 %v18140_v3  ;;  %17261 = vmatpush3.bf16.msra.mxu0 %v18144_v18 }
0x2f50   : > { %17190 = vmatprep.subr.bf16.mxu1 %v18141_v43  ;;  %17262 = vmatprep.subr.bf16.mxu0 %v18145_v33 }
0x2f53   : > { %17191 = vmatpush3.bf16.msra.mxu1 %v18141_v43  ;;  %17263 = vmatpush3.bf16.msra.mxu0 %v18145_v33 }
0x2f54   : > { %17264 = vmatprep.subr.bf16.mxu0 %v18146_v29 }
0x2f56   : > { %17193 = vmatmul.mubr.bf16.vlgmr.msra.gmra.mrb[40].mxu1 %v21495_v38 }
0x2f57   : > { %17196 = vmatprep.mubr.bf16.mxu1 %v21497_v56  ;;  %17265 = vmatpush3.bf16.msra.mxu0 %v18146_v29 }
0x2f5e   : > { %17197 = vmatmul.mubr.bf16.gmra.mrb[44].mxu1 %v21503_v13 }
0x3018   : > { %v17210_v23 = vpop.f32.mrb[224].mxu0 }
0x3019   : > { %v10544_v9 = vpop.f32.mrb[225].mxu0  ;;  %v21625_v49 = vadd.f32 %v17210_v23, %v10480_v31 }
0x301a   : > { %v21620_v59 = vadd.f32 %v10544_v9, %v10478_v55  ;;  %v17211_v36 = vpop.f32.mrb[226].mxu0 }
0x301b   : > { %v10547_v27 = vpop.f32.mrb[227].mxu0  ;;  %v21631_v46 = vadd.f32 %v17211_v36, %v10481_v24  ;;  %v10581_v58 = vsel %vm915_vm1, %v21625_v49, -inf }
0x301c   : > { %v21627_v50 = vadd.f32 %v10547_v27, %v10479_v57  ;;  %v10575_v41 = vsel %vm915_vm1, %v21620_v59, -inf }
0x301d   : > { %10576 = vmax.xlane.f32.xlu0 %v10575_v41  ;;  %v10584_v54 = vsel %vm915_vm1, %v21631_v46, -inf }
0x301e   : > { %v10578_v52 = vsel %vm915_vm1, %v21627_v50, -inf }
0x301f   : > { %10579 = vmax.xlane.f32.xlu1 %v10578_v52 }
0x3020   : > { %v17214_v61 = vpop.f32.mrb[228].mxu0 }
0x3021   : > { %v10560_v62 = vpop.f32.mrb[229].mxu0  ;;  %10582 = vmax.xlane.f32.xlu0 %v10581_v58  ;;  %v21649_v63 = vadd.f32 %v17214_v61, %v10484_v44 }
0x3022   : > { %v21651_v8 = vadd.f32 %v10560_v62, %v10482_v48  ;;  %v17215_v11 = vpop.f32.mrb[230].mxu0 }
0x3023   : > { %v10563_v1 = vpop.f32.mrb[231].mxu0  ;;  %10585 = vmax.xlane.f32.xlu1 %v10584_v54  ;;  %v21655_v6 = vadd.f32 %v17215_v11, %v10485_v45  ;;  %v10593_v14 = vsel %vm915_vm1, %v21649_v63, -inf }
0x3024   : > { %v21657_v10 = vadd.f32 %v10563_v1, %v10483_v53  ;;  %v10587_v0 = vsel %vm915_vm1, %v21651_v8, -inf }
0x3025   : > { %10588 = vmax.xlane.f32.xlu0 %v10587_v0  ;;  %v10596_v19 = vsel %vm915_vm1, %v21655_v6, -inf }
0x3026   : > { %v10590_v2 = vsel %vm915_vm1, %v21657_v10, -inf }
0x3027   : > { %10591 = vmax.xlane.f32.xlu1 %v10590_v2 }
0x3029   : > { %10594 = vmax.xlane.f32.xlu0 %v10593_v14  ;;  %v17194_v32 = vpop.f32.mrb[40].mxu1 }
0x302a   : > { %v10440_v25 = vadd.f32 %v17194_v32, %v14459_v35  ;;  %v10431_v34 = vpop.f32.mrb[41].mxu1 }
0x302b   : > { %10597 = vmax.xlane.f32.xlu1 %v10596_v19  ;;  %v10432_v40 = vadd.f32 %v14459_v35, %v10431_v34  ;;  %v17195_v5 = vpop.f32.mrb[42].mxu1  ;;  %v18149_v34 = vld [vmem:[%s22325_s3 + $0x78] sm:$0xff]  }
0x302c   : > { %v10443_v22 = vadd.f32 %v17195_v5, %v14459_v35  ;;  %v10434_v28 = vpop.f32.mrb[43].mxu1 }
0x302d   : > { %v10435_v4 = vadd.f32 %v14459_v35, %v10434_v28 }
0x302e   : > { %v10668_v30 = vpack.c.bf16 %v10443_v22, %v10440_v25  ;;  %v18148_v25 = vld [vmem:[%s22325_s3 + $0x70] sm:$0xff]  }
0x302f   : > { %v10667_v16 = vpack.c.bf16 %v10435_v4, %v10432_v40  ;;  %v18150_v40 = vld [vmem:[%s22323_s1 + $0x40] sm:$0xff]  }
0x3031   : > { %v17198_v21 = vpop.f32.mrb[44].mxu1  ;;  %17216 = vmatprep.subr.bf16.mxu1 %v10667_v16 }
0x3032   : > { %v10456_v39 = vadd.f32 %v17198_v21, %v14459_v35  ;;  %v10447_v47 = vpop.f32.mrb[45].mxu1  ;;  %17217 = vmatpush3.bf16.msra.mxu1 %v10667_v16 }
0x3033   : > { %v10448_v20 = vadd.f32 %v14459_v35, %v10447_v47  ;;  %v17199_v51 = vpop.f32.mrb[46].mxu1  ;;  %17218 = vmatprep.subr.bf16.mxu1 %v10668_v30 }
0x3034   : > { %v10459_v37 = vadd.f32 %v17199_v51, %v14459_v35  ;;  %v10450_v26 = vpop.f32.mrb[47].mxu1 }
0x3035   : > { %v10451_v3 = vadd.f32 %v14459_v35, %v10450_v26  ;;  %v18147_v35 = vld [vmem:[%s22325_s3 + $0x68] sm:$0xff]  }
0x3036   : > { %v10670_v23 = vpack.c.bf16 %v10459_v37, %v10456_v39  ;;  %17219 = vmatpush3.bf16.msra.mxu1 %v10668_v30  ;;  %17266 = vmatprep.subr.bf16.mxu0 %v18147_v35 }
0x3037   : > { %v10669_v9 = vpack.c.bf16 %v10451_v3, %v10448_v20  ;;  %17267 = vmatpush3.bf16.msra.mxu0 %v18147_v35 }
0x3038   : > { %17268 = vmatprep.subr.bf16.mxu0 %v18148_v25 }
0x3039   : > { %17220 = vmatprep.subr.bf16.mxu1 %v10669_v9 }
0x303a   : > { %17221 = vmatpush3.bf16.msra.mxu1 %v10669_v9 }
0x303b   : > { %17222 = vmatprep.subr.bf16.mxu1 %v10670_v23  ;;  %17269 = vmatpush3.bf16.msra.mxu0 %v18148_v25 }
0x303c   : > { %17270 = vmatprep.subr.bf16.mxu0 %v18149_v34 }
0x303e   : > { %17223 = vmatpush3.bf16.msra.mxu1 %v10670_v23  ;;  %v18151_v23 = vld [vmem:[%s22323_s1 + $0x48] sm:$0xff]  }
0x303f   : > { %17271 = vmatpush3.bf16.msra.mxu0 %v18149_v34  ;;  %17232 = vmatprep.subr.bf16.mxu1 %v18150_v40 }
0x3042   : > { %17273 = vmatmul.mubr.bf16.vlgmr.msra.gmra.mrb[232].mxu0 %v21495_v38 }
0x3043   : > { %17276 = vmatprep.mubr.bf16.mxu0 %v21497_v56 }
0x304a   : > { %17277 = vmatmul.mubr.bf16.gmra.mrb[236].mxu0 %v21503_v13 }
0x30aa   : > { %v10577_v42 = vpop.xlane.xlu0 %10576 }
0x30ab   : > { %v10599_v15 = vsub.f32 %v21620_v59, %v10577_v42 }
0x30ac   : > { %v10580_v7 = vpop.xlane.xlu1 %10579 }
0x30ad   : > { %v10607_v43 = vmul.f32 1.442695, %v10599_v15  ;;  %v10600_v55 = vsub.f32 %v21627_v50, %v10580_v7 }
0x30ae   : > { %v10583_v31 = vpop.xlane.xlu0 %10582 }
0x30af   : > { %18606 = vpow2.f32 %v10607_v43  ;;  %v10609_v57 = vmul.f32 1.442695, %v10600_v55  ;;  %v10601_v36 = vsub.f32 %v21625_v49, %v10583_v31 }
0x30b0   : > { %v10586_v24 = vpop.xlane.xlu1 %10585 }
0x30b1   : > { %18608 = vpow2.f32 %v10609_v57  ;;  %v10611_v27 = vmul.f32 1.442695, %v10601_v36  ;;  %v10602_v59 = vsub.f32 %v21631_v46, %v10586_v24 }
0x30b2   : > { %v10589_v41 = vpop.xlane.xlu0 %10588 }
0x30b3   : > { %18610 = vpow2.f32 %v10611_v27  ;;  %v10613_v52 = vmul.f32 1.442695, %v10602_v59  ;;  %v10603_v50 = vsub.f32 %v21651_v8, %v10589_v41  ;;  %v18152_v27 = vld [vmem:[%s22323_s1 + $0x50] sm:$0xff]  }
0x30b4   : > { %v10592_v44 = vpop.xlane.xlu1 %10591 }
0x30b5   : > { %18612 = vpow2.f32 %v10613_v52  ;;  %v10615_v48 = vmul.f32 1.442695, %v10603_v50  ;;  %v10604_v61 = vsub.f32 %v21657_v10, %v10592_v44  ;;  %v18153_v44 = vld [vmem:[%s22323_s1 + $0x58] sm:$0xff]  }
0x30b6   : > { %v10595_v49 = vpop.xlane.xlu0 %10594 }
0x30b7   : > { %18614 = vpow2.f32 %v10615_v48  ;;  %v10617_v58 = vmul.f32 1.442695, %v10604_v61  ;;  %v10605_v62 = vsub.f32 %v21649_v63, %v10595_v49  ;;  %v18154_v48 = vld [vmem:[%s22323_s1 + $0x60] sm:$0xff]   ;;  %v18155_v61 = vld [vmem:[%s22323_s1 + $0x68] sm:$0xff]   ;;  %v18156_v49 = vld [vmem:[%s22323_s1 + $0x70] sm:$0xff]  }
0x30b8   : > { %v10598_v45 = vpop.xlane.xlu1 %10597 }
0x30b9   : > { %v18607_v46 = vpop.eup %18606  ;;  %18616 = vpow2.f32 %v10617_v58  ;;  %v10619_v53 = vmul.f32 1.442695, %v10605_v62  ;;  %v10606_v11 = vsub.f32 %v21655_v6, %v10598_v45  ;;  %v18157_v58 = vld [vmem:[%s22323_s1 + $0x78] sm:$0xff]   ;;  %v14518_v62 = vld [vmem:[%s22326_s4 + $0x1] ss:$0 sm:$0xff] }
0x30ba   : > { %v10623_v54 = vsel %vm915_vm1, %v18607_v46, 0.0 }
0x30bb   : > { %v18609_v8 = vpop.eup %18608  ;;  %18618 = vpow2.f32 %v10619_v53  ;;  %v10621_v1 = vmul.f32 1.442695, %v10606_v11  ;;  %10624 = vadd.xlane.f32.xlu0 %v10623_v54 }
0x30bc   : > { %v10626_v10 = vsel %vm915_vm1, %v18609_v8, 0.0 }
0x30bd   : > { %v18611_v0 = vpop.eup %18610  ;;  %18620 = vpow2.f32 %v10621_v1  ;;  %10627 = vadd.xlane.f32.xlu1 %v10626_v10 }
0x30be   : > { %v10629_v2 = vsel %vm915_vm1, %v18611_v0, 0.0 }
0x30bf   : > { %v18613_v63 = vpop.eup %18612  ;;  %10630 = vadd.xlane.f32.xlu0 %v10629_v2 }
0x30c0   : > { %v10632_v14 = vsel %vm915_vm1, %v18613_v63, 0.0 }
0x30c1   : > { %v18615_v19 = vpop.eup %18614  ;;  %10633 = vadd.xlane.f32.xlu1 %v10632_v14 }
0x30c2   : > { %v10635_v6 = vsel %vm915_vm1, %v18615_v19, 0.0 }
0x30c3   : > { %v18617_v12 = vpop.eup %18616  ;;  %10636 = vadd.xlane.f32.xlu0 %v10635_v6 }
0x30c4   : > { %v10638_v17 = vsel %vm915_vm1, %v18617_v12, 0.0 }
0x30c5   : > { %v18619_v18 = vpop.eup %18618  ;;  %10639 = vadd.xlane.f32.xlu1 %v10638_v17 }
0x30c6   : > { %v10641_v33 = vsel %vm915_vm1, %v18619_v18, 0.0 }
0x30c7   : > { %v18621_v29 = vpop.eup %18620  ;;  %10642 = vadd.xlane.f32.xlu0 %v10641_v33 }
0x30c8   : > { %v10644_v32 = vsel %vm915_vm1, %v18621_v29, 0.0 }
0x30c9   : > { %10645 = vadd.xlane.f32.xlu1 %v10644_v32 }
0x3115   : > { %v17274_v45 = vpop.f32.mrb[232].mxu0 }
0x3116   : > { %v10997_v53 = vpop.f32.mrb[233].mxu0 }
0x3117   : > { %v10998_v11 = vadd.f32 %v14518_v62, %v10997_v53  ;;  %v17275_v54 = vpop.f32.mrb[234].mxu0 }
0x3118   : > { %v11000_v1 = vpop.f32.mrb[235].mxu0 }
0x3119   : > { %v11001_v10 = vadd.f32 %v14518_v62, %v11000_v1  ;;  %v18159_v1 = vld [vmem:[%s22327_s5 + $0x48] sm:$0xff]  }
0x311b   : > { %v11176_v2 = vpack.c.bf16 %v11001_v10, %v10998_v11  ;;  %v18160_v10 = vld [vmem:[%s22327_s5 + $0x50] sm:$0xff]  }
0x311d   : > { %17740 = vmatprep.subr.msk.bf16.mxu0 %vm825_vm0, %v11176_v2  ;;  %v17278_v14 = vpop.f32.mrb[236].mxu0 }
0x311e   : > { %v11013_v6 = vpop.f32.mrb[237].mxu0 }
0x311f   : > { %v17279_v17 = vpop.f32.mrb[238].mxu0 }
0x3120   : > { %v11025_v33 = vadd.f32 %v17279_v17, %v14518_v62  ;;  %v14555_v17 = vld [vmem:[%s22329_s7 + $0x50] sm:$0xff] }
0x3148   : > { %v10625_v5 = vpop.xlane.xlu0 %10624 }
0x3149   : > { %18622 = vrcp.f32 %v10625_v5 }
0x314a   : > { %v10628_v22 = vpop.xlane.xlu1 %10627 }
0x314b   : > { %18624 = vrcp.f32 %v10628_v22 }
0x314c   : > { %v10631_v28 = vpop.xlane.xlu0 %10630 }
0x314d   : > { %18626 = vrcp.f32 %v10631_v28 }
0x314e   : > { %v10634_v4 = vpop.xlane.xlu1 %10633 }
0x314f   : > { %18628 = vrcp.f32 %v10634_v4 }
0x3150   : > { %v10637_v30 = vpop.xlane.xlu0 %10636 }
0x3151   : > { %18630 = vrcp.f32 %v10637_v30 }
0x3152   : > { %v10640_v16 = vpop.xlane.xlu1 %10639 }
0x3153   : > { %v18623_v21 = vpop.eup %18622  ;;  %18632 = vrcp.f32 %v10640_v16 }
0x3154   : > { %v10643_v39 = vpop.xlane.xlu0 %10642  ;;  %v10648_v20 = vmul.f32 %v18623_v21, %v18607_v46  ;;  %v11006_v46 = vadd.f32 %v17274_v45, %v14518_v62 }
0x3155   : > { %v18625_v47 = vpop.eup %18624  ;;  %18634 = vrcp.f32 %v10643_v39 }
0x3156   : > { %v10646_v42 = vpop.xlane.xlu1 %10645  ;;  %v10650_v51 = vmul.f32 %v18625_v47, %v18609_v8  ;;  %v11009_v8 = vadd.f32 %v17275_v54, %v14518_v62 }
0x3157   : > { %v18627_v15 = vpop.eup %18626  ;;  %18636 = vrcp.f32 %v10646_v42 }
0x3158   : > { %v10663_v37 = vpack.c.bf16 %v10650_v51, %v10648_v20  ;;  %v10652_v7 = vmul.f32 %v18627_v15, %v18611_v0  ;;  %v11177_v0 = vpack.c.bf16 %v11009_v8, %v11006_v46  ;;  %v14492_v15 = vld [vmem:[#allocation2 + $0x1] ss:$0 sm:$0xff] }
0x3159   : > { %v18629_v26 = vpop.eup %18628  ;;  %v18158_v8 = vld [vmem:[%s22327_s5 + $0x40] sm:$0xff]  }
0x315a   : > { %v10654_v3 = vmul.f32 %v18629_v26, %v18613_v63  ;;  %17224 = vmatprep.mubr.msk.bf16.mxu1 %vm915_vm1, %v10663_v37  ;;  %v11201_v63 = vsel %vm825_vm0, %v11176_v2, 0  ;;  %v18162_v2 = vld [vmem:[%s22327_s5 + $0x60] sm:$0xff]  }
0x315b   : > { %v18631_v43 = vpop.eup %18630  ;;  %17305 = vmatpush3.bf16.xpose.msra.mxu0 %v11201_v63  ;;  %v18163_v63 = vld [vmem:[%s22327_s5 + $0x68] sm:$0xff]  }
0x315c   : > { %v10664_v55 = vpack.c.bf16 %v10654_v3, %v10652_v7  ;;  %v10656_v9 = vmul.f32 %v18631_v43, %v18615_v19  ;;  %17741 = vmatprep.subr.msk.bf16.mxu0 %vm825_vm0, %v11177_v0  ;;  %v11022_v19 = vadd.f32 %v17278_v14, %v14518_v62  ;;  %v18164_v14 = vld [vmem:[%s22327_s5 + $0x70] sm:$0xff]  }
0x315d   : > { %v18633_v31 = vpop.eup %18632 }
0x315e   : > { %17225 = vmatmul.mubr.msk.bf16.vlgmr.msra.gmra.mrb[48].mxu1 %vm915_vm1, %v10664_v55  ;;  %v10658_v57 = vmul.f32 %v18633_v31, %v18617_v12  ;;  %v11204_v12 = vsel %vm825_vm0, %v11177_v0, 0  ;;  %v11179_v35 = vpack.c.bf16 %v11025_v33, %v11022_v19  ;;  %v18161_v0 = vld [vmem:[%s22327_s5 + $0x58] sm:$0xff]   ;;  %v14554_v33 = vld [vmem:[%s22329_s7 + $0x48] sm:$0xff] }
0x315f   : > { %v18635_v36 = vpop.eup %18634  ;;  %17233 = vmatpush3.bf16.msra.mxu1 %v18150_v40  ;;  %v18165_v19 = vld [vmem:[%s22327_s5 + $0x78] sm:$0xff]  }
0x3160   : > { %17234 = vmatprep.subr.bf16.mxu1 %v18151_v23  ;;  %v10665_v24 = vpack.c.bf16 %v10658_v57, %v10656_v9  ;;  %v10660_v41 = vmul.f32 %v18635_v36, %v18619_v18  ;;  %v11014_v18 = vadd.f32 %v14518_v62, %v11013_v6  ;;  %v11210_v40 = vsel %vm825_vm0, %v11179_v35, 0  ;;  %v14553_v6 = vld [vmem:[%s22329_s7 + $0x40] sm:$0xff] }
0x3161   : > { %v18637_v59 = vpop.eup %18636 }
0x3162   : > { %v10662_v52 = vmul.f32 %v18637_v59, %v18621_v29  ;;  %17228 = vmatprep.mubr.msk.bf16.mxu1 %vm915_vm1, %v10665_v24  ;;  %v11016_v29 = vpop.f32.mrb[239].mxu0 }
0x3163   : > { %17235 = vmatpush3.bf16.msra.mxu1 %v18151_v23  ;;  %17307 = vmatpush3.bf16.xpose.msra.mxu0 %v11204_v12  ;;  %v11017_v32 = vadd.f32 %v14518_v62, %v11016_v29 }
0x3164   : > { %v10666_v50 = vpack.c.bf16 %v10662_v52, %v10660_v41  ;;  %17236 = vmatprep.subr.bf16.mxu1 %v18152_v27 }
0x3165   : > { %v11178_v25 = vpack.c.bf16 %v11017_v32, %v11014_v18  ;;  %v14556_v32 = vld [vmem:[%s22329_s7 + $0x58] sm:$0xff] }
0x3166   : > { %17229 = vmatmul.mubr.msk.bf16.gmra.mrb[52].mxu1 %vm915_vm1, %v10666_v50 }
0x3167   : > { %17237 = vmatpush3.bf16.msra.mxu1 %v18152_v27  ;;  %17248 = vmatprep.mubr.bf16.mxu1 %v21470_v60  ;;  %v11207_v34 = vsel %vm825_vm0, %v11178_v25, 0 }
0x3168   : > { %17238 = vmatprep.subr.bf16.mxu1 %v18153_v44  ;;  %17742 = vmatprep.subr.msk.bf16.mxu0 %vm825_vm0, %v11178_v25 }
0x316b   : > { %17239 = vmatpush3.bf16.msra.mxu1 %v18153_v44  ;;  %17309 = vmatpush3.bf16.xpose.msra.mxu0 %v11207_v34 }
0x316c   : > { %17240 = vmatprep.subr.bf16.mxu1 %v18154_v48  ;;  %17743 = vmatprep.subr.msk.bf16.mxu0 %vm825_vm0, %v11179_v35 }
0x316f   : > { %17241 = vmatpush3.bf16.msra.mxu1 %v18154_v48 }
0x3170   : > { %17242 = vmatprep.subr.bf16.mxu1 %v18155_v61 }
0x3173   : > { %17243 = vmatpush3.bf16.msra.mxu1 %v18155_v61  ;;  %17311 = vmatpush3.bf16.xpose.msra.mxu0 %v11210_v40 }
0x3174   : > { %17244 = vmatprep.subr.bf16.mxu1 %v18156_v49 }
0x3177   : > { %17245 = vmatpush3.bf16.msra.mxu1 %v18156_v49 }
0x3178   : > { %17246 = vmatprep.subr.bf16.mxu1 %v18157_v58 }
0x317b   : > { %17247 = vmatpush3.bf16.msra.mxu1 %v18157_v58 }
0x317c   : > { %17280 = vmatprep.subr.bf16.mxu1 %v18158_v8 }
0x317e   : > { %17249 = vmatmul.mubr.bf16.vlgmr.msra.gmra.mrb[56].mxu1 %v21495_v38 }
0x317f   : > { %17252 = vmatprep.mubr.bf16.mxu1 %v21497_v56  ;;  %17281 = vmatpush3.bf16.msra.mxu1 %v18158_v8 }
0x3180   : > { %17282 = vmatprep.subr.bf16.mxu1 %v18159_v1 }
0x3183   : > { %17283 = vmatpush3.bf16.msra.mxu1 %v18159_v1 }
0x3184   : > { %17284 = vmatprep.subr.bf16.mxu1 %v18160_v10 }
0x3186   : > { %17253 = vmatmul.mubr.bf16.gmra.mrb[60].mxu1 %v21503_v13 }
0x3187   : > { %17296 = vmatprep.mubr.bf16.mxu1 %v21470_v60  ;;  %17285 = vmatpush3.bf16.msra.mxu1 %v18160_v10 }
0x3188   : > { %17286 = vmatprep.subr.bf16.mxu1 %v18161_v0 }
0x318b   : > { %17287 = vmatpush3.bf16.msra.mxu1 %v18161_v0 }
0x318c   : > { %17288 = vmatprep.subr.bf16.mxu1 %v18162_v2 }
0x318f   : > { %17289 = vmatpush3.bf16.msra.mxu1 %v18162_v2 }
0x3190   : > { %17290 = vmatprep.subr.bf16.mxu1 %v18163_v63 }
0x3193   : > { %17291 = vmatpush3.bf16.msra.mxu1 %v18163_v63 }
0x3194   : > { %17292 = vmatprep.subr.bf16.mxu1 %v18164_v14 }
0x3197   : > { %17293 = vmatpush3.bf16.msra.mxu1 %v18164_v14 }
0x3198   : > { %17294 = vmatprep.subr.bf16.mxu1 %v18165_v19 }
0x319b   : > { %17295 = vmatpush3.bf16.msra.mxu1 %v18165_v19 }
0x319e   : > { %17297 = vmatmul.mubr.bf16.vlgmr.msra.gmra.mrb[64].mxu1 %v21495_v38 }
0x319f   : > { %17300 = vmatprep.mubr.bf16.mxu1 %v21497_v56 }
0x31a6   : > { %17301 = vmatmul.mubr.bf16.gmra.mrb[68].mxu1 %v21503_v13 }
0x3231   : > { %v21757_v5 = vpop.f32.mrb[48].mxu1 }
0x3232   : > { %v21759_v22 = vpop.f32.mrb[49].mxu1 }
0x3233   : > { %v21761_v28 = vpop.f32.mrb[50].mxu1 }
0x3234   : > { %v10749_v4 = vpack.c.bf16 %v21761_v28, %v21757_v5  ;;  %v21765_v30 = vpop.f32.mrb[51].mxu1  ;;  %v18174_v5 = vld [vmem:[%s22325_s3 + $0xa0] sm:$0xff]   ;;  %v18175_v28 = vld [vmem:[%s22325_s3 + $0xa8] sm:$0xff]  }
0x3235   : > { %v10748_v16 = vpack.c.bf16 %v21765_v30, %v21759_v22  ;;  %v18172_v22 = vld [vmem:[%s22325_s3 + $0x90] sm:$0xff]   ;;  %v18173_v30 = vld [vmem:[%s22325_s3 + $0x98] sm:$0xff]  }
0x3239   : > { %v21769_v21 = vpop.f32.mrb[52].mxu1 }
0x323a   : > { %v21771_v39 = vpop.f32.mrb[53].mxu1 }
0x323b   : > { %v21773_v47 = vpop.f32.mrb[54].mxu1 }
0x323c   : > { %v10751_v42 = vpack.c.bf16 %v21773_v47, %v21769_v21  ;;  %v21777_v20 = vpop.f32.mrb[55].mxu1  ;;  %v14601_v21 = vld [vmem:[#allocation2 + $0x2] ss:$0 sm:$0xff] }
0x323d   : > { %v10750_v51 = vpack.c.bf16 %v21777_v20, %v21771_v39 }
0x3251   : > { %v17250_v37 = vpop.f32.mrb[56].mxu1 }
0x3252   : > { %v10870_v26 = vadd.f32 %v17250_v37, %v14492_v15  ;;  %v10861_v7 = vpop.f32.mrb[57].mxu1 }
0x3253   : > { %v10862_v3 = vadd.f32 %v14492_v15, %v10861_v7  ;;  %v17251_v43 = vpop.f32.mrb[58].mxu1  ;;  %v14557_v7 = vld [vmem:[%s22329_s7 + $0x60] sm:$0xff] }
0x3254   : > { %v10873_v55 = vadd.f32 %v17251_v43, %v14492_v15  ;;  %v10864_v23 = vpop.f32.mrb[59].mxu1  ;;  %v11166_v9 = vmul.f32 0.17677669, %v10870_v26 }
0x3255   : > { %v10865_v31 = vadd.f32 %v14492_v15, %v10864_v23  ;;  %v11164_v36 = vmul.f32 0.17677669, %v10862_v3 }
0x3256   : > { %v11167_v57 = vmul.f32 0.17677669, %v10873_v55  ;;  %v14559_v55 = vld [vmem:[%s22329_s7 + $0x70] sm:$0xff] }
0x3257   : > { %v11165_v24 = vmul.f32 0.17677669, %v10865_v31  ;;  %v14558_v31 = vld [vmem:[%s22329_s7 + $0x68] sm:$0xff] }
0x3258   : > { %v11173_v27 = vpack.c.bf16 %v11167_v57, %v11166_v9 }
0x3259   : > { %v11172_v59 = vpack.c.bf16 %v11165_v24, %v11164_v36  ;;  %v17254_v41 = vpop.f32.mrb[60].mxu1  ;;  %v14560_v24 = vld [vmem:[%s22329_s7 + $0x78] sm:$0xff] }
0x325a   : > { %v10886_v52 = vadd.f32 %v17254_v41, %v14492_v15  ;;  %v10877_v50 = vpop.f32.mrb[61].mxu1 }
0x325b   : > { %v10878_v44 = vadd.f32 %v14492_v15, %v10877_v50  ;;  %v17255_v48 = vpop.f32.mrb[62].mxu1  ;;  %17312 = vmatprep.mubr.msk.bf16.mxu0 %vm825_vm0, %v11172_v59 }
0x325c   : > { %v10889_v61 = vadd.f32 %v17255_v48, %v14492_v15  ;;  %v10880_v49 = vpop.f32.mrb[63].mxu1  ;;  %17313 = vmatmul.mubr.msk.bf16.vlgmr.msra.gmra.mrb[240].mxu0 %vm825_vm0, %v11173_v27  ;;  %v11170_v62 = vmul.f32 0.17677669, %v10886_v52 }
0x325d   : > { %v10881_v58 = vadd.f32 %v14492_v15, %v10880_v49  ;;  %v11168_v46 = vmul.f32 0.17677669, %v10878_v44  ;;  %v14544_v49 = vld [vmem:[%s22328_s6 + $0x1] ss:$0 sm:$0xff] }
0x325e   : > { %v11171_v45 = vmul.f32 0.17677669, %v10889_v61 }
0x325f   : > { %v11169_v53 = vmul.f32 0.17677669, %v10881_v58 }
0x3260   : > { %v11175_v11 = vpack.c.bf16 %v11171_v45, %v11170_v62 }
0x3261   : > { %v11174_v54 = vpack.c.bf16 %v11169_v53, %v11168_v46 }
0x3263   : > { %17316 = vmatprep.mubr.msk.bf16.mxu0 %vm825_vm0, %v11174_v54 }
0x3264   : > { %17317 = vmatmul.mubr.msk.bf16.gmra.mrb[244].mxu0 %vm825_vm0, %v11175_v11 }
0x3271   : > { %v17298_v58 = vpop.f32.mrb[64].mxu1 }
0x3272   : > { %v11142_v62 = vadd.f32 %v17298_v58, %v14544_v49  ;;  %v11133_v45 = vpop.f32.mrb[65].mxu1 }
0x3273   : > { %v11134_v46 = vadd.f32 %v14544_v49, %v11133_v45  ;;  %v17299_v53 = vpop.f32.mrb[66].mxu1 }
0x3274   : > { %v11145_v11 = vadd.f32 %v17299_v53, %v14544_v49  ;;  %v11136_v54 = vpop.f32.mrb[67].mxu1 }
0x3275   : > { %v11137_v8 = vadd.f32 %v14544_v49, %v11136_v54 }
0x3276   : > { %v11370_v1 = vpack.c.bf16 %v11145_v11, %v11142_v62 }
0x3277   : > { %v11369_v10 = vpack.c.bf16 %v11137_v8, %v11134_v46 }
0x3279   : > { %v17302_v0 = vpop.f32.mrb[68].mxu1  ;;  %17320 = vmatprep.subr.bf16.mxu1 %v11369_v10 }
0x327a   : > { %v11158_v2 = vadd.f32 %v17302_v0, %v14544_v49  ;;  %v11149_v63 = vpop.f32.mrb[69].mxu1  ;;  %17321 = vmatpush3.bf16.msra.mxu1 %v11369_v10 }
0x327b   : > { %v11150_v19 = vadd.f32 %v14544_v49, %v11149_v63  ;;  %17322 = vmatprep.subr.bf16.mxu1 %v11370_v1  ;;  %v18166_v63 = vld [vmem:[%s22330_s8 + $0x10] sm:$0xff]  }
0x327c   : > { %17336 = vmatprep.subr.bf16.mxu0 %v18166_v63 }
0x327d   : > { %17337 = vmatpush3.bf16.msra.mxu0 %v18166_v63  ;;  %v18170_v63 = vld [vmem:[%s22325_s3 + $0x80] sm:$0xff]  }
0x327e   : > { %17323 = vmatpush3.bf16.msra.mxu1 %v11370_v1 }
0x332f   : > { %v17314_v12 = vpop.f32.mrb[240].mxu0 }
0x3330   : > { %v11246_v18 = vpop.f32.mrb[241].mxu0  ;;  %v21824_v34 = vadd.f32 %v17314_v12, %v14555_v17 }
0x3331   : > { %v11247_v29 = vadd.f32 %v14553_v6, %v11246_v18  ;;  %v17315_v35 = vpop.f32.mrb[242].mxu0  ;;  %v17303_v6 = vpop.f32.mrb[70].mxu1 }
0x3332   : > { %v11249_v25 = vpop.f32.mrb[243].mxu0  ;;  %v21827_v37 = vadd.f32 %v17315_v35, %v14556_v32  ;;  %v11283_v43 = vsel %vm915_vm1, %v21824_v34, -inf  ;;  %v11161_v17 = vadd.f32 %v17303_v6, %v14544_v49  ;;  %v11152_v18 = vpop.f32.mrb[71].mxu1 }
0x3333   : > { %v11250_v40 = vadd.f32 %v14554_v33, %v11249_v25  ;;  %v11277_v15 = vsel %vm915_vm1, %v11247_v29, -inf  ;;  %v11153_v35 = vadd.f32 %v14544_v49, %v11152_v18 }
0x3334   : > { %11278 = vmax.xlane.f32.xlu0 %v11277_v15  ;;  %v11286_v36 = vsel %vm915_vm1, %v21827_v37, -inf  ;;  %v11372_v15 = vpack.c.bf16 %v11161_v17, %v11158_v2 }
0x3335   : > { %v11280_v26 = vsel %vm915_vm1, %v11250_v40, -inf }
0x3336   : > { %11281 = vmax.xlane.f32.xlu1 %v11280_v26 }
0x3337   : > { %v17318_v3 = vpop.f32.mrb[244].mxu0 }
0x3338   : > { %v11262_v23 = vpop.f32.mrb[245].mxu0  ;;  %11284 = vmax.xlane.f32.xlu0 %v11283_v43  ;;  %v21848_v59 = vadd.f32 %v17318_v3, %v14559_v55 }
0x3339   : > { %v21841_v9 = vadd.f32 %v14557_v7, %v11262_v23  ;;  %v17319_v57 = vpop.f32.mrb[246].mxu0  ;;  %v11371_v7 = vpack.c.bf16 %v11153_v35, %v11150_v19 }
0x333a   : > { %v11265_v27 = vpop.f32.mrb[247].mxu0  ;;  %11287 = vmax.xlane.f32.xlu1 %v11286_v36  ;;  %v21852_v50 = vadd.f32 %v17319_v57, %v14560_v24  ;;  %v11295_v48 = vsel %vm915_vm1, %v21848_v59, -inf }
0x333b   : > { %v11266_v41 = vadd.f32 %v14558_v31, %v11265_v27  ;;  %v11289_v52 = vsel %vm915_vm1, %v21841_v9, -inf  ;;  %17324 = vmatprep.subr.bf16.mxu1 %v11371_v7 }
0x333c   : > { %11290 = vmax.xlane.f32.xlu0 %v11289_v52  ;;  %v11298_v61 = vsel %vm915_vm1, %v21852_v50, -inf  ;;  %17325 = vmatpush3.bf16.msra.mxu1 %v11371_v7 }
0x333d   : > { %v11292_v44 = vsel %vm915_vm1, %v11266_v41, -inf  ;;  %17326 = vmatprep.subr.bf16.mxu1 %v11372_v15 }
0x333e   : > { %11293 = vmax.xlane.f32.xlu1 %v11292_v44 }
0x3340   : > { %11296 = vmax.xlane.f32.xlu0 %v11295_v48  ;;  %17327 = vmatpush3.bf16.msra.mxu1 %v11372_v15 }
0x3342   : > { %11299 = vmax.xlane.f32.xlu1 %v11298_v61 }
0x33c1   : > { %v11279_v14 = vpop.xlane.xlu0 %11278 }
0x33c2   : > { %v11301_v12 = vsub.f32 %v11247_v29, %v11279_v14  ;;  %v18167_v14 = vld [vmem:[%s22330_s8 + $0x18] sm:$0xff]  }
0x33c3   : > { %v11282_v33 = vpop.xlane.xlu1 %11281  ;;  %17338 = vmatprep.subr.bf16.mxu0 %v18167_v14 }
0x33c4   : > { %v11309_v32 = vmul.f32 1.442695, %v11301_v12  ;;  %v11302_v25 = vsub.f32 %v11250_v40, %v11282_v33  ;;  %17339 = vmatpush3.bf16.msra.mxu0 %v18167_v14 }
0x33c5   : > { %v11285_v26 = vpop.xlane.xlu0 %11284 }
0x33c6   : > { %18638 = vpow2.f32 %v11309_v32  ;;  %v11311_v3 = vmul.f32 1.442695, %v11302_v25  ;;  %v11303_v43 = vsub.f32 %v21824_v34, %v11285_v26 }
0x33c7   : > { %v11288_v55 = vpop.xlane.xlu1 %11287 }
0x33c8   : > { %18640 = vpow2.f32 %v11311_v3  ;;  %v11313_v23 = vmul.f32 1.442695, %v11303_v43  ;;  %v11304_v29 = vsub.f32 %v21827_v37, %v11288_v55 }
0x33c9   : > { %v11291_v31 = vpop.xlane.xlu0 %11290 }
0x33ca   : > { %18642 = vpow2.f32 %v11313_v23  ;;  %v11315_v57 = vmul.f32 1.442695, %v11304_v29  ;;  %v11305_v40 = vsub.f32 %v21841_v9, %v11291_v31 }
0x33cb   : > { %v11294_v36 = vpop.xlane.xlu1 %11293 }
0x33cc   : > { %18644 = vpow2.f32 %v11315_v57  ;;  %v11317_v24 = vmul.f32 1.442695, %v11305_v40  ;;  %v11306_v27 = vsub.f32 %v11266_v41, %v11294_v36 }
0x33cd   : > { %v11297_v52 = vpop.xlane.xlu0 %11296 }
0x33ce   : > { %18646 = vpow2.f32 %v11317_v24  ;;  %v11319_v34 = vmul.f32 1.442695, %v11306_v27  ;;  %v11307_v44 = vsub.f32 %v21848_v59, %v11297_v52 }
0x33cf   : > { %v11300_v48 = vpop.xlane.xlu1 %11299 }
0x33d0   : > { %v18639_v61 = vpop.eup %18638  ;;  %18648 = vpow2.f32 %v11319_v34  ;;  %v11321_v37 = vmul.f32 1.442695, %v11307_v44  ;;  %v11308_v49 = vsub.f32 %v21852_v50, %v11300_v48 }
0x33d1   : > { %v11325_v58 = vsel %vm915_vm1, %v18639_v61, 0.0 }
0x33d2   : > { %v18641_v62 = vpop.eup %18640  ;;  %18650 = vpow2.f32 %v11321_v37  ;;  %v11323_v9 = vmul.f32 1.442695, %v11308_v49  ;;  %11326 = vadd.xlane.f32.xlu0 %v11325_v58  ;;  %v18168_v37 = vld [vmem:[%s22330_s8] sm:$0xff]   ;;  %v18179_v58 = vld [vmem:[%s22323_s1 + $0x88] sm:$0xff]  }
0x33d3   : > { %v11328_v41 = vsel %vm915_vm1, %v18641_v62, 0.0  ;;  %17348 = vmatprep.subr.bf16.mxu0 %v18168_v37  ;;  %v18177_v49 = vld [vmem:[%s22323_s1 + $0x80] sm:$0xff]  }
0x33d4   : > { %v18643_v45 = vpop.eup %18642  ;;  %18652 = vpow2.f32 %v11323_v9  ;;  %11329 = vadd.xlane.f32.xlu1 %v11328_v41  ;;  %17360 = vmatprep.subr.bf16.mxu1 %v18177_v49  ;;  %v18181_v9 = vld [vmem:[%s22323_s1 + $0x98] sm:$0xff]   ;;  %v18182_v41 = vld [vmem:[%s22323_s1 + $0xa0] sm:$0xff]  }
0x33d5   : > { %v11331_v46 = vsel %vm915_vm1, %v18643_v45, 0.0 }
0x33d6   : > { %v18645_v59 = vpop.eup %18644  ;;  %11332 = vadd.xlane.f32.xlu0 %v11331_v46  ;;  %v18184_v46 = vld [vmem:[%s22323_s1 + $0xb0] sm:$0xff]  }
0x33d7   : > { %v11334_v53 = vsel %vm915_vm1, %v18645_v59, 0.0 }
0x33d8   : > { %v18647_v11 = vpop.eup %18646  ;;  %11335 = vadd.xlane.f32.xlu1 %v11334_v53 }
0x33d9   : > { %v11337_v50 = vsel %vm915_vm1, %v18647_v11, 0.0 }
0x33da   : > { %v18649_v54 = vpop.eup %18648  ;;  %11338 = vadd.xlane.f32.xlu0 %v11337_v50 }
0x33db   : > { %v11340_v8 = vsel %vm915_vm1, %v18649_v54, 0.0 }
0x33dc   : > { %v18651_v1 = vpop.eup %18650  ;;  %11341 = vadd.xlane.f32.xlu1 %v11340_v8 }
0x33dd   : > { %v11343_v10 = vsel %vm915_vm1, %v18651_v1, 0.0 }
0x33de   : > { %v18653_v0 = vpop.eup %18652  ;;  %11344 = vadd.xlane.f32.xlu0 %v11343_v10  ;;  %v18169_v10 = vld [vmem:[%s22330_s8 + $0x8] sm:$0xff]  }
0x33df   : > { %v11346_v2 = vsel %vm915_vm1, %v18653_v0, 0.0 }
0x33e0   : > { %11347 = vadd.xlane.f32.xlu1 %v11346_v2 }
0x345f   : > { %v11327_v19 = vpop.xlane.xlu0 %11326 }
0x3460   : > { %18654 = vrcp.f32 %v11327_v19 }
0x3461   : > { %v11330_v6 = vpop.xlane.xlu1 %11329 }
0x3462   : > { %18656 = vrcp.f32 %v11330_v6 }
0x3463   : > { %v11333_v12 = vpop.xlane.xlu0 %11332 }
0x3464   : > { %18658 = vrcp.f32 %v11333_v12 }
0x3465   : > { %v11336_v17 = vpop.xlane.xlu1 %11335 }
0x3466   : > { %18660 = vrcp.f32 %v11336_v17  ;;  %v18171_v17 = vld [vmem:[%s22325_s3 + $0x88] sm:$0xff]  }
0x3467   : > { %v11339_v18 = vpop.xlane.xlu0 %11338 }
0x3468   : > { %18662 = vrcp.f32 %v11339_v18 }
0x3469   : > { %v11342_v33 = vpop.xlane.xlu1 %11341 }
0x346a   : > { %v18655_v35 = vpop.eup %18654  ;;  %18664 = vrcp.f32 %v11342_v33 }
0x346b   : > { %v11345_v32 = vpop.xlane.xlu0 %11344  ;;  %v11350_v26 = vmul.f32 %v18655_v35, %v18639_v61 }
0x346c   : > { %v18657_v25 = vpop.eup %18656  ;;  %18666 = vrcp.f32 %v11345_v32 }
0x346d   : > { %v11348_v15 = vpop.xlane.xlu1 %11347  ;;  %v11352_v7 = vmul.f32 %v18657_v25, %v18641_v62  ;;  %v18180_v62 = vld [vmem:[%s22323_s1 + $0x90] sm:$0xff]  }
0x346e   : > { %v18659_v3 = vpop.eup %18658  ;;  %18668 = vrcp.f32 %v11348_v15 }
0x346f   : > { %v11365_v43 = vpack.c.bf16 %v11352_v7, %v11350_v26  ;;  %v11354_v23 = vmul.f32 %v18659_v3, %v18643_v45  ;;  %v18183_v45 = vld [vmem:[%s22323_s1 + $0xa8] sm:$0xff]  }
0x3470   : > { %v18661_v55 = vpop.eup %18660 }
0x3471   : > { %v11356_v29 = vmul.f32 %v18661_v55, %v18645_v59  ;;  %17328 = vmatprep.mubr.msk.bf16.mxu1 %vm915_vm1, %v11365_v43  ;;  %v18185_v59 = vld [vmem:[%s22323_s1 + $0xb8] sm:$0xff]  }
0x3472   : > { %v18663_v31 = vpop.eup %18662 }
0x3473   : > { %v11366_v57 = vpack.c.bf16 %v11356_v29, %v11354_v23  ;;  %v11358_v36 = vmul.f32 %v18663_v31, %v18647_v11 }
0x3474   : > { %v18665_v40 = vpop.eup %18664 }
0x3475   : > { %17329 = vmatmul.mubr.msk.bf16.vlgmr.msra.gmra.mrb[72].mxu1 %vm915_vm1, %v11366_v57  ;;  %v11360_v24 = vmul.f32 %v18665_v40, %v18649_v54 }
0x3476   : > { %v18667_v27 = vpop.eup %18666  ;;  %17361 = vmatpush3.bf16.msra.mxu1 %v18177_v49 }
0x3477   : > { %v11367_v52 = vpack.c.bf16 %v11360_v24, %v11358_v36  ;;  %v11362_v44 = vmul.f32 %v18667_v27, %v18651_v1  ;;  %17362 = vmatprep.subr.bf16.mxu1 %v18179_v58 }
0x3478   : > { %v18669_v34 = vpop.eup %18668 }
0x3479   : > { %v11364_v48 = vmul.f32 %v18669_v34, %v18653_v0  ;;  %17332 = vmatprep.mubr.msk.bf16.mxu1 %vm915_vm1, %v11367_v52 }
0x347a   : > { %17363 = vmatpush3.bf16.msra.mxu1 %v18179_v58 }
0x347b   : > { %v11368_v61 = vpack.c.bf16 %v11364_v48, %v11362_v44  ;;  %17364 = vmatprep.subr.bf16.mxu1 %v18180_v62 }
0x347d   : > { %17333 = vmatmul.mubr.msk.bf16.gmra.mrb[76].mxu1 %vm915_vm1, %v11368_v61 }
0x347e   : > { %17376 = vmatprep.mubr.bf16.mxu1 %v21470_v60  ;;  %17365 = vmatpush3.bf16.msra.mxu1 %v18180_v62 }
0x347f   : > { %17366 = vmatprep.subr.bf16.mxu1 %v18181_v9 }
0x3482   : > { %17367 = vmatpush3.bf16.msra.mxu1 %v18181_v9 }
0x3483   : > { %17368 = vmatprep.subr.bf16.mxu1 %v18182_v41 }
0x3486   : > { %17369 = vmatpush3.bf16.msra.mxu1 %v18182_v41 }
0x3487   : > { %17370 = vmatprep.subr.bf16.mxu1 %v18183_v45 }
0x348a   : > { %17371 = vmatpush3.bf16.msra.mxu1 %v18183_v45 }
0x348b   : > { %17372 = vmatprep.subr.bf16.mxu1 %v18184_v46 }
0x348e   : > { %17373 = vmatpush3.bf16.msra.mxu1 %v18184_v46 }
0x348f   : > { %17374 = vmatprep.subr.bf16.mxu1 %v18185_v59 }
0x3492   : > { %17375 = vmatpush3.bf16.msra.mxu1 %v18185_v59 }
0x3495   : > { %17377 = vmatmul.mubr.bf16.vlgmr.msra.gmra.mrb[80].mxu1 %v21495_v38 }
0x3496   : > { %17380 = vmatprep.mubr.bf16.mxu1 %v21497_v56 }
0x349d   : > { %17381 = vmatmul.mubr.bf16.gmra.mrb[84].mxu1 %v21503_v13 }
0x349e   : > { %17424 = vmatprep.mubr.bf16.mxu1 %v21470_v60 }
0x3548   : > { %v17330_v53 = vpop.f32.mrb[72].mxu1 }
0x3549   : > { %v11419_v11 = vpop.f32.mrb[73].mxu1 }
0x354a   : > { %v17331_v50 = vpop.f32.mrb[74].mxu1 }
0x354b   : > { %v11451_v54 = vpack.c.bf16 %v17331_v50, %v17330_v53  ;;  %v11422_v8 = vpop.f32.mrb[75].mxu1 }
0x354c   : > { %v11450_v1 = vpack.c.bf16 %v11422_v8, %v11419_v11 }
0x354e   : > { %17340 = vmatprep.mubr.msk.bf16.mxu0 %vm825_vm0, %v11450_v1 }
0x354f   : > { %17341 = vmatmul.mubr.msk.bf16.vlgmr.msra.gmra.mrb[248].mxu0 %vm825_vm0, %v11451_v54 }
0x3550   : > { %17349 = vmatpush3.bf16.msra.mxu0 %v18168_v37  ;;  %v17334_v0 = vpop.f32.mrb[76].mxu1  ;;  %v14627_v37 = vld [vmem:[%s22326_s4 + $0x2] ss:$0 sm:$0xff] }
0x3551   : > { %v11435_v2 = vpop.f32.mrb[77].mxu1  ;;  %17350 = vmatprep.subr.bf16.mxu0 %v18169_v10 }
0x3552   : > { %v17335_v14 = vpop.f32.mrb[78].mxu1 }
0x3553   : > { %v11453_v19 = vpack.c.bf16 %v17335_v14, %v17334_v0  ;;  %v11438_v6 = vpop.f32.mrb[79].mxu1 }
0x3554   : > { %v11452_v12 = vpack.c.bf16 %v11438_v6, %v11435_v2  ;;  %17351 = vmatpush3.bf16.msra.mxu0 %v18169_v10 }
0x3555   : > { %17384 = vmatprep.subr.bf16.mxu0 %v18170_v63 }
0x3556   : > { %17344 = vmatprep.mubr.msk.bf16.mxu0 %vm825_vm0, %v11452_v12 }
0x3557   : > { %17345 = vmatmul.mubr.msk.bf16.gmra.mrb[252].mxu0 %vm825_vm0, %v11453_v19 }
0x3558   : > { %17352 = vmatprep.mubr.msk.bf16.mxu0 %vm825_vm0, %v10748_v16  ;;  %v18178_v16 = vld [vmem:[%s22325_s3 + $0xb8] sm:$0xff]  }
0x355f   : > { %17353 = vmatmul.mubr.msk.bf16.vlgmr.msra.gmra.mrb[248].mxu0 %vm825_vm0, %v10749_v4  ;;  %v18176_v4 = vld [vmem:[%s22325_s3 + $0xb0] sm:$0xff]  }
0x3560   : > { %17385 = vmatpush3.bf16.msra.mxu0 %v18170_v63  ;;  %17356 = vmatprep.mubr.msk.bf16.mxu0 %vm825_vm0, %v10750_v51 }
0x3561   : > { %17386 = vmatprep.subr.bf16.mxu0 %v18171_v17 }
0x3564   : > { %17387 = vmatpush3.bf16.msra.mxu0 %v18171_v17 }
0x3565   : > { %17388 = vmatprep.subr.bf16.mxu0 %v18172_v22 }
0x3567   : > { %17357 = vmatmul.mubr.msk.bf16.gmra.mrb[252].mxu0 %vm825_vm0, %v10751_v42 }
0x3568   : > { %17389 = vmatpush3.bf16.msra.mxu0 %v18172_v22  ;;  %17400 = vmatprep.mubr.bf16.mxu0 %v21470_v60  ;;  %v17378_v39 = vpop.f32.mrb[80].mxu1  ;;  %v18186_v22 = vld [vmem:[%s22327_s5 + $0x80] sm:$0xff]  }
0x3569   : > { %17390 = vmatprep.subr.bf16.mxu0 %v18173_v30  ;;  %v11750_v47 = vadd.f32 %v17378_v39, %v14601_v21  ;;  %v11741_v42 = vpop.f32.mrb[81].mxu1  ;;  %17408 = vmatprep.subr.bf16.mxu1 %v18186_v22  ;;  %v18193_v39 = vld [vmem:[%s22327_s5 + $0xb8] sm:$0xff]  }
0x356a   : > { %v11742_v20 = vadd.f32 %v14601_v21, %v11741_v42  ;;  %v17379_v51 = vpop.f32.mrb[82].mxu1  ;;  %17409 = vmatpush3.bf16.msra.mxu1 %v18186_v22 }
0x356b   : > { %v12046_v18 = vmul.f32 0.17677669, %v11750_v47  ;;  %v11753_v33 = vadd.f32 %v17379_v51, %v14601_v21  ;;  %v11744_v35 = vpop.f32.mrb[83].mxu1  ;;  %v14662_v47 = vld [vmem:[%s22329_s7 + $0x80] sm:$0xff] }
0x356c   : > { %17391 = vmatpush3.bf16.msra.mxu0 %v18173_v30  ;;  %v12044_v32 = vmul.f32 0.17677669, %v11742_v20  ;;  %v11745_v25 = vadd.f32 %v14601_v21, %v11744_v35  ;;  %v18187_v30 = vld [vmem:[%s22327_s5 + $0x88] sm:$0xff]   ;;  %v14664_v20 = vld [vmem:[%s22329_s7 + $0x90] sm:$0xff] }
0x356d   : > { %17392 = vmatprep.subr.bf16.mxu0 %v18174_v5  ;;  %v12047_v15 = vmul.f32 0.17677669, %v11753_v33  ;;  %17410 = vmatprep.subr.bf16.mxu1 %v18187_v30 }
0x356e   : > { %v12045_v26 = vmul.f32 0.17677669, %v11745_v25  ;;  %17411 = vmatpush3.bf16.msra.mxu1 %v18187_v30 }
0x356f   : > { %v12053_v7 = vpack.c.bf16 %v12047_v15, %v12046_v18  ;;  %v14663_v18 = vld [vmem:[%s22329_s7 + $0x88] sm:$0xff] }
0x3570   : > { %17393 = vmatpush3.bf16.msra.mxu0 %v18174_v5  ;;  %v12052_v3 = vpack.c.bf16 %v12045_v26, %v12044_v32  ;;  %v17382_v43 = vpop.f32.mrb[84].mxu1  ;;  %v18188_v5 = vld [vmem:[%s22327_s5 + $0x90] sm:$0xff]   ;;  %v14665_v32 = vld [vmem:[%s22329_s7 + $0x98] sm:$0xff] }
0x3571   : > { %17394 = vmatprep.subr.bf16.mxu0 %v18175_v28  ;;  %v11766_v55 = vadd.f32 %v17382_v43, %v14601_v21  ;;  %v11757_v23 = vpop.f32.mrb[85].mxu1  ;;  %17412 = vmatprep.subr.bf16.mxu1 %v18188_v5 }
0x3572   : > { %v11758_v29 = vadd.f32 %v14601_v21, %v11757_v23  ;;  %v17383_v31 = vpop.f32.mrb[86].mxu1  ;;  %17413 = vmatpush3.bf16.msra.mxu1 %v18188_v5  ;;  %v14666_v23 = vld [vmem:[%s22329_s7 + $0xa0] sm:$0xff] }
0x3573   : > { %v12050_v57 = vmul.f32 0.17677669, %v11766_v55  ;;  %v11769_v40 = vadd.f32 %v17383_v31, %v14601_v21  ;;  %v11760_v36 = vpop.f32.mrb[87].mxu1  ;;  %v14668_v55 = vld [vmem:[%s22329_s7 + $0xb0] sm:$0xff] }
0x3574   : > { %17395 = vmatpush3.bf16.msra.mxu0 %v18175_v28  ;;  %v12048_v24 = vmul.f32 0.17677669, %v11758_v29  ;;  %v11761_v27 = vadd.f32 %v14601_v21, %v11760_v36  ;;  %v18189_v28 = vld [vmem:[%s22327_s5 + $0x98] sm:$0xff]   ;;  %v18192_v21 = vld [vmem:[%s22327_s5 + $0xb0] sm:$0xff]   ;;  %v14667_v36 = vld [vmem:[%s22329_s7 + $0xa8] sm:$0xff] }
0x3575   : > { %17396 = vmatprep.subr.bf16.mxu0 %v18176_v4  ;;  %v12051_v52 = vmul.f32 0.17677669, %v11769_v40  ;;  %17414 = vmatprep.subr.bf16.mxu1 %v18189_v28  ;;  %v14669_v40 = vld [vmem:[%s22329_s7 + $0xb8] sm:$0xff] }
0x3576   : > { %v12049_v34 = vmul.f32 0.17677669, %v11761_v27  ;;  %17415 = vmatpush3.bf16.msra.mxu1 %v18189_v28 }
0x3577   : > { %v12055_v44 = vpack.c.bf16 %v12051_v52, %v12050_v57 }
0x3578   : > { %17397 = vmatpush3.bf16.msra.mxu0 %v18176_v4  ;;  %v12054_v48 = vpack.c.bf16 %v12049_v34, %v12048_v24  ;;  %v18190_v4 = vld [vmem:[%s22327_s5 + $0xa0] sm:$0xff]  }
0x3579   : > { %17398 = vmatprep.subr.bf16.mxu0 %v18178_v16  ;;  %17416 = vmatprep.subr.bf16.mxu1 %v18190_v4 }
0x357a   : > { %17417 = vmatpush3.bf16.msra.mxu1 %v18190_v4 }
0x357c   : > { %17399 = vmatpush3.bf16.msra.mxu0 %v18178_v16  ;;  %v18191_v16 = vld [vmem:[%s22327_s5 + $0xa8] sm:$0xff]  }
0x357d   : > { %17418 = vmatprep.subr.bf16.mxu1 %v18191_v16 }
0x357e   : > { %17419 = vmatpush3.bf16.msra.mxu1 %v18191_v16 }
0x357f   : > { %17401 = vmatmul.mubr.bf16.vlgmr.msra.gmra.mrb[0].mxu0 %v21495_v38  ;;  %17420 = vmatprep.subr.bf16.mxu1 %v18192_v21 }
0x3580   : > { %17404 = vmatprep.mubr.bf16.mxu0 %v21497_v56 }
0x3582   : > { %17421 = vmatpush3.bf16.msra.mxu1 %v18192_v21 }
0x3583   : > { %17422 = vmatprep.subr.bf16.mxu1 %v18193_v39 }
0x3586   : > { %17423 = vmatpush3.bf16.msra.mxu1 %v18193_v39 }
0x3587   : > { %17405 = vmatmul.mubr.bf16.gmra.mrb[4].mxu0 %v21503_v13 }
0x3588   : > { %17440 = vmatprep.mubr.msk.bf16.mxu0 %vm825_vm0, %v12052_v3 }
0x3589   : > { %17425 = vmatmul.mubr.bf16.vlgmr.msra.gmra.mrb[88].mxu1 %v21495_v38 }
0x358a   : > { %17428 = vmatprep.mubr.bf16.mxu1 %v21497_v56 }
0x3591   : > { %17429 = vmatmul.mubr.bf16.gmra.mrb[92].mxu1 %v21503_v13 }
0x3652   : > { %v17402_v61 = vpop.f32.mrb[0].mxu0 }
0x3653   : > { %v11877_v49 = vpop.f32.mrb[1].mxu0  ;;  %v11886_v62 = vadd.f32 %v17402_v61, %v14627_v37 }
0x3654   : > { %v17403_v58 = vpop.f32.mrb[2].mxu0  ;;  %v11878_v45 = vadd.f32 %v14627_v37, %v11877_v49 }
0x3655   : > { %v11889_v9 = vadd.f32 %v17403_v58, %v14627_v37  ;;  %v11880_v41 = vpop.f32.mrb[3].mxu0 }
0x3656   : > { %v11881_v46 = vadd.f32 %v14627_v37, %v11880_v41 }
0x3657   : > { %v12057_v59 = vpack.c.bf16 %v11889_v9, %v11886_v62  ;;  %v14653_v9 = vld [vmem:[%s22328_s6 + $0x2] ss:$0 sm:$0xff] }
0x3658   : > { %v12056_v53 = vpack.c.bf16 %v11881_v46, %v11878_v45 }
0x3659   : > { %v12084_v6 = vsel %vm825_vm0, %v12057_v59, 0 }
0x365a   : > { %17744 = vmatprep.subr.msk.bf16.mxu0 %vm825_vm0, %v12056_v53  ;;  %v12081_v11 = vsel %vm825_vm0, %v12056_v53, 0  ;;  %v17406_v50 = vpop.f32.mrb[4].mxu0 }
0x365b   : > { %17433 = vmatpush3.bf16.xpose.msra.mxu0 %v12081_v11  ;;  %v11902_v54 = vadd.f32 %v17406_v50, %v14627_v37  ;;  %v11893_v8 = vpop.f32.mrb[5].mxu0 }
0x365c   : > { %17745 = vmatprep.subr.msk.bf16.mxu0 %vm825_vm0, %v12057_v59  ;;  %v11894_v1 = vadd.f32 %v14627_v37, %v11893_v8  ;;  %v17407_v10 = vpop.f32.mrb[6].mxu0  ;;  %v17426_v41 = vpop.f32.mrb[88].mxu1 }
0x365d   : > { %v11905_v0 = vadd.f32 %v17407_v10, %v14627_v37  ;;  %v11896_v2 = vpop.f32.mrb[7].mxu0  ;;  %v12022_v45 = vadd.f32 %v17426_v41, %v14653_v9  ;;  %v12013_v46 = vpop.f32.mrb[89].mxu1  ;;  %v18194_v41 = vld [vmem:[%s22330_s8 + $0x20] sm:$0xff]  }
0x365e   : > { %v11897_v63 = vadd.f32 %v14627_v37, %v11896_v2  ;;  %v12014_v59 = vadd.f32 %v14653_v9, %v12013_v46  ;;  %v17427_v53 = vpop.f32.mrb[90].mxu1 }
0x365f   : > { %v12059_v14 = vpack.c.bf16 %v11905_v0, %v11902_v54  ;;  %v12025_v11 = vadd.f32 %v17427_v53, %v14653_v9  ;;  %v12016_v50 = vpop.f32.mrb[91].mxu1 }
0x3660   : > { %v12058_v19 = vpack.c.bf16 %v11897_v63, %v11894_v1  ;;  %v12017_v54 = vadd.f32 %v14653_v9, %v12016_v50 }
0x3661   : > { %v12090_v17 = vsel %vm825_vm0, %v12059_v14, 0  ;;  %v12250_v8 = vpack.c.bf16 %v12025_v11, %v12022_v45  ;;  %v18195_v45 = vld [vmem:[%s22330_s8 + $0x28] sm:$0xff]  }
0x3662   : > { %v12087_v12 = vsel %vm825_vm0, %v12058_v19, 0  ;;  %v12249_v1 = vpack.c.bf16 %v12017_v54, %v12014_v59 }
0x3663   : > { %17435 = vmatpush3.bf16.xpose.msra.mxu0 %v12084_v6 }
0x3664   : > { %17746 = vmatprep.subr.msk.bf16.mxu0 %vm825_vm0, %v12058_v19  ;;  %v17430_v10 = vpop.f32.mrb[92].mxu1  ;;  %17448 = vmatprep.subr.bf16.mxu1 %v12249_v1 }
0x3665   : > { %v12038_v0 = vadd.f32 %v17430_v10, %v14653_v9  ;;  %v12029_v2 = vpop.f32.mrb[93].mxu1  ;;  %17449 = vmatpush3.bf16.msra.mxu1 %v12249_v1 }
0x3666   : > { %v17431_v19 = vpop.f32.mrb[94].mxu1  ;;  %17450 = vmatprep.subr.bf16.mxu1 %v12250_v8 }
0x3669   : > { %17451 = vmatpush3.bf16.msra.mxu1 %v12250_v8 }
0x366b   : > { %17437 = vmatpush3.bf16.xpose.msra.mxu0 %v12087_v12  ;;  %v12041_v12 = vadd.f32 %v17431_v19, %v14653_v9 }
0x366c   : > { %17747 = vmatprep.subr.msk.bf16.mxu0 %vm825_vm0, %v12059_v14  ;;  %v12030_v14 = vadd.f32 %v14653_v9, %v12029_v2 }
0x366d   : > { %v12252_v4 = vpack.c.bf16 %v12041_v12, %v12038_v0 }
0x3673   : > { %17439 = vmatpush3.bf16.xpose.msra.mxu0 %v12090_v17  ;;  %v12032_v17 = vpop.f32.mrb[95].mxu1 }
0x3674   : > { %v12033_v30 = vadd.f32 %v14653_v9, %v12032_v17  ;;  %17464 = vmatprep.subr.bf16.mxu0 %v18194_v41 }
0x3676   : > { %v12251_v21 = vpack.c.bf16 %v12033_v30, %v12030_v14 }
0x3678   : > { %17452 = vmatprep.subr.bf16.mxu1 %v12251_v21 }
0x3679   : > { %17453 = vmatpush3.bf16.msra.mxu1 %v12251_v21 }
0x367a   : > { %17441 = vmatmul.mubr.msk.bf16.vlgmr.msra.gmra.mrb[8].mxu0 %vm825_vm0, %v12053_v7  ;;  %17454 = vmatprep.subr.bf16.mxu1 %v12252_v4 }
0x367b   : > { %17444 = vmatprep.mubr.msk.bf16.mxu0 %vm825_vm0, %v12054_v48  ;;  %17465 = vmatpush3.bf16.msra.mxu0 %v18194_v41 }
0x367c   : > { %17466 = vmatprep.subr.bf16.mxu0 %v18195_v45 }
0x367d   : > { %17455 = vmatpush3.bf16.msra.mxu1 %v12252_v4 }
0x367f   : > { %17467 = vmatpush3.bf16.msra.mxu0 %v18195_v45 }
0x3682   : > { %17445 = vmatmul.mubr.msk.bf16.gmra.mrb[12].mxu0 %vm825_vm0, %v12055_v44 }
0x374d   : > { %v17442_v42 = vpop.f32.mrb[8].mxu0 }
0x374e   : > { %v12126_v51 = vpop.f32.mrb[9].mxu0  ;;  %v22022_v15 = vadd.f32 %v17442_v42, %v14664_v20 }
0x374f   : > { %v12127_v33 = vadd.f32 %v14662_v47, %v12126_v51  ;;  %v17443_v35 = vpop.f32.mrb[10].mxu0 }
0x3750   : > { %v12129_v25 = vpop.f32.mrb[11].mxu0  ;;  %v22025_v3 = vadd.f32 %v17443_v35, %v14665_v32  ;;  %v12163_v31 = vsel %vm915_vm1, %v22022_v15, -inf }
0x3751   : > { %v12130_v26 = vadd.f32 %v14663_v18, %v12129_v25  ;;  %v12157_v7 = vsel %vm915_vm1, %v12127_v33, -inf }
0x3752   : > { %12158 = vmax.xlane.f32.xlu0 %v12157_v7  ;;  %v12166_v34 = vsel %vm915_vm1, %v22025_v3, -inf }
0x3753   : > { %v12160_v43 = vsel %vm915_vm1, %v12130_v26, -inf }
0x3754   : > { %12161 = vmax.xlane.f32.xlu1 %v12160_v43 }
0x3755   : > { %v17446_v29 = vpop.f32.mrb[12].mxu0 }
0x3756   : > { %v12142_v57 = vpop.f32.mrb[13].mxu0  ;;  %12164 = vmax.xlane.f32.xlu0 %v12163_v31  ;;  %v22042_v24 = vadd.f32 %v17446_v29, %v14668_v55 }
0x3757   : > { %v12143_v27 = vadd.f32 %v14666_v23, %v12142_v57  ;;  %v17447_v52 = vpop.f32.mrb[14].mxu0 }
0x3758   : > { %v12145_v44 = vpop.f32.mrb[15].mxu0  ;;  %12167 = vmax.xlane.f32.xlu1 %v12166_v34  ;;  %v22046_v48 = vadd.f32 %v17447_v52, %v14669_v40  ;;  %v12175_v58 = vsel %vm915_vm1, %v22042_v24, -inf }
0x3759   : > { %v12146_v61 = vadd.f32 %v14667_v36, %v12145_v44  ;;  %v12169_v37 = vsel %vm915_vm1, %v12143_v27, -inf }
0x375a   : > { %12170 = vmax.xlane.f32.xlu0 %v12169_v37  ;;  %v12178_v62 = vsel %vm915_vm1, %v22046_v48, -inf }
0x375b   : > { %v12172_v49 = vsel %vm915_vm1, %v12146_v61, -inf }
0x375c   : > { %12173 = vmax.xlane.f32.xlu1 %v12172_v49 }
0x375e   : > { %12176 = vmax.xlane.f32.xlu0 %v12175_v58 }
0x3760   : > { %12179 = vmax.xlane.f32.xlu1 %v12178_v62 }
0x37df   : > { %v12159_v63 = vpop.xlane.xlu0 %12158 }
0x37e0   : > { %v12181_v6 = vsub.f32 %v12127_v33, %v12159_v63 }
0x37e1   : > { %v12162_v22 = vpop.xlane.xlu1 %12161 }
0x37e2   : > { %v12189_v5 = vmul.f32 1.442695, %v12181_v6  ;;  %v12182_v28 = vsub.f32 %v12130_v26, %v12162_v22 }
0x37e3   : > { %v12165_v16 = vpop.xlane.xlu0 %12164 }
0x37e4   : > { %18670 = vpow2.f32 %v12189_v5  ;;  %v12191_v39 = vmul.f32 1.442695, %v12182_v28  ;;  %v12183_v47 = vsub.f32 %v22022_v15, %v12165_v16 }
0x37e5   : > { %v12168_v42 = vpop.xlane.xlu1 %12167 }
0x37e6   : > { %18672 = vpow2.f32 %v12191_v39  ;;  %v12193_v20 = vmul.f32 1.442695, %v12183_v47  ;;  %v12184_v51 = vsub.f32 %v22025_v3, %v12168_v42 }
0x37e7   : > { %v12171_v18 = vpop.xlane.xlu0 %12170 }
0x37e8   : > { %18674 = vpow2.f32 %v12193_v20  ;;  %v12195_v33 = vmul.f32 1.442695, %v12184_v51  ;;  %v12185_v35 = vsub.f32 %v12143_v27, %v12171_v18  ;;  %v18196_v51 = vld [vmem:[%s22325_s3 + $0xc0] sm:$0xff]  }
0x37e9   : > { %v12174_v32 = vpop.xlane.xlu1 %12173  ;;  %17500 = vmatprep.subr.bf16.mxu0 %v18196_v51  ;;  %v18203_v18 = vld [vmem:[%s22323_s1 + $0xc0] sm:$0xff]  }
0x37ea   : > { %18676 = vpow2.f32 %v12195_v33  ;;  %v12197_v25 = vmul.f32 1.442695, %v12185_v35  ;;  %v12186_v26 = vsub.f32 %v12146_v61, %v12174_v32  ;;  %17476 = vmatprep.subr.bf16.mxu1 %v18203_v18  ;;  %v18205_v33 = vld [vmem:[%s22323_s1 + $0xc8] sm:$0xff]   ;;  %v18206_v35 = vld [vmem:[%s22323_s1 + $0xd0] sm:$0xff]   ;;  %v18207_v32 = vld [vmem:[%s22323_s1 + $0xd8] sm:$0xff]  }
0x37eb   : > { %v12177_v7 = vpop.xlane.xlu0 %12176 }
0x37ec   : > { %18678 = vpow2.f32 %v12197_v25  ;;  %v12199_v15 = vmul.f32 1.442695, %v12186_v26  ;;  %v12187_v43 = vsub.f32 %v22042_v24, %v12177_v7  ;;  %v18208_v25 = vld [vmem:[%s22323_s1 + $0xe0] sm:$0xff]   ;;  %v18209_v26 = vld [vmem:[%s22323_s1 + $0xe8] sm:$0xff]   ;;  %v18210_v7 = vld [vmem:[%s22323_s1 + $0xf0] sm:$0xff]  }
0x37ed   : > { %v12180_v55 = vpop.xlane.xlu1 %12179 }
0x37ee   : > { %v18671_v23 = vpop.eup %18670  ;;  %18680 = vpow2.f32 %v12199_v15  ;;  %v12201_v3 = vmul.f32 1.442695, %v12187_v43  ;;  %v12188_v29 = vsub.f32 %v22046_v48, %v12180_v55  ;;  %v18211_v15 = vld [vmem:[%s22323_s1 + $0xf8] sm:$0xff]  }
0x37ef   : > { %v12205_v31 = vsel %vm915_vm1, %v18671_v23, 0.0 }
0x37f0   : > { %v18673_v57 = vpop.eup %18672  ;;  %18682 = vpow2.f32 %v12201_v3  ;;  %v12203_v40 = vmul.f32 1.442695, %v12188_v29  ;;  %12206 = vadd.xlane.f32.xlu0 %v12205_v31 }
0x37f1   : > { %v12208_v36 = vsel %vm915_vm1, %v18673_v57, 0.0 }
0x37f2   : > { %v18675_v27 = vpop.eup %18674  ;;  %18684 = vpow2.f32 %v12203_v40  ;;  %12209 = vadd.xlane.f32.xlu1 %v12208_v36 }
0x37f3   : > { %v12211_v52 = vsel %vm915_vm1, %v18675_v27, 0.0 }
0x37f4   : > { %v18677_v24 = vpop.eup %18676  ;;  %12212 = vadd.xlane.f32.xlu0 %v12211_v52 }
0x37f5   : > { %v12214_v34 = vsel %vm915_vm1, %v18677_v24, 0.0 }
0x37f6   : > { %v18679_v44 = vpop.eup %18678  ;;  %12215 = vadd.xlane.f32.xlu1 %v12214_v34 }
0x37f7   : > { %v12217_v48 = vsel %vm915_vm1, %v18679_v44, 0.0 }
0x37f8   : > { %v18681_v61 = vpop.eup %18680  ;;  %12218 = vadd.xlane.f32.xlu0 %v12217_v48  ;;  %v18199_v48 = vld [vmem:[%s22325_s3 + $0xd8] sm:$0xff]  }
0x37f9   : > { %v12220_v37 = vsel %vm915_vm1, %v18681_v61, 0.0 }
0x37fa   : > { %v18683_v49 = vpop.eup %18682  ;;  %12221 = vadd.xlane.f32.xlu1 %v12220_v37  ;;  %v18201_v37 = vld [vmem:[%s22325_s3 + $0xe8] sm:$0xff]  }
0x37fb   : > { %v12223_v58 = vsel %vm915_vm1, %v18683_v49, 0.0 }
0x37fc   : > { %v18685_v62 = vpop.eup %18684  ;;  %12224 = vadd.xlane.f32.xlu0 %v12223_v58  ;;  %v14704_v58 = vld [vmem:[#allocation2 + $0x3] ss:$0 sm:$0xff] }
0x37fd   : > { %v12226_v9 = vsel %vm915_vm1, %v18685_v62, 0.0 }
0x37fe   : > { %12227 = vadd.xlane.f32.xlu1 %v12226_v9 }
0x387d   : > { %v12207_v46 = vpop.xlane.xlu0 %12206 }
0x387e   : > { %18686 = vrcp.f32 %v12207_v46 }
0x387f   : > { %v12210_v59 = vpop.xlane.xlu1 %12209 }
0x3880   : > { %18688 = vrcp.f32 %v12210_v59 }
0x3881   : > { %v12213_v53 = vpop.xlane.xlu0 %12212 }
0x3882   : > { %18690 = vrcp.f32 %v12213_v53 }
0x3883   : > { %v12216_v11 = vpop.xlane.xlu1 %12215 }
0x3884   : > { %18692 = vrcp.f32 %v12216_v11 }
0x3885   : > { %v12219_v50 = vpop.xlane.xlu0 %12218 }
0x3886   : > { %18694 = vrcp.f32 %v12219_v50 }
0x3887   : > { %v12222_v54 = vpop.xlane.xlu1 %12221 }
0x3888   : > { %v18687_v8 = vpop.eup %18686  ;;  %18696 = vrcp.f32 %v12222_v54 }
0x3889   : > { %v12225_v1 = vpop.xlane.xlu0 %12224  ;;  %v12230_v2 = vmul.f32 %v18687_v8, %v18671_v23 }
0x388a   : > { %v18689_v10 = vpop.eup %18688  ;;  %18698 = vrcp.f32 %v12225_v1 }
0x388b   : > { %v12228_v0 = vpop.xlane.xlu1 %12227  ;;  %v12232_v63 = vmul.f32 %v18689_v10, %v18673_v57  ;;  %v18197_v57 = vld [vmem:[%s22325_s3 + $0xc8] sm:$0xff]  }
0x388c   : > { %v18691_v14 = vpop.eup %18690  ;;  %18700 = vrcp.f32 %v12228_v0 }
0x388d   : > { %v12245_v19 = vpack.c.bf16 %v12232_v63, %v12230_v2  ;;  %v12234_v12 = vmul.f32 %v18691_v14, %v18675_v27  ;;  %v18198_v27 = vld [vmem:[%s22325_s3 + $0xd0] sm:$0xff]  }
0x388e   : > { %v18693_v6 = vpop.eup %18692 }
0x388f   : > { %v12236_v17 = vmul.f32 %v18693_v6, %v18677_v24  ;;  %17456 = vmatprep.mubr.msk.bf16.mxu1 %vm915_vm1, %v12245_v19 }
0x3890   : > { %v18695_v22 = vpop.eup %18694 }
0x3891   : > { %v12246_v30 = vpack.c.bf16 %v12236_v17, %v12234_v12  ;;  %v12238_v28 = vmul.f32 %v18695_v22, %v18679_v44 }
0x3892   : > { %v18697_v5 = vpop.eup %18696 }
0x3893   : > { %17457 = vmatmul.mubr.msk.bf16.vlgmr.msra.gmra.mrb[96].mxu1 %vm915_vm1, %v12246_v30  ;;  %v12240_v4 = vmul.f32 %v18697_v5, %v18681_v61  ;;  %v18200_v61 = vld [vmem:[%s22325_s3 + $0xe0] sm:$0xff]  }
0x3894   : > { %v18699_v16 = vpop.eup %18698  ;;  %17477 = vmatpush3.bf16.msra.mxu1 %v18203_v18 }
0x3895   : > { %v12247_v21 = vpack.c.bf16 %v12240_v4, %v12238_v28  ;;  %v12242_v47 = vmul.f32 %v18699_v16, %v18683_v49  ;;  %17478 = vmatprep.subr.bf16.mxu1 %v18205_v33  ;;  %v18202_v49 = vld [vmem:[%s22325_s3 + $0xf0] sm:$0xff]  }
0x3896   : > { %v18701_v39 = vpop.eup %18700 }
0x3897   : > { %v12244_v42 = vmul.f32 %v18701_v39, %v18685_v62  ;;  %17460 = vmatprep.mubr.msk.bf16.mxu1 %vm915_vm1, %v12247_v21 }
0x3898   : > { %17479 = vmatpush3.bf16.msra.mxu1 %v18205_v33 }
0x3899   : > { %v12248_v20 = vpack.c.bf16 %v12244_v42, %v12242_v47  ;;  %17480 = vmatprep.subr.bf16.mxu1 %v18206_v35  ;;  %v14730_v47 = vld [vmem:[%s22326_s4 + $0x3] ss:$0 sm:$0xff] }
0x389b   : > { %17461 = vmatmul.mubr.msk.bf16.gmra.mrb[100].mxu1 %vm915_vm1, %v12248_v20 }
0x389c   : > { %17492 = vmatprep.mubr.bf16.mxu1 %v21470_v60  ;;  %17481 = vmatpush3.bf16.msra.mxu1 %v18206_v35 }
0x389d   : > { %17482 = vmatprep.subr.bf16.mxu1 %v18207_v32 }
0x38a0   : > { %17483 = vmatpush3.bf16.msra.mxu1 %v18207_v32 }
0x38a1   : > { %17484 = vmatprep.subr.bf16.mxu1 %v18208_v25 }
0x38a4   : > { %17485 = vmatpush3.bf16.msra.mxu1 %v18208_v25 }
0x38a5   : > { %17486 = vmatprep.subr.bf16.mxu1 %v18209_v26 }
0x38a8   : > { %17487 = vmatpush3.bf16.msra.mxu1 %v18209_v26 }
0x38a9   : > { %17488 = vmatprep.subr.bf16.mxu1 %v18210_v7 }
0x38ac   : > { %17489 = vmatpush3.bf16.msra.mxu1 %v18210_v7 }
0x38ad   : > { %17490 = vmatprep.subr.bf16.mxu1 %v18211_v15 }
0x38b0   : > { %17491 = vmatpush3.bf16.msra.mxu1 %v18211_v15 }
0x38b3   : > { %17493 = vmatmul.mubr.bf16.vlgmr.msra.gmra.mrb[104].mxu1 %v21495_v38 }
0x38b4   : > { %17496 = vmatprep.mubr.bf16.mxu1 %v21497_v56 }
0x38bb   : > { %17497 = vmatmul.mubr.bf16.gmra.mrb[108].mxu1 %v21503_v13 }
0x38bc   : > { %17540 = vmatprep.mubr.bf16.mxu1 %v21470_v60 }
0x3966   : > { %v17458_v43 = vpop.f32.mrb[96].mxu1 }
0x3967   : > { %v12299_v55 = vpop.f32.mrb[97].mxu1 }
0x3968   : > { %v17459_v23 = vpop.f32.mrb[98].mxu1 }
0x3969   : > { %v12331_v3 = vpack.c.bf16 %v17459_v23, %v17458_v43  ;;  %v12302_v29 = vpop.f32.mrb[99].mxu1 }
0x396a   : > { %v12330_v31 = vpack.c.bf16 %v12302_v29, %v12299_v55 }
0x396c   : > { %17468 = vmatprep.mubr.msk.bf16.mxu0 %vm825_vm0, %v12330_v31 }
0x396d   : > { %17469 = vmatmul.mubr.msk.bf16.vlgmr.msra.gmra.mrb[248].mxu0 %vm825_vm0, %v12331_v3 }
0x396e   : > { %17501 = vmatpush3.bf16.msra.mxu0 %v18196_v51  ;;  %v17462_v40 = vpop.f32.mrb[100].mxu1 }
0x396f   : > { %v12315_v36 = vpop.f32.mrb[101].mxu1  ;;  %17502 = vmatprep.subr.bf16.mxu0 %v18197_v57 }
0x3970   : > { %v17463_v52 = vpop.f32.mrb[102].mxu1 }
0x3971   : > { %v12333_v24 = vpack.c.bf16 %v17463_v52, %v17462_v40  ;;  %v12318_v34 = vpop.f32.mrb[103].mxu1 }
0x3972   : > { %v12332_v44 = vpack.c.bf16 %v12318_v34, %v12315_v36  ;;  %17503 = vmatpush3.bf16.msra.mxu0 %v18197_v57  ;;  %v18212_v34 = vld [vmem:[%s22327_s5 + $0xc0] sm:$0xff]  }
0x3973   : > { %17504 = vmatprep.subr.bf16.mxu0 %v18198_v27  ;;  %17524 = vmatprep.subr.bf16.mxu1 %v18212_v34 }
0x3974   : > { %17472 = vmatprep.mubr.msk.bf16.mxu0 %vm825_vm0, %v12332_v44  ;;  %v18213_v44 = vld [vmem:[%s22327_s5 + $0xc8] sm:$0xff]   ;;  %17525 = vmatpush3.bf16.msra.mxu1 %v18212_v34 }
0x3975   : > { %17473 = vmatmul.mubr.msk.bf16.gmra.mrb[252].mxu0 %vm825_vm0, %v12333_v24  ;;  %17526 = vmatprep.subr.bf16.mxu1 %v18213_v44 }
0x3976   : > { %17505 = vmatpush3.bf16.msra.mxu0 %v18198_v27  ;;  %17516 = vmatprep.mubr.bf16.mxu0 %v21470_v60  ;;  %v18204_v60 = vld [vmem:[%s22325_s3 + $0xf8] sm:$0xff]  }
0x3977   : > { %17506 = vmatprep.subr.bf16.mxu0 %v18199_v48 }
0x3978   : > { %17527 = vmatpush3.bf16.msra.mxu1 %v18213_v44 }
0x397a   : > { %17507 = vmatpush3.bf16.msra.mxu0 %v18199_v48  ;;  %v18214_v48 = vld [vmem:[%s22327_s5 + $0xd0] sm:$0xff]  }
0x397b   : > { %17508 = vmatprep.subr.bf16.mxu0 %v18200_v61  ;;  %17528 = vmatprep.subr.bf16.mxu1 %v18214_v48 }
0x397c   : > { %17529 = vmatpush3.bf16.msra.mxu1 %v18214_v48 }
0x397e   : > { %17509 = vmatpush3.bf16.msra.mxu0 %v18200_v61  ;;  %v18215_v61 = vld [vmem:[%s22327_s5 + $0xd8] sm:$0xff]  }
0x397f   : > { %17510 = vmatprep.subr.bf16.mxu0 %v18201_v37  ;;  %17530 = vmatprep.subr.bf16.mxu1 %v18215_v61 }
0x3980   : > { %17531 = vmatpush3.bf16.msra.mxu1 %v18215_v61 }
0x3982   : > { %17511 = vmatpush3.bf16.msra.mxu0 %v18201_v37  ;;  %v18216_v37 = vld [vmem:[%s22327_s5 + $0xe0] sm:$0xff]  }
0x3983   : > { %17512 = vmatprep.subr.bf16.mxu0 %v18202_v49  ;;  %17532 = vmatprep.subr.bf16.mxu1 %v18216_v37 }
0x3984   : > { %17533 = vmatpush3.bf16.msra.mxu1 %v18216_v37 }
0x3986   : > { %17513 = vmatpush3.bf16.msra.mxu0 %v18202_v49  ;;  %v17494_v62 = vpop.f32.mrb[104].mxu1  ;;  %v18217_v49 = vld [vmem:[%s22327_s5 + $0xe8] sm:$0xff]  }
0x3987   : > { %17514 = vmatprep.subr.bf16.mxu0 %v18204_v60  ;;  %v12549_v9 = vadd.f32 %v17494_v62, %v14704_v58  ;;  %v12540_v41 = vpop.f32.mrb[105].mxu1  ;;  %17534 = vmatprep.subr.bf16.mxu1 %v18217_v49  ;;  %v14765_v62 = vld [vmem:[%s22329_s7 + $0xc0] sm:$0xff] }
0x3988   : > { %v12541_v45 = vadd.f32 %v14704_v58, %v12540_v41  ;;  %v17495_v46 = vpop.f32.mrb[106].mxu1  ;;  %17535 = vmatpush3.bf16.msra.mxu1 %v18217_v49  ;;  %v14767_v41 = vld [vmem:[%s22329_s7 + $0xd0] sm:$0xff] }
0x3989   : > { %v12845_v59 = vmul.f32 0.17677669, %v12549_v9  ;;  %v12552_v53 = vadd.f32 %v17495_v46, %v14704_v58  ;;  %v12543_v11 = vpop.f32.mrb[107].mxu1  ;;  %v14766_v46 = vld [vmem:[%s22329_s7 + $0xc8] sm:$0xff] }
0x398a   : > { %17515 = vmatpush3.bf16.msra.mxu0 %v18204_v60  ;;  %v12843_v50 = vmul.f32 0.17677669, %v12541_v45  ;;  %v12544_v54 = vadd.f32 %v14704_v58, %v12543_v11  ;;  %v18218_v60 = vld [vmem:[%s22327_s5 + $0xf0] sm:$0xff]  }
0x398b   : > { %v12846_v8 = vmul.f32 0.17677669, %v12552_v53  ;;  %17536 = vmatprep.subr.bf16.mxu1 %v18218_v60 }
0x398c   : > { %v12844_v1 = vmul.f32 0.17677669, %v12544_v54  ;;  %17537 = vmatpush3.bf16.msra.mxu1 %v18218_v60 }
0x398d   : > { %17517 = vmatmul.mubr.bf16.vlgmr.msra.gmra.mrb[16].mxu0 %v21495_v38  ;;  %v12852_v10 = vpack.c.bf16 %v12846_v8, %v12845_v59 }
0x398e   : > { %17520 = vmatprep.mubr.bf16.mxu0 %v21497_v56  ;;  %v12851_v0 = vpack.c.bf16 %v12844_v1, %v12843_v50  ;;  %v17498_v2 = vpop.f32.mrb[108].mxu1  ;;  %v14769_v1 = vld [vmem:[%s22329_s7 + $0xe0] sm:$0xff] }
0x398f   : > { %v12565_v63 = vadd.f32 %v17498_v2, %v14704_v58  ;;  %v12556_v14 = vpop.f32.mrb[109].mxu1  ;;  %v14771_v2 = vld [vmem:[%s22329_s7 + $0xf0] sm:$0xff] }
0x3990   : > { %v12557_v19 = vadd.f32 %v14704_v58, %v12556_v14  ;;  %v17499_v6 = vpop.f32.mrb[110].mxu1  ;;  %v14770_v14 = vld [vmem:[%s22329_s7 + $0xe8] sm:$0xff] }
0x3991   : > { %v12849_v12 = vmul.f32 0.17677669, %v12565_v63  ;;  %v12568_v17 = vadd.f32 %v17499_v6, %v14704_v58  ;;  %v12559_v22 = vpop.f32.mrb[111].mxu1 }
0x3992   : > { %v12847_v30 = vmul.f32 0.17677669, %v12557_v19  ;;  %v12560_v5 = vadd.f32 %v14704_v58, %v12559_v22  ;;  %v18219_v58 = vld [vmem:[%s22327_s5 + $0xf8] sm:$0xff]  }
0x3993   : > { %v12850_v28 = vmul.f32 0.17677669, %v12568_v17  ;;  %17538 = vmatprep.subr.bf16.mxu1 %v18219_v58  ;;  %v14772_v17 = vld [vmem:[%s22329_s7 + $0xf8] sm:$0xff] }
0x3994   : > { %v12848_v4 = vmul.f32 0.17677669, %v12560_v5  ;;  %17539 = vmatpush3.bf16.msra.mxu1 %v18219_v58 }
0x3995   : > { %17521 = vmatmul.mubr.bf16.gmra.mrb[20].mxu0 %v21503_v13  ;;  %v12854_v16 = vpack.c.bf16 %v12850_v28, %v12849_v12 }
0x3996   : > { %17556 = vmatprep.mubr.msk.bf16.mxu0 %vm825_vm0, %v12851_v0  ;;  %v12853_v21 = vpack.c.bf16 %v12848_v4, %v12847_v30 }
0x3997   : > { %17541 = vmatmul.mubr.bf16.vlgmr.msra.gmra.mrb[112].mxu1 %v21495_v38 }
0x3998   : > { %17544 = vmatprep.mubr.bf16.mxu1 %v21497_v56  ;;  %v14768_v56 = vld [vmem:[%s22329_s7 + $0xd8] sm:$0xff] }
0x399f   : > { %17545 = vmatmul.mubr.bf16.gmra.mrb[116].mxu1 %v21503_v13 }
0x3a60   : > { %v17518_v39 = vpop.f32.mrb[16].mxu0 }
0x3a61   : > { %v12676_v42 = vpop.f32.mrb[17].mxu0  ;;  %v12685_v51 = vadd.f32 %v17518_v39, %v14730_v47 }
0x3a62   : > { %v17519_v20 = vpop.f32.mrb[18].mxu0  ;;  %v12677_v35 = vadd.f32 %v14730_v47, %v12676_v42 }
0x3a63   : > { %v12688_v18 = vadd.f32 %v17519_v20, %v14730_v47  ;;  %v12679_v33 = vpop.f32.mrb[19].mxu0 }
0x3a64   : > { %v12680_v32 = vadd.f32 %v14730_v47, %v12679_v33 }
0x3a65   : > { %v12856_v25 = vpack.c.bf16 %v12688_v18, %v12685_v51 }
0x3a66   : > { %v12855_v26 = vpack.c.bf16 %v12680_v32, %v12677_v35 }
0x3a67   : > { %v12883_v27 = vsel %vm825_vm0, %v12856_v25, 0 }
0x3a68   : > { %17748 = vmatprep.subr.msk.bf16.mxu0 %vm825_vm0, %v12855_v26  ;;  %v12880_v7 = vsel %vm825_vm0, %v12855_v26, 0  ;;  %v17522_v15 = vpop.f32.mrb[20].mxu0 }
0x3a69   : > { %17549 = vmatpush3.bf16.xpose.msra.mxu0 %v12880_v7  ;;  %v12701_v43 = vadd.f32 %v17522_v15, %v14730_v47  ;;  %v12692_v55 = vpop.f32.mrb[21].mxu0 }
0x3a6a   : > { %17749 = vmatprep.subr.msk.bf16.mxu0 %vm825_vm0, %v12856_v25  ;;  %v12693_v23 = vadd.f32 %v14730_v47, %v12692_v55  ;;  %v17523_v3 = vpop.f32.mrb[22].mxu0  ;;  %v17542_v42 = vpop.f32.mrb[112].mxu1 }
0x3a6b   : > { %v12704_v29 = vadd.f32 %v17523_v3, %v14730_v47  ;;  %v12695_v31 = vpop.f32.mrb[23].mxu0  ;;  %v12812_v51 = vpop.f32.mrb[113].mxu1 }
0x3a6c   : > { %v12696_v57 = vadd.f32 %v14730_v47, %v12695_v31  ;;  %v14756_v47 = vld [vmem:[%s22328_s6 + $0x3] ss:$0 sm:$0xff]  ;;  %v17543_v33 = vpop.f32.mrb[114].mxu1 }
0x3a6d   : > { %v12858_v40 = vpack.c.bf16 %v12704_v29, %v12701_v43  ;;  %v12821_v20 = vadd.f32 %v17542_v42, %v14756_v47  ;;  %v12813_v18 = vadd.f32 %v14756_v47, %v12812_v51  ;;  %v12824_v35 = vadd.f32 %v17543_v33, %v14756_v47  ;;  %v12815_v32 = vpop.f32.mrb[115].mxu1 }
0x3a6e   : > { %v12857_v36 = vpack.c.bf16 %v12696_v57, %v12693_v23  ;;  %v12816_v25 = vadd.f32 %v14756_v47, %v12815_v32 }
0x3a6f   : > { %v12889_v24 = vsel %vm825_vm0, %v12858_v40, 0  ;;  %v13049_v26 = vpack.c.bf16 %v12824_v35, %v12821_v20 }
0x3a70   : > { %v12886_v52 = vsel %vm825_vm0, %v12857_v36, 0  ;;  %v13048_v7 = vpack.c.bf16 %v12816_v25, %v12813_v18 }
0x3a71   : > { %17551 = vmatpush3.bf16.xpose.msra.mxu0 %v12883_v27 }
0x3a72   : > { %17750 = vmatprep.subr.msk.bf16.mxu0 %vm825_vm0, %v12857_v36  ;;  %v17546_v15 = vpop.f32.mrb[116].mxu1  ;;  %17564 = vmatprep.subr.bf16.mxu1 %v13048_v7 }
0x3a73   : > { %v12837_v43 = vadd.f32 %v17546_v15, %v14756_v47  ;;  %v12828_v55 = vpop.f32.mrb[117].mxu1  ;;  %17565 = vmatpush3.bf16.msra.mxu1 %v13048_v7 }
0x3a74   : > { %v12829_v3 = vadd.f32 %v14756_v47, %v12828_v55  ;;  %v17547_v29 = vpop.f32.mrb[118].mxu1  ;;  %17566 = vmatprep.subr.bf16.mxu1 %v13049_v26 }
0x3a75   : > { %v12840_v57 = vadd.f32 %v17547_v29, %v14756_v47 }
0x3a77   : > { %v13051_v34 = vpack.c.bf16 %v12840_v57, %v12837_v43  ;;  %17567 = vmatpush3.bf16.msra.mxu1 %v13049_v26 }
0x3a79   : > { %17553 = vmatpush3.bf16.xpose.msra.mxu0 %v12886_v52 }
0x3a7a   : > { %17751 = vmatprep.subr.msk.bf16.mxu0 %vm825_vm0, %v12858_v40  ;;  %v12831_v40 = vpop.f32.mrb[119].mxu1 }
0x3a7b   : > { %v12832_v27 = vadd.f32 %v14756_v47, %v12831_v40 }
0x3a7d   : > { %v13050_v48 = vpack.c.bf16 %v12832_v27, %v12829_v3 }
0x3a7f   : > { %17568 = vmatprep.subr.bf16.mxu1 %v13050_v48 }
0x3a80   : > { %17569 = vmatpush3.bf16.msra.mxu1 %v13050_v48 }
0x3a81   : > { %17555 = vmatpush3.bf16.xpose.msra.mxu0 %v12889_v24  ;;  %17570 = vmatprep.subr.bf16.mxu1 %v13051_v34 }
0x3a84   : > { %17571 = vmatpush3.bf16.msra.mxu1 %v13051_v34 }
0x3a88   : > { %17557 = vmatmul.mubr.msk.bf16.vlgmr.msra.gmra.mrb[24].mxu0 %vm825_vm0, %v12852_v10 }
0x3a89   : > { %17560 = vmatprep.mubr.msk.bf16.mxu0 %vm825_vm0, %v12853_v21 }
0x3a90   : > { %17561 = vmatmul.mubr.msk.bf16.gmra.mrb[28].mxu0 %vm825_vm0, %v12854_v16 }
0x3b5b   : > { %v17558_v9 = vpop.f32.mrb[24].mxu0 }
0x3b5c   : > { %v12925_v45 = vpop.f32.mrb[25].mxu0  ;;  %v22194_v53 = vadd.f32 %v17558_v9, %v14767_v41 }
0x3b5d   : > { %v12926_v59 = vadd.f32 %v14765_v62, %v12925_v45  ;;  %v17559_v38 = vpop.f32.mrb[26].mxu0 }
0x3b5e   : > { %v12928_v13 = vpop.f32.mrb[27].mxu0  ;;  %v22197_v54 = vadd.f32 %v17559_v38, %v14768_v56  ;;  %v12962_v0 = vsel %vm915_vm1, %v22194_v53, -inf }
0x3b5f   : > { %v12929_v11 = vadd.f32 %v14766_v46, %v12928_v13  ;;  %v12956_v50 = vsel %vm915_vm1, %v12926_v59, -inf }
0x3b60   : > { %12957 = vmax.xlane.f32.xlu0 %v12956_v50  ;;  %v12965_v12 = vsel %vm915_vm1, %v22197_v54, -inf }
0x3b61   : > { %v12959_v8 = vsel %vm915_vm1, %v12929_v11, -inf }
0x3b62   : > { %12960 = vmax.xlane.f32.xlu1 %v12959_v8 }
0x3b63   : > { %v17562_v10 = vpop.f32.mrb[28].mxu0 }
0x3b64   : > { %v12941_v63 = vpop.f32.mrb[29].mxu0  ;;  %12963 = vmax.xlane.f32.xlu0 %v12962_v0  ;;  %v22218_v30 = vadd.f32 %v17562_v10, %v14771_v2 }
0x3b65   : > { %v22211_v19 = vadd.f32 %v14769_v1, %v12941_v63  ;;  %v17563_v6 = vpop.f32.mrb[30].mxu0 }
0x3b66   : > { %v12944_v22 = vpop.f32.mrb[31].mxu0  ;;  %12966 = vmax.xlane.f32.xlu1 %v12965_v12  ;;  %v22222_v4 = vadd.f32 %v17563_v6, %v14772_v17  ;;  %v12974_v21 = vsel %vm915_vm1, %v22218_v30, -inf }
0x3b67   : > { %v12945_v5 = vadd.f32 %v14770_v14, %v12944_v22  ;;  %v12968_v28 = vsel %vm915_vm1, %v22211_v19, -inf }
0x3b68   : > { %12969 = vmax.xlane.f32.xlu0 %v12968_v28  ;;  %v12977_v39 = vsel %vm915_vm1, %v22222_v4, -inf }
0x3b69   : > { %v12971_v16 = vsel %vm915_vm1, %v12945_v5, -inf }
0x3b6a   : > { %12972 = vmax.xlane.f32.xlu1 %v12971_v16  ;;  %v18220_v16 = vld [vmem:[%s22330_s8 + $0x30] sm:$0xff]  }
0x3b6b   : > { %17580 = vmatprep.subr.bf16.mxu0 %v18220_v16 }
0x3b6c   : > { %12975 = vmax.xlane.f32.xlu0 %v12974_v21  ;;  %v18221_v21 = vld [vmem:[%s22330_s8 + $0x38] sm:$0xff]   ;;  %17581 = vmatpush3.bf16.msra.mxu0 %v18220_v16 }
0x3b6d   : > { %17582 = vmatprep.subr.bf16.mxu0 %v18221_v21 }
0x3b6e   : > { %12978 = vmax.xlane.f32.xlu1 %v12977_v39 }
0x3b70   : > { %17583 = vmatpush3.bf16.msra.mxu0 %v18221_v21 }
0x3bed   : > { %v12958_v23 = vpop.xlane.xlu0 %12957 }
0x3bee   : > { %v12980_v31 = vsub.f32 %v12926_v59, %v12958_v23 }
0x3bef   : > { %v12961_v36 = vpop.xlane.xlu1 %12960 }
0x3bf0   : > { %v12988_v52 = vmul.f32 1.442695, %v12980_v31  ;;  %v12981_v24 = vsub.f32 %v12929_v11, %v12961_v36 }
0x3bf1   : > { %v12964_v44 = vpop.xlane.xlu0 %12963 }
0x3bf2   : > { %18702 = vpow2.f32 %v12988_v52  ;;  %v12990_v61 = vmul.f32 1.442695, %v12981_v24  ;;  %v12982_v37 = vsub.f32 %v22194_v53, %v12964_v44 }
0x3bf3   : > { %v12967_v49 = vpop.xlane.xlu1 %12966 }
0x3bf4   : > { %18704 = vpow2.f32 %v12990_v61  ;;  %v12992_v60 = vmul.f32 1.442695, %v12982_v37  ;;  %v12983_v58 = vsub.f32 %v22197_v54, %v12967_v49 }
0x3bf5   : > { %v12970_v62 = vpop.xlane.xlu0 %12969 }
0x3bf6   : > { %18706 = vpow2.f32 %v12992_v60  ;;  %v12994_v9 = vmul.f32 1.442695, %v12983_v58  ;;  %v12984_v41 = vsub.f32 %v22211_v19, %v12970_v62 }
0x3bf7   : > { %v12973_v45 = vpop.xlane.xlu1 %12972 }
0x3bf8   : > { %18708 = vpow2.f32 %v12994_v9  ;;  %v12996_v46 = vmul.f32 1.442695, %v12984_v41  ;;  %v12985_v59 = vsub.f32 %v12945_v5, %v12973_v45 }
0x3bf9   : > { %v12976_v38 = vpop.xlane.xlu0 %12975 }
0x3bfa   : > { %18710 = vpow2.f32 %v12996_v46  ;;  %v12998_v56 = vmul.f32 1.442695, %v12985_v59  ;;  %v12986_v13 = vsub.f32 %v22218_v30, %v12976_v38 }
0x3bfb   : > { %v12979_v53 = vpop.xlane.xlu1 %12978 }
0x3bfc   : > { %v18703_v11 = vpop.eup %18702  ;;  %18712 = vpow2.f32 %v12998_v56  ;;  %v13000_v50 = vmul.f32 1.442695, %v12986_v13  ;;  %v12987_v54 = vsub.f32 %v22222_v4, %v12979_v53  ;;  %v18736_v13 = vld [vmem:[%s22331_s9] ss:$0 sm:$0xff] }
0x3bfd   : > { %v13004_v8 = vsel %vm915_vm1, %v18703_v11, 0.0 }
0x3bfe   : > { %v18705_v1 = vpop.eup %18704  ;;  %18714 = vpow2.f32 %v13000_v50  ;;  %v13002_v10 = vmul.f32 1.442695, %v12987_v54  ;;  %13005 = vadd.xlane.f32.xlu0 %v13004_v8 }
0x3bff   : > { %v13007_v0 = vsel %vm915_vm1, %v18705_v1, 0.0 }
0x3c00   : > { %v18707_v2 = vpop.eup %18706  ;;  %18716 = vpow2.f32 %v13002_v10  ;;  %13008 = vadd.xlane.f32.xlu1 %v13007_v0 }
0x3c01   : > { %v13010_v63 = vsel %vm915_vm1, %v18707_v2, 0.0 }
0x3c02   : > { %v18709_v14 = vpop.eup %18708  ;;  %13011 = vadd.xlane.f32.xlu0 %v13010_v63 }
0x3c03   : > { %v13013_v19 = vsel %vm915_vm1, %v18709_v14, 0.0 }
0x3c04   : > { %v18711_v6 = vpop.eup %18710  ;;  %13014 = vadd.xlane.f32.xlu1 %v13013_v19 }
0x3c05   : > { %v13016_v12 = vsel %vm915_vm1, %v18711_v6, 0.0 }
0x3c06   : > { %v18713_v17 = vpop.eup %18712  ;;  %13017 = vadd.xlane.f32.xlu0 %v13016_v12 }
0x3c07   : > { %v13019_v22 = vsel %vm915_vm1, %v18713_v17, 0.0 }
0x3c08   : > { %v18715_v30 = vpop.eup %18714  ;;  %13020 = vadd.xlane.f32.xlu1 %v13019_v22 }
0x3c09   : > { %v13022_v5 = vsel %vm915_vm1, %v18715_v30, 0.0 }
0x3c0a   : > { %v18717_v28 = vpop.eup %18716  ;;  %13023 = vadd.xlane.f32.xlu0 %v13022_v5 }
0x3c0b   : > { %v13025_v4 = vsel %vm915_vm1, %v18717_v28, 0.0 }
0x3c0c   : > { %13026 = vadd.xlane.f32.xlu1 %v13025_v4 }
0x3c8b   : > { %v13006_v39 = vpop.xlane.xlu0 %13005 }
0x3c8c   : > { %18718 = vrcp.f32 %v13006_v39 }
0x3c8d   : > { %v13009_v47 = vpop.xlane.xlu1 %13008 }
0x3c8e   : > { %18720 = vrcp.f32 %v13009_v47 }
0x3c8f   : > { %v13012_v42 = vpop.xlane.xlu0 %13011 }
0x3c90   : > { %18722 = vrcp.f32 %v13012_v42 }
0x3c91   : > { %v13015_v20 = vpop.xlane.xlu1 %13014 }
0x3c92   : > { %18724 = vrcp.f32 %v13015_v20 }
0x3c93   : > { %v13018_v51 = vpop.xlane.xlu0 %13017 }
0x3c94   : > { %18726 = vrcp.f32 %v13018_v51 }
0x3c95   : > { %v13021_v18 = vpop.xlane.xlu1 %13020 }
0x3c96   : > { %v18719_v33 = vpop.eup %18718  ;;  %18728 = vrcp.f32 %v13021_v18 }
0x3c97   : > { %v13024_v35 = vpop.xlane.xlu0 %13023  ;;  %v13029_v26 = vmul.f32 %v18719_v33, %v18703_v11 }
0x3c98   : > { %v18721_v32 = vpop.eup %18720  ;;  %18730 = vrcp.f32 %v13024_v35 }
0x3c99   : > { %v13027_v25 = vpop.xlane.xlu1 %13026  ;;  %v13031_v7 = vmul.f32 %v18721_v32, %v18705_v1 }
0x3c9a   : > { %v18723_v15 = vpop.eup %18722  ;;  %18732 = vrcp.f32 %v13027_v25 }
0x3c9b   : > { %v13044_v43 = vpack.c.bf16 %v13031_v7, %v13029_v26  ;;  %v13033_v23 = vmul.f32 %v18723_v15, %v18707_v2 }
0x3c9c   : > { %v18725_v55 = vpop.eup %18724 }
0x3c9d   : > { %v13035_v3 = vmul.f32 %v18725_v55, %v18709_v14  ;;  %17572 = vmatprep.mubr.msk.bf16.mxu1 %vm915_vm1, %v13044_v43 }
0x3c9e   : > { %v18727_v29 = vpop.eup %18726 }
0x3c9f   : > { %v13045_v31 = vpack.c.bf16 %v13035_v3, %v13033_v23  ;;  %v13037_v40 = vmul.f32 %v18727_v29, %v18711_v6 }
0x3ca0   : > { %v18729_v57 = vpop.eup %18728 }
0x3ca1   : > { %17573 = vmatmul.mubr.msk.bf16.vlgmr.msra.gmra.mrb[120].mxu1 %vm915_vm1, %v13045_v31  ;;  %v13039_v36 = vmul.f32 %v18729_v57, %v18713_v17 }
0x3ca2   : > { %v18731_v27 = vpop.eup %18730 }
0x3ca3   : > { %v13046_v52 = vpack.c.bf16 %v13039_v36, %v13037_v40  ;;  %v13041_v34 = vmul.f32 %v18731_v27, %v18715_v30 }
0x3ca4   : > { %v18733_v24 = vpop.eup %18732 }
0x3ca5   : > { %v13043_v44 = vmul.f32 %v18733_v24, %v18717_v28  ;;  %17576 = vmatprep.mubr.msk.bf16.mxu1 %vm915_vm1, %v13046_v52 }
0x3ca7   : > { %v13047_v48 = vpack.c.bf16 %v13043_v44, %v13041_v34 }
0x3ca9   : > { %17577 = vmatmul.mubr.msk.bf16.gmra.mrb[124].mxu1 %vm915_vm1, %v13047_v48 }
0x3d74   : > { %v17574_v61 = vpop.f32.mrb[120].mxu1 }
0x3d75   : > { %v13098_v37 = vpop.f32.mrb[121].mxu1 }
0x3d76   : > { %v17575_v49 = vpop.f32.mrb[122].mxu1 }
0x3d77   : > { %v13130_v60 = vpack.c.bf16 %v17575_v49, %v17574_v61  ;;  %v13101_v58 = vpop.f32.mrb[123].mxu1 }
0x3d78   : > { %v13129_v62 = vpack.c.bf16 %v13101_v58, %v13098_v37 }
0x3d7a   : > { %17584 = vmatprep.mubr.msk.bf16.mxu0 %vm825_vm0, %v13129_v62 }
0x3d7b   : > { %17585 = vmatmul.mubr.msk.bf16.vlgmr.msra.gmra.mrb[248].mxu0 %vm825_vm0, %v13130_v60 }
0x3d7c   : > { %v17578_v9 = vpop.f32.mrb[124].mxu1 }
0x3d7d   : > { %v13114_v41 = vpop.f32.mrb[125].mxu1 }
0x3d7e   : > { %v17579_v45 = vpop.f32.mrb[126].mxu1 }
0x3d7f   : > { %v13132_v46 = vpack.c.bf16 %v17579_v45, %v17578_v9  ;;  %v13117_v59 = vpop.f32.mrb[127].mxu1 }
0x3d80   : > { %v13131_v38 = vpack.c.bf16 %v13117_v59, %v13114_v41 }
0x3d82   : > { %17588 = vmatprep.mubr.msk.bf16.mxu0 %vm825_vm0, %v13131_v38 }
0x3d83   : > { %17589 = vmatmul.mubr.msk.bf16.gmra.mrb[252].mxu0 %vm825_vm0, %v13132_v46 }
0x3e4e   : > { %v17586_v56 = vpop.f32.mrb[248].mxu0 }
0x3e4f   : > { %v13236_v53 = vadd.f32 %v18736_v13, %v17586_v56  ;;  %v13195_v11 = vpop.f32.mrb[249].mxu0 }
0x3e50   : > { %v13234_v50 = vadd.f32 %v18736_v13, %v13195_v11  ;;  %v17587_v54 = vpop.f32.mrb[250].mxu0 }
0x3e51   : > { %14793 = vst [vmem:[%s19922_s29 + $0xd0] sm:$0xff] %v13236_v53  ;;  %v13237_v8 = vadd.f32 %v18736_v13, %v17587_v54  ;;  %v13198_v1 = vpop.f32.mrb[251].mxu0 }
0x3e52   : > { %14791 = vst [vmem:[%s19922_s29 + $0xc0] sm:$0xff] %v13234_v50  ;;  %v13235_v10 = vadd.f32 %v18736_v13, %v13198_v1 }
0x3e53   : > { %14794 = vst [vmem:[%s19922_s29 + $0xd8] sm:$0xff] %v13237_v8 }
0x3e54   : > { %14792 = vst [vmem:[%s19922_s29 + $0xc8] sm:$0xff] %v13235_v10 }
0x3e56   : > { %v17590_v0 = vpop.f32.mrb[252].mxu0 }
0x3e57   : > { %v13240_v2 = vadd.f32 %v18736_v13, %v17590_v0  ;;  %v13211_v63 = vpop.f32.mrb[253].mxu0 }
0x3e58   : > { %v13238_v14 = vadd.f32 %v18736_v13, %v13211_v63  ;;  %v17591_v19 = vpop.f32.mrb[254].mxu0 }
0x3e59   : > { %14797 = vst [vmem:[%s19922_s29 + $0xf0] sm:$0xff] %v13240_v2  ;;  %v13241_v6 = vadd.f32 %v18736_v13, %v17591_v19  ;;  %v13214_v12 = vpop.f32.mrb[255].mxu0 }
0x3e5a   : > { %14795 = vst [vmem:[%s19922_s29 + $0xe0] sm:$0xff] %v13238_v14  ;;  %v13239_v17 = vadd.f32 %v18736_v13, %v13214_v12 }
0x3e5b   : > { %14798 = vst [vmem:[%s19922_s29 + $0xf8] sm:$0xff] %v13241_v6 }
0x3e5c   : > { %14796 = vst [vmem:[%s19922_s29 + $0xe8] sm:$0xff] %v13239_v17 }
0x3e5d   : > { %18778 = shalt.err (!%p18775_p7)
}
0x3e5e   : > { %s18779_s29 = scalar_lea.hbm %s22272_s12, 4096  ;;  %s18783_s30 = scalar_lea.hbm %s22332_s10, 8192 }
0x3e5f   : > { %p18780_p8 = scmp.ne.s32.totalorder %s22272_s12, %s18779_s29  ;;  %p18784_p1 = scmp.lt.u32.totalorder %s22272_s12, %s22332_s10 }
0x3e60   : > { %p18785_p0 = scmp.lt.u32.totalorder %s18783_s30, %s18779_s29  ;;  %p18787_p6 = scmp.lt.u32.totalorder %s18779_s29, %s22272_s12 }
0x3e61   : > { %p18781_p11 = pnand %p18780_p8, %p22345_p9 }
0x3e62   : > { %p18786_p5 = por %p18785_p0, %p18784_p1 }
0x3e63   : > { %p18782_p13 = pneg %p18781_p11 }
0x3e64   : > { %p18788_p10 = por %p18787_p6, %p18786_p5 }
0x3e66   : > { %p18789_p12 = pnand %p18788_p10, %p18782_p13 }
0x3e68   : > { %18792 = shalt.err (!%p18789_p12)
}
0x3e69   : > { %s18837_s20 = smov 128   ;;  %s18838_s21 = smov 8  }
0x3e6a   : > { %17756 = dma.vmem_to_hbm [thread:$0]  (%p22345_p9), %s22274_s11, 4096, %s22272_s12, %s22281_s18, %s18837_s20, %s18837_s20, %s18838_s21  }
0x3e6b PF: > { %p17768_p2 = scmp.ge.s32.totalorder %s18831_s16, 2  ;;  %s13281_s28 = sand.u32 1, %s18819_s13  }
0x3e6c   : > { %p22346_p3 = scmp.ne.s32.totalorder %s22338_s24, 0  ;;  %s13282_s29 = scalar_lea.sflag [#allocation4], %s13281_s28 }
0x3e6e   : > { %p17763_p4 = pnand %p17768_p2, %p22346_p3 }
0x3e70   : > { %18814 = dma.done.wait (!%p17763_p4), %s13282_s29, 4096  }
0x3e71   : > { %18816 = vsyncadd (!%p17763_p4), %s13282_s29, 4294963200  ;;  %p21_p7 = scmp.ge.s32.totalorder %s18919_s19, 4   ;;  %s22347_s13 = smov %s18823_s14 }
0x3e72   : > { %s22348_s14 = smov %s18827_s15  ;;  %s22349_s15 = smov %s18930_s22 }
0x3e73   : > { %s22350_s16 = smov %s18919_s19  ;;  %23 = sbr.rel (!%p21_p7) target bundleno = 4 (0x4), region = 130 }
0x3e7a   :  { %13287 = vsyncpa [#allocation3], 1 }
0x3e7b   :  { %13289 = vsyncpa [#allocation3 + $0x1], 1 }
0x3e7c   :  { %13290 = vsyncpa [#allocation4], 1 }
0x3e7d   :  { %13292 = vsyncpa [#allocation4 + $0x1], 1 }

</bundles_post_ra>
